<compile_context>
chip_gen: v7x
topology: tpu7x:2x2x1
jax: 0.10.0
libtpu: 0.0.40
codegen_flags: <defaults>
</compile_context>

<pallas_src>
import jax
import jax.numpy as jnp
import numpy as np
from jax.experimental import pallas as pl
from jax.experimental.pallas import tpu as pltpu

LANE = 128


def _round_up(n, m):
    return ((n + m - 1) // m) * m


def _make_residual_block_kernel(H, W, Cp, bs, has_map):
    """Kernel body: processes `bs` images per grid step, each as an
    (HW, Cp) channels-last tile."""
    HW = H * W
    P = _round_up(W, 8)                 # sublane-aligned top/bottom zero pad
    HWP = HW + 2 * P
    COL_OFF = (W - (P % W)) % W         # so the column index is never negative

    def kernel(*refs):
        if has_map:
            (x_ref, t_ref, wmap_ref, w1a_ref, w1b_ref, wc1_ref, bc1_ref,
             wd_ref, bd_ref, w2a_ref, w2b_ref, wc2_ref, bc2_ref, o_ref) = refs
        else:
            (x_ref, t_ref, w1a_ref, w1b_ref, wc1_ref, bc1_ref,
             wd_ref, bd_ref, w2a_ref, w2b_ref, wc2_ref, bc2_ref, o_ref) = refs
            wmap_ref = None

        f32, bf16 = jnp.float32, jnp.bfloat16

        # ---- hoisted constants, shared by both convs and all bs images ----
        # Horizontal-boundary masks in *padded* flattened coordinates: the
        # dx=+-1 taps must be zeroed at the left / right image edge (this
        # also kills the row-wrap of the flattened +-1 shift).  Vertical
        # boundaries are free: they land in the zero-padded rows.
        q = jax.lax.broadcasted_iota(jnp.int32, (HWP, 1), 0)
        col = (q + COL_OFF) % W          # == (q - P) mod W, non-negative
        mask_l = col >= 1                # valid source for dx = -1
        mask_r = col < (W - 1)           # valid source for dx = +1
        zrows = jnp.zeros((P, Cp), bf16)
        zrow1 = jnp.zeros((1, Cp), bf16)

        def se_silu(a, wa_ref, wb_ref):
            # SELayer(reduction, offset=1) followed by SiLU.  a: (HW, Cp) f32.
            # NOTE(padded lanes): after this, padded channels hold
            # silu((0+1)*sigmoid(0)) ~= 0.31; they are annihilated only
            # because the padded *input-channel* rows of the conv weights are
            # zero.  Do not insert per-channel ops between here and the conv.
            mu = jnp.mean(a, axis=0, keepdims=True)                     # (1, Cp)
            h = jnp.maximum(
                jnp.dot(mu.astype(bf16), wa_ref[...],
                        preferred_element_type=f32), 0.0)               # (1, hid)
            y = jax.nn.sigmoid(
                jnp.dot(h.astype(bf16), wb_ref[...],
                        preferred_element_type=f32))                    # (1, Cp)
            a = (a + 1.0) * y                                           # offset=1
            return a * jax.nn.sigmoid(a)                                # SiLU

        def conv3x3(a, wc_ref, bc_ref):
            # 3x3 "same" conv from 3 pre-shifted buffers:
            #   a_l[r] = a[r-1] (dx=-1 source, left edge masked)
            #   ac [r] = a[r]   (dx= 0)
            #   a_r[r] = a[r+1] (dx=+1 source, right edge masked)
            # each zero-padded with P sublane-aligned rows top/bottom, so the
            # 9 taps are aligned row-slices at offsets {P-W, P, P+W}.
            # Grouping taps by ky gives 3 MXU dots of K = 3*Cp consuming
            # views of ONE lane-concatenated buffer (no (HW, 9*Cp) temp).
            ab = a.astype(bf16)
            ac = jnp.concatenate([zrows, ab, zrows], axis=0)            # (HWP, Cp)
            a_l = jnp.where(mask_l,
                            jnp.concatenate([zrow1, ac[:-1]], axis=0), 0)
            a_r = jnp.where(mask_r,
                            jnp.concatenate([ac[1:], zrow1], axis=0), 0)
            big = jnp.concatenate([a_l, ac, a_r], axis=1)               # (HWP, 3*Cp)
            out = None
            for ky in range(3):
                start = P + (ky - 1) * W                                # aligned if W%8==0
                slab = big[start:start + HW, :]                         # view
                d = jnp.dot(slab, wc_ref[ky], preferred_element_type=f32)
                out = d if out is None else out + d
            return out + bc_ref[...]

        for i in range(bs):                                             # static unroll
            if has_map:
                # 1x1 "map" conv (no bias): one MXU matmul.
                xi = jnp.dot(x_ref[i], wmap_ref[...],
                             preferred_element_type=f32)                # (HW, Cp) f32
            else:
                # in_c == out_c: PyTorch skips self.map -> full-precision skip.
                xi = x_ref[i].astype(f32)

            # block1 = SE -> SiLU -> 3x3 conv (+bias)
            h1 = conv3x3(se_silu(xi, w1a_ref, w1b_ref), wc1_ref, bc1_ref)

            # time embedding: 1x1 conv on t, broadcast over all pixels
            temb = jnp.dot(t_ref[i], wd_ref[...],
                           preferred_element_type=f32) + bd_ref[...]    # (1, Cp)
            h1 = h1 + temb

            # block2
            h2 = conv3x3(se_silu(h1, w2a_ref, w2b_ref), wc2_ref, bc2_ref)

            o_ref[i] = (xi + h2).astype(o_ref.dtype)

    return kernel


def residual_block_forward(x_nchw, t, params, *, out_dtype=jnp.float32):
    """x_nchw: (B, in_c, H, W), t: (B, emb_dim).  Returns (B, out_c, H, W).

    When chaining residual blocks, hoist the NCHW<->channels-last
    transpose/pad/slice to the network boundary and pass the padded
    (B, HW, Cp) activations between blocks directly (pure HBM traffic here).
    """
    B, Cin, H, W = x_nchw.shape
    Cout = params["w1a"].shape[0]
    hid = params["w1a"].shape[1]
    emb = t.shape[1]
    HW = H * W
    bf16 = jnp.bfloat16
    has_map = (Cin != Cout)

    # Lane-dense padding of every channel-like dim.
    Cp = _round_up(Cout, LANE)
    Cin_p = _round_up(Cin, LANE) if has_map else Cp
    hid_p = _round_up(hid, LANE)
    emb_p = _round_up(emb, LANE)

    # Batch folding: keep >= 2 "parallel" grid steps (both v7x TensorCores
    # busy); fold ceil(B/2) images per step to amortize per-step overhead.
    n_steps = 2 if B >= 2 else 1
    bs = -(-B // n_steps)
    Bp = n_steps * bs

    def pad2(a, r, c):
        return jnp.pad(a, ((0, r - a.shape[0]), (0, c - a.shape[1])))

    def prep_conv(wc):   # HWIO (3,3,Cout,Cout) -> (3, 3*Cp, Cp) bf16
        wc_p = jnp.pad(wc, ((0, 0), (0, 0),
                            (0, Cp - wc.shape[2]), (0, Cp - wc.shape[3])))
        return wc_p.reshape(3, 3 * Cp, Cp).astype(bf16)

    w = {
        "w1a": pad2(params["w1a"], Cp, hid_p).astype(bf16),
        "w1b": pad2(params["w1b"], hid_p, Cp).astype(bf16),
        "wc1": prep_conv(params["wc1"]),
        "bc1": pad2(params["bc1"], 1, Cp),             # f32
        "wd": pad2(params["wd"], emb_p, Cp).astype(bf16),
        "bd": pad2(params["bd"], 1, Cp),               # f32
        "w2a": pad2(params["w2a"], Cp, hid_p).astype(bf16),
        "w2b": pad2(params["w2b"], hid_p, Cp).astype(bf16),
        "wc2": prep_conv(params["wc2"]),
        "bc2": pad2(params["bc2"], 1, Cp),             # f32
    }
    order = ["w1a", "w1b", "wc1", "bc1", "wd", "bd", "w2a", "w2b", "wc2", "bc2"]
    if has_map:
        w["wmap"] = pad2(params["wmap"], Cin_p, Cp).astype(bf16)
        order = ["wmap"] + order

    # Activations: NCHW -> channels-last flattened (Bp, HW, Cin_p).
    x_dtype = bf16 if has_map else jnp.float32
    x_flat = jnp.transpose(x_nchw, (0, 2, 3, 1)).reshape(B, HW, Cin)
    x_flat = jnp.pad(x_flat,
                     ((0, Bp - B), (0, 0), (0, Cin_p - Cin))).astype(x_dtype)
    t3 = jnp.pad(t, ((0, Bp - B), (0, emb_p - emb))).astype(bf16)
    t3 = t3.reshape(Bp, 1, emb_p)

    kernel = _make_residual_block_kernel(H, W, Cp, bs, has_map)

    def full_spec(a):
        nd = a.ndim
        # Constant index map -> no re-DMA across grid steps.
        return pl.BlockSpec(a.shape, lambda s: (0,) * nd)

    in_specs = [
        pl.BlockSpec((bs, HW, Cin_p), lambda s: (s, 0, 0)),
        pl.BlockSpec((bs, 1, emb_p), lambda s: (s, 0, 0)),
    ] + [full_spec(w[k]) for k in order]

    out_flat = pl.pallas_call(
        kernel,
        out_shape=jax.ShapeDtypeStruct((Bp, HW, Cp), out_dtype),
        grid=(n_steps,),
        in_specs=in_specs,
        out_specs=pl.BlockSpec((bs, HW, Cp), lambda s: (s, 0, 0)),
        compiler_params=pltpu.CompilerParams(
            dimension_semantics=("parallel",),
            # ~3 MiB live per step at these sizes; 48 MiB leaves headroom for
            # larger H*W / Cp while staying inside v7x's 64 MiB physical VMEM
            # (re-derive / add a spatial grid axis with a 1-row halo before
            # scaling to big images).
            vmem_limit_bytes=48 * 1024 * 1024,
        ),
    )(x_flat, t3, *[w[k] for k in order])

    out = out_flat[:B, :, :Cout].reshape(B, H, W, Cout)
    return jnp.transpose(out, (0, 3, 1, 2))


def residual_block_reference(x_nchw, t, p):
    """Pure-JAX reference mirroring the PyTorch module (same bf16 cast points
    as the kernel, f32 accumulation)."""
    bf16 = jnp.bfloat16
    out_c = p["w1a"].shape[0]
    x = jnp.transpose(x_nchw, (0, 2, 3, 1))                      # NHWC
    if x.shape[-1] == out_c:
        xi = x.astype(jnp.float32)                               # map is skipped
    else:
        xi = jnp.einsum("bhwi,io->bhwo", x.astype(bf16),
                        p["wmap"].astype(bf16),
                        preferred_element_type=jnp.float32)

    def scale_act_conv(a, wa, wb, wc, bc):
        mu = jnp.mean(a, axis=(1, 2))                            # (B, C) f32
        h = jnp.maximum(jnp.dot(mu.astype(bf16), wa.astype(bf16),
                                preferred_element_type=jnp.float32), 0.0)
        y = jax.nn.sigmoid(jnp.dot(h.astype(bf16), wb.astype(bf16),
                                   preferred_element_type=jnp.float32))
        a = (a + 1.0) * y[:, None, None, :]                      # SE, offset=1
        a = a * jax.nn.sigmoid(a)                                # SiLU
        out = jax.lax.conv_general_dilated(
            a.astype(bf16), wc.astype(bf16), window_strides=(1, 1),
            padding="SAME", dimension_numbers=("NHWC", "HWIO", "NHWC"),
            preferred_element_type=jnp.float32)
        return out + bc.reshape(1, 1, 1, -1)

    h1 = scale_act_conv(xi, p["w1a"], p["w1b"], p["wc1"], p["bc1"])
    temb = jnp.dot(t.astype(bf16), p["wd"].astype(bf16),
                   preferred_element_type=jnp.float32) + p["bd"]  # (B, Cout)
    h1 = h1 + temb[:, None, None, :]
    h2 = scale_act_conv(h1, p["w2a"], p["w2b"], p["wc2"], p["bc2"])
    out = xi + h2
    return jnp.transpose(out, (0, 3, 1, 2))


def init_params(key, in_c, out_c, emb_dim, reduction=3):
    hid = out_c // reduction
    ks = jax.random.split(key, 11)

    def w(k, shape, scale):
        return (scale * jax.random.normal(k, shape)).astype(jnp.float32)

    return {
        # map: 1x1 conv (out_c, in_c, 1, 1) stored as (in_c, out_c)
        "wmap": w(ks[0], (in_c, out_c), 1.0 / np.sqrt(in_c)),
        # block1 SE: Linear(out_c, hid, no bias), Linear(hid, out_c, no bias)
        "w1a": w(ks[1], (out_c, hid), 1.0 / np.sqrt(out_c)),
        "w1b": w(ks[2], (hid, out_c), 1.0 / np.sqrt(hid)),
        # block1 conv: torch (out_c, out_c, 3, 3) stored as HWIO (3,3,out_c,out_c)
        "wc1": w(ks[3], (3, 3, out_c, out_c), 1.0 / np.sqrt(9 * out_c)),
        "bc1": w(ks[4], (1, out_c), 0.1),
        # dense (time emb): 1x1 conv (out_c, emb_dim, 1, 1) stored as (emb_dim, out_c)
        "wd": w(ks[5], (emb_dim, out_c), 1.0 / np.sqrt(emb_dim)),
        "bd": w(ks[6], (1, out_c), 0.1),
        # block2
        "w2a": w(ks[7], (out_c, hid), 1.0 / np.sqrt(out_c)),
        "w2b": w(ks[8], (hid, out_c), 1.0 / np.sqrt(hid)),
        "wc2": w(ks[9], (3, 3, out_c, out_c), 1.0 / np.sqrt(9 * out_c)),
        "bc2": w(ks[10], (1, out_c), 0.1),
    }


if __name__ == "__main__":
    key = jax.random.PRNGKey(0)
    kx, kt, kp = jax.random.split(key, 3)

    B, in_c, out_c, H, W, emb_dim = 2, 4, 8, 16, 16, 32
    x = jax.random.normal(kx, (B, in_c, H, W), dtype=jnp.float32)
    t = jax.random.normal(kt, (B, emb_dim), dtype=jnp.float32)
    params = init_params(kp, in_c, out_c, emb_dim)

    out = residual_block_forward(x, t, params)
    out = jax.block_until_ready(out)
    assert out.shape == (B, out_c, H, W)

    ref = residual_block_reference(x, t, params)
    # Kernel and reference use identical bf16 cast points with f32 accumulation;
    # remaining differences are accumulation order + rare 1-ulp cast rounding.
    np.testing.assert_allclose(np.asarray(out), np.asarray(ref),
                               rtol=1e-2, atol=1e-2)
    print("KERNEL_OK")
</pallas_src>

<mosaic_0001>
module attributes {stable_mosaic.version = 11 : i64} {
  func.func @kernel(%arg0: i32, %arg1: memref<1x256x128xbf16, #tpu.memory_space<vmem>>, %arg2: memref<1x1x128xbf16, #tpu.memory_space<vmem>>, %arg3: memref<128x128xbf16, #tpu.memory_space<vmem>>, %arg4: memref<128x128xbf16, #tpu.memory_space<vmem>>, %arg5: memref<128x128xbf16, #tpu.memory_space<vmem>>, %arg6: memref<3x384x128xbf16, #tpu.memory_space<vmem>>, %arg7: memref<1x128xf32, #tpu.memory_space<vmem>>, %arg8: memref<128x128xbf16, #tpu.memory_space<vmem>>, %arg9: memref<1x128xf32, #tpu.memory_space<vmem>>, %arg10: memref<128x128xbf16, #tpu.memory_space<vmem>>, %arg11: memref<128x128xbf16, #tpu.memory_space<vmem>>, %arg12: memref<3x384x128xbf16, #tpu.memory_space<vmem>>, %arg13: memref<1x128xf32, #tpu.memory_space<vmem>>, %arg14: memref<1x256x128xf32, #tpu.memory_space<vmem>>) attributes {dimension_semantics = [#tpu.dimension_semantics<parallel>], iteration_bounds = array<i64: 2>, scalar_prefetch = 0 : i64, scratch_operands = 0 : i64, tpu.core_type = #tpu.core_type<tc>, window_params = [{transform_indices = @transform_0, window_bounds = array<i64: 1, 256, 128>}, {transform_indices = @transform_1, window_bounds = array<i64: 1, 1, 128>}, {pipeline_mode = #tpu.pipeline_mode<synchronous>, transform_indices = @transform_2, window_bounds = array<i64: 128, 128>}, {pipeline_mode = #tpu.pipeline_mode<synchronous>, transform_indices = @transform_3, window_bounds = array<i64: 128, 128>}, {pipeline_mode = #tpu.pipeline_mode<synchronous>, transform_indices = @transform_4, window_bounds = array<i64: 128, 128>}, {pipeline_mode = #tpu.pipeline_mode<synchronous>, transform_indices = @transform_5, window_bounds = array<i64: 3, 384, 128>}, {pipeline_mode = #tpu.pipeline_mode<synchronous>, transform_indices = @transform_6, window_bounds = array<i64: 1, 128>}, {pipeline_mode = #tpu.pipeline_mode<synchronous>, transform_indices = @transform_7, window_bounds = array<i64: 128, 128>}, {pipeline_mode = #tpu.pipeline_mode<synchronous>, transform_indices = @transform_8, window_bounds = array<i64: 1, 128>}, {pipeline_mode = #tpu.pipeline_mode<synchronous>, transform_indices = @transform_9, window_bounds = array<i64: 128, 128>}, {pipeline_mode = #tpu.pipeline_mode<synchronous>, transform_indices = @transform_10, window_bounds = array<i64: 128, 128>}, {pipeline_mode = #tpu.pipeline_mode<synchronous>, transform_indices = @transform_11, window_bounds = array<i64: 3, 384, 128>}, {pipeline_mode = #tpu.pipeline_mode<synchronous>, transform_indices = @transform_12, window_bounds = array<i64: 1, 128>}, {transform_indices = @transform_13, window_bounds = array<i64: 1, 256, 128>}]} {
    %0 = tpu.iota {dimensions = array<i32: 0>} : vector<288x1xi32>
    %c0_i32 = arith.constant 0 : i32
    %1 = vector.broadcast %c0_i32 : i32 to vector<288x1xi32>
    %2 = arith.addi %0, %1 : vector<288x1xi32>
    %c16_i32 = arith.constant 16 : i32
    %c0_i32_0 = arith.constant 0 : i32
    %3 = arith.cmpi eq, %c16_i32, %c0_i32_0 : i32
    %c1_i32 = arith.constant 1 : i32
    %4 = arith.select %3, %c1_i32, %c16_i32 : i32
    %5 = vector.broadcast %4 : i32 to vector<288x1xi32>
    %6 = arith.remsi %2, %5 : vector<288x1xi32>
    %c0_i32_1 = arith.constant 0 : i32
    %7 = vector.broadcast %c0_i32_1 : i32 to vector<288x1xi32>
    %8 = arith.cmpi ne, %6, %7 : vector<288x1xi32>
    %c0_i32_2 = arith.constant 0 : i32
    %9 = vector.broadcast %c0_i32_2 : i32 to vector<288x1xi32>
    %10 = arith.cmpi slt, %6, %9 : vector<288x1xi32>
    %c0_i32_3 = arith.constant 0 : i32
    %11 = arith.cmpi slt, %4, %c0_i32_3 : i32
    %12 = vector.broadcast %11 : i1 to vector<288x1xi1>
    %13 = vector.broadcast %12 : vector<288x1xi1> to vector<288x1xi1>
    %14 = arith.xori %10, %13 : vector<288x1xi1>
    %15 = arith.andi %14, %8 : vector<288x1xi1>
    %16 = vector.broadcast %4 : i32 to vector<288x1xi32>
    %17 = arith.addi %6, %16 : vector<288x1xi32>
    %18 = arith.select %15, %17, %6 : vector<288x1xi1>, vector<288x1xi32>
    %c1_i32_4 = arith.constant 1 : i32
    %19 = vector.broadcast %c1_i32_4 : i32 to vector<288x1xi32>
    %20 = arith.cmpi sge, %18, %19 : vector<288x1xi32>
    %c15_i32 = arith.constant 15 : i32
    %21 = vector.broadcast %c15_i32 : i32 to vector<288x1xi32>
    %22 = arith.cmpi slt, %18, %21 : vector<288x1xi32>
    %cst = arith.constant 0.000000e+00 : bf16
    %23 = vector.broadcast %cst : bf16 to vector<16x128xbf16>
    %cst_5 = arith.constant 0.000000e+00 : bf16
    %24 = vector.broadcast %cst_5 : bf16 to vector<1x128xbf16>
    %c0 = arith.constant 0 : index
    %c0_6 = arith.constant 0 : index
    %c0_7 = arith.constant 0 : index
    %25 = vector.load %arg1[%c0, %c0_6, %c0_7] : memref<1x256x128xbf16, #tpu.memory_space<vmem>>, vector<1x256x128xbf16>
    %26 = vector.shape_cast %25 : vector<1x256x128xbf16> to vector<256x128xbf16>
    %c0_8 = arith.constant 0 : index
    %c0_9 = arith.constant 0 : index
    %27 = vector.load %arg3[%c0_8, %c0_9] : memref<128x128xbf16, #tpu.memory_space<vmem>>, vector<128x128xbf16>
    %cst_10 = arith.constant dense<0.000000e+00> : vector<256x128xf32>
    %28 = tpu.matmul %26, %27, %cst_10 {dimension_numbers = #tpu.dot_dimension_numbers<[1], [0], [0], [1], [0, 0, 1, 1], [], []>} : vector<256x128xbf16>, vector<128x128xbf16>, vector<256x128xf32> -> vector<256x128xf32>
    %cst_11 = arith.constant dense<0.000000e+00> : vector<128xf32>
    %29 = vector.multi_reduction <add>, %28, %cst_11 [0] : vector<256x128xf32> to vector<128xf32>
    %30 = vector.shape_cast %29 : vector<128xf32> to vector<1x128xf32>
    %cst_12 = arith.constant 2.560000e+02 : f32
    %31 = vector.broadcast %cst_12 : f32 to vector<1x128xf32>
    %32 = arith.divf %30, %31 : vector<1x128xf32>
    %33 = arith.truncf %32 : vector<1x128xf32> to vector<1x128xbf16>
    %c0_13 = arith.constant 0 : index
    %c0_14 = arith.constant 0 : index
    %34 = vector.load %arg4[%c0_13, %c0_14] : memref<128x128xbf16, #tpu.memory_space<vmem>>, vector<128x128xbf16>
    %cst_15 = arith.constant dense<0.000000e+00> : vector<1x128xf32>
    %35 = tpu.matmul %33, %34, %cst_15 {dimension_numbers = #tpu.dot_dimension_numbers<[1], [0], [0], [1], [0, 0, 1, 1], [], []>} : vector<1x128xbf16>, vector<128x128xbf16>, vector<1x128xf32> -> vector<1x128xf32>
    %cst_16 = arith.constant 0.000000e+00 : f32
    %36 = vector.broadcast %cst_16 : f32 to vector<1x128xf32>
    %37 = arith.maximumf %35, %36 : vector<1x128xf32>
    %38 = arith.truncf %37 : vector<1x128xf32> to vector<1x128xbf16>
    %c0_17 = arith.constant 0 : index
    %c0_18 = arith.constant 0 : index
    %39 = vector.load %arg5[%c0_17, %c0_18] : memref<128x128xbf16, #tpu.memory_space<vmem>>, vector<128x128xbf16>
    %cst_19 = arith.constant dense<0.000000e+00> : vector<1x128xf32>
    %40 = tpu.matmul %38, %39, %cst_19 {dimension_numbers = #tpu.dot_dimension_numbers<[1], [0], [0], [1], [0, 0, 1, 1], [], []>} : vector<1x128xbf16>, vector<128x128xbf16>, vector<1x128xf32> -> vector<1x128xf32>
    %41 = arith.negf %40 : vector<1x128xf32>
    %42 = math.exp %41 : vector<1x128xf32>
    %cst_20 = arith.constant 1.000000e+00 : f32
    %43 = vector.broadcast %cst_20 : f32 to vector<1x128xf32>
    %44 = arith.addf %43, %42 : vector<1x128xf32>
    %45 = arith.divf %43, %44 : vector<1x128xf32>
    %cst_21 = arith.constant 1.000000e+00 : f32
    %46 = vector.broadcast %cst_21 : f32 to vector<256x128xf32>
    %47 = arith.addf %28, %46 : vector<256x128xf32>
    %48 = vector.broadcast %45 : vector<1x128xf32> to vector<256x128xf32>
    %49 = arith.mulf %47, %48 : vector<256x128xf32>
    %50 = arith.negf %49 : vector<256x128xf32>
    %51 = math.exp %50 : vector<256x128xf32>
    %cst_22 = arith.constant 1.000000e+00 : f32
    %52 = vector.broadcast %cst_22 : f32 to vector<256x128xf32>
    %53 = arith.addf %52, %51 : vector<256x128xf32>
    %54 = arith.divf %52, %53 : vector<256x128xf32>
    %55 = arith.mulf %49, %54 : vector<256x128xf32>
    %56 = arith.truncf %55 : vector<256x128xf32> to vector<256x128xbf16>
    %57 = tpu.concatenate %23, %56, %23 in 0 : vector<16x128xbf16>, vector<256x128xbf16>, vector<16x128xbf16> -> vector<288x128xbf16>
    %58 = vector.extract_strided_slice %57 {offsets = [0, 0], sizes = [287, 128], strides = [1, 1]} : vector<288x128xbf16> to vector<287x128xbf16>
    %59 = tpu.concatenate %24, %58 in 0 : vector<1x128xbf16>, vector<287x128xbf16> -> vector<288x128xbf16>
    %c0_i32_23 = arith.constant 0 : i32
    %60 = arith.sitofp %c0_i32_23 : i32 to bf16
    %61 = vector.shape_cast %20 : vector<288x1xi1> to vector<288x1xi1>
    %62 = vector.broadcast %61 : vector<288x1xi1> to vector<288x128xi1>
    %63 = vector.broadcast %60 : bf16 to vector<288x128xbf16>
    %64 = arith.select %62, %59, %63 : vector<288x128xi1>, vector<288x128xbf16>
    %65 = vector.extract_strided_slice %57 {offsets = [1, 0], sizes = [287, 128], strides = [1, 1]} : vector<288x128xbf16> to vector<287x128xbf16>
    %66 = tpu.concatenate %65, %24 in 0 : vector<287x128xbf16>, vector<1x128xbf16> -> vector<288x128xbf16>
    %c0_i32_24 = arith.constant 0 : i32
    %67 = arith.sitofp %c0_i32_24 : i32 to bf16
    %68 = vector.shape_cast %22 : vector<288x1xi1> to vector<288x1xi1>
    %69 = vector.broadcast %68 : vector<288x1xi1> to vector<288x128xi1>
    %70 = vector.broadcast %67 : bf16 to vector<288x128xbf16>
    %71 = arith.select %69, %66, %70 : vector<288x128xi1>, vector<288x128xbf16>
    %72 = tpu.concatenate %64, %57, %71 in 1 : vector<288x128xbf16>, vector<288x128xbf16>, vector<288x128xbf16> -> vector<288x384xbf16>
    %73 = vector.extract_strided_slice %72 {offsets = [0, 0], sizes = [256, 384], strides = [1, 1]} : vector<288x384xbf16> to vector<256x384xbf16>
    %c0_25 = arith.constant 0 : index
    %c0_26 = arith.constant 0 : index
    %c0_27 = arith.constant 0 : index
    %74 = vector.load %arg6[%c0_25, %c0_26, %c0_27] : memref<3x384x128xbf16, #tpu.memory_space<vmem>>, vector<1x384x128xbf16>
    %75 = vector.shape_cast %74 : vector<1x384x128xbf16> to vector<384x128xbf16>
    %cst_28 = arith.constant dense<0.000000e+00> : vector<256x128xf32>
    %76 = tpu.matmul %73, %75, %cst_28 {dimension_numbers = #tpu.dot_dimension_numbers<[1], [0], [0], [1], [0, 0, 1, 1], [], []>} : vector<256x384xbf16>, vector<384x128xbf16>, vector<256x128xf32> -> vector<256x128xf32>
    %77 = vector.extract_strided_slice %72 {offsets = [16, 0], sizes = [256, 384], strides = [1, 1]} : vector<288x384xbf16> to vector<256x384xbf16>
    %c1 = arith.constant 1 : index
    %c0_29 = arith.constant 0 : index
    %c0_30 = arith.constant 0 : index
    %78 = vector.load %arg6[%c1, %c0_29, %c0_30] : memref<3x384x128xbf16, #tpu.memory_space<vmem>>, vector<1x384x128xbf16>
    %79 = vector.shape_cast %78 : vector<1x384x128xbf16> to vector<384x128xbf16>
    %cst_31 = arith.constant dense<0.000000e+00> : vector<256x128xf32>
    %80 = tpu.matmul %77, %79, %cst_31 {dimension_numbers = #tpu.dot_dimension_numbers<[1], [0], [0], [1], [0, 0, 1, 1], [], []>} : vector<256x384xbf16>, vector<384x128xbf16>, vector<256x128xf32> -> vector<256x128xf32>
    %81 = arith.addf %76, %80 : vector<256x128xf32>
    %82 = vector.extract_strided_slice %72 {offsets = [32, 0], sizes = [256, 384], strides = [1, 1]} : vector<288x384xbf16> to vector<256x384xbf16>
    %c2 = arith.constant 2 : index
    %c0_32 = arith.constant 0 : index
    %c0_33 = arith.constant 0 : index
    %83 = vector.load %arg6[%c2, %c0_32, %c0_33] : memref<3x384x128xbf16, #tpu.memory_space<vmem>>, vector<1x384x128xbf16>
    %84 = vector.shape_cast %83 : vector<1x384x128xbf16> to vector<384x128xbf16>
    %cst_34 = arith.constant dense<0.000000e+00> : vector<256x128xf32>
    %85 = tpu.matmul %82, %84, %cst_34 {dimension_numbers = #tpu.dot_dimension_numbers<[1], [0], [0], [1], [0, 0, 1, 1], [], []>} : vector<256x384xbf16>, vector<384x128xbf16>, vector<256x128xf32> -> vector<256x128xf32>
    %86 = arith.addf %81, %85 : vector<256x128xf32>
    %c0_35 = arith.constant 0 : index
    %c0_36 = arith.constant 0 : index
    %87 = vector.load %arg7[%c0_35, %c0_36] : memref<1x128xf32, #tpu.memory_space<vmem>>, vector<1x128xf32>
    %88 = vector.broadcast %87 : vector<1x128xf32> to vector<256x128xf32>
    %89 = arith.addf %86, %88 : vector<256x128xf32>
    %c0_37 = arith.constant 0 : index
    %c0_38 = arith.constant 0 : index
    %c0_39 = arith.constant 0 : index
    %90 = vector.load %arg2[%c0_37, %c0_38, %c0_39] : memref<1x1x128xbf16, #tpu.memory_space<vmem>>, vector<1x1x128xbf16>
    %91 = vector.shape_cast %90 : vector<1x1x128xbf16> to vector<1x128xbf16>
    %c0_40 = arith.constant 0 : index
    %c0_41 = arith.constant 0 : index
    %92 = vector.load %arg8[%c0_40, %c0_41] : memref<128x128xbf16, #tpu.memory_space<vmem>>, vector<128x128xbf16>
    %cst_42 = arith.constant dense<0.000000e+00> : vector<1x128xf32>
    %93 = tpu.matmul %91, %92, %cst_42 {dimension_numbers = #tpu.dot_dimension_numbers<[1], [0], [0], [1], [0, 0, 1, 1], [], []>} : vector<1x128xbf16>, vector<128x128xbf16>, vector<1x128xf32> -> vector<1x128xf32>
    %c0_43 = arith.constant 0 : index
    %c0_44 = arith.constant 0 : index
    %94 = vector.load %arg9[%c0_43, %c0_44] : memref<1x128xf32, #tpu.memory_space<vmem>>, vector<1x128xf32>
    %95 = arith.addf %93, %94 : vector<1x128xf32>
    %96 = vector.broadcast %95 : vector<1x128xf32> to vector<256x128xf32>
    %97 = arith.addf %89, %96 : vector<256x128xf32>
    %cst_45 = arith.constant dense<0.000000e+00> : vector<128xf32>
    %98 = vector.multi_reduction <add>, %97, %cst_45 [0] : vector<256x128xf32> to vector<128xf32>
    %99 = vector.shape_cast %98 : vector<128xf32> to vector<1x128xf32>
    %cst_46 = arith.constant 2.560000e+02 : f32
    %100 = vector.broadcast %cst_46 : f32 to vector<1x128xf32>
    %101 = arith.divf %99, %100 : vector<1x128xf32>
    %102 = arith.truncf %101 : vector<1x128xf32> to vector<1x128xbf16>
    %c0_47 = arith.constant 0 : index
    %c0_48 = arith.constant 0 : index
    %103 = vector.load %arg10[%c0_47, %c0_48] : memref<128x128xbf16, #tpu.memory_space<vmem>>, vector<128x128xbf16>
    %cst_49 = arith.constant dense<0.000000e+00> : vector<1x128xf32>
    %104 = tpu.matmul %102, %103, %cst_49 {dimension_numbers = #tpu.dot_dimension_numbers<[1], [0], [0], [1], [0, 0, 1, 1], [], []>} : vector<1x128xbf16>, vector<128x128xbf16>, vector<1x128xf32> -> vector<1x128xf32>
    %cst_50 = arith.constant 0.000000e+00 : f32
    %105 = vector.broadcast %cst_50 : f32 to vector<1x128xf32>
    %106 = arith.maximumf %104, %105 : vector<1x128xf32>
    %107 = arith.truncf %106 : vector<1x128xf32> to vector<1x128xbf16>
    %c0_51 = arith.constant 0 : index
    %c0_52 = arith.constant 0 : index
    %108 = vector.load %arg11[%c0_51, %c0_52] : memref<128x128xbf16, #tpu.memory_space<vmem>>, vector<128x128xbf16>
    %cst_53 = arith.constant dense<0.000000e+00> : vector<1x128xf32>
    %109 = tpu.matmul %107, %108, %cst_53 {dimension_numbers = #tpu.dot_dimension_numbers<[1], [0], [0], [1], [0, 0, 1, 1], [], []>} : vector<1x128xbf16>, vector<128x128xbf16>, vector<1x128xf32> -> vector<1x128xf32>
    %110 = arith.negf %109 : vector<1x128xf32>
    %111 = math.exp %110 : vector<1x128xf32>
    %cst_54 = arith.constant 1.000000e+00 : f32
    %112 = vector.broadcast %cst_54 : f32 to vector<1x128xf32>
    %113 = arith.addf %112, %111 : vector<1x128xf32>
    %114 = arith.divf %112, %113 : vector<1x128xf32>
    %cst_55 = arith.constant 1.000000e+00 : f32
    %115 = vector.broadcast %cst_55 : f32 to vector<256x128xf32>
    %116 = arith.addf %97, %115 : vector<256x128xf32>
    %117 = vector.broadcast %114 : vector<1x128xf32> to vector<256x128xf32>
    %118 = arith.mulf %116, %117 : vector<256x128xf32>
    %119 = arith.negf %118 : vector<256x128xf32>
    %120 = math.exp %119 : vector<256x128xf32>
    %cst_56 = arith.constant 1.000000e+00 : f32
    %121 = vector.broadcast %cst_56 : f32 to vector<256x128xf32>
    %122 = arith.addf %121, %120 : vector<256x128xf32>
    %123 = arith.divf %121, %122 : vector<256x128xf32>
    %124 = arith.mulf %118, %123 : vector<256x128xf32>
    %125 = arith.truncf %124 : vector<256x128xf32> to vector<256x128xbf16>
    %126 = tpu.concatenate %23, %125, %23 in 0 : vector<16x128xbf16>, vector<256x128xbf16>, vector<16x128xbf16> -> vector<288x128xbf16>
    %127 = vector.extract_strided_slice %126 {offsets = [0, 0], sizes = [287, 128], strides = [1, 1]} : vector<288x128xbf16> to vector<287x128xbf16>
    %128 = tpu.concatenate %24, %127 in 0 : vector<1x128xbf16>, vector<287x128xbf16> -> vector<288x128xbf16>
    %c0_i32_57 = arith.constant 0 : i32
    %129 = arith.sitofp %c0_i32_57 : i32 to bf16
    %130 = vector.shape_cast %20 : vector<288x1xi1> to vector<288x1xi1>
    %131 = vector.broadcast %130 : vector<288x1xi1> to vector<288x128xi1>
    %132 = vector.broadcast %129 : bf16 to vector<288x128xbf16>
    %133 = arith.select %131, %128, %132 : vector<288x128xi1>, vector<288x128xbf16>
    %134 = vector.extract_strided_slice %126 {offsets = [1, 0], sizes = [287, 128], strides = [1, 1]} : vector<288x128xbf16> to vector<287x128xbf16>
    %135 = tpu.concatenate %134, %24 in 0 : vector<287x128xbf16>, vector<1x128xbf16> -> vector<288x128xbf16>
    %c0_i32_58 = arith.constant 0 : i32
    %136 = arith.sitofp %c0_i32_58 : i32 to bf16
    %137 = vector.shape_cast %22 : vector<288x1xi1> to vector<288x1xi1>
    %138 = vector.broadcast %137 : vector<288x1xi1> to vector<288x128xi1>
    %139 = vector.broadcast %136 : bf16 to vector<288x128xbf16>
    %140 = arith.select %138, %135, %139 : vector<288x128xi1>, vector<288x128xbf16>
    %141 = tpu.concatenate %133, %126, %140 in 1 : vector<288x128xbf16>, vector<288x128xbf16>, vector<288x128xbf16> -> vector<288x384xbf16>
    %142 = vector.extract_strided_slice %141 {offsets = [0, 0], sizes = [256, 384], strides = [1, 1]} : vector<288x384xbf16> to vector<256x384xbf16>
    %c0_59 = arith.constant 0 : index
    %c0_60 = arith.constant 0 : index
    %c0_61 = arith.constant 0 : index
    %143 = vector.load %arg12[%c0_59, %c0_60, %c0_61] : memref<3x384x128xbf16, #tpu.memory_space<vmem>>, vector<1x384x128xbf16>
    %144 = vector.shape_cast %143 : vector<1x384x128xbf16> to vector<384x128xbf16>
    %cst_62 = arith.constant dense<0.000000e+00> : vector<256x128xf32>
    %145 = tpu.matmul %142, %144, %cst_62 {dimension_numbers = #tpu.dot_dimension_numbers<[1], [0], [0], [1], [0, 0, 1, 1], [], []>} : vector<256x384xbf16>, vector<384x128xbf16>, vector<256x128xf32> -> vector<256x128xf32>
    %146 = vector.extract_strided_slice %141 {offsets = [16, 0], sizes = [256, 384], strides = [1, 1]} : vector<288x384xbf16> to vector<256x384xbf16>
    %c1_63 = arith.constant 1 : index
    %c0_64 = arith.constant 0 : index
    %c0_65 = arith.constant 0 : index
    %147 = vector.load %arg12[%c1_63, %c0_64, %c0_65] : memref<3x384x128xbf16, #tpu.memory_space<vmem>>, vector<1x384x128xbf16>
    %148 = vector.shape_cast %147 : vector<1x384x128xbf16> to vector<384x128xbf16>
    %cst_66 = arith.constant dense<0.000000e+00> : vector<256x128xf32>
    %149 = tpu.matmul %146, %148, %cst_66 {dimension_numbers = #tpu.dot_dimension_numbers<[1], [0], [0], [1], [0, 0, 1, 1], [], []>} : vector<256x384xbf16>, vector<384x128xbf16>, vector<256x128xf32> -> vector<256x128xf32>
    %150 = arith.addf %145, %149 : vector<256x128xf32>
    %151 = vector.extract_strided_slice %141 {offsets = [32, 0], sizes = [256, 384], strides = [1, 1]} : vector<288x384xbf16> to vector<256x384xbf16>
    %c2_67 = arith.constant 2 : index
    %c0_68 = arith.constant 0 : index
    %c0_69 = arith.constant 0 : index
    %152 = vector.load %arg12[%c2_67, %c0_68, %c0_69] : memref<3x384x128xbf16, #tpu.memory_space<vmem>>, vector<1x384x128xbf16>
    %153 = vector.shape_cast %152 : vector<1x384x128xbf16> to vector<384x128xbf16>
    %cst_70 = arith.constant dense<0.000000e+00> : vector<256x128xf32>
    %154 = tpu.matmul %151, %153, %cst_70 {dimension_numbers = #tpu.dot_dimension_numbers<[1], [0], [0], [1], [0, 0, 1, 1], [], []>} : vector<256x384xbf16>, vector<384x128xbf16>, vector<256x128xf32> -> vector<256x128xf32>
    %155 = arith.addf %150, %154 : vector<256x128xf32>
    %c0_71 = arith.constant 0 : index
    %c0_72 = arith.constant 0 : index
    %156 = vector.load %arg13[%c0_71, %c0_72] : memref<1x128xf32, #tpu.memory_space<vmem>>, vector<1x128xf32>
    %157 = vector.broadcast %156 : vector<1x128xf32> to vector<256x128xf32>
    %158 = arith.addf %155, %157 : vector<256x128xf32>
    %159 = arith.addf %28, %158 : vector<256x128xf32>
    %c0_73 = arith.constant 0 : index
    %c0_74 = arith.constant 0 : index
    %c0_75 = arith.constant 0 : index
    %160 = vector.load %arg14[%c0_73, %c0_74, %c0_75] : memref<1x256x128xf32, #tpu.memory_space<vmem>>, vector<1x256x128xf32>
    %161 = vector.shape_cast %160 : vector<1x256x128xf32> to vector<256x128xf32>
    %162 = vector.shape_cast %159 : vector<256x128xf32> to vector<1x256x128xf32>
    tpu.vector_store %arg14[%c0_73, %c0_74, %c0_75], %162 {strides = array<i32>} : memref<1x256x128xf32, #tpu.memory_space<vmem>>, vector<1x256x128xf32>,
    return
  }
  func.func @transform_0(%arg0: i32) -> (i32, i32, i32) {
    %c0_i32 = arith.constant 0 : i32
    %c0_i32_0 = arith.constant 0 : i32
    %c0_i32_1 = arith.constant 0 : i32
    return %arg0, %c0_i32, %c0_i32_0 : i32, i32, i32
  }
  func.func @transform_1(%arg0: i32) -> (i32, i32, i32) {
    %c0_i32 = arith.constant 0 : i32
    %c0_i32_0 = arith.constant 0 : i32
    %c0_i32_1 = arith.constant 0 : i32
    return %arg0, %c0_i32, %c0_i32_0 : i32, i32, i32
  }
  func.func @transform_2(%arg0: i32) -> (i32, i32) {
    %c0_i32 = arith.constant 0 : i32
    %c0_i32_0 = arith.constant 0 : i32
    %c0_i32_1 = arith.constant 0 : i32
    return %c0_i32, %c0_i32_0 : i32, i32
  }
  func.func @transform_3(%arg0: i32) -> (i32, i32) {
    %c0_i32 = arith.constant 0 : i32
    %c0_i32_0 = arith.constant 0 : i32
    %c0_i32_1 = arith.constant 0 : i32
    return %c0_i32, %c0_i32_0 : i32, i32
  }
  func.func @transform_4(%arg0: i32) -> (i32, i32) {
    %c0_i32 = arith.constant 0 : i32
    %c0_i32_0 = arith.constant 0 : i32
    %c0_i32_1 = arith.constant 0 : i32
    return %c0_i32, %c0_i32_0 : i32, i32
  }
  func.func @transform_5(%arg0: i32) -> (i32, i32, i32) {
    %c0_i32 = arith.constant 0 : i32
    %c0_i32_0 = arith.constant 0 : i32
    %c0_i32_1 = arith.constant 0 : i32
    %c0_i32_2 = arith.constant 0 : i32
    return %c0_i32, %c0_i32_0, %c0_i32_1 : i32, i32, i32
  }
  func.func @transform_6(%arg0: i32) -> (i32, i32) {
    %c0_i32 = arith.constant 0 : i32
    %c0_i32_0 = arith.constant 0 : i32
    %c0_i32_1 = arith.constant 0 : i32
    return %c0_i32, %c0_i32_0 : i32, i32
  }
  func.func @transform_7(%arg0: i32) -> (i32, i32) {
    %c0_i32 = arith.constant 0 : i32
    %c0_i32_0 = arith.constant 0 : i32
    %c0_i32_1 = arith.constant 0 : i32
    return %c0_i32, %c0_i32_0 : i32, i32
  }
  func.func @transform_8(%arg0: i32) -> (i32, i32) {
    %c0_i32 = arith.constant 0 : i32
    %c0_i32_0 = arith.constant 0 : i32
    %c0_i32_1 = arith.constant 0 : i32
    return %c0_i32, %c0_i32_0 : i32, i32
  }
  func.func @transform_9(%arg0: i32) -> (i32, i32) {
    %c0_i32 = arith.constant 0 : i32
    %c0_i32_0 = arith.constant 0 : i32
    %c0_i32_1 = arith.constant 0 : i32
    return %c0_i32, %c0_i32_0 : i32, i32
  }
  func.func @transform_10(%arg0: i32) -> (i32, i32) {
    %c0_i32 = arith.constant 0 : i32
    %c0_i32_0 = arith.constant 0 : i32
    %c0_i32_1 = arith.constant 0 : i32
    return %c0_i32, %c0_i32_0 : i32, i32
  }
  func.func @transform_11(%arg0: i32) -> (i32, i32, i32) {
    %c0_i32 = arith.constant 0 : i32
    %c0_i32_0 = arith.constant 0 : i32
    %c0_i32_1 = arith.constant 0 : i32
    %c0_i32_2 = arith.constant 0 : i32
    return %c0_i32, %c0_i32_0, %c0_i32_1 : i32, i32, i32
  }
  func.func @transform_12(%arg0: i32) -> (i32, i32) {
    %c0_i32 = arith.constant 0 : i32
    %c0_i32_0 = arith.constant 0 : i32
    %c0_i32_1 = arith.constant 0 : i32
    return %c0_i32, %c0_i32_0 : i32, i32
  }
  func.func @transform_13(%arg0: i32) -> (i32, i32, i32) {
    %c0_i32 = arith.constant 0 : i32
    %c0_i32_0 = arith.constant 0 : i32
    %c0_i32_1 = arith.constant 0 : i32
    return %arg0, %c0_i32, %c0_i32_0 : i32, i32, i32
  }
}

</mosaic_0001>

<bundles_post_ra>
// kernel: tpu_custom_call.1
= control target key start
LH: loop header
LB: loop body
LE: loop exit
PB: predicated region body
PF: predicated region fallthrough
CT: control target
= control target key end

     0   :  { %s14149_s0 = inlined_call_operand.hbm [shape: bf16[2,256,128], index: 0, kind: input, shape index: {}]   ;;  %s14150_s1 = inlined_call_operand.vmem [shape: bf16[2,1,128], index: 1, kind: input, shape index: {}]   ;;  %s14151_s2 = inlined_call_operand.hbm [shape: bf16[128,128], index: 2, kind: input, shape index: {}]   ;;  %s14152_s3 = inlined_call_operand.hbm [shape: bf16[128,128], index: 3, kind: input, shape index: {}]   ;;  %s14153_s4 = inlined_call_operand.hbm [shape: bf16[128,128], index: 4, kind: input, shape index: {}]   ;;  %s14154_s5 = inlined_call_operand.hbm [shape: bf16[3,384,128], index: 5, kind: input, shape index: {}]   ;;  %s14155_s6 = inlined_call_operand.vmem [shape: f32[1,128], index: 6, kind: input, shape index: {}]   ;;  %s14156_s7 = inlined_call_operand.hbm [shape: bf16[128,128], index: 7, kind: input, shape index: {}]   ;;  %s14157_s8 = inlined_call_operand.vmem [shape: f32[1,128], index: 8, kind: input, shape index: {}]   ;;  %s14158_s9 = inlined_call_operand.hbm [shape: bf16[128,128], index: 9, kind: input, shape index: {}]   ;;  %s14159_s10 = inlined_call_operand.hbm [shape: bf16[128,128], index: 10, kind: input, shape index: {}]   ;;  %s14160_s11 = inlined_call_operand.hbm [shape: bf16[3,384,128], index: 11, kind: input, shape index: {}]   ;;  %s14161_s12 = inlined_call_operand.vmem [shape: f32[1,128], index: 12, kind: input, shape index: {}]   ;;  %s14162_s13 = inlined_call_operand.hbm [shape: f32[2,256,128], index: 13, kind: output, shape index: {}]  }
   0x1   :  { %14494 = sst [smem:[#allocation113_spill]] %s14150_s1 }
   0x2   :  { %14495 = sst [smem:[#allocation114_spill]] %s14151_s2 }
   0x3   :  { %14496 = sst [smem:[#allocation115_spill]] %s14155_s6 }
   0x4   :  { %14497 = sst [smem:[#allocation116_spill]] %s14157_s8 }
   0x5   :  { %14498 = sst [smem:[#allocation117_spill]] %s14161_s12 }
   0x6   :  { %14499 = sst [smem:[#allocation118_spill]] %s14162_s13 }
   0x7   :  { %18 = vsyncpa [#allocation3], 0 }
   0x8   :  { %20 = vsyncpa [#allocation3 + $0x1], 0 }
   0x9   :  { %21 = vsyncpa [#allocation6], 0 }
   0xa   :  { %22 = vsyncpa [#allocation9], 0 }
   0xb   :  { %23 = vsyncpa [#allocation12], 0 }
   0xc   :  { %24 = vsyncpa [#allocation15], 0 }
   0xd   :  { %25 = vsyncpa [#allocation4], 0 }
   0xe   :  { %27 = vsyncpa [#allocation4 + $0x1], 0  ;;  %s10392_s25 = smov 0   ;;  %s10394_s26 = smov 0  }
   0xf   :  { %s10396_s27 = smov 0   ;;  %s10398_s28 = smov 0  }
  0x10 LB: > { %s10304_s29 = smov [#allocation5]   ;;  %s10413_s14 = sadd.s32 4294967295, %s10302_s28   ;;  %s10302_s28 = sphi %s10398_s28, %s15127_s28   ;;  %s10298_s27 = sphi %s10396_s27, %s15126_s27   ;;  %s10294_s26 = sphi %s10394_s26, %s15125_s26   ;;  %s10290_s25 = sphi %s10392_s25, %s15124_s25  }
  0x11   : > { %s359_s30 = sshll.u32 %s10304_s29, 4  ;;  %p7167_p0 = scmp.ge.s32.totalorder %s10302_s28, 1  ;;  %s10418_s30 = int_to_ptr.vmem [resolvable:$true] %s359_s30 }
  0x12   : > { %p14164_p1 = scmp.eq.s32.totalorder %s10413_s14, 0  ;;  %p347_p2 = scmp.lt.s32.totalorder %s10302_s28, 3 }
  0x13   : > { %s10305_s16 = smov [#allocation8]   ;;  %s10306_s19 = smov [#allocation11]  }
  0x14   : > { %p10420_p3 = pnand %p7167_p0, %p347_p2  ;;  %s385_s17 = sshll.u32 %s10305_s16, 4  ;;  %s10433_s17 = int_to_ptr.vmem [resolvable:$true] %s385_s17 }
  0x15   : > { %s414_s20 = sshll.u32 %s10306_s19, 4  ;;  %s14502_s2 = sld [smem:[#allocation114_spill]]  ;;  %s10435_s20 = int_to_ptr.vmem [resolvable:$true] %s414_s20 }
  0x16   : > { %s14500_s15 = scalar_select %p10420_p3, 1, 0 }
  0x17   : > { %p9395_p5 = pneg %p10420_p3 }
  0x19   : > { %p10429_p6 = pnand %p9395_p5, %p14164_p1 }
  0x1b   : > { %s9966_s23 = scalar_lea.hbm %s14502_s2, 1024  ;;  %p10445_p8 = pneg %p10429_p6 }
  0x1c   : > { %p9967_p7 = scmp.ne.s32.totalorder %s14502_s2, %s9966_s23  ;;  %p9973_p11 = scmp.lt.u32.totalorder %s9966_s23, %s14502_s2 }
  0x1e   : > { %p9969_p9 = pnand %p10445_p8, %p9967_p7 }
  0x20   : > { %p9970_p10 = pneg %p9969_p9 }
  0x22   : > { %p9975_p12 = pnand %p9973_p11, %p9970_p10 }
  0x24   : > { %9978 = shalt.err (!%p9975_p12)
}
  0x25   : > { %s9979_s21 = scalar_lea.vmem %s10418_s30, 1024  ;;  %p9987_p5 = scmp.lt.s32.totalorder %s10418_s30, %s10418_s30 }
  0x26   : > { %p9980_p13 = scmp.ne.s32.totalorder %s10418_s30, %s9979_s21  ;;  %p9988_p4 = scmp.lt.s32.totalorder %s9979_s21, %s9979_s21 }
  0x28   : > { %p9982_p0 = pnand %p9980_p13, %p10445_p8  ;;  %p9989_p7 = por %p9988_p4, %p9987_p5 }
  0x2a   : > { %p9983_p2 = pneg %p9982_p0 }
  0x2c   : > { %p9990_p9 = pnand %p9989_p7, %p9983_p2 }
  0x2e   : > { %9993 = shalt.err (!%p9990_p9)
}
  0x2f   : > { %s14166_s22 = smov 64   ;;  %s10308_s13 = smov 4  }
  0x30   : > { %9398 = dma.hbm_to_vmem [thread:$0]  (!%p10429_p6), %s14502_s2, 1024, %s10418_s30, [#allocation6], %s14166_s22, %s14166_s22, %s10308_s13  }
  0x31   : > { %s9994_s21 = scalar_lea.hbm %s14153_s4, 1024 }
  0x32   : > { %p9995_p4 = scmp.ne.s32.totalorder %s14153_s4, %s9994_s21  ;;  %p10001_p12 = scmp.lt.u32.totalorder %s9994_s21, %s14153_s4 }
  0x34   : > { %p9997_p10 = pnand %p9995_p4, %p10445_p8 }
  0x36   : > { %p9998_p11 = pneg %p9997_p10 }
  0x38   : > { %p10003_p13 = pnand %p10001_p12, %p9998_p11 }
  0x3a   : > { %10006 = shalt.err (!%p10003_p13)
}
  0x3b   : > { %s10007_s30 = scalar_lea.vmem %s10433_s17, 1024  ;;  %p10015_p7 = scmp.lt.s32.totalorder %s10433_s17, %s10433_s17 }
  0x3c   : > { %p10008_p0 = scmp.ne.s32.totalorder %s10433_s17, %s10007_s30  ;;  %p10016_p9 = scmp.lt.s32.totalorder %s10007_s30, %s10007_s30 }
  0x3e   : > { %p10010_p2 = pnand %p10008_p0, %p10445_p8  ;;  %p10017_p4 = por %p10016_p9, %p10015_p7 }
  0x40   : > { %p10011_p5 = pneg %p10010_p2 }
  0x42   : > { %p10018_p10 = pnand %p10017_p4, %p10011_p5 }
  0x44   : > { %10021 = shalt.err (!%p10018_p10)
}
  0x45   : > { %9404 = dma.hbm_to_vmem [thread:$0]  (!%p10429_p6), %s14153_s4, 1024, %s10433_s17, [#allocation9], %s14166_s22, %s14166_s22, %s10308_s13  }
  0x46   : > { %s10022_s23 = scalar_lea.hbm %s14156_s7, 1024 }
  0x47   : > { %p10023_p11 = scmp.ne.s32.totalorder %s14156_s7, %s10022_s23  ;;  %p10029_p0 = scmp.lt.u32.totalorder %s10022_s23, %s14156_s7 }
  0x49   : > { %p10025_p12 = pnand %p10023_p11, %p10445_p8 }
  0x4b   : > { %p10026_p13 = pneg %p10025_p12 }
  0x4d   : > { %p10031_p2 = pnand %p10029_p0, %p10026_p13 }
  0x4f   : > { %10034 = shalt.err (!%p10031_p2)
}
  0x50   : > { %s10035_s17 = scalar_lea.vmem %s10435_s20, 1024  ;;  %p10043_p4 = scmp.lt.s32.totalorder %s10435_s20, %s10435_s20 }
  0x51   : > { %p10036_p5 = scmp.ne.s32.totalorder %s10435_s20, %s10035_s17  ;;  %p10044_p10 = scmp.lt.s32.totalorder %s10035_s17, %s10035_s17 }
  0x53   : > { %p10038_p7 = pnand %p10036_p5, %p10445_p8  ;;  %p10045_p11 = por %p10044_p10, %p10043_p4 }
  0x55   : > { %p10039_p9 = pneg %p10038_p7 }
  0x57   : > { %p10046_p12 = pnand %p10045_p11, %p10039_p9 }
  0x59   : > { %10049 = shalt.err (!%p10046_p12)
}
  0x5a   : > { %9410 = dma.hbm_to_vmem [thread:$0]  (!%p10429_p6), %s14156_s7, 1024, %s10435_s20, [#allocation12], %s14166_s22, %s14166_s22, %s10308_s13  }
  0x5b   : > { %s10309_s6 = smov [#allocation14]   ;;  %s10310_s12 = smov [#allocation7]  }
  0x5c   : > { %s443_s8 = sshll.u32 %s10309_s6, 4  ;;  %s372_s23 = sshll.u32 %s10310_s12, 4  ;;  %s444_s8 = int_to_ptr.vmem [resolvable:$true] %s443_s8  ;;  %s373_s23 = int_to_ptr.vmem [resolvable:$true] %s372_s23 }
  0x5d   : > { %s10050_s19 = scalar_lea.hbm %s14159_s10, 1024 }
  0x5e   : > { %p10051_p13 = scmp.ne.s32.totalorder %s14159_s10, %s10050_s19  ;;  %p10057_p5 = scmp.lt.u32.totalorder %s10050_s19, %s14159_s10 }
  0x60   : > { %p10053_p0 = pnand %p10051_p13, %p10445_p8 }
  0x62   : > { %p10054_p2 = pneg %p10053_p0 }
  0x64   : > { %p10059_p7 = pnand %p10057_p5, %p10054_p2 }
  0x66   : > { %10062 = shalt.err (!%p10059_p7)
}
  0x67   : > { %s10063_s20 = scalar_lea.vmem %s444_s8, 1024  ;;  %p10071_p11 = scmp.lt.s32.totalorder %s444_s8, %s444_s8 }
  0x68   : > { %p10064_p9 = scmp.ne.s32.totalorder %s444_s8, %s10063_s20  ;;  %p10072_p12 = scmp.lt.s32.totalorder %s10063_s20, %s10063_s20 }
  0x6a   : > { %p10066_p4 = pnand %p10064_p9, %p10445_p8  ;;  %p10073_p1 = por %p10072_p12, %p10071_p11 }
  0x6c   : > { %p10067_p10 = pneg %p10066_p4 }
  0x6e   : > { %p10074_p3 = pnand %p10073_p1, %p10067_p10 }
  0x70   : > { %10077 = shalt.err (!%p10074_p3)
}
  0x71   : > { %9416 = dma.hbm_to_vmem [thread:$0]  (!%p10429_p6), %s14159_s10, 1024, %s444_s8, [#allocation15], %s14166_s22, %s14166_s22, %s10308_s13  }
  0x72   : > { %s10078_s24 = scalar_lea.hbm %s14152_s3, 1024 }
  0x73   : > { %p10079_p1 = scmp.ne.s32.totalorder %s14152_s3, %s10078_s24  ;;  %p10085_p0 = scmp.lt.u32.totalorder %s10078_s24, %s14152_s3 }
  0x75   : > { %p10081_p3 = pnand %p10079_p1, %p10445_p8 }
  0x77   : > { %p10082_p13 = pneg %p10081_p3 }
  0x79   : > { %p10087_p2 = pnand %p10085_p0, %p10082_p13 }
  0x7b   : > { %10090 = shalt.err (!%p10087_p2)
}
  0x7c   : > { %s10091_s30 = scalar_lea.vmem %s373_s23, 1024  ;;  %p10099_p4 = scmp.lt.s32.totalorder %s373_s23, %s373_s23 }
  0x7d   : > { %p10092_p5 = scmp.ne.s32.totalorder %s373_s23, %s10091_s30  ;;  %p10100_p10 = scmp.lt.s32.totalorder %s10091_s30, %s10091_s30 }
  0x7f   : > { %p10094_p7 = pnand %p10092_p5, %p10445_p8  ;;  %p10101_p11 = por %p10100_p10, %p10099_p4 }
  0x81   : > { %p10095_p9 = pneg %p10094_p7 }
  0x83   : > { %p10102_p12 = pnand %p10101_p11, %p10095_p9 }
  0x85   : > { %10105 = shalt.err (!%p10102_p12)
}
  0x86   : > { %9401 = dma.hbm_to_vmem [thread:$0]  (!%p10429_p6), %s14152_s3, 1024, %s373_s23, [#allocation6], %s14166_s22, %s14166_s22, %s10308_s13  }
  0x87   : > { %s10311_s2 = smov [#allocation10]   ;;  %s10312_s6 = smov [#allocation13]  }
  0x88   : > { %s398_s1 = sshll.u32 %s10311_s2, 4  ;;  %s430_s12 = sshll.u32 %s10312_s6, 4  ;;  %s399_s1 = int_to_ptr.vmem [resolvable:$true] %s398_s1  ;;  %s431_s12 = int_to_ptr.vmem [resolvable:$true] %s430_s12 }
  0x89   : > { %s10106_s19 = scalar_lea.hbm %s14154_s5, 9216 }
  0x8a   : > { %p10107_p1 = scmp.ne.s32.totalorder %s14154_s5, %s10106_s19  ;;  %p10113_p0 = scmp.lt.u32.totalorder %s10106_s19, %s14154_s5 }
  0x8c   : > { %p10109_p3 = pnand %p10107_p1, %p10445_p8 }
  0x8e   : > { %p10110_p13 = pneg %p10109_p3 }
  0x90   : > { %p10115_p2 = pnand %p10113_p0, %p10110_p13 }
  0x92   : > { %10118 = shalt.err (!%p10115_p2)
}
  0x93   : > { %s10119_s23 = scalar_lea.vmem %s399_s1, 9216  ;;  %p10127_p4 = scmp.lt.s32.totalorder %s399_s1, %s399_s1 }
  0x94   : > { %p10120_p5 = scmp.ne.s32.totalorder %s399_s1, %s10119_s23  ;;  %p10128_p10 = scmp.lt.s32.totalorder %s10119_s23, %s10119_s23 }
  0x96   : > { %p10122_p7 = pnand %p10120_p5, %p10445_p8  ;;  %p10129_p11 = por %p10128_p10, %p10127_p4 }
  0x98   : > { %p10123_p9 = pneg %p10122_p7 }
  0x9a   : > { %p10130_p12 = pnand %p10129_p11, %p10123_p9 }
  0x9c   : > { %10133 = shalt.err (!%p10130_p12)
}
  0x9d   : > { %9407 = dma.hbm_to_vmem [thread:$0]  (!%p10429_p6), %s14154_s5, 9216, %s399_s1, [#allocation9], %s14166_s22, %s14166_s22, %s10308_s13  }
  0x9e   : > { %s10134_s29 = scalar_lea.hbm %s14158_s9, 1024 }
  0x9f   : > { %p10135_p1 = scmp.ne.s32.totalorder %s14158_s9, %s10134_s29  ;;  %p10141_p0 = scmp.lt.u32.totalorder %s10134_s29, %s14158_s9 }
  0xa1   : > { %p10137_p3 = pnand %p10135_p1, %p10445_p8 }
  0xa3   : > { %p10138_p13 = pneg %p10137_p3 }
  0xa5   : > { %p10143_p2 = pnand %p10141_p0, %p10138_p13 }
  0xa7   : > { %10146 = shalt.err (!%p10143_p2)
}
  0xa8   : > { %s10147_s8 = scalar_lea.vmem %s431_s12, 1024  ;;  %p10155_p4 = scmp.lt.s32.totalorder %s431_s12, %s431_s12 }
  0xa9   : > { %p10148_p5 = scmp.ne.s32.totalorder %s431_s12, %s10147_s8  ;;  %p10156_p10 = scmp.lt.s32.totalorder %s10147_s8, %s10147_s8 }
  0xab   : > { %p10150_p7 = pnand %p10148_p5, %p10445_p8  ;;  %p10157_p11 = por %p10156_p10, %p10155_p4 }
  0xad   : > { %p10151_p9 = pneg %p10150_p7 }
  0xaf   : > { %p10158_p12 = pnand %p10157_p11, %p10151_p9 }
  0xb1   : > { %10161 = shalt.err (!%p10158_p12)
}
  0xb2   : > { %9413 = dma.hbm_to_vmem [thread:$0]  (!%p10429_p6), %s14158_s9, 1024, %s431_s12, [#allocation12], %s14166_s22, %s14166_s22, %s10308_s13  }
  0xb3   : > { %s10313_s20 = smov [#allocation16]   ;;  %s10162_s29 = scalar_lea.hbm %s14160_s11, 9216 }
  0xb4   : > { %s456_s2 = sshll.u32 %s10313_s20, 4  ;;  %p10163_p1 = scmp.ne.s32.totalorder %s14160_s11, %s10162_s29  ;;  %s457_s2 = int_to_ptr.vmem [resolvable:$true] %s456_s2 }
  0xb5   : > { %p10169_p0 = scmp.lt.u32.totalorder %s10162_s29, %s14160_s11 }
  0xb6   : > { %p10165_p3 = pnand %p10163_p1, %p10445_p8 }
  0xb8   : > { %p10166_p13 = pneg %p10165_p3 }
  0xba   : > { %p10171_p2 = pnand %p10169_p0, %p10166_p13 }
  0xbc   : > { %10174 = shalt.err (!%p10171_p2)
}
  0xbd   : > { %s10175_s12 = scalar_lea.vmem %s457_s2, 9216  ;;  %p10183_p4 = scmp.lt.s32.totalorder %s457_s2, %s457_s2 }
  0xbe   : > { %p10176_p5 = scmp.ne.s32.totalorder %s457_s2, %s10175_s12  ;;  %p10184_p10 = scmp.lt.s32.totalorder %s10175_s12, %s10175_s12 }
  0xc0   : > { %p10178_p7 = pnand %p10176_p5, %p10445_p8  ;;  %p10185_p11 = por %p10184_p10, %p10183_p4 }
  0xc2   : > { %p10179_p9 = pneg %p10178_p7 }
  0xc4   : > { %p10186_p12 = pnand %p10185_p11, %p10179_p9 }
  0xc6   : > { %10189 = shalt.err (!%p10186_p12)
}
  0xc7   : > { %9419 = dma.hbm_to_vmem [thread:$0]  (!%p10429_p6), %s14160_s11, 9216, %s457_s2, [#allocation15], %s14166_s22, %s14166_s22, %s10308_s13  }
  0xc8   : > { %s7166_s18 = sadd.s32 4294967294, %s10302_s28   ;;  %s10628_s16 = sadd.s32 1, %s10302_s28  }
  0xc9   : > { %s37_s23 = ssub.s32 %s10302_s28, %s10628_s16  ;;  %s40_s20 = sadd.s32 1, %s10298_s27 }
  0xca   : > { %p38_p8 = scmp.eq.s32.totalorder %s37_s23, 0  ;;  %p47_p1 = scmp.ne.s32.totalorder %s10298_s27, %s10294_s26 }
  0xcb   : > { %p48_p3 = scmp.eq.s32.totalorder %s10302_s28, 0  ;;  %p53_p13 = scmp.ne.s32.totalorder %s10294_s26, %s10290_s25 }
  0xcc   : > { %s10639_s6 = scalar_select %p38_p8, %s10298_s27, %s40_s20  }
  0xcd   : > { %p10641_p0 = por %p48_p3, %p47_p1  ;;  %p14505_p2 = scmp.eq.s32.totalorder %s10413_s14, 0 }
  0xce   : > { %p334_p5 = scmp.eq.s32.totalorder %s10413_s14, 1  ;;  %p340_p7 = scmp.eq.s32.totalorder %s7166_s18, 1 }
  0xcf   : > { %p10647_p6 = por %p14505_p2, %p53_p13  ;;  %p9436_p9 = scmp.lt.s32.totalorder %s10302_s28, 2 }
  0xd0   : > { %s473_s29 = sand.u32 1, %s10298_s27   ;;  %p10654_p4 = por %p334_p5, %p47_p1 }
  0xd1   : > { %p10658_p10 = por %p340_p7, %p53_p13  ;;  %s7177_s17 = sshll.u32 %s473_s29, 7 }
  0xd2   : > { %s14507_s19 = scalar_select %p10654_p4, 1, 0 }
  0xd3   : > { %s14508_s21 = scalar_select %p10658_p10, 1, 0 }
  0xd4   : > { %s7700_s30 = sshll.u32 %s10302_s28, 11  ;;  %s477_s18 = scalar_lea.vmem [#allocation2], %s7177_s17 }
  0xd5   : > { %s10666_s1 = scalar_lea.hbm %s14149_s0, %s7700_s30  ;;  %s484_s23 = sshll.u32 %s477_s18, 4  ;;  %s10668_s23 = int_to_ptr.vmem [resolvable:$true] %s484_s23 }
  0xd6   : > { %p10672_p11 = pnand %p9436_p9, %p10641_p0  ;;  %s10676_s22 = scalar_lea.sflag [#allocation3], %s473_s29 }
  0xd7   : > { %s10190_s12 = scalar_lea.hbm %s10666_s1, 2048  ;;  %s10195_s24 = scalar_lea.hbm %s14149_s0, 4096 }
  0xd8   : > { %p10191_p12 = scmp.ne.s32.totalorder %s10666_s1, %s10190_s12  ;;  %p10192_p8 = pneg %p10672_p11 }
  0xd9   : > { %p10196_p13 = scmp.lt.u32.totalorder %s10666_s1, %s14149_s0  ;;  %p10197_p0 = scmp.lt.u32.totalorder %s10195_s24, %s10190_s12 }
  0xda   : > { %p10193_p1 = pnand %p10192_p8, %p10191_p12  ;;  %p10199_p5 = scmp.lt.u32.totalorder %s10190_s12, %s10666_s1 }
  0xdb   : > { %p10198_p2 = por %p10197_p0, %p10196_p13 }
  0xdc   : > { %p10194_p3 = pneg %p10193_p1 }
  0xdd   : > { %p10200_p7 = por %p10199_p5, %p10198_p2 }
  0xdf   : > { %p10201_p9 = pnand %p10200_p7, %p10194_p3 }
  0xe1   : > { %10204 = shalt.err (!%p10201_p9)
}
  0xe2   : > { %s10205_s29 = scalar_lea.vmem %s10668_s23, 2048  ;;  %s10314_s17 = smov [#allocation2]  }
  0xe3   : > { %p10206_p12 = scmp.ne.s32.totalorder %s10668_s23, %s10205_s29  ;;  %s10210_s30 = sshll.u32 %s10314_s17, 4  ;;  %s10211_s30 = int_to_ptr.vmem [resolvable:$false] %s10210_s30 }
  0xe4   : > { %s10212_s8 = scalar_lea.vmem %s10211_s30, 4096  ;;  %p10213_p4 = scmp.lt.s32.totalorder %s10668_s23, %s10211_s30 }
  0xe5   : > { %p10208_p1 = pnand %p10206_p12, %p10192_p8  ;;  %p10214_p13 = scmp.lt.s32.totalorder %s10212_s8, %s10205_s29 }
  0xe7   : > { %p10209_p10 = pneg %p10208_p1  ;;  %p10215_p0 = por %p10214_p13, %p10213_p4 }
  0xe9   : > { %p10216_p2 = pnand %p10215_p0, %p10209_p10 }
  0xeb   : > { %10219 = shalt.err (!%p10216_p2)
}
  0xec   : > { %s14510_s12 = smov 64   ;;  %p14511_p8 = scmp.ne.s32.totalorder %s14500_s15, 0 }
  0xed   : > { %9423 = dma.hbm_to_vmem [thread:$0]  (!%p10672_p11), %s10666_s1, 2048, %s10668_s23, %s10676_s22, %s14510_s12, %s14510_s12, %s10308_s13  }
  0xee   : > { %502 = sbr.rel (%p14511_p8) target bundleno = 2814 (0xafe), region = 72 }
  0xf5   : > { %s10710_s24 = sand.u32 1, %s10294_s26  }
  0xf6   : > { %s7181_s18 = sshll.u32 %s10710_s24, 7  ;;  %s505_s29 = scalar_lea.sflag [#allocation3], %s10710_s24 }
  0xf7   : > { %s10714_s17 = scalar_lea.vmem [#allocation2], %s7181_s18 }
  0xf8   : > { %10265 = dma.done.wait (%p10647_p6), %s505_s29, 2048  }
  0xf9   : > { %10267 = vsyncadd (%p10647_p6), %s505_s29, 4294965248  ;;  %p14512_p4 = scmp.eq.s32.totalorder %s10413_s14, 0 }
  0xfb   : > { %10269 = dma.done.wait (%p14512_p4), [#allocation6], 2048   ;;  %p14513_p10 = pmov %p14512_p4 }
  0xfc   : > { %p14514_p11 = pmov %p14512_p4 }
  0xfd   : > { %10271 = vsyncadd (%p14513_p10), [#allocation6], 4294965248 }
  0xfe   : > { %10273 = dma.done.wait (%p14514_p11), [#allocation9], 10240   ;;  %p14515_p3 = pmov %p14512_p4 }
 0x100   : > { %10275 = vsyncadd (%p14515_p3), [#allocation9], 4294957056  ;;  %p14516_p5 = pmov %p14515_p3 }
 0x101   : > { %p14517_p7 = pmov %p14515_p3 }
 0x102   : > { %10277 = dma.done.wait (%p14516_p5), [#allocation12], 2048  }
 0x103   : > { %10279 = vsyncadd (%p14517_p7), [#allocation12], 4294965248  ;;  %p14518_p6 = pmov %p14515_p3 }
 0x104   : > { %p14519_p9 = pmov %p14515_p3 }
 0x105   : > { %10281 = dma.done.wait (%p14518_p6), [#allocation15], 10240  }
 0x106   : > { %10283 = vsyncadd (%p14519_p9), [#allocation15], 4294957056  ;;  %v9494_v0 = vld [vmem:[#allocation5] sm:$0xff]   ;;  %v9495_v1 = vld [vmem:[#allocation5 + $0x8] sm:$0xff]   ;;  %v14168_v25 = vmov 0.0   ;;  %vm14246_vm0 = vmmov 0  }
 0x107   : > { %8587 = vmatprep.subr.bf16.mxu0 %v9494_v0  ;;  %v9496_v2 = vld [vmem:[#allocation5 + $0x10] sm:$0xff]   ;;  %v9497_v3 = vld [vmem:[#allocation5 + $0x18] sm:$0xff]   ;;  %v9502_v4 = vld [vmem:[%s10714_s17] sm:$0xff]   ;;  %8635 = vmatprep.subr.bf16.mxu1 %v14168_v25  ;;  %vm10317_vm3 = vmmov 1   ;;  %vm14249_vm12 = vsmask.f32 256 }
 0x108   : > { %8588 = vmatpush3.bf16.msra.mxu0 %v9494_v0  ;;  %8603 = vmatprep.mubr.bf16.mxu0 %v9502_v4  ;;  %v9498_v5 = vld [vmem:[#allocation5 + $0x20] sm:$0xff]   ;;  %v9499_v6 = vld [vmem:[#allocation5 + $0x28] sm:$0xff]   ;;  %v9500_v7 = vld [vmem:[#allocation5 + $0x30] sm:$0xff]   ;;  %p586_p12 = scmp.lt.s32.totalorder %s10413_s14, 1  ;;  %s14835_s2 = sld [smem:[#allocation113_spill]] }
 0x109   : > { %8589 = vmatprep.subr.bf16.mxu0 %v9495_v1  ;;  %v9501_v8 = vld [vmem:[#allocation5 + $0x38] sm:$0xff]   ;;  %v9503_v9 = vld [vmem:[%s10714_s17 + $0x8] sm:$0xff]   ;;  %v9504_v10 = vld [vmem:[%s10714_s17 + $0x10] sm:$0xff]   ;;  %8651 = vmatprep.mubr.msk.bf16.mxu1 %vm14246_vm0, %v14168_v25  ;;  %s14910_s30 = sld [smem:[#allocation116_spill]]  ;;  %s14911_s18 = sld [smem:[#allocation115_spill]] }
 0x10a   : > { %v9505_v11 = vld [vmem:[%s10714_s17 + $0x18] sm:$0xff]   ;;  %v9506_v12 = vld [vmem:[%s10714_s17 + $0x20] sm:$0xff]   ;;  %v9507_v13 = vld [vmem:[%s10714_s17 + $0x28] sm:$0xff]   ;;  %s587_s15 = scalar_select %p586_p12, %s10413_s14, 1 }
 0x10b   : > { %v9508_v14 = vld [vmem:[%s10714_s17 + $0x30] sm:$0xff]   ;;  %v9509_v15 = vld [vmem:[%s10714_s17 + $0x38] sm:$0xff]   ;;  %v9510_v16 = vld [vmem:[%s10714_s17 + $0x40] sm:$0xff]   ;;  %s7190_s22 = sshll.u32 %s10710_s24, 8  ;;  %p15121_p13 = scmp.ne.s32.totalorder %s14507_s19, 0 }
 0x10c   : > { %8590 = vmatpush3.bf16.msra.mxu0 %v9495_v1  ;;  %v9511_v17 = vld [vmem:[%s10714_s17 + $0x48] sm:$0xff]   ;;  %v9512_v18 = vld [vmem:[%s10714_s17 + $0x50] sm:$0xff]   ;;  %v9513_v19 = vld [vmem:[%s10714_s17 + $0x58] sm:$0xff]   ;;  %s13978_s13 = scalar_lea.vmem [#allocation17], %s7190_s22 }
 0x10d   : > { %8591 = vmatprep.subr.bf16.mxu0 %v9496_v2  ;;  %v9514_v20 = vld [vmem:[%s10714_s17 + $0x60] sm:$0xff]   ;;  %v9515_v21 = vld [vmem:[%s10714_s17 + $0x68] sm:$0xff]   ;;  %v9516_v22 = vld [vmem:[%s10714_s17 + $0x70] sm:$0xff]  }
 0x10e   : > { %v9517_v23 = vld [vmem:[%s10714_s17 + $0x78] sm:$0xff]   ;;  %v9518_v24 = vld [vmem:[#allocation7] sm:$0xff]   ;;  %v9519_v26 = vld [vmem:[#allocation7 + $0x8] sm:$0xff]   ;;  %s588_s1 = scalar_lea.vmem %s14835_s2, %s587_s15  ;;  %s15087_s15 = sld [smem:[#allocation117_spill]] }
 0x10f   : > { %8636 = vmatpush3.bf16.msra.mxu1 %v9518_v24  ;;  %v9520_v27 = vld [vmem:[#allocation7 + $0x10] sm:$0xff]   ;;  %v9521_v28 = vld [vmem:[#allocation7 + $0x18] sm:$0xff]   ;;  %v9522_v29 = vld [vmem:[#allocation7 + $0x20] sm:$0xff]   ;;  %s7701_s2 = sshll.u32 %s10413_s14, 12  ;;  %s6995_s14 = scalar_lea.sflag [#allocation4], %s10710_s24 }
 0x110   : > { %8592 = vmatpush3.bf16.msra.mxu0 %v9496_v2  ;;  %8637 = vmatprep.subr.bf16.mxu1 %v14168_v25  ;;  %v9523_v30 = vld [vmem:[#allocation7 + $0x28] sm:$0xff]   ;;  %v9524_v31 = vld [vmem:[#allocation7 + $0x30] sm:$0xff]   ;;  %v9525_v32 = vld [vmem:[#allocation7 + $0x38] sm:$0xff]  }
 0x111   : > { %8593 = vmatprep.subr.bf16.mxu0 %v9497_v3  ;;  %vm2281_vm4 = vmpackc.low %vm10317_vm3, %vm10317_vm3 }
 0x113   : > { %8638 = vmatpush3.bf16.msra.mxu1 %v9519_v26 }
 0x114   : > { %8594 = vmatpush3.bf16.msra.mxu0 %v9497_v3  ;;  %8639 = vmatprep.subr.bf16.mxu1 %v14168_v25 }
 0x115   : > { %8595 = vmatprep.subr.bf16.mxu0 %v9498_v5 }
 0x117   : > { %8640 = vmatpush3.bf16.msra.mxu1 %v9520_v27 }
 0x118   : > { %8596 = vmatpush3.bf16.msra.mxu0 %v9498_v5  ;;  %8641 = vmatprep.subr.bf16.mxu1 %v14168_v25 }
 0x119   : > { %8597 = vmatprep.subr.bf16.mxu0 %v9499_v6 }
 0x11b   : > { %8642 = vmatpush3.bf16.msra.mxu1 %v9521_v28 }
 0x11c   : > { %8598 = vmatpush3.bf16.msra.mxu0 %v9499_v6  ;;  %8643 = vmatprep.subr.bf16.mxu1 %v14168_v25 }
 0x11d   : > { %8599 = vmatprep.subr.bf16.mxu0 %v9500_v7 }
 0x11f   : > { %8644 = vmatpush3.bf16.msra.mxu1 %v9522_v29 }
 0x120   : > { %8600 = vmatpush3.bf16.msra.mxu0 %v9500_v7  ;;  %8645 = vmatprep.subr.bf16.mxu1 %v14168_v25 }
 0x121   : > { %8601 = vmatprep.subr.bf16.mxu0 %v9501_v8 }
 0x123   : > { %8646 = vmatpush3.bf16.msra.mxu1 %v9523_v30 }
 0x124   : > { %8602 = vmatpush3.bf16.msra.mxu0 %v9501_v8  ;;  %8647 = vmatprep.subr.bf16.mxu1 %v14168_v25 }
 0x127   : > { %8604 = vmatmul.mubr.bf16.vlgmr.msra.gmra.mrb[0].mxu0 %v9503_v9  ;;  %8648 = vmatpush3.bf16.msra.mxu1 %v9524_v31 }
 0x128   : > { %8607 = vmatprep.mubr.bf16.mxu0 %v9504_v10  ;;  %8649 = vmatprep.subr.bf16.mxu1 %v14168_v25 }
 0x12b   : > { %8650 = vmatpush3.bf16.msra.mxu1 %v9525_v32 }
 0x12c   : > { %8655 = vmatprep.subr.bf16.mxu1 %v14168_v25 }
 0x12f   : > { %8608 = vmatmul.mubr.bf16.gmra.mrb[4].mxu0 %v9505_v11 }
 0x130   : > { %8611 = vmatprep.mubr.bf16.mxu0 %v9506_v12 }
 0x137   : > { %8612 = vmatmul.mubr.bf16.gmra.mrb[8].mxu0 %v9507_v13 }
 0x138   : > { %8615 = vmatprep.mubr.bf16.mxu0 %v9508_v14 }
 0x13f   : > { %8616 = vmatmul.mubr.bf16.gmra.mrb[12].mxu0 %v9509_v15 }
 0x140   : > { %8619 = vmatprep.mubr.bf16.mxu0 %v9510_v16 }
 0x147   : > { %8620 = vmatmul.mubr.bf16.gmra.mrb[16].mxu0 %v9511_v17 }
 0x148   : > { %8623 = vmatprep.mubr.bf16.mxu0 %v9512_v18 }
 0x14f   : > { %8624 = vmatmul.mubr.bf16.gmra.mrb[20].mxu0 %v9513_v19 }
 0x150   : > { %8627 = vmatprep.mubr.bf16.mxu0 %v9514_v20 }
 0x157   : > { %8628 = vmatmul.mubr.bf16.gmra.mrb[24].mxu0 %v9515_v21 }
 0x158   : > { %8631 = vmatprep.mubr.bf16.mxu0 %v9516_v22 }
 0x15f   : > { %8632 = vmatmul.mubr.bf16.gmra.mrb[28].mxu0 %v9517_v23 }
 0x1fa   : > { %v10763_v33 = vpop.f32.mrb[0].mxu0 }
 0x1fb   : > { %14520 = vst [vmem:[#allocation24_spill] sm:$0xff] %v10763_v33  ;;  %v10765_v34 = vpop.f32.mrb[1].mxu0 }
 0x1fc   : > { %14521 = vst [vmem:[#allocation25_spill] sm:$0xff] %v10765_v34  ;;  %v10767_v35 = vpop.f32.mrb[2].mxu0 }
 0x1fd   : > { %14522 = vst [vmem:[#allocation26_spill] sm:$0xff] %v10767_v35  ;;  %v10769_v36 = vpop.f32.mrb[3].mxu0 }
 0x1fe   : > { %14523 = vst [vmem:[#allocation27_spill] sm:$0xff] %v10769_v36  ;;  %v1486_v37 = vadd.f32 %v10769_v36, %v10765_v34 }
 0x200   : > { %v1487_v38 = vadd.f32 %v10763_v33, %v1486_v37 }
 0x202   : > { %v10774_v39 = vpop.f32.mrb[4].mxu0  ;;  %v1488_v40 = vadd.f32 %v10767_v35, %v1487_v38 }
 0x203   : > { %14524 = vst [vmem:[#allocation28_spill] sm:$0xff] %v10774_v39  ;;  %v10777_v41 = vpop.f32.mrb[5].mxu0 }
 0x204   : > { %14525 = vst [vmem:[#allocation29_spill] sm:$0xff] %v10777_v41  ;;  %v1489_v42 = vadd.f32 %v1488_v40, %v10777_v41  ;;  %v10780_v43 = vpop.f32.mrb[6].mxu0 }
 0x205   : > { %14526 = vst [vmem:[#allocation30_spill] sm:$0xff] %v10780_v43  ;;  %v10782_v44 = vpop.f32.mrb[7].mxu0 }
 0x206   : > { %14527 = vst [vmem:[#allocation31_spill] sm:$0xff] %v10782_v44  ;;  %v1490_v45 = vadd.f32 %v1489_v42, %v10782_v44 }
 0x208   : > { %v1491_v46 = vadd.f32 %v10774_v39, %v1490_v45 }
 0x20a   : > { %v10786_v47 = vpop.f32.mrb[8].mxu0  ;;  %v1492_v48 = vadd.f32 %v10780_v43, %v1491_v46 }
 0x20b   : > { %14528 = vst [vmem:[#allocation32_spill] sm:$0xff] %v10786_v47  ;;  %v10789_v49 = vpop.f32.mrb[9].mxu0 }
 0x20c   : > { %14529 = vst [vmem:[#allocation33_spill] sm:$0xff] %v10789_v49  ;;  %v1493_v50 = vadd.f32 %v1492_v48, %v10789_v49  ;;  %v10792_v51 = vpop.f32.mrb[10].mxu0 }
 0x20d   : > { %14530 = vst [vmem:[#allocation34_spill] sm:$0xff] %v10792_v51  ;;  %v10794_v52 = vpop.f32.mrb[11].mxu0 }
 0x20e   : > { %14531 = vst [vmem:[#allocation35_spill] sm:$0xff] %v10794_v52  ;;  %v1494_v53 = vadd.f32 %v1493_v50, %v10794_v52  ;;  %v9526_v50 = vld [vmem:[#allocation8] sm:$0xff]  }
 0x210   : > { %v1495_v54 = vadd.f32 %v10786_v47, %v1494_v53 }
 0x212   : > { %v10798_v55 = vpop.f32.mrb[12].mxu0  ;;  %v1496_v56 = vadd.f32 %v10792_v51, %v1495_v54  ;;  %v9527_v54 = vld [vmem:[#allocation8 + $0x8] sm:$0xff]  }
 0x213   : > { %14532 = vst [vmem:[#allocation36_spill] sm:$0xff] %v10798_v55  ;;  %v10801_v57 = vpop.f32.mrb[13].mxu0 }
 0x214   : > { %14533 = vst [vmem:[#allocation37_spill] sm:$0xff] %v10801_v57  ;;  %v1497_v58 = vadd.f32 %v1496_v56, %v10801_v57  ;;  %v10804_v59 = vpop.f32.mrb[14].mxu0  ;;  %v9528_v56 = vld [vmem:[#allocation8 + $0x10] sm:$0xff]  }
 0x215   : > { %14534 = vst [vmem:[#allocation38_spill] sm:$0xff] %v10804_v59  ;;  %v10806_v60 = vpop.f32.mrb[15].mxu0 }
 0x216   : > { %14535 = vst [vmem:[#allocation39_spill] sm:$0xff] %v10806_v60  ;;  %v1498_v61 = vadd.f32 %v1497_v58, %v10806_v60  ;;  %v9529_v58 = vld [vmem:[#allocation8 + $0x18] sm:$0xff]  }
 0x218   : > { %v1499_v62 = vadd.f32 %v10798_v55, %v1498_v61  ;;  %v9530_v61 = vld [vmem:[#allocation8 + $0x20] sm:$0xff]  }
 0x21a   : > { %v10810_v63 = vpop.f32.mrb[16].mxu0  ;;  %v1500_v0 = vadd.f32 %v10804_v59, %v1499_v62  ;;  %v9531_v62 = vld [vmem:[#allocation8 + $0x28] sm:$0xff]  }
 0x21b   : > { %14536 = vst [vmem:[#allocation40_spill] sm:$0xff] %v10810_v63  ;;  %v10813_v1 = vpop.f32.mrb[17].mxu0 }
 0x21c   : > { %14537 = vst [vmem:[#allocation41_spill] sm:$0xff] %v10813_v1  ;;  %v1501_v2 = vadd.f32 %v1500_v0, %v10813_v1  ;;  %v10816_v3 = vpop.f32.mrb[18].mxu0  ;;  %v9532_v0 = vld [vmem:[#allocation8 + $0x30] sm:$0xff]  }
 0x21d   : > { %14538 = vst [vmem:[#allocation42_spill] sm:$0xff] %v10816_v3  ;;  %v10818_v4 = vpop.f32.mrb[19].mxu0 }
 0x21e   : > { %14539 = vst [vmem:[#allocation43_spill] sm:$0xff] %v10818_v4  ;;  %v1502_v5 = vadd.f32 %v1501_v2, %v10818_v4  ;;  %v9533_v2 = vld [vmem:[#allocation8 + $0x38] sm:$0xff]  }
 0x220   : > { %v1503_v6 = vadd.f32 %v10810_v63, %v1502_v5 }
 0x222   : > { %v10822_v7 = vpop.f32.mrb[20].mxu0  ;;  %v1504_v8 = vadd.f32 %v10816_v3, %v1503_v6 }
 0x223   : > { %14540 = vst [vmem:[#allocation44_spill] sm:$0xff] %v10822_v7  ;;  %v10825_v9 = vpop.f32.mrb[21].mxu0 }
 0x224   : > { %14541 = vst [vmem:[#allocation45_spill] sm:$0xff] %v10825_v9  ;;  %v1505_v10 = vadd.f32 %v1504_v8, %v10825_v9  ;;  %v10828_v11 = vpop.f32.mrb[22].mxu0 }
 0x225   : > { %14542 = vst [vmem:[#allocation46_spill] sm:$0xff] %v10828_v11  ;;  %v10830_v12 = vpop.f32.mrb[23].mxu0 }
 0x226   : > { %14543 = vst [vmem:[#allocation47_spill] sm:$0xff] %v10830_v12  ;;  %v1506_v13 = vadd.f32 %v1505_v10, %v10830_v12 }
 0x228   : > { %v1507_v14 = vadd.f32 %v10822_v7, %v1506_v13 }
 0x22a   : > { %v10834_v15 = vpop.f32.mrb[24].mxu0  ;;  %v1508_v16 = vadd.f32 %v10828_v11, %v1507_v14 }
 0x22b   : > { %14544 = vst [vmem:[#allocation48_spill] sm:$0xff] %v10834_v15  ;;  %v10837_v17 = vpop.f32.mrb[25].mxu0 }
 0x22c   : > { %14545 = vst [vmem:[#allocation49_spill] sm:$0xff] %v10837_v17  ;;  %v1509_v18 = vadd.f32 %v1508_v16, %v10837_v17  ;;  %v10840_v19 = vpop.f32.mrb[26].mxu0  ;;  %v9534_v16 = vld [vmem:[#allocation10 + $0x100] sm:$0xff]  }
 0x22d   : > { %14546 = vst [vmem:[#allocation50_spill] sm:$0xff] %v10840_v19  ;;  %v10842_v20 = vpop.f32.mrb[27].mxu0  ;;  %7744 = vmatprep.subr.bf16.mxu0 %v9534_v16 }
 0x22e   : > { %14547 = vst [vmem:[#allocation51_spill] sm:$0xff] %v10842_v20  ;;  %v1510_v21 = vadd.f32 %v1509_v18, %v10842_v20  ;;  %v9535_v18 = vld [vmem:[#allocation10 + $0xc0] sm:$0xff]  }
 0x22f   : > { %7745 = vmatpush3.bf16.msra.mxu0 %v9535_v18 }
 0x230   : > { %v1511_v22 = vadd.f32 %v10834_v15, %v1510_v21  ;;  %v9536_v21 = vld [vmem:[#allocation10 + $0x108] sm:$0xff]  }
 0x231   : > { %7746 = vmatprep.subr.bf16.mxu0 %v9536_v21 }
 0x232   : > { %v10846_v23 = vpop.f32.mrb[28].mxu0  ;;  %v1512_v24 = vadd.f32 %v10840_v19, %v1511_v22  ;;  %v9537_v22 = vld [vmem:[#allocation10 + $0xc8] sm:$0xff]  }
 0x233   : > { %14548 = vst [vmem:[#allocation52_spill] sm:$0xff] %v10846_v23  ;;  %v10849_v26 = vpop.f32.mrb[29].mxu0  ;;  %7747 = vmatpush3.bf16.msra.mxu0 %v9537_v22 }
 0x234   : > { %14549 = vst [vmem:[#allocation53_spill] sm:$0xff] %v10849_v26  ;;  %v1513_v27 = vadd.f32 %v1512_v24, %v10849_v26  ;;  %v10852_v28 = vpop.f32.mrb[30].mxu0  ;;  %v9538_v24 = vld [vmem:[#allocation10 + $0x110] sm:$0xff]  }
 0x235   : > { %14550 = vst [vmem:[#allocation54_spill] sm:$0xff] %v10852_v28  ;;  %v10854_v29 = vpop.f32.mrb[31].mxu0  ;;  %7748 = vmatprep.subr.bf16.mxu0 %v9538_v24 }
 0x236   : > { %14551 = vst [vmem:[#allocation55_spill] sm:$0xff] %v10854_v29  ;;  %v1514_v30 = vadd.f32 %v1513_v27, %v10854_v29  ;;  %v9539_v27 = vld [vmem:[#allocation10 + $0xd0] sm:$0xff]  }
 0x237   : > { %7749 = vmatpush3.bf16.msra.mxu0 %v9539_v27 }
 0x238   : > { %v1515_v31 = vadd.f32 %v10846_v23, %v1514_v30  ;;  %v9540_v30 = vld [vmem:[#allocation10 + $0x118] sm:$0xff]  }
 0x239   : > { %7750 = vmatprep.subr.bf16.mxu0 %v9540_v30 }
 0x23a   : > { %v1516_v32 = vadd.f32 %v10852_v28, %v1515_v31  ;;  %v9541_v31 = vld [vmem:[#allocation10 + $0xd8] sm:$0xff]  }
 0x23b   : > { %7751 = vmatpush3.bf16.msra.mxu0 %v9541_v31 }
 0x23c   : > { %v1517_v37 = vrot.slane %v1516_v32, 4 }
 0x23e   : > { %v1518_v38 = vadd.f32 %v1517_v37, %v1516_v32  ;;  %v9542_v32 = vld [vmem:[#allocation10 + $0x120] sm:$0xff]  }
 0x23f   : > { %v9543_v37 = vld [vmem:[#allocation10 + $0xe0] sm:$0xff]   ;;  %7752 = vmatprep.subr.bf16.mxu0 %v9542_v32 }
 0x240   : > { %v1519_v40 = vrot.slane %v1518_v38, 2  ;;  %7753 = vmatpush3.bf16.msra.mxu0 %v9543_v37 }
 0x242   : > { %v1520_v42 = vadd.f32 %v1519_v40, %v1518_v38  ;;  %v9544_v38 = vld [vmem:[#allocation10 + $0x128] sm:$0xff]  }
 0x243   : > { %v9545_v40 = vld [vmem:[#allocation10 + $0xe8] sm:$0xff]   ;;  %7754 = vmatprep.subr.bf16.mxu0 %v9544_v38 }
 0x244   : > { %v1521_v45 = vrot.slane %v1520_v42, 1  ;;  %7755 = vmatpush3.bf16.msra.mxu0 %v9545_v40 }
 0x246   : > { %v1522_v46 = vadd.f32 %v1521_v45, %v1520_v42  ;;  %v9546_v42 = vld [vmem:[#allocation10 + $0x130] sm:$0xff]  }
 0x247   : > { %v9547_v45 = vld [vmem:[#allocation10 + $0xf0] sm:$0xff]   ;;  %7756 = vmatprep.subr.bf16.mxu0 %v9546_v42 }
 0x248   : > { %v1524_v48 = vmul.f32 0.00390625, %v1522_v46  ;;  %v9548_v46 = vld [vmem:[#allocation10 + $0x138] sm:$0xff]   ;;  %7757 = vmatpush3.bf16.msra.mxu0 %v9547_v45 }
 0x249   : > { %7758 = vmatprep.subr.bf16.mxu0 %v9548_v46 }
 0x24a   : > { %v1525_v53 = vpack.c.bf16 %v1524_v48, %v1524_v48  ;;  %v9549_v48 = vld [vmem:[#allocation10 + $0xf8] sm:$0xff]  }
 0x24c   : > { %8652 = vmatmul.mubr.bf16.vlgmr.msra.gmra.mrb[0].mxu1 %v1525_v53  ;;  %7759 = vmatpush3.bf16.msra.mxu0 %v9549_v48 }
 0x24d   : > { %8656 = vmatpush3.bf16.msra.mxu1 %v9526_v50  ;;  %8671 = vmatprep.mubr.msk.bf16.mxu1 %vm14246_vm0, %v14168_v25  ;;  %v10868_v50 = vld [vmem:[#allocation10 + $0x140] sm:$0xff]  }
 0x24e   : > { %8657 = vmatprep.subr.bf16.mxu1 %v14168_v25  ;;  %14552 = vst [vmem:[#allocation56_spill] sm:$0xff] %v10868_v50 }
 0x251   : > { %8658 = vmatpush3.bf16.msra.mxu1 %v9527_v54 }
 0x252   : > { %8659 = vmatprep.subr.bf16.mxu1 %v14168_v25 }
 0x255   : > { %8660 = vmatpush3.bf16.msra.mxu1 %v9528_v56 }
 0x256   : > { %8661 = vmatprep.subr.bf16.mxu1 %v14168_v25 }
 0x259   : > { %8662 = vmatpush3.bf16.msra.mxu1 %v9529_v58 }
 0x25a   : > { %8663 = vmatprep.subr.bf16.mxu1 %v14168_v25 }
 0x25d   : > { %8664 = vmatpush3.bf16.msra.mxu1 %v9530_v61 }
 0x25e   : > { %8665 = vmatprep.subr.bf16.mxu1 %v14168_v25 }
 0x261   : > { %8666 = vmatpush3.bf16.msra.mxu1 %v9531_v62 }
 0x262   : > { %8667 = vmatprep.subr.bf16.mxu1 %v14168_v25 }
 0x265   : > { %8668 = vmatpush3.bf16.msra.mxu1 %v9532_v0 }
 0x266   : > { %8669 = vmatprep.subr.bf16.mxu1 %v14168_v25  ;;  %v1767_v25 = vadd.f32 1.0, %v10842_v20 }
 0x269   : > { %8670 = vmatpush3.bf16.msra.mxu1 %v9533_v2  ;;  %v592_v2 = vlaneseq }
 0x26a   : > { %9023 = vmatprep.subr.bf16.mxu1 %v9534_v16  ;;  %v1746_v16 = vadd.f32 1.0, %v10777_v41 }
 0x31f   : > { %v1624_v5 = vpop.f32.mrb[0].mxu1 }
 0x320   : > { %v1630_v6 = vmax.f32 %v1624_v5, 0.0  ;;  %v8653_v8 = vpop.f32.mrb[1].mxu1  ;;  %v10871_v5 = vshrl.u32 %v592_v2, 7  ;;  %v1769_v2 = vadd.f32 1.0, %v10840_v19 }
 0x321   : > { %v1627_v10 = vpop.f32.mrb[2].mxu1  ;;  %v1742_v8 = vadd.f32 1.0, %v10765_v34 }
 0x322   : > { %v1631_v13 = vpack.c.bf16 %v1630_v6, %v1630_v6  ;;  %v8654_v14 = vpop.f32.mrb[3].mxu1  ;;  %v1744_v6 = vadd.f32 1.0, %v10763_v33  ;;  %v1745_v10 = vadd.f32 1.0, %v10767_v35 }
 0x323   : > { %v1748_v14 = vadd.f32 1.0, %v10774_v39 }
 0x324   : > { %8672 = vmatmul.mubr.bf16.vlgmr.msra.gmra.mrb[4].mxu1 %v1631_v13  ;;  %v1743_v13 = vadd.f32 1.0, %v10769_v36 }
 0x325   : > { %9031 = vmatpush3.bf16.msra.mxu1 %v9535_v18  ;;  %v1749_v18 = vadd.f32 1.0, %v10780_v43  ;;  %v615_v43 = vadd.s32 176, %v10871_v5 }
 0x326   : > { %9024 = vmatprep.subr.bf16.mxu1 %v9536_v21  ;;  %v1747_v21 = vadd.f32 1.0, %v10782_v44 }
 0x329   : > { %9032 = vmatpush3.bf16.msra.mxu1 %v9537_v22  ;;  %v1752_v22 = vadd.f32 1.0, %v10786_v47 }
 0x32a   : > { %9025 = vmatprep.subr.bf16.mxu1 %v9538_v24  ;;  %v1750_v24 = vadd.f32 1.0, %v10789_v49 }
 0x32d   : > { %9033 = vmatpush3.bf16.msra.mxu1 %v9539_v27  ;;  %v1753_v27 = vadd.f32 1.0, %v10792_v51 }
 0x32e   : > { %9026 = vmatprep.subr.bf16.mxu1 %v9540_v30  ;;  %v1751_v30 = vadd.f32 1.0, %v10794_v52 }
 0x331   : > { %9034 = vmatpush3.bf16.msra.mxu1 %v9541_v31  ;;  %v1756_v31 = vadd.f32 1.0, %v10798_v55 }
 0x332   : > { %9027 = vmatprep.subr.bf16.mxu1 %v9542_v32  ;;  %v10887_v32 = vsub.s32 0, %v10871_v5 }
 0x334   : > { %14553 = vst [vmem:[#allocation57_spill] sm:$0xff] %v10887_v32 }
 0x335   : > { %9035 = vmatpush3.bf16.msra.mxu1 %v9543_v37  ;;  %v1754_v37 = vadd.f32 1.0, %v10801_v57 }
 0x336   : > { %9028 = vmatprep.subr.bf16.mxu1 %v9544_v38  ;;  %v1757_v38 = vadd.f32 1.0, %v10804_v59 }
 0x339   : > { %9036 = vmatpush3.bf16.msra.mxu1 %v9545_v40  ;;  %v1755_v40 = vadd.f32 1.0, %v10806_v60 }
 0x33a   : > { %9029 = vmatprep.subr.bf16.mxu1 %v9546_v42  ;;  %v1760_v42 = vadd.f32 1.0, %v10810_v63 }
 0x33d   : > { %9037 = vmatpush3.bf16.msra.mxu1 %v9547_v45  ;;  %v1758_v45 = vadd.f32 1.0, %v10813_v1 }
 0x33e   : > { %9030 = vmatprep.subr.bf16.mxu1 %v9548_v46  ;;  %v1761_v46 = vadd.f32 1.0, %v10816_v3 }
 0x341   : > { %9038 = vmatpush3.bf16.msra.mxu1 %v9549_v48  ;;  %v1759_v48 = vadd.f32 1.0, %v10818_v4  ;;  %v1772_v4 = vadd.f32 1.0, %v10846_v23 }
 0x342   : > { %8675 = vmatprep.subr.bf16.mxu1 %v10868_v50 }
 0x3f7   : > { %v1730_v53 = vpop.f32.mrb[4].mxu1 }
 0x3f8   : > { %v7231_v54 = vmul.f32 -1.442695, %v1730_v53  ;;  %v8673_v56 = vpop.f32.mrb[5].mxu1  ;;  %v1764_v53 = vadd.f32 1.0, %v10822_v7  ;;  %v1770_v7 = vadd.f32 1.0, %v10849_v26 }
 0x3f9   : > { %v1733_v58 = vpop.f32.mrb[6].mxu1  ;;  %v1762_v56 = vadd.f32 1.0, %v10825_v9  ;;  %v1773_v9 = vadd.f32 1.0, %v10852_v28 }
 0x3fa   : > { %9702 = vpow2.f32 %v7231_v54  ;;  %v8674_v61 = vpop.f32.mrb[7].mxu1  ;;  %v1765_v58 = vadd.f32 1.0, %v10828_v11  ;;  %v1771_v11 = vadd.f32 1.0, %v10854_v29 }
 0x3fb   : > { %v1763_v61 = vadd.f32 1.0, %v10830_v12 }
 0x404   : > { %v9703_v62 = vpop.eup %9702 }
 0x405   : > { %v1739_v0 = vadd.f32 1.0, %v9703_v62  ;;  %v1768_v62 = vadd.f32 1.0, %v10834_v15 }
 0x407   : > { %9704 = vrcp.f32 %v1739_v0  ;;  %v1766_v0 = vadd.f32 1.0, %v10837_v17 }
 0x411   : > { %v9705_v54 = vpop.eup %9704 }
 0x412   : > { %v1777_v3 = vrot.slane %v9705_v54, %v10887_v32  ;;  %v787_v32 = vand.u32 15, %v615_v43 }
 0x414   : > { %v10909_v1 = vmul.f32 %v1777_v3, %v1742_v8  ;;  %v10911_v12 = vmul.f32 %v1777_v3, %v1743_v13  ;;  %v10913_v15 = vmul.f32 %v1777_v3, %v1744_v6  ;;  %v10915_v17 = vmul.f32 %v1777_v3, %v1745_v10 }
 0x415   : > { %v10917_v19 = vmul.f32 %v1777_v3, %v1746_v16  ;;  %v10919_v20 = vmul.f32 %v1777_v3, %v1747_v21  ;;  %v10921_v54 = vmul.f32 %v1777_v3, %v1748_v14  ;;  %v10923_v23 = vmul.f32 %v1777_v3, %v1749_v18 }
 0x416   : > { %v10925_v26 = vmul.f32 %v1777_v3, %v1750_v24  ;;  %v10927_v28 = vmul.f32 %v1777_v3, %v1751_v30  ;;  %v10929_v8 = vmul.f32 %v1777_v3, %v1752_v22  ;;  %v10931_v13 = vmul.f32 %v1777_v3, %v1753_v27 }
 0x417   : > { %v10933_v6 = vmul.f32 %v1777_v3, %v1754_v37  ;;  %v10935_v10 = vmul.f32 %v1777_v3, %v1755_v40  ;;  %v10937_v16 = vmul.f32 %v1777_v3, %v1756_v31  ;;  %v10939_v21 = vmul.f32 %v1777_v3, %v1757_v38 }
 0x418   : > { %v10941_v14 = vmul.f32 %v1777_v3, %v1758_v45  ;;  %v10943_v18 = vmul.f32 %v1777_v3, %v1759_v48  ;;  %v10945_v24 = vmul.f32 %v1777_v3, %v1760_v42  ;;  %v10947_v30 = vmul.f32 %v1777_v3, %v1761_v46  ;;  %v9560_v42 = vld [vmem:[#allocation10 + $0x1c0] sm:$0xff]  }
 0x419   : > { %v10949_v22 = vmul.f32 %v1777_v3, %v1762_v56  ;;  %v10951_v27 = vmul.f32 %v1777_v3, %v1763_v61  ;;  %v10953_v37 = vmul.f32 %v1777_v3, %v1764_v53  ;;  %v10955_v40 = vmul.f32 %v1777_v3, %v1765_v58  ;;  %8016 = vmatprep.subr.bf16.mxu0 %v9560_v42 }
 0x41a   : > { %v10957_v31 = vmul.f32 %v1777_v3, %v1766_v0  ;;  %v10959_v38 = vmul.f32 %v1777_v3, %v1767_v25  ;;  %v10961_v45 = vmul.f32 %v1777_v3, %v1768_v62  ;;  %v10963_v48 = vmul.f32 %v1777_v3, %v1769_v2 }
 0x41b   : > { %14554 = vst [vmem:[#allocation58_spill] sm:$0xff] %v10953_v37  ;;  %14555 = vst [vmem:[#allocation59_spill] sm:$0xff] %v10955_v40  ;;  %v10965_v29 = vmul.f32 %v1777_v3, %v1770_v7  ;;  %v10967_v46 = vmul.f32 %v1777_v3, %v1771_v11  ;;  %v10969_v56 = vmul.f32 %v1777_v3, %v1772_v4  ;;  %v7232_v53 = vmul.f32 -1.442695, %v10909_v1 }
 0x41c   : > { %14556 = vst [vmem:[#allocation60_spill] sm:$0xff] %v10957_v31  ;;  %14557 = vst [vmem:[#allocation61_spill] sm:$0xff] %v10959_v38  ;;  %v10971_v61 = vmul.f32 %v1777_v3, %v1773_v9  ;;  %v7233_v58 = vmul.f32 -1.442695, %v10911_v12  ;;  %v7234_v25 = vmul.f32 -1.442695, %v10913_v15 }
 0x41d   : > { %14558 = vst [vmem:[#allocation62_spill] sm:$0xff] %v10961_v45  ;;  %14559 = vst [vmem:[#allocation63_spill] sm:$0xff] %v10963_v48  ;;  %v7235_v62 = vmul.f32 -1.442695, %v10915_v17  ;;  %v7236_v0 = vmul.f32 -1.442695, %v10917_v19  ;;  %9706 = vpow2.f32 %v7232_v53 }
 0x41e   : > { %14560 = vst [vmem:[#allocation64_spill] sm:$0xff] %v10965_v29  ;;  %14561 = vst [vmem:[#allocation65_spill] sm:$0xff] %v10967_v46  ;;  %v7237_v7 = vmul.f32 -1.442695, %v10919_v20  ;;  %9708 = vpow2.f32 %v7233_v58  ;;  %v7238_v4 = vmul.f32 -1.442695, %v10921_v54 }
 0x41f   : > { %14562 = vst [vmem:[#allocation66_spill] sm:$0xff] %v10969_v56  ;;  %14563 = vst [vmem:[#allocation67_spill] sm:$0xff] %v10971_v61  ;;  %9710 = vpow2.f32 %v7234_v25  ;;  %v7239_v3 = vmul.f32 -1.442695, %v10923_v23  ;;  %v7240_v9 = vmul.f32 -1.442695, %v10925_v26 }
 0x420   : > { %9712 = vpow2.f32 %v7235_v62  ;;  %v7241_v11 = vmul.f32 -1.442695, %v10927_v28  ;;  %v7242_v2 = vmul.f32 -1.442695, %v10929_v8  ;;  %v7243_v42 = vmul.f32 -1.442695, %v10931_v13 }
 0x421   : > { %9714 = vpow2.f32 %v7236_v0  ;;  %v7244_v53 = vmul.f32 -1.442695, %v10933_v6  ;;  %v7245_v58 = vmul.f32 -1.442695, %v10935_v10  ;;  %v7246_v62 = vmul.f32 -1.442695, %v10937_v16 }
 0x422   : > { %9716 = vpow2.f32 %v7237_v7  ;;  %v7247_v63 = vmul.f32 -1.442695, %v10939_v21  ;;  %v7251_v59 = vmul.f32 -1.442695, %v10947_v30  ;;  %v7252_v57 = vmul.f32 -1.442695, %v10949_v22 }
 0x423   : > { %9718 = vpow2.f32 %v7238_v4  ;;  %v7248_v4 = vmul.f32 -1.442695, %v10941_v14  ;;  %v7253_v55 = vmul.f32 -1.442695, %v10951_v27  ;;  %v7254_v52 = vmul.f32 -1.442695, %v10953_v37 }
 0x424   : > { %9720 = vpow2.f32 %v7239_v3  ;;  %v7255_v51 = vmul.f32 -1.442695, %v10955_v40  ;;  %v7256_v49 = vmul.f32 -1.442695, %v10957_v31  ;;  %v7257_v47 = vmul.f32 -1.442695, %v10959_v38 }
 0x425   : > { %9722 = vpow2.f32 %v7240_v9  ;;  %v7249_v9 = vmul.f32 -1.442695, %v10943_v18  ;;  %v7259_v41 = vmul.f32 -1.442695, %v10963_v48  ;;  %v7260_v39 = vmul.f32 -1.442695, %v10965_v29 }
 0x426   : > { %9724 = vpow2.f32 %v7241_v11  ;;  %v7250_v11 = vmul.f32 -1.442695, %v10945_v24  ;;  %v7261_v35 = vmul.f32 -1.442695, %v10967_v46  ;;  %v7262_v33 = vmul.f32 -1.442695, %v10969_v56 }
 0x427   : > { %v9707_v25 = vpop.eup %9706  ;;  %9726 = vpow2.f32 %v7242_v2  ;;  %v7263_v50 = vmul.f32 -1.442695, %v10971_v61  ;;  %vm11052_vm2 = vcmp.ge.s32.totalorder %v787_v32, 1  ;;  %v11130_v38 = vadd.s32 208, %v10871_v5 }
 0x428   : > { %v9709_v0 = vpop.eup %9708  ;;  %9728 = vpow2.f32 %v7243_v42  ;;  %v1906_v48 = vadd.f32 1.0, %v9707_v25  ;;  %vm2302_vm7 = vmpackc.low %vm11052_vm2, %vm11052_vm2 }
 0x429   : > { %v10989_v7 = vpop.eup %9710  ;;  %9730 = vpow2.f32 %v7244_v53 }
 0x42a   : > { %v10992_v3 = vpop.eup %9712  ;;  %9732 = vpow2.f32 %v7245_v58 }
 0x42b   : > { %v10995_v60 = vpop.eup %9714  ;;  %9734 = vpow2.f32 %v7246_v62  ;;  %v1909_v25 = vadd.f32 1.0, %v10992_v3 }
 0x42c   : > { %v10998_v2 = vpop.eup %9716  ;;  %9736 = vpow2.f32 %v7247_v63 }
 0x42d   : > { %v11001_v42 = vpop.eup %9718  ;;  %9738 = vpow2.f32 %v7248_v4 }
 0x42e   : > { %v11004_v53 = vpop.eup %9720  ;;  %9740 = vpow2.f32 %v7249_v9  ;;  %v595_v9 = vadd.s32 16, %v10871_v5 }
 0x42f   : > { %v11007_v58 = vpop.eup %9722  ;;  %9742 = vpow2.f32 %v7250_v11  ;;  %v7258_v11 = vmul.f32 -1.442695, %v10961_v45  ;;  %v1913_v3 = vadd.f32 1.0, %v11004_v53  ;;  %v11099_v53 = vadd.s32 192, %v10871_v5 }
 0x430   : > { %v11010_v62 = vpop.eup %9724  ;;  %9744 = vpow2.f32 %v7251_v59 }
 0x431   : > { %v11013_v63 = vpop.eup %9726  ;;  %9746 = vpow2.f32 %v7252_v57  ;;  %v801_v45 = vand.u32 15, %v11099_v53 }
 0x432   : > { %v11016_v4 = vpop.eup %9728  ;;  %9748 = vpow2.f32 %v7253_v55  ;;  %v597_v55 = vadd.s32 32, %v10871_v5 }
 0x433   : > { %v11020_v44 = vpop.eup %9730  ;;  %9750 = vpow2.f32 %v7254_v52  ;;  %v647_v52 = vand.u32 15, %v595_v9  ;;  %v1907_v9 = vadd.f32 1.0, %v9709_v0  ;;  %vm11176_vm13 = vcmp.ge.s32.totalorder %v801_v45, 1 }
 0x434   : > { %v11024_v59 = vpop.eup %9732  ;;  %9752 = vpow2.f32 %v7255_v51  ;;  %v661_v46 = vand.u32 15, %v597_v55  ;;  %v1910_v55 = vadd.f32 1.0, %v10995_v60  ;;  %v1912_v60 = vadd.f32 1.0, %v11001_v42 }
 0x435   : > { %v11027_v57 = vpop.eup %9734  ;;  %9754 = vpow2.f32 %v7256_v49  ;;  %v599_v49 = vadd.s32 48, %v10871_v5  ;;  %vm11045_vm1 = vcmp.ge.s32.totalorder %v647_v52, 1 }
 0x436   : > { %v11031_v36 = vpop.eup %9736  ;;  %9756 = vpow2.f32 %v7257_v47  ;;  %vm2282_vm5 = vmpackc.low %vm11045_vm1, %vm11045_vm1  ;;  %vm11065_vm6 = vcmp.ge.s32.totalorder %v661_v46, 1  ;;  %v1920_v53 = vadd.f32 1.0, %v11027_v57 }
 0x437   : > { %v11034_v34 = vpop.eup %9738  ;;  %9758 = vpow2.f32 %v7258_v11  ;;  %vm2284_vm8 = vmpackc.low %vm11065_vm6, %vm11065_vm6  ;;  %v1915_v11 = vadd.f32 1.0, %v11010_v62 }
 0x438   : > { %v11037_v51 = vpop.eup %9740  ;;  %9760 = vpow2.f32 %v7259_v41  ;;  %v1908_v41 = vadd.f32 1.0, %v10989_v7  ;;  %v1922_v40 = vadd.f32 1.0, %v11034_v34  ;;  %vm2304_vm1 = vmpackc.low %vm11176_vm13, %vm11176_vm13 }
 0x439   : > { %v11041_v29 = vpop.eup %9742  ;;  %9762 = vpow2.f32 %v7260_v39 }
 0x43a   : > { %v11043_v47 = vpop.eup %9744  ;;  %9764 = vpow2.f32 %v7261_v35  ;;  %v675_v35 = vand.u32 15, %v599_v49  ;;  %v1914_v49 = vadd.f32 1.0, %v11007_v58 }
 0x43b   : > { %v11049_v43 = vpop.eup %9746  ;;  %9766 = vpow2.f32 %v7262_v33  ;;  %v1916_v33 = vadd.f32 1.0, %v11013_v63  ;;  %v1921_v63 = vadd.f32 1.0, %v11031_v36  ;;  %v14575_v36 = vmov 0 }
 0x43c   : > { %v11056_v39 = vpop.eup %9748  ;;  %9768 = vpow2.f32 %v7263_v50  ;;  %v1911_v50 = vadd.f32 1.0, %v10998_v2  ;;  %vm11088_vm9 = vcmp.ge.s32.totalorder %v675_v35, 1  ;;  %v1926_v34 = vadd.f32 1.0, %v11049_v43 }
 0x43d   : > { %v11059_v0 = vpop.eup %9750  ;;  %9770 = vrcp.f32 %v1906_v48  ;;  %v14210_v48 = vmov 0   ;;  %vm2286_vm10 = vmpackc.low %vm11088_vm9, %vm11088_vm9 }
 0x43e   : > { %v11069_v32 = vpop.eup %9752  ;;  %9772 = vrcp.f32 %v1907_v9  ;;  %v11079_v46 = vsel %vm2281_vm4, 65537, %v14210_v48  ;;  %v2318_v2 = vsel %vm2282_vm5, 65537, %v14210_v48  ;;  %v11096_v9 = vsel %vm2302_vm7, 65537, %v14210_v48 }
 0x43f   : > { %v11075_v7 = vpop.eup %9754  ;;  %9774 = vrcp.f32 %v1908_v41  ;;  %14572 = vst [vmem:[#allocation68_spill] sm:$0xff] %v11096_v9  ;;  %v11111_v58 = vsel %vm2284_vm8, 65537, %v14210_v48  ;;  %v7265_v61 = vcombine.low %v2318_v2, %v11079_v46  ;;  %v14574_v2 = vmov 0  }
 0x440   : > { %v11081_v56 = vpop.eup %9756  ;;  %9776 = vrcp.f32 %v1909_v25  ;;  %v11105_v25 = vrot.slane %v14210_v48, 7  ;;  %v1918_v48 = vadd.f32 1.0, %v11020_v44  ;;  %v11143_v44 = vsel %vm2286_vm10, 65537, %v14574_v2 }
 0x441   : > { %v11092_v42 = vpop.eup %9758  ;;  %9778 = vrcp.f32 %v1910_v55  ;;  %v11117_v55 = vadd.s32 64, %v10871_v5  ;;  %v1924_v2 = vadd.f32 1.0, %v11041_v29  ;;  %v1925_v9 = vadd.f32 1.0, %v11043_v47 }
 0x442   : > { %v11101_v41 = vpop.eup %9760  ;;  %9780 = vrcp.f32 %v1911_v50  ;;  %14573 = vst [vmem:[#allocation69_spill] sm:$0xff] %v11105_v25  ;;  %v1917_v50 = vadd.f32 1.0, %v11016_v4  ;;  %v1919_v4 = vadd.f32 1.0, %v11024_v59  ;;  %vm11154_vm11 = vcmp.ne.s16.totalorder %v7265_v61, 0 }
 0x443   : > { %v11107_v35 = vpop.eup %9762  ;;  %9782 = vrcp.f32 %v1912_v60  ;;  %v689_v59 = vand.u32 15, %v11117_v55  ;;  %v14576_v36 = vsel %vm11154_vm11, 4294967295, %v14575_v36  ;;  %v1928_v29 = vadd.f32 1.0, %v11059_v0 }
 0x444   : > { %v11119_v62 = vpop.eup %9764  ;;  %9784 = vrcp.f32 %v1913_v3  ;;  %v1923_v3 = vadd.f32 1.0, %v11037_v51  ;;  %14577 = vst [vmem:[#allocation70_spill] sm:$0xff] %v14576_v36  ;;  %v1927_v51 = vadd.f32 1.0, %v11056_v39  ;;  %v1932_v45 = vadd.f32 1.0, %v11092_v42 }
 0x445   : > { %v11125_v60 = vpop.eup %9766  ;;  %9786 = vrcp.f32 %v1914_v49  ;;  %vm11187_vm14 = vcmp.ge.s32.totalorder %v689_v59, 1 }
 0x446   : > { %v11132_v31 = vpop.eup %9768  ;;  %9788 = vrcp.f32 %v1915_v11  ;;  %vm2288_vm2 = vmpackc.low %vm11187_vm14, %vm11187_vm14 }
 0x447   : > { %v9771_v49 = vpop.eup %9770  ;;  %9790 = vrcp.f32 %v1916_v33 }
 0x448   : > { %v9773_v11 = vpop.eup %9772  ;;  %9792 = vrcp.f32 %v1917_v50  ;;  %v2002_v37 = vmul.f32 %v9771_v49, %v10909_v1  ;;  %v1930_v50 = vadd.f32 1.0, %v11075_v7 }
 0x449   : > { %v9775_v52 = vpop.eup %9774  ;;  %9794 = vrcp.f32 %v1918_v48  ;;  %v2003_v57 = vmul.f32 %v9773_v11, %v10911_v12  ;;  %v1929_v48 = vadd.f32 1.0, %v11069_v32 }
 0x44a   : > { %v9777_v33 = vpop.eup %9776  ;;  %9796 = vrcp.f32 %v1919_v4  ;;  %v2004_v1 = vmul.f32 %v9775_v52, %v10913_v15  ;;  %v9561_v52 = vld [vmem:[#allocation10 + $0x180] sm:$0xff]  }
 0x44b   : > { %v9779_v55 = vpop.eup %9778  ;;  %9798 = vrcp.f32 %v1920_v53  ;;  %v2005_v47 = vmul.f32 %v9777_v33, %v10915_v17  ;;  %v11163_v12 = vpack.c.bf16 %v2003_v57, %v2002_v37  ;;  %v1931_v37 = vadd.f32 1.0, %v11081_v56  ;;  %v9572_v56 = vld [vmem:[#allocation10 + $0x1e0] sm:$0xff]  }
 0x44c   : > { %v9781_v61 = vpop.eup %9780  ;;  %9800 = vrcp.f32 %v1921_v63  ;;  %v2006_v43 = vmul.f32 %v9779_v55, %v10917_v19  ;;  %v1933_v33 = vadd.f32 1.0, %v11101_v41  ;;  %v1934_v41 = vadd.f32 1.0, %v11107_v35  ;;  %v9563_v35 = vld [vmem:[#allocation10 + $0x188] sm:$0xff]  }
 0x44d   : > { %v9783_v39 = vpop.eup %9782  ;;  %9802 = vrcp.f32 %v1922_v40  ;;  %v2007_v15 = vmul.f32 %v9781_v61, %v10919_v20  ;;  %v11169_v4 = vpack.c.bf16 %v2005_v47, %v2004_v1  ;;  %v14226_v0 = vshrl.u32 %v11163_v12, 16  ;;  %3022 = vmatprep.mubr.bf16.mxu0 %v11163_v12 }
 0x44e   : > { %v9785_v17 = vpop.eup %9784  ;;  %9804 = vrcp.f32 %v1923_v3  ;;  %v2008_v32 = vmul.f32 %v9783_v39, %v10921_v54  ;;  %v14228_v7 = vshll.u32 %v11163_v12, 16 }
 0x44f   : > { %v9787_v40 = vpop.eup %9786  ;;  %9806 = vrcp.f32 %v1924_v2  ;;  %v2009_v20 = vmul.f32 %v9785_v17, %v10923_v23  ;;  %v11181_v63 = vpack.c.bf16 %v2007_v15, %v2006_v43  ;;  %v11185_v49 = vrot.slane %v14226_v0, 7 }
 0x450   : > { %v9789_v54 = vpop.eup %9788  ;;  %9808 = vrcp.f32 %v1925_v9  ;;  %v2010_v3 = vmul.f32 %v9787_v40, %v10925_v26  ;;  %v14222_v2 = vshrl.u32 %v11169_v4, 16  ;;  %v9562_v9 = vld [vmem:[#allocation10 + $0x1c8] sm:$0xff]   ;;  %v14224_v43 = vshll.u32 %v11169_v4, 16 }
 0x451   : > { %v9791_v53 = vpop.eup %9790  ;;  %9810 = vrcp.f32 %v1926_v34  ;;  %v2011_v23 = vmul.f32 %v9789_v54, %v10927_v28  ;;  %v11195_v11 = vpack.c.bf16 %v2009_v20, %v2008_v32  ;;  %v2064_v59 = vor.u32 %v14228_v7, %v11185_v49 }
 0x452   : > { %v9793_v57 = vpop.eup %9792  ;;  %9812 = vrcp.f32 %v1927_v51  ;;  %v2012_v42 = vmul.f32 %v9791_v53, %v10929_v8  ;;  %v11204_v26 = vrot.slane %v14222_v2, 7  ;;  %v1935_v8 = vadd.f32 1.0, %v11119_v62  ;;  %v9568_v53 = vld [vmem:[#allocation10 + $0x1d8] sm:$0xff]  }
 0x453   : > { %v9795_v34 = vpop.eup %9794  ;;  %9814 = vrcp.f32 %v1928_v29  ;;  %v2013_v28 = vmul.f32 %v9793_v57, %v10931_v13  ;;  %v11207_v1 = vpack.c.bf16 %v2011_v23, %v2010_v3  ;;  %v11211_v55 = vsel %vm14249_vm12, %v11105_v25, %v2064_v59 }
 0x454   : > { %v9797_v47 = vpop.eup %9796  ;;  %9816 = vrcp.f32 %v1929_v48  ;;  %v2014_v51 = vmul.f32 %v9795_v34, %v10933_v6  ;;  %7324 = vmatmul.mubr.msk.bf16.vlgmr.msra.gmra.mrb[32].mxu0 %vm11154_vm11, %v11211_v55  ;;  %v1936_v48 = vadd.f32 1.0, %v11125_v60  ;;  %v14221_v39 = vshrl.u32 %v11181_v63, 16 }
 0x455   : > { %v9799_v29 = vpop.eup %9798  ;;  %9818 = vrcp.f32 %v1930_v50  ;;  %v2015_v13 = vmul.f32 %v9797_v47, %v10935_v10  ;;  %v11220_v61 = vpack.c.bf16 %v2013_v28, %v2012_v42  ;;  %3030 = vmatprep.mubr.bf16.mxu0 %v11169_v4  ;;  %8017 = vmatpush3.bf16.msra.mxu0 %v9561_v52  ;;  %v9566_v50 = vld [vmem:[#allocation10 + $0x1d0] sm:$0xff]   ;;  %v2072_v32 = vor.u32 %v14224_v43, %v11204_v26  ;;  %v14586_v28 = vld [vmem:[#allocation68_spill] sm:$0xff]  ;;  %v9581_v43 = vld [vmem:[#allocation10 + $0x1b8] sm:$0xff]  }
 0x456   : > { %v9801_v62 = vpop.eup %9800  ;;  %9820 = vrcp.f32 %v1931_v37  ;;  %v2016_v6 = vmul.f32 %v9799_v29, %v10937_v16  ;;  %8018 = vmatprep.subr.bf16.mxu0 %v9562_v9  ;;  %v1937_v60 = vadd.f32 1.0, %v11132_v31  ;;  %v815_v37 = vand.u32 15, %v11130_v38  ;;  %v14592_v29 = vld [vmem:[#allocation58_spill] sm:$0xff] }
 0x457   : > { %v9803_v15 = vpop.eup %9802  ;;  %9822 = vrcp.f32 %v1932_v45  ;;  %v2017_v10 = vmul.f32 %v9801_v62, %v10939_v21  ;;  %v11228_v17 = vpack.c.bf16 %v2015_v13, %v2014_v51  ;;  %v14582_v21 = vcombine.low %v11111_v58, %v11079_v46 }
 0x458   : > { %v9805_v40 = vpop.eup %9804  ;;  %9824 = vrcp.f32 %v1933_v33  ;;  %v2018_v16 = vmul.f32 %v9803_v15, %v10941_v14  ;;  %v14583_v3 = vmov 0  ;;  %v9567_v14 = vld [vmem:[#allocation10 + $0x190] sm:$0xff]   ;;  %v7267_v58 = vcombine.low %v11143_v44, %v11079_v46 }
 0x459   : > { %v9807_v20 = vpop.eup %9806  ;;  %9826 = vrcp.f32 %v1934_v41  ;;  %v2019_v54 = vmul.f32 %v9805_v40, %v10943_v18  ;;  %v11237_v45 = vpack.c.bf16 %v2017_v10, %v2016_v6  ;;  %vm11242_vm15 = vcmp.ne.s16.totalorder %v14582_v21, 0  ;;  %8019 = vmatpush3.bf16.msra.mxu0 %v9563_v35  ;;  %v14595_v6 = vld [vmem:[#allocation59_spill] sm:$0xff] }
 0x45a   : > { %v14584_v3 = vsel %vm11242_vm15, 4294967295, %v14583_v3  ;;  %v9809_v31 = vpop.eup %9808  ;;  %9828 = vrcp.f32 %v1935_v8  ;;  %v2020_v38 = vmul.f32 %v9807_v20, %v10945_v24  ;;  %v11252_v18 = vrot.slane %v14221_v39, 7  ;;  %8020 = vmatprep.subr.bf16.mxu0 %v9566_v50  ;;  %v9569_v8 = vld [vmem:[#allocation10 + $0x198] sm:$0xff]  }
 0x45b   : > { %14585 = vst [vmem:[#allocation71_spill] sm:$0xff] %v14584_v3  ;;  %v9811_v23 = vpop.eup %9810  ;;  %9830 = vrcp.f32 %v1936_v48  ;;  %v2021_v59 = vmul.f32 %v9809_v31, %v10947_v30  ;;  %v11260_v52 = vpack.c.bf16 %v2019_v54, %v2018_v16  ;;  %v11264_v24 = vsel %vm14249_vm12, %v11185_v49, %v2072_v32 }
 0x45c   : > { %v9813_v57 = vpop.eup %9812  ;;  %9832 = vrcp.f32 %v1937_v60  ;;  %v2022_v44 = vmul.f32 %v9811_v23, %v10949_v22  ;;  %7325 = vmatmul.mubr.msk.bf16.gmra.mrb[36].mxu0 %vm11242_vm15, %v11264_v24  ;;  %v14223_v33 = vshll.u32 %v11181_v63, 16  ;;  %v603_v42 = vadd.s32 80, %v10871_v5  ;;  %v14599_v60 = vld [vmem:[#allocation60_spill] sm:$0xff] }
 0x45d   : > { %v9815_v9 = vpop.eup %9814  ;;  %v2023_v30 = vmul.f32 %v9813_v57, %v10951_v27  ;;  %v11273_v34 = vpack.c.bf16 %v2021_v59, %v2020_v38  ;;  %v14587_v49 = vcombine.low %v14586_v28, %v11079_v46  ;;  %v14588_v47 = vmov 0  ;;  %3038 = vmatprep.mubr.bf16.mxu0 %v11181_v63  ;;  %8021 = vmatpush3.bf16.msra.mxu0 %v9567_v14  ;;  %v14600_v14 = vld [vmem:[#allocation61_spill] sm:$0xff]  ;;  %v9573_v23 = vld [vmem:[#allocation10 + $0x1a0] sm:$0xff]   ;;  %v14602_v57 = vld [vmem:[#allocation62_spill] sm:$0xff] }
 0x45e   : > { %v14591_v22 = vmov 0   ;;  %v9817_v51 = vpop.eup %9816  ;;  %v2024_v13 = vmul.f32 %v9815_v9, %v14592_v29  ;;  %v2080_v19 = vor.u32 %v14223_v33, %v11252_v18  ;;  %vm11303_vm4 = vcmp.ge.s32.totalorder %v815_v37, 1  ;;  %8022 = vmatprep.subr.bf16.mxu0 %v9568_v53  ;;  %v9574_v28 = vld [vmem:[#allocation10 + $0x1e8] sm:$0xff]  }
 0x45f   : > { %vm11278_vm3 = vcmp.ne.s16.totalorder %v14587_v49, 0  ;;  %v11288_v41 = vsel %vm2304_vm1, 65537, %v14591_v22  ;;  %v11297_v27 = vsel %vm2288_vm2, 65537, %v14591_v22  ;;  %v14218_v62 = vshrl.u32 %v11195_v11, 16  ;;  %v9819_v48 = vpop.eup %9818  ;;  %vm2306_vm7 = vmpackc.low %vm11303_vm4, %vm11303_vm4 }
 0x460   : > { %v14589_v47 = vsel %vm11278_vm3, 4294967295, %v14588_v47  ;;  %v2025_v50 = vmul.f32 %v9817_v51, %v14595_v6  ;;  %v11309_v15 = vpack.c.bf16 %v2023_v30, %v2022_v44  ;;  %vm11311_vm5 = vcmp.ne.s16.totalorder %v7267_v58, 0  ;;  %v9821_v40 = vpop.eup %9820 }
 0x461   : > { %14590 = vst [vmem:[#allocation68_spill] sm:$0xff] %v14589_v47  ;;  %v14596_v10 = vmov 0  ;;  %v11316_v32 = vadd.s32 224, %v10871_v5  ;;  %v2026_v16 = vmul.f32 %v9819_v48, %v14599_v60  ;;  %v7268_v37 = vcombine.low %v11297_v27, %v11079_v46  ;;  %v9823_v21 = vpop.eup %9822  ;;  %8023 = vmatpush3.bf16.msra.mxu0 %v9569_v8  ;;  %v14603_v27 = vld [vmem:[#allocation63_spill] sm:$0xff]  ;;  %v14608_v60 = vld [vmem:[#allocation65_spill] sm:$0xff]  ;;  %v9556_v47 = vld [vmem:[#allocation10 + $0x170] sm:$0xff]  }
 0x462   : > { %v14597_v10 = vsel %vm11311_vm5, 4294967295, %v14596_v10  ;;  %v703_v20 = vand.u32 15, %v603_v42  ;;  %v605_v54 = vadd.s32 96, %v10871_v5  ;;  %v2027_v31 = vmul.f32 %v9821_v40, %v14600_v14  ;;  %3102 = vmatprep.mubr.bf16.mxu1 %v11309_v15  ;;  %v9825_v59 = vpop.eup %9824  ;;  %8024 = vmatprep.subr.bf16.mxu0 %v9572_v56 }
 0x463   : > { %14598 = vst [vmem:[#allocation58_spill] sm:$0xff] %v14597_v10  ;;  %v11323_v38 = vpack.c.bf16 %v2025_v50, %v2024_v13  ;;  %v2131_v58 = vshrl.u32 %v11273_v34, 16  ;;  %v14232_v53 = vshrl.u32 %v11309_v15, 16  ;;  %v2028_v44 = vmul.f32 %v9823_v21, %v14602_v57  ;;  %v9827_v49 = vpop.eup %9826 }
 0x464   : > { %v2142_v42 = vshll.u32 %v11309_v15, 16  ;;  %v11332_v9 = vsel %vm14249_vm12, %v11204_v26, %v2080_v19  ;;  %v11336_v30 = vrot.slane %v14218_v62, 7  ;;  %v2029_v51 = vmul.f32 %v9825_v59, %v14603_v27  ;;  %v9829_v48 = vpop.eup %9828  ;;  %v14605_v26 = vld [vmem:[#allocation64_spill] sm:$0xff]  ;;  %v14610_v59 = vld [vmem:[#allocation66_spill] sm:$0xff]  ;;  %v9580_v62 = vld [vmem:[#allocation10 + $0x1f8] sm:$0xff]  }
 0x465   : > { %14601 = vst [vmem:[#allocation59_spill] sm:$0xff] %v11323_v38  ;;  %v11339_v8 = vpack.c.bf16 %v2027_v31, %v2026_v16  ;;  %v11343_v29 = vrot.slane %v14232_v53, 7  ;;  %v14230_v13 = vshrl.u32 %v11323_v38, 16  ;;  %v2030_v19 = vmul.f32 %v9827_v49, %v14605_v26  ;;  %7326 = vmatmul.mubr.msk.bf16.gmra.mrb[40].mxu0 %vm11311_vm5, %v11332_v9  ;;  %v9831_v40 = vpop.eup %9830 }
 0x466   : > { %v14220_v56 = vshll.u32 %v11195_v11, 16  ;;  %vm11351_vm6 = vcmp.ge.s32.totalorder %v703_v20, 1  ;;  %v717_v50 = vand.u32 15, %v605_v54  ;;  %v2031_v16 = vmul.f32 %v9829_v48, %v14608_v60  ;;  %3046 = vmatprep.mubr.bf16.mxu0 %v11195_v11  ;;  %8025 = vmatpush3.bf16.msra.mxu0 %v9573_v23  ;;  %v9833_v20 = vpop.eup %9832  ;;  %v9551_v54 = vld [vmem:[#allocation10 + $0x148] sm:$0xff]   ;;  %v14611_v48 = vld [vmem:[#allocation67_spill] sm:$0xff] }
 0x467   : > { %14604 = vst [vmem:[#allocation60_spill] sm:$0xff] %v11339_v8  ;;  %v11356_v21 = vpack.c.bf16 %v2029_v51, %v2028_v44  ;;  %v11360_v14 = vrot.slane %v2131_v58, 7  ;;  %v2144_v31 = vor.u32 %v2142_v42, %v11343_v29  ;;  %v2032_v57 = vmul.f32 %v9831_v40, %v14610_v59  ;;  %8026 = vmatprep.subr.bf16.mxu0 %v9574_v28  ;;  %v9575_v51 = vld [vmem:[#allocation10 + $0x1a8] sm:$0xff]   ;;  %vm2290_vm8 = vmpackc.low %vm11351_vm6, %vm11351_vm6 }
 0x468   : > { %v2088_v44 = vor.u32 %v14220_v56, %v11336_v30  ;;  %v829_v49 = vand.u32 15, %v11316_v32  ;;  %v14219_v27 = vshrl.u32 %v11207_v1, 16  ;;  %v2033_v23 = vmul.f32 %v9833_v20, %v14611_v48  ;;  %v9578_v32 = vld [vmem:[#allocation10 + $0x1f0] sm:$0xff]   ;;  %v9554_v48 = vld [vmem:[#allocation10 + $0x160] sm:$0xff]  }
 0x469   : > { %14609 = vst [vmem:[#allocation61_spill] sm:$0xff] %v11356_v21  ;;  %v11376_v26 = vpack.c.bf16 %v2031_v16, %v2030_v19  ;;  %v11380_v40 = vsel %vm14249_vm12, %v11360_v14, %v2144_v31  ;;  %v11384_v60 = vrot.slane %v14230_v13, 7  ;;  %vm11392_vm9 = vcmp.ge.s32.totalorder %v717_v50, 1  ;;  %v14616_v19 = vld [vmem:[#allocation56_spill] sm:$0xff]  ;;  %v9552_v50 = vld [vmem:[#allocation10 + $0x150] sm:$0xff]  }
 0x46a   : > { %14613 = vst [vmem:[#allocation63_spill] sm:$0xff] %v11380_v40  ;;  %7334 = vmatmul.mubr.msk.bf16.vlgmr.msra.gmra.mrb[8].mxu1 %vm11278_vm3, %v11380_v40  ;;  %v2150_v16 = vshll.u32 %v11323_v38, 16  ;;  %v7276_v6 = vcombine.low %v11288_v41, %v11079_v46  ;;  %vm11401_vm10 = vcmp.ne.s16.totalorder %v7268_v37, 0  ;;  %v14617_v31 = vmov 0  ;;  %8027 = vmatpush3.bf16.msra.mxu0 %v9575_v51  ;;  %vm2292_vm14 = vmpackc.low %vm11392_vm9, %vm11392_vm9  ;;  %v9579_v51 = vld [vmem:[#allocation10 + $0x1b0] sm:$0xff]  }
 0x46b   : > { %14612 = vst [vmem:[#allocation62_spill] sm:$0xff] %v11376_v26  ;;  %8676 = vmatpush3.bf16.msra.mxu1 %v14616_v19  ;;  %3110 = vmatprep.mubr.bf16.mxu1 %v11323_v38  ;;  %v14618_v31 = vsel %vm11401_vm10, 4294967295, %v14617_v31  ;;  %v11405_v20 = vpack.c.bf16 %v2033_v23, %v2032_v57  ;;  %v2342_v59 = vsel %vm2306_vm7, 65537, %v14591_v22  ;;  %vm11413_vm13 = vcmp.ge.s32.totalorder %v829_v49, 1 }
 0x46c   : > { %14619 = vst [vmem:[#allocation64_spill] sm:$0xff] %v14618_v31  ;;  %8677 = vmatprep.subr.bf16.mxu1 %v9551_v54  ;;  %v2326_v41 = vsel %vm2290_vm8, 65537, %v14591_v22  ;;  %v607_v37 = vadd.s32 112, %v10871_v5  ;;  %v2152_v57 = vor.u32 %v2150_v16, %v11384_v60  ;;  %v14229_v23 = vshrl.u32 %v11339_v8, 16  ;;  %8028 = vmatprep.subr.bf16.mxu0 %v9578_v32  ;;  %vm2308_vm2 = vmpackc.low %vm11413_vm13, %vm11413_vm13 }
 0x46d   : > { %v11425_v35 = vsel %vm14249_vm12, %v11252_v18, %v2088_v44  ;;  %v11429_v49 = vrot.slane %v14219_v27, 7  ;;  %v623_v19 = vadd.s32 240, %v10871_v5  ;;  %vm11438_vm1 = vcmp.ne.s16.totalorder %v7276_v6, 0 }
 0x46e   : > { %7327 = vmatmul.mubr.msk.bf16.gmra.mrb[44].mxu0 %vm11401_vm10, %v11425_v35  ;;  %v14622_v18 = vmov 0  ;;  %v14225_v44 = vshll.u32 %v11207_v1, 16  ;;  %v7269_v32 = vcombine.low %v2326_v41, %v11079_v46  ;;  %v625_v27 = vadd.s32 256, %v10871_v5 }
 0x46f   : > { %8678 = vmatpush3.bf16.msra.mxu1 %v9551_v54  ;;  %v14623_v18 = vsel %vm11438_vm1, 4294967295, %v14622_v18  ;;  %3054 = vmatprep.mubr.bf16.mxu0 %v11207_v1  ;;  %v7277_v56 = vcombine.low %v2342_v59, %v11079_v46  ;;  %v9553_v54 = vld [vmem:[#allocation10 + $0x158] sm:$0xff]   ;;  %v14227_v6 = vshrl.u32 %v11220_v61, 16  ;;  %v2328_v39 = vsel %vm2292_vm14, 65537, %v14591_v22 }
 0x470   : > { %14624 = vst [vmem:[#allocation65_spill] sm:$0xff] %v14623_v18  ;;  %8679 = vmatprep.subr.bf16.mxu1 %v9552_v50  ;;  %v731_v2 = vand.u32 15, %v607_v37  ;;  %v11459_v33 = vsel %vm14249_vm12, %v11343_v29, %v2152_v57  ;;  %v11463_v41 = vrot.slane %v14229_v23, 7  ;;  %v2096_v59 = vor.u32 %v14225_v44, %v11429_v49  ;;  %8029 = vmatpush3.bf16.msra.mxu0 %v9579_v51 }
 0x471   : > { %14625 = vst [vmem:[#allocation66_spill] sm:$0xff] %v11459_v33  ;;  %v11477_v29 = vsel %vm2308_vm2, 65537, %v14591_v22  ;;  %v843_v28 = vand.u32 15, %v623_v19  ;;  %8030 = vmatprep.subr.bf16.mxu0 %v9580_v62  ;;  %v2158_v37 = vshll.u32 %v11339_v8, 16  ;;  %vm11481_vm4 = vcmp.ne.s16.totalorder %v7269_v32, 0 }
 0x472   : > { %7335 = vmatmul.mubr.msk.bf16.gmra.mrb[12].mxu1 %vm11438_vm1, %v11459_v33  ;;  %v14626_v57 = vmov 0  ;;  %v7270_v51 = vcombine.low %v2328_v39, %v11079_v46  ;;  %v857_v44 = vand.u32 15, %v625_v27  ;;  %vm11486_vm6 = vcmp.ne.s16.totalorder %v7277_v56, 0 }
 0x473   : > { %3118 = vmatprep.mubr.bf16.mxu1 %v11339_v8  ;;  %8680 = vmatpush3.bf16.msra.mxu1 %v9552_v50  ;;  %v14627_v57 = vsel %vm11481_vm4, 4294967295, %v14626_v57  ;;  %v14629_v0 = vmov 0  ;;  %v11492_v62 = vrot.slane %v14227_v6, 7  ;;  %vm14248_vm7 = vsmask.f32 7424 }
 0x474   : > { %14628 = vst [vmem:[#allocation67_spill] sm:$0xff] %v14627_v57  ;;  %v14630_v0 = vsel %vm11486_vm6, 4294967295, %v14629_v0  ;;  %8681 = vmatprep.subr.bf16.mxu1 %v9553_v54  ;;  %vm11494_vm8 = vcmp.ge.s32.totalorder %v731_v2, 1  ;;  %v2160_v19 = vor.u32 %v2158_v37, %v11463_v41  ;;  %v2163_v39 = vshrl.u32 %v11356_v21, 16  ;;  %8031 = vmatpush3.bf16.msra.mxu0 %v9581_v43 }
 0x475   : > { %14631 = vst [vmem:[#allocation56_spill] sm:$0xff] %v14630_v0  ;;  %v11502_v56 = vsel %vm14249_vm12, %v11336_v30, %v2096_v59  ;;  %v14231_v27 = vshll.u32 %v11273_v34, 16  ;;  %v7278_v32 = vcombine.low %v11477_v29, %v11079_v46  ;;  %v14233_v2 = vshll.u32 %v11220_v61, 16  ;;  %vm2294_vm2 = vmpackc.low %vm11494_vm8, %vm11494_vm8 }
 0x476   : > { %7328 = vmatmul.mubr.msk.bf16.gmra.mrb[48].mxu0 %vm11481_vm4, %v11502_v56  ;;  %v11512_v6 = vadd.s32 24, %v10871_v5  ;;  %v609_v7 = vadd.s32 128, %v10871_v5  ;;  %vm11515_vm9 = vcmp.ge.s32.totalorder %v843_v28, 1  ;;  %vm11520_vm13 = vcmp.ne.s16.totalorder %v7270_v51, 0  ;;  %v9555_v28 = vld [vmem:[#allocation10 + $0x168] sm:$0xff]  }
 0x477   : > { %8682 = vmatpush3.bf16.msra.mxu1 %v9553_v54  ;;  %3062 = vmatprep.mubr.bf16.mxu0 %v11220_v61  ;;  %v14636_v43 = vmov 0  ;;  %vm11524_vm14 = vcmp.ge.s32.totalorder %v857_v44, 1  ;;  %v11530_v29 = vrot.slane %v14231_v27, 1  ;;  %v2166_v54 = vshll.u32 %v11356_v21, 16  ;;  %vm2310_vm8 = vmpackc.low %vm11515_vm9, %vm11515_vm9 }
 0x478   : > { %v14637_v43 = vsel %vm11520_vm13, 4294967295, %v14636_v43  ;;  %8683 = vmatprep.subr.bf16.mxu1 %v9554_v48  ;;  %v2104_v23 = vor.u32 %v14233_v2, %v11492_v62  ;;  %v2475_v44 = vrot.slane %v2142_v42, 1  ;;  %v14641_v13 = vmov 0.0   ;;  %vm2312_vm9 = vmpackc.low %vm11524_vm14, %vm11524_vm14 }
 0x479   : > { %14638 = vst [vmem:[#allocation72_spill] sm:$0xff] %v14637_v43  ;;  %8819 = vmatprep.subr.bf16.mxu0 %v14641_v13  ;;  %v11545_v27 = vsel %vm14249_vm12, %v11384_v60, %v2160_v19  ;;  %v11547_v53 = vrot.slane %v2163_v39, 7  ;;  %v2474_v2 = vor.u32 %v11530_v29, %v2131_v58  ;;  %v2478_v50 = vrot.slane %v2150_v16, 1 }
 0x47a   : > { %14642 = vst [vmem:[#allocation73_spill] sm:$0xff] %v11545_v27  ;;  %7336 = vmatmul.mubr.msk.bf16.gmra.mrb[16].mxu1 %vm11486_vm6, %v11545_v27  ;;  %v2174_v42 = vshll.u32 %v11376_v26, 16  ;;  %v654_v51 = vand.u32 15, %v11512_v6  ;;  %v745_v18 = vand.u32 15, %v609_v7  ;;  %v14643_v60 = vshrl.u32 %v11309_v15, 16 }
 0x47b   : > { %3126 = vmatprep.mubr.bf16.mxu1 %v11356_v21  ;;  %8684 = vmatpush3.bf16.msra.mxu1 %v9554_v48  ;;  %v2330_v58 = vsel %vm2294_vm2, 65537, %v14591_v22  ;;  %v11564_v33 = vsel %vm14248_vm7, %v2474_v2, %v2475_v44  ;;  %v14644_v16 = vshrl.u32 %v11323_v38, 16  ;;  %v2481_v27 = vrot.slane %v2158_v37, 1 }
 0x47c   : > { %v2477_v19 = vor.u32 %v2475_v44, %v14643_v60  ;;  %8685 = vmatprep.subr.bf16.mxu1 %v9555_v28  ;;  %v11570_v7 = vsel %vm14249_vm12, %v11429_v49, %v2104_v23  ;;  %v14645_v6 = vshrl.u32 %v11228_v17, 16  ;;  %v2484_v21 = vrot.slane %v2166_v54, 1 }
 0x47d   : > { %v2480_v0 = vor.u32 %v2478_v50, %v14644_v16  ;;  %v2168_v2 = vor.u32 %v2166_v54, %v11547_v53  ;;  %v2171_v44 = vshrl.u32 %v11376_v26, 16  ;;  %v14646_v23 = vshrl.u32 %v11339_v8, 16 }
 0x47e   : > { %v11574_v60 = vrot.slane %v14645_v6, 7  ;;  %v11577_v48 = vsel %vm14248_vm7, %v2477_v19, %v2478_v50  ;;  %7329 = vmatmul.mubr.msk.bf16.gmra.mrb[52].mxu0 %vm11520_vm13, %v11570_v7  ;;  %vm11592_vm2 = vcmp.ge.s32.totalorder %v745_v18, 1  ;;  %v611_v54 = vadd.s32 144, %v10871_v5 }
 0x47f   : > { %v11585_v37 = vsel %vm14248_vm7, %v2480_v0, %v2481_v27  ;;  %v2483_v49 = vor.u32 %v2481_v27, %v14646_v23  ;;  %v2486_v19 = vor.u32 %v2484_v21, %v2163_v39  ;;  %v2487_v30 = vrot.slane %v2174_v42, 1  ;;  %8686 = vmatpush3.bf16.msra.mxu1 %v9555_v28  ;;  %3070 = vmatprep.mubr.bf16.mxu0 %v11228_v17  ;;  %v9557_v39 = vld [vmem:[#allocation10 + $0x178] sm:$0xff]  }
 0x480   : > { %vm11597_vm0 = vcmp.ne.s16.totalorder %v7278_v32, 0  ;;  %v14649_v16 = vmov 0  ;;  %v14250_v0 = vshll.u32 %v11228_v17, 16  ;;  %v7271_v27 = vcombine.low %v2330_v58, %v11079_v46  ;;  %8687 = vmatprep.subr.bf16.mxu1 %v9556_v47 }
 0x481   : > { %v14650_v16 = vsel %vm11597_vm0, 4294967295, %v14649_v16  ;;  %v11605_v18 = vsel %vm14248_vm7, %v2483_v49, %v2484_v21  ;;  %v2346_v6 = vsel %vm2310_vm8, 65537, %v14591_v22  ;;  %v11612_v32 = vsel %vm14248_vm7, %v2486_v19, %v2487_v30  ;;  %vm2296_vm8 = vmpackc.low %vm11592_vm2, %vm11592_vm2 }
 0x482   : > { %14651 = vst [vmem:[#allocation74_spill] sm:$0xff] %v14650_v16  ;;  %v11614_v28 = vor.u32 %v2487_v30, %v2171_v44  ;;  %v11618_v23 = vsel %vm14249_vm12, %v11463_v41, %v2168_v2  ;;  %v11620_v58 = vrot.slane %v2171_v44, 7  ;;  %v2112_v21 = vor.u32 %v14250_v0, %v11574_v60 }
 0x483   : > { %14652 = vst [vmem:[#allocation75_spill] sm:$0xff] %v11618_v23  ;;  %v14255_v49 = vshrl.u32 %v11237_v45, 16  ;;  %7337 = vmatmul.mubr.msk.bf16.gmra.mrb[20].mxu1 %vm11597_vm0, %v11618_v23  ;;  %vm11632_vm7 = vcmp.lt.s32.totalorder %v654_v51, 15  ;;  %v598_v41 = vadd.s32 40, %v10871_v5  ;;  %v759_v2 = vand.u32 15, %v611_v54  ;;  %v9558_v54 = vld [vmem:[#allocation10 + $0x40] sm:$0xff]  }
 0x484   : > { %3134 = vmatprep.mubr.bf16.mxu1 %v11376_v26  ;;  %v7279_v44 = vcombine.low %v2346_v6, %v11079_v46  ;;  %8688 = vmatpush3.bf16.msra.mxu1 %v9556_v47  ;;  %vm11639_vm12 = vcmp.ne.s16.totalorder %v7271_v27, 0  ;;  %v14655_v50 = vmov 0  ;;  %v600_v30 = vadd.s32 56, %v10871_v5  ;;  %vm2590_vm2 = vmpackc.low %vm11632_vm7, %vm11632_vm7 }
 0x485   : > { %v14656_v50 = vsel %vm11639_vm12, 4294967295, %v14655_v50  ;;  %v2348_v51 = vsel %vm2312_vm9, 65537, %v14591_v22  ;;  %8689 = vmatprep.subr.bf16.mxu1 %v9557_v39  ;;  %v2332_v0 = vsel %vm2296_vm8, 65537, %v14591_v22  ;;  %v2176_v6 = vor.u32 %v2174_v42, %v11620_v58 }
 0x486   : > { %14657 = vst [vmem:[#allocation76_spill] sm:$0xff] %v14656_v50  ;;  %vm14658_vm0 = vsmask.f32 256  ;;  %v11662_v59 = vrot.slane %v14255_v49, 7  ;;  %v668_v26 = vand.u32 15, %v598_v41  ;;  %vm11667_vm14 = vcmp.ge.s32.totalorder %v759_v2, 1 }
 0x487   : > { %v11658_v27 = vsel %vm14658_vm0, %v11492_v62, %v2112_v21  ;;  %v613_v19 = vadd.s32 160, %v10871_v5  ;;  %vm11672_vm7 = vcmp.ne.s16.totalorder %v7279_v44, 0  ;;  %v14661_v47 = vmov 0  ;;  %vm2298_vm9 = vmpackc.low %vm11667_vm14, %vm11667_vm14 }
 0x488   : > { %7330 = vmatmul.mubr.msk.bf16.gmra.mrb[56].mxu0 %vm11639_vm12, %v11658_v27  ;;  %v14662_v47 = vsel %vm11672_vm7, 4294967295, %v14661_v47  ;;  %8690 = vmatpush3.bf16.msra.mxu1 %v9557_v39  ;;  %v682_v62 = vand.u32 15, %v600_v30  ;;  %v14260_v21 = vshll.u32 %v11237_v45, 16  ;;  %v7272_v49 = vcombine.low %v2332_v0, %v11079_v46 }
 0x489   : > { %14663 = vst [vmem:[#allocation77_spill] sm:$0xff] %v14662_v47  ;;  %3078 = vmatprep.mubr.bf16.mxu0 %v11237_v45  ;;  %v7280_v41 = vcombine.low %v2348_v51, %v11079_v46  ;;  %v2626_v2 = vsel %vm2590_vm2, 65537, %v14591_v22  ;;  %7880 = vmatprep.subr.bf16.mxu1 %v9558_v54  ;;  %v11683_v16 = vsel %vm14658_vm0, %v11547_v53, %v2176_v6  ;;  %v14665_v44 = vshrl.u32 %v11405_v20, 16 }
 0x48a   : > { %14664 = vst [vmem:[#allocation78_spill] sm:$0xff] %v11683_v16  ;;  %v2120_v39 = vor.u32 %v14260_v21, %v11662_v59  ;;  %v14667_v53 = vshll.u32 %v11163_v12, 16  ;;  %vm11703_vm8 = vcmp.lt.s32.totalorder %v668_v26, 15  ;;  %v602_v54 = vadd.s32 72, %v10871_v5 }
 0x48b   : > { %v11687_v23 = vrot.slane %v14665_v44, 7  ;;  %7338 = vmatmul.mubr.msk.bf16.gmra.mrb[24].mxu1 %vm11672_vm7, %v11683_v16  ;;  %v773_v6 = vand.u32 15, %v613_v19  ;;  %v14267_v42 = vshll.u32 %v11405_v20, 16  ;;  %vm11710_vm2 = vcmp.lt.s32.totalorder %v682_v62, 15  ;;  %vm2592_vm0 = vmpackc.low %vm11703_vm8, %vm11703_vm8 }
 0x48c   : > { %v11701_v0 = vrot.slane %v14667_v53, 1  ;;  %3142 = vmatprep.mubr.bf16.mxu1 %v11405_v20  ;;  %vm11714_vm14 = vcmp.ne.s16.totalorder %v7272_v49, 0  ;;  %v14673_v21 = vmov 0  ;;  %v604_v26 = vadd.s32 88, %v10871_v5 }
 0x48d   : > { %14666 = vst [vmem:[#allocation79_spill] sm:$0xff] %v11687_v23  ;;  %v14674_v21 = vsel %vm11714_vm14, 4294967295, %v14673_v21  ;;  %v7283_v53 = vcombine.low %v11079_v46, %v2626_v2  ;;  %v2334_v30 = vsel %vm2298_vm9, 65537, %v14591_v22  ;;  %v2184_v19 = vor.u32 %v14267_v42, %v11687_v23  ;;  %vm2594_vm9 = vmpackc.low %vm11710_vm2, %vm11710_vm2 }
 0x48e   : > { %14668 = vst [vmem:[#allocation80_spill] sm:$0xff] %v11701_v0  ;;  %14675 = vst [vmem:[#allocation81_spill] sm:$0xff] %v14674_v21  ;;  %vm14676_vm7 = vsmask.f32 256  ;;  %v14677_v62 = vshrl.u32 %v11260_v52, 16  ;;  %v14678_v2 = vshrl.u32 %v11163_v12, 16 }
 0x48f   : > { %v11729_v49 = vsel %vm14676_vm7, %v11574_v60, %v2120_v39  ;;  %v696_v51 = vand.u32 15, %v602_v54  ;;  %vm11744_vm8 = vcmp.ge.s32.totalorder %v773_v6, 1  ;;  %vm11748_vm7 = vcmp.ne.s16.totalorder %v7280_v41, 0  ;;  %v9604_v21 = vld [vmem:[#allocation10 + $0x208] sm:$0xff]  }
 0x490   : > { %v11733_v47 = vrot.slane %v14677_v62, 7  ;;  %v2447_v16 = vor.u32 %v11701_v0, %v14678_v2  ;;  %7331 = vmatmul.mubr.msk.bf16.gmra.mrb[60].mxu0 %vm11714_vm14, %v11729_v49  ;;  %v14681_v39 = vmov 0  ;;  %v710_v62 = vand.u32 15, %v604_v26  ;;  %vm2300_vm1 = vmpackc.low %vm11744_vm8, %vm11744_vm8 }
 0x491   : > { %v14682_v39 = vsel %vm11748_vm7, 4294967295, %v14681_v39  ;;  %3086 = vmatprep.mubr.bf16.mxu0 %v11260_v52  ;;  %v14274_v44 = vshll.u32 %v11260_v52, 16  ;;  %v7273_v2 = vcombine.low %v2334_v30, %v11079_v46  ;;  %v14684_v42 = vshll.u32 %v11169_v4, 16 }
 0x492   : > { %14683 = vst [vmem:[#allocation82_spill] sm:$0xff] %v14682_v39  ;;  %vm11757_vm2 = vcmp.ne.s16.totalorder %v7283_v53, 0  ;;  %v14685_v54 = vmov 0  ;;  %v2628_v6 = vsel %vm2592_vm0, 65537, %v14591_v22  ;;  %vm14688_vm6 = vsmask.f32 256 }
 0x493   : > { %v2448_v0 = vrot.slane %v14684_v42, 1  ;;  %v14686_v54 = vsel %vm11757_vm2, 4294967295, %v14685_v54  ;;  %v11764_v41 = vsel %vm14688_vm6, %v11620_v58, %v2184_v19  ;;  %v2630_v23 = vsel %vm2594_vm9, 65537, %v14591_v22 }
 0x494   : > { %14687 = vst [vmem:[#allocation83_spill] sm:$0xff] %v14686_v54  ;;  %14689 = vst [vmem:[#allocation84_spill] sm:$0xff] %v11764_v41  ;;  %v2128_v26 = vor.u32 %v14274_v44, %v11733_v47  ;;  %v14690_v30 = vshll.u32 %v11181_v63, 16  ;;  %7339 = vmatmul.mubr.msk.bf16.gmra.mrb[28].mxu1 %vm11748_vm7, %v11764_v41  ;;  %vm14691_vm0 = vsmask.f32 7424  ;;  %vm11781_vm6 = vcmp.lt.s32.totalorder %v696_v51, 15 }
 0x495   : > { %v11779_v58 = vsel %vm14691_vm0, %v2447_v16, %v2448_v0  ;;  %v606_v19 = vadd.s32 104, %v10871_v5  ;;  %v7284_v60 = vcombine.low %v11079_v46, %v2628_v6  ;;  %vm11790_vm9 = vcmp.lt.s32.totalorder %v710_v62, 15  ;;  %vm2596_vm0 = vmpackc.low %vm11781_vm6, %vm11781_vm6 }
 0x496   : > { %v2451_v42 = vrot.slane %v14690_v30, 1  ;;  %14692 = vst [vmem:[#allocation85_spill] sm:$0xff] %v11779_v58  ;;  %8691 = vmatprep.mubr.msk.bf16.mxu1 %vm11757_vm2, %v11779_v58  ;;  %vm11794_vm8 = vcmp.ne.s16.totalorder %v7273_v2, 0  ;;  %v14697_v44 = vmov 0  ;;  %v608_v16 = vadd.s32 120, %v10871_v5  ;;  %vm2598_vm7 = vmpackc.low %vm11790_vm9, %vm11790_vm9  ;;  %v9564_v58 = vld [vmem:[#allocation10 + $0x48] sm:$0xff]  }
 0x497   : > { %v14698_v44 = vsel %vm11794_vm8, 4294967295, %v14697_v44  ;;  %v7285_v51 = vcombine.low %v11079_v46, %v2630_v23  ;;  %v2336_v39 = vsel %vm2300_vm1, 65537, %v14591_v22  ;;  %v14700_v41 = vshrl.u32 %v11169_v4, 16 }
 0x498   : > { %14699 = vst [vmem:[#allocation86_spill] sm:$0xff] %v14698_v44  ;;  %vm14701_vm2 = vsmask.f32 256  ;;  %v14702_v2 = vshrl.u32 %v11181_v63, 16  ;;  %v724_v23 = vand.u32 15, %v606_v19  ;;  %vm11818_vm1 = vcmp.ne.s16.totalorder %v7284_v60, 0 }
 0x499   : > { %v2450_v54 = vor.u32 %v2448_v0, %v14700_v41  ;;  %v11808_v62 = vsel %vm14701_vm2, %v11662_v59, %v2128_v26  ;;  %v14703_v0 = vmov 0  ;;  %v9559_v41 = vld [vmem:[#allocation10] sm:$0xff]   ;;  %v738_v59 = vand.u32 15, %v608_v16 }
 0x49a   : > { %v2453_v6 = vor.u32 %v2451_v42, %v14702_v2  ;;  %7332 = vmatmul.mubr.msk.bf16.gmra.mrb[64].mxu0 %vm11794_vm8, %v11808_v62  ;;  %v14704_v0 = vsel %vm11818_vm1, 4294967295, %v14703_v0  ;;  %v7274_v26 = vcombine.low %v2336_v39, %v11079_v46  ;;  %v14706_v53 = vshll.u32 %v11195_v11, 16 }
 0x49b   : > { %14705 = vst [vmem:[#allocation87_spill] sm:$0xff] %v14704_v0  ;;  %3094 = vmatprep.mubr.bf16.mxu0 %v11273_v34  ;;  %vm11826_vm2 = vcmp.ne.s16.totalorder %v7285_v51, 0  ;;  %v14707_v2 = vmov 0  ;;  %v2632_v19 = vsel %vm2596_vm0, 65537, %v14591_v22  ;;  %vm14710_vm6 = vsmask.f32 7424 }
 0x49c   : > { %v2454_v30 = vrot.slane %v14706_v53, 1  ;;  %v14708_v2 = vsel %vm11826_vm2, 4294967295, %v14707_v2  ;;  %v11832_v60 = vsel %vm14710_vm6, %v2450_v54, %v2451_v42  ;;  %v2634_v8 = vsel %vm2598_vm7, 65537, %v14591_v22  ;;  %vm14713_vm9 = vmmov %vm14710_vm6  ;;  %v9565_v42 = vld [vmem:[#allocation10 + $0x8] sm:$0xff]   ;;  %v14850_v57 = vld [vmem:[#allocation83_spill] sm:$0xff] }
 0x49d   : > { %14709 = vst [vmem:[#allocation88_spill] sm:$0xff] %v14708_v2  ;;  %14711 = vst [vmem:[#allocation89_spill] sm:$0xff] %v11832_v60  ;;  %v14712_v16 = vshll.u32 %v11273_v34, 16  ;;  %8692 = vmatmul.mubr.msk.bf16.vlgmr.msra.gmra.mrb[32].mxu1 %vm11818_vm1, %v11832_v60  ;;  %v14715_v51 = vshll.u32 %v11207_v1, 16  ;;  %vm11846_vm0 = vcmp.lt.s32.totalorder %v724_v23, 15  ;;  %v610_v54 = vadd.s32 136, %v10871_v5 }
 0x49e   : > { %v11842_v39 = vsel %vm14713_vm9, %v2453_v6, %v2454_v30  ;;  %7881 = vmatpush3.bf16.msra.mxu1 %v9559_v41  ;;  %vm11855_vm7 = vcmp.lt.s32.totalorder %v738_v59, 15  ;;  %vm11859_vm6 = vcmp.ne.s16.totalorder %v7274_v26, 0  ;;  %v612_v23 = vadd.s32 152, %v10871_v5  ;;  %vm2600_vm9 = vmpackc.low %vm11846_vm0, %vm11846_vm0  ;;  %v14849_v43 = vld [vmem:[#allocation85_spill] sm:$0xff] }
 0x49f   : > { %v2136_v38 = vor.u32 %v14712_v16, %v11360_v14  ;;  %14714 = vst [vmem:[#allocation90_spill] sm:$0xff] %v11842_v39  ;;  %v2457_v53 = vrot.slane %v14715_v51, 1  ;;  %8695 = vmatprep.mubr.msk.bf16.mxu1 %vm11826_vm2, %v11842_v39  ;;  %v7286_v14 = vcombine.low %v11079_v46, %v2632_v19  ;;  %v14720_v16 = vmov 0  ;;  %7882 = vmatprep.subr.bf16.mxu1 %v9564_v58  ;;  %v9570_v51 = vld [vmem:[#allocation10 + $0x50] sm:$0xff]   ;;  %vm2602_vm1 = vmpackc.low %vm11855_vm7, %vm11855_vm7 }
 0x4a0   : > { %v14721_v16 = vsel %vm11859_vm6, 4294967295, %v14720_v16  ;;  %v7287_v41 = vcombine.low %v11079_v46, %v2634_v8  ;;  %v14723_v2 = vshrl.u32 %v11195_v11, 16  ;;  %vm14724_vm2 = vsmask.f32 256  ;;  %v9571_v58 = vld [vmem:[#allocation10 + $0x10] sm:$0xff]  }
 0x4a1   : > { %14722 = vst [vmem:[#allocation91_spill] sm:$0xff] %v14721_v16  ;;  %v11872_v59 = vsel %vm14724_vm2, %v11733_v47, %v2136_v38  ;;  %v14725_v26 = vshrl.u32 %v11207_v1, 16  ;;  %v752_v8 = vand.u32 15, %v610_v54  ;;  %vm11882_vm3 = vcmp.ne.s16.totalorder %v7286_v14, 0  ;;  %v9576_v54 = vld [vmem:[#allocation10 + $0x58] sm:$0xff]  }
 0x4a2   : > { %v2456_v39 = vor.u32 %v2454_v30, %v14723_v2  ;;  %7333 = vmatmul.mubr.msk.bf16.gmra.mrb[68].mxu0 %vm11859_vm6, %v11872_v59  ;;  %v14726_v40 = vmov 0  ;;  %7883 = vmatpush3.bf16.msra.mxu1 %v9565_v42  ;;  %v766_v38 = vand.u32 15, %v612_v23  ;;  %v14729_v47 = vshll.u32 %v11220_v61, 16 }
 0x4a3   : > { %v2459_v19 = vor.u32 %v2457_v53, %v14725_v26  ;;  %v14727_v40 = vsel %vm11882_vm3, 4294967295, %v14726_v40  ;;  %4003 = vmatprep.mubr.bf16.mxu0 %v11169_v4  ;;  %vm11889_vm2 = vcmp.ne.s16.totalorder %v7287_v41, 0  ;;  %v14730_v2 = vmov 0  ;;  %7884 = vmatprep.subr.bf16.mxu1 %v9570_v51 }
 0x4a4   : > { %14728 = vst [vmem:[#allocation92_spill] sm:$0xff] %v14727_v40  ;;  %v2460_v30 = vrot.slane %v14729_v47, 1  ;;  %v14731_v2 = vsel %vm11889_vm2, 4294967295, %v14730_v2  ;;  %v2636_v6 = vsel %vm2600_vm9, 65537, %v14591_v22  ;;  %vm14733_vm0 = vsmask.f32 7424 }
 0x4a5   : > { %14732 = vst [vmem:[#allocation93_spill] sm:$0xff] %v14731_v2  ;;  %v11895_v14 = vsel %vm14733_vm0, %v2456_v39, %v2457_v53  ;;  %v2638_v42 = vsel %vm2602_vm1, 65537, %v14591_v22  ;;  %vm14735_vm7 = vmmov %vm14733_vm0  ;;  %v14737_v41 = vshll.u32 %v11228_v17, 16  ;;  %vm11906_vm6 = vcmp.lt.s32.totalorder %v752_v8, 15  ;;  %v9577_v53 = vld [vmem:[#allocation10 + $0x18] sm:$0xff]   ;;  %v9582_v40 = vld [vmem:[#allocation10 + $0x60] sm:$0xff]  }
 0x4a6   : > { %14734 = vst [vmem:[#allocation94_spill] sm:$0xff] %v11895_v14  ;;  %8696 = vmatmul.mubr.msk.bf16.gmra.mrb[36].mxu1 %vm11882_vm3, %v11895_v14  ;;  %v11902_v23 = vsel %vm14735_vm7, %v2459_v19, %v2460_v30  ;;  %v614_v47 = vadd.s32 168, %v10871_v5  ;;  %v7288_v39 = vcombine.low %v11079_v46, %v2636_v6  ;;  %vm11915_vm1 = vcmp.lt.s32.totalorder %v766_v38, 15  ;;  %v9595_v14 = vld [vmem:[#allocation11] sm:$0xff]   ;;  %vm2604_vm9 = vmpackc.low %vm11906_vm6, %vm11906_vm6 }
 0x4a7   : > { %14736 = vst [vmem:[#allocation95_spill] sm:$0xff] %v11902_v23  ;;  %v2463_v26 = vrot.slane %v14737_v41, 1  ;;  %8699 = vmatprep.mubr.msk.bf16.mxu1 %vm11889_vm2, %v11902_v23  ;;  %7885 = vmatpush3.bf16.msra.mxu1 %v9571_v58  ;;  %v616_v41 = vadd.s32 184, %v10871_v5  ;;  %v7289_v8 = vcombine.low %v11079_v46, %v2638_v42  ;;  %v14742_v0 = vshrl.u32 %v11220_v61, 16  ;;  %vm2606_vm0 = vmpackc.low %vm11915_vm1, %vm11915_vm1 }
 0x4a8   : > { %7886 = vmatprep.subr.bf16.mxu1 %v9576_v54  ;;  %v14743_v58 = vshrl.u32 %v11228_v17, 16  ;;  %v780_v6 = vand.u32 15, %v614_v47  ;;  %vm11934_vm7 = vcmp.ne.s16.totalorder %v7288_v39, 0  ;;  %v14744_v54 = vmov 0 }
 0x4a9   : > { %v2462_v60 = vor.u32 %v2460_v30, %v14742_v0  ;;  %v14745_v54 = vsel %vm11934_vm7, 4294967295, %v14744_v54  ;;  %v9583_v0 = vld [vmem:[#allocation10 + $0x20] sm:$0xff]   ;;  %v794_v30 = vand.u32 15, %v616_v41  ;;  %v14747_v42 = vshll.u32 %v11237_v45, 16 }
 0x4aa   : > { %v2465_v38 = vor.u32 %v2463_v26, %v14743_v58  ;;  %7436 = vmatmul.mubr.msk.bf16.vlgmr.msra.gmra.mrb[72].mxu0 %vm11242_vm15, %v11264_v24  ;;  %14746 = vst [vmem:[#allocation96_spill] sm:$0xff] %v14745_v54  ;;  %vm11941_vm6 = vcmp.ne.s16.totalorder %v7289_v8, 0  ;;  %v14748_v19 = vmov 0  ;;  %v2640_v47 = vsel %vm2604_vm9, 65537, %v14591_v22  ;;  %v9584_v58 = vld [vmem:[#allocation10 + $0x68] sm:$0xff]  }
 0x4ab   : > { %7887 = vmatpush3.bf16.msra.mxu1 %v9577_v53  ;;  %4011 = vmatprep.mubr.bf16.mxu0 %v11181_v63  ;;  %v2466_v51 = vrot.slane %v14747_v42, 1  ;;  %v14749_v19 = vsel %vm11941_vm6, 4294967295, %v14748_v19  ;;  %vm14751_vm1 = vsmask.f32 7424  ;;  %v2642_v53 = vsel %vm2606_vm0, 65537, %v14591_v22 }
 0x4ac   : > { %14750 = vst [vmem:[#allocation97_spill] sm:$0xff] %v14749_v19  ;;  %7888 = vmatprep.subr.bf16.mxu1 %v9582_v40  ;;  %8820 = vmatpush3.bf16.msra.mxu0 %v9595_v14  ;;  %v11947_v39 = vsel %vm14751_vm1, %v2462_v60, %v2463_v26  ;;  %vm14753_vm2 = vmmov %vm14751_vm1  ;;  %v14754_v8 = vshll.u32 %v11260_v52, 16  ;;  %vm11959_vm9 = vcmp.lt.s32.totalorder %v780_v6, 15  ;;  %v618_v60 = vadd.s32 200, %v10871_v5  ;;  %v9597_v6 = vld [vmem:[#allocation11 + $0x8] sm:$0xff]  }
 0x4ad   : > { %14752 = vst [vmem:[#allocation98_spill] sm:$0xff] %v11947_v39  ;;  %8821 = vmatprep.subr.bf16.mxu0 %v14641_v13  ;;  %v11955_v41 = vsel %vm14753_vm2, %v2465_v38, %v2466_v51  ;;  %v7290_v14 = vcombine.low %v11079_v46, %v2640_v47  ;;  %vm11968_vm0 = vcmp.lt.s32.totalorder %v794_v30, 15  ;;  %v9585_v38 = vld [vmem:[#allocation10 + $0x28] sm:$0xff]   ;;  %v7291_v54 = vcombine.low %v11079_v46, %v2642_v53  ;;  %vm2608_vm2 = vmpackc.low %vm11959_vm9, %vm11959_vm9 }
 0x4ae   : > { %8700 = vmatmul.mubr.msk.bf16.gmra.mrb[40].mxu1 %vm11934_vm7, %v11947_v39  ;;  %v2469_v42 = vrot.slane %v14754_v8, 1  ;;  %v620_v8 = vadd.s32 216, %v10871_v5  ;;  %v9586_v39 = vld [vmem:[#allocation10 + $0x70] sm:$0xff]   ;;  %v14759_v2 = vshrl.u32 %v11237_v45, 16  ;;  %vm2610_vm1 = vmpackc.low %vm11968_vm0, %vm11968_vm0  ;;  %v808_v47 = vand.u32 15, %v618_v60  ;;  %v9588_v60 = vld [vmem:[#allocation10 + $0x78] sm:$0xff]  }
 0x4af   : > { %8703 = vmatprep.mubr.msk.bf16.mxu1 %vm11941_vm6, %v11955_v41  ;;  %7889 = vmatpush3.bf16.msra.mxu1 %v9583_v0  ;;  %v14760_v0 = vshrl.u32 %v11260_v52, 16  ;;  %vm11988_vm6 = vcmp.ne.s16.totalorder %v7290_v14, 0  ;;  %vm11993_vm9 = vcmp.ne.s16.totalorder %v7291_v54, 0  ;;  %v14764_v53 = vmov 0 }
 0x4b0   : > { %7890 = vmatprep.subr.bf16.mxu1 %v9584_v58  ;;  %v2468_v23 = vor.u32 %v2466_v51, %v14759_v2  ;;  %8822 = vmatpush3.bf16.msra.mxu0 %v9597_v6  ;;  %v14761_v2 = vmov 0  ;;  %v822_v51 = vand.u32 15, %v620_v8  ;;  %v9587_v58 = vld [vmem:[#allocation10 + $0x30] sm:$0xff]   ;;  %v14765_v53 = vsel %vm11993_vm9, 4294967295, %v14764_v53  ;;  %v9589_v8 = vld [vmem:[#allocation10 + $0x38] sm:$0xff]  }
 0x4b1   : > { %v2471_v30 = vor.u32 %v2469_v42, %v14760_v0  ;;  %8823 = vmatprep.subr.bf16.mxu0 %v14641_v13  ;;  %v14762_v2 = vsel %vm11988_vm6, 4294967295, %v14761_v2  ;;  %14766 = vst [vmem:[#allocation100_spill] sm:$0xff] %v14765_v53  ;;  %v2644_v40 = vsel %vm2608_vm2, 65537, %v14591_v22  ;;  %vm14767_vm0 = vsmask.f32 7424  ;;  %v12024_v0 = vld [vmem:[#allocation10 + $0x80] sm:$0xff]  }
 0x4b2   : > { %7437 = vmatmul.mubr.msk.bf16.gmra.mrb[76].mxu0 %vm11311_vm5, %v11332_v9  ;;  %14763 = vst [vmem:[#allocation99_spill] sm:$0xff] %v14762_v2  ;;  %v11999_v26 = vsel %vm14767_vm0, %v2468_v23, %v2469_v42  ;;  %v2646_v14 = vsel %vm2610_vm1, 65537, %v14591_v22  ;;  %vm14768_vm7 = vmmov %vm14767_vm0  ;;  %vm12009_vm3 = vcmp.lt.s32.totalorder %v808_v47, 15  ;;  %v7292_v23 = vcombine.low %v11079_v46, %v2644_v40  ;;  %v9599_v42 = vld [vmem:[#allocation11 + $0x10] sm:$0xff]  }
 0x4b3   : > { %7891 = vmatpush3.bf16.msra.mxu1 %v9585_v38  ;;  %4019 = vmatprep.mubr.bf16.mxu0 %v11195_v11  ;;  %v12007_v38 = vsel %vm14768_vm7, %v2471_v30, %v11530_v29  ;;  %vm12018_vm2 = vcmp.lt.s32.totalorder %v822_v51, 15  ;;  %v624_v29 = vadd.s32 248, %v10871_v5  ;;  %v7293_v6 = vcombine.low %v11079_v46, %v2646_v14  ;;  %vm2612_vm7 = vmpackc.low %vm12009_vm3, %vm12009_vm3 }
 0x4b4   : > { %7892 = vmatprep.subr.bf16.mxu1 %v9586_v39  ;;  %v622_v39 = vadd.s32 232, %v10871_v5  ;;  %vm2614_vm1 = vmpackc.low %vm12018_vm2, %vm12018_vm2  ;;  %vm12035_vm0 = vcmp.ne.s16.totalorder %v7292_v23, 0  ;;  %v14773_v47 = vmov 0  ;;  %v2648_v40 = vsel %vm2612_vm7, 65537, %v14591_v22  ;;  %8824 = vmatpush3.bf16.msra.mxu0 %v9599_v42 }
 0x4b5   : > { %v14774_v47 = vsel %vm12035_vm0, 4294967295, %v14773_v47  ;;  %v850_v51 = vand.u32 15, %v624_v29  ;;  %v626_v54 = vadd.s32 264, %v10871_v5  ;;  %8825 = vmatprep.subr.bf16.mxu0 %v14641_v13  ;;  %v633_v14 = vand.u32 15, %v10871_v5 }
 0x4b6   : > { %8704 = vmatmul.mubr.msk.bf16.gmra.mrb[44].mxu1 %vm11988_vm6, %v11999_v26  ;;  %v836_v30 = vand.u32 15, %v622_v39  ;;  %14775 = vst [vmem:[#allocation101_spill] sm:$0xff] %v14774_v47  ;;  %v7294_v39 = vcombine.low %v11079_v46, %v2648_v40  ;;  %v14791_v42 = vmov 0 }
 0x4b7   : > { %8707 = vmatprep.mubr.msk.bf16.mxu1 %vm11993_vm9, %v12007_v38  ;;  %7893 = vmatpush3.bf16.msra.mxu1 %v9587_v58  ;;  %vm12040_vm9 = vcmp.ne.s16.totalorder %v7293_v6, 0  ;;  %v14776_v58 = vmov 0  ;;  %vm1128_vm2 = vcmp.lt.s32.totalorder %v850_v51, 15  ;;  %v864_v29 = vand.u32 15, %v626_v54 }
 0x4b8   : > { %7894 = vmatprep.subr.bf16.mxu1 %v9588_v60  ;;  %v14777_v58 = vsel %vm12040_vm9, 4294967295, %v14776_v58  ;;  %v2650_v60 = vsel %vm2614_vm1, 65537, %v14591_v22  ;;  %vm12050_vm3 = vcmp.lt.s32.totalorder %v836_v30, 15  ;;  %vm2618_vm1 = vmpackc.low %vm1128_vm2, %vm1128_vm2  ;;  %v14784_v6 = vmov 0 }
 0x4b9   : > { %14778 = vst [vmem:[#allocation102_spill] sm:$0xff] %v14777_v58  ;;  %v7295_v23 = vcombine.low %v11079_v46, %v2650_v60  ;;  %vm2616_vm7 = vmpackc.low %vm12050_vm3, %vm12050_vm3  ;;  %v2654_v51 = vsel %vm2618_vm1, 65537, %v14591_v22  ;;  %vm1130_vm3 = vcmp.lt.s32.totalorder %v864_v29, 15  ;;  %v14787_v54 = vmov 0 }
 0x4ba   : > { %7438 = vmatmul.mubr.msk.bf16.gmra.mrb[80].mxu0 %vm11401_vm10, %v11425_v35  ;;  %v2652_v30 = vsel %vm2616_vm7, 65537, %v14591_v22  ;;  %v7297_v60 = vcombine.low %v11079_v46, %v2654_v51  ;;  %vm2620_vm2 = vmpackc.low %vm1130_vm3, %vm1130_vm3  ;;  %vm14794_vm3 = vsmask.f32 7424 }
 0x4bb   : > { %4027 = vmatprep.mubr.bf16.mxu0 %v11207_v1  ;;  %7895 = vmatpush3.bf16.msra.mxu1 %v9589_v8  ;;  %v14781_v8 = vmov 0  ;;  %v7296_v40 = vcombine.low %v11079_v46, %v2652_v30  ;;  %v2656_v29 = vsel %vm2620_vm2, 65537, %v14591_v22 }
 0x4bc   : > { %8723 = vmatprep.subr.bf16.mxu1 %v12024_v0  ;;  %vm12097_vm1 = vcmp.ne.s16.totalorder %v7297_v60, 0  ;;  %v7298_v51 = vcombine.low %v11079_v46, %v2656_v29 }
 0x4bd   : > { %vm12090_vm7 = vcmp.ne.s16.totalorder %v7296_v40, 0  ;;  %v14792_v42 = vsel %vm12097_vm1, 4294967295, %v14791_v42  ;;  %v14795_v40 = vshrl.u32 %v11405_v20, 16 }
 0x4be   : > { %8708 = vmatmul.mubr.msk.bf16.gmra.mrb[48].mxu1 %vm12035_vm0, %v11564_v33  ;;  %vm12066_vm0 = vcmp.ne.s16.totalorder %v7294_v39, 0  ;;  %v14788_v54 = vsel %vm12090_vm7, 4294967295, %v14787_v54  ;;  %v14790_v39 = vshll.u32 %v11405_v20, 16  ;;  %14793 = vst [vmem:[#allocation106_spill] sm:$0xff] %v14792_v42  ;;  %vm12121_vm2 = vcmp.ne.s16.totalorder %v7298_v51, 0 }
 0x4bf   : > { %8711 = vmatprep.mubr.msk.bf16.mxu1 %vm12040_vm9, %v11577_v48  ;;  %v14782_v8 = vsel %vm12066_vm0, 4294967295, %v14781_v8  ;;  %vm12071_vm9 = vcmp.ne.s16.totalorder %v7295_v23, 0  ;;  %14789 = vst [vmem:[#allocation105_spill] sm:$0xff] %v14788_v54  ;;  %v12119_v54 = vrot.slane %v14591_v22, 1 }
 0x4c0   : > { %14783 = vst [vmem:[#allocation103_spill] sm:$0xff] %v14782_v8  ;;  %v14785_v6 = vsel %vm12071_vm9, 4294967295, %v14784_v6  ;;  %v2490_v23 = vrot.slane %v14790_v39, 1  ;;  %v9601_v39 = vld [vmem:[#allocation11 + $0x18] sm:$0xff]  }
 0x4c1   : > { %14786 = vst [vmem:[#allocation104_spill] sm:$0xff] %v14785_v6  ;;  %14796 = vst [vmem:[#allocation107_spill] sm:$0xff] %v12119_v54  ;;  %8826 = vmatpush3.bf16.msra.mxu0 %v9601_v39  ;;  %v9592_v39 = vld [vmem:[#allocation10 + $0x90] sm:$0xff]  }
 0x4c2   : > { %7439 = vmatmul.mubr.msk.bf16.gmra.mrb[84].mxu0 %vm11481_vm4, %v11502_v56  ;;  %v12107_v30 = vsel %vm14794_vm3, %v11614_v28, %v2490_v23  ;;  %v2492_v60 = vor.u32 %v2490_v23, %v14795_v40  ;;  %v14797_v28 = vmov 0  ;;  %8827 = vmatprep.subr.bf16.mxu0 %v14641_v13  ;;  %v14803_v40 = vmov 0 }
 0x4c3   : > { %4035 = vmatprep.mubr.bf16.mxu0 %v11220_v61  ;;  %v14798_v28 = vsel %vm12121_vm2, 4294967295, %v14797_v28 }
 0x4c4   : > { %14799 = vst [vmem:[#allocation108_spill] sm:$0xff] %v14798_v28 }
 0x4c6   : > { %8712 = vmatmul.mubr.msk.bf16.gmra.mrb[52].mxu1 %vm12066_vm0, %v11585_v37 }
 0x4c7   : > { %8715 = vmatprep.mubr.msk.bf16.mxu1 %vm12071_vm9, %v11605_v18  ;;  %vm1061_vm9 = vcmp.ge.s32.totalorder %v633_v14, 1 }
 0x4c8   : > { %vm2280_vm0 = vmpackc.low %vm1061_vm9, %vm1061_vm9 }
 0x4c9   : > { %v2316_v14 = vsel %vm2280_vm0, 65537, %v14591_v22  ;;  %vm14800_vm9 = vmmov %vm14794_vm3  ;;  %vm2205_vm3 = vcmask 1040384  }
 0x4ca   : > { %7440 = vmatmul.mubr.msk.bf16.gmra.mrb[88].mxu0 %vm11520_vm13, %v11570_v7  ;;  %v12130_v23 = vsel %vm14800_vm9, %v2492_v60, %v12119_v54  ;;  %v7264_v29 = vcombine.low %v2316_v14, %v11079_v46  ;;  %v9591_v60 = vld [vmem:[#allocation10 + $0x88] sm:$0xff]   ;;  %v9603_v14 = vld [vmem:[#allocation11 + $0x20] sm:$0xff]  }
 0x4cb   : > { %4043 = vmatprep.mubr.bf16.mxu0 %v11228_v17  ;;  %8828 = vmatpush3.bf16.msra.mxu0 %v9603_v14  ;;  %v14810_v14 = vld [vmem:[#allocation59_spill] sm:$0xff] }
 0x4cc   : > { %vm12144_vm0 = vcmp.ne.s16.totalorder %v7264_v29, 0  ;;  %v9593_v29 = vld [vmem:[#allocation10 + $0x98] sm:$0xff]   ;;  %8829 = vmatprep.subr.bf16.mxu0 %v14641_v13 }
 0x4cd   : > { %v14804_v40 = vsel %vm12144_vm0, 4294967295, %v14803_v40 }
 0x4ce   : > { %8716 = vmatmul.mubr.msk.bf16.gmra.mrb[56].mxu1 %vm12090_vm7, %v11612_v32  ;;  %14805 = vst [vmem:[#allocation110_spill] sm:$0xff] %v14804_v40 }
 0x4cf   : > { %8719 = vmatprep.mubr.msk.bf16.mxu1 %vm12097_vm1, %v12107_v30  ;;  %vm14801_vm1 = vsmask.f32 256 }
 0x4d0   : > { %vm2206_vm7 = vmand %vm2205_vm3, %vm14801_vm1 }
 0x4d1   : > { %v12142_v51 = vsel %vm2206_vm7, 0, %v11105_v25  ;;  %vm14806_vm7 = vnez %v14721_v16 }
 0x4d2   : > { %7441 = vmatmul.mubr.msk.bf16.gmra.mrb[92].mxu0 %vm11639_vm12, %v11658_v27  ;;  %14802 = vst [vmem:[#allocation109_spill] sm:$0xff] %v12142_v51 }
 0x4d3   : > { %4051 = vmatprep.mubr.bf16.mxu0 %v11237_v45 }
 0x4d6   : > { %8720 = vmatmul.mubr.msk.bf16.gmra.mrb[60].mxu1 %vm12121_vm2, %v12130_v23 }
 0x4d7   : > { %3488 = vmatprep.mubr.bf16.mxu1 %v14591_v22 }
 0x4da   : > { %7442 = vmatmul.mubr.msk.bf16.gmra.mrb[96].mxu0 %vm11714_vm14, %v11729_v49 }
 0x4db   : > { %4059 = vmatprep.mubr.bf16.mxu0 %v11260_v52 }
 0x4de   : > { %7380 = vmatmul.mubr.msk.bf16.vlgmr.msra.gmra.mrb[64].mxu1 %vm12144_vm0, %v12142_v51  ;;  %v9612_v51 = vld [vmem:[#allocation11 + $0x38] sm:$0xff]  }
 0x4df   : > { %8724 = vmatpush3.bf16.msra.mxu1 %v12024_v0  ;;  %3496 = vmatprep.mubr.bf16.mxu1 %v11163_v12  ;;  %v9594_v12 = vld [vmem:[#allocation10 + $0xa0] sm:$0xff]   ;;  %v9596_v0 = vld [vmem:[#allocation10 + $0xa8] sm:$0xff]  }
 0x4e0   : > { %8725 = vmatprep.subr.bf16.mxu1 %v9591_v60 }
 0x4e2   : > { %7443 = vmatmul.mubr.msk.bf16.gmra.mrb[100].mxu0 %vm11794_vm8, %v11808_v62 }
 0x4e3   : > { %8726 = vmatpush3.bf16.msra.mxu1 %v9591_v60  ;;  %4067 = vmatprep.mubr.bf16.mxu0 %v11273_v34  ;;  %v14807_v60 = vld [vmem:[#allocation63_spill] sm:$0xff] }
 0x4e4   : > { %8727 = vmatprep.subr.bf16.mxu1 %v9592_v39 }
 0x4e6   : > { %7381 = vmatmul.mubr.msk.bf16.gmra.mrb[68].mxu1 %vm11154_vm11, %v11211_v55  ;;  %v9598_v55 = vld [vmem:[#allocation10 + $0xb0] sm:$0xff]   ;;  %vm14884_vm11 = vnez %v14792_v42 }
 0x4e7   : > { %3504 = vmatprep.mubr.bf16.mxu1 %v11169_v4  ;;  %8728 = vmatpush3.bf16.msra.mxu1 %v9592_v39  ;;  %v9606_v4 = vld [vmem:[#allocation11 + $0x28] sm:$0xff]   ;;  %v14808_v39 = vld [vmem:[#allocation68_spill] sm:$0xff] }
 0x4e8   : > { %8729 = vmatprep.subr.bf16.mxu1 %v9593_v29  ;;  %8830 = vmatpush3.bf16.msra.mxu0 %v9606_v4  ;;  %vm14809_vm1 = vnez %v14808_v39  ;;  %v14814_v4 = vld [vmem:[#allocation60_spill] sm:$0xff] }
 0x4e9   : > { %8831 = vmatprep.subr.bf16.mxu0 %v14641_v13 }
 0x4ea   : > { %7444 = vmatmul.mubr.msk.bf16.gmra.mrb[104].mxu0 %vm14806_vm7, %v11872_v59 }
 0x4eb   : > { %4075 = vmatprep.mubr.bf16.mxu0 %v11309_v15  ;;  %8730 = vmatpush3.bf16.msra.mxu1 %v9593_v29  ;;  %v9600_v29 = vld [vmem:[#allocation10 + $0xb8] sm:$0xff]  }
 0x4ec   : > { %8731 = vmatprep.subr.bf16.mxu1 %v9594_v12 }
 0x4ee   : > { %7382 = vmatmul.mubr.msk.bf16.gmra.mrb[72].mxu1 %vm11242_vm15, %v11264_v24  ;;  %v14811_v24 = vld [vmem:[#allocation66_spill] sm:$0xff]  ;;  %vm14881_vm15 = vnez %v14785_v6 }
 0x4ef   : > { %3512 = vmatprep.mubr.bf16.mxu1 %v11181_v63  ;;  %8732 = vmatpush3.bf16.msra.mxu1 %v9594_v12  ;;  %v12180_v63 = vld [vmem:[#allocation10 + $0x200] sm:$0xff]   ;;  %v14812_v12 = vld [vmem:[#allocation65_spill] sm:$0xff] }
 0x4f0   : > { %8733 = vmatprep.subr.bf16.mxu1 %v9596_v0  ;;  %vm14813_vm9 = vnez %v14812_v12 }
 0x4f2   : > { %7445 = vmatmul.mubr.msk.bf16.gmra.mrb[108].mxu0 %vm14809_vm1, %v14807_v60 }
 0x4f3   : > { %4083 = vmatprep.mubr.bf16.mxu0 %v14810_v14  ;;  %8734 = vmatpush3.bf16.msra.mxu1 %v9596_v0  ;;  %v14816_v0 = vld [vmem:[#allocation56_spill] sm:$0xff] }
 0x4f4   : > { %8735 = vmatprep.subr.bf16.mxu1 %v9598_v55  ;;  %vm14817_vm3 = vnez %v14816_v0 }
 0x4f6   : > { %7383 = vmatmul.mubr.msk.bf16.gmra.mrb[76].mxu1 %vm11311_vm5, %v11332_v9  ;;  %v14815_v9 = vld [vmem:[#allocation73_spill] sm:$0xff] }
 0x4f7   : > { %3520 = vmatprep.mubr.bf16.mxu1 %v11195_v11  ;;  %8736 = vmatpush3.bf16.msra.mxu1 %v9598_v55  ;;  %v9609_v11 = vld [vmem:[#allocation11 + $0x30] sm:$0xff]   ;;  %v14818_v55 = vld [vmem:[#allocation61_spill] sm:$0xff] }
 0x4f8   : > { %8737 = vmatprep.subr.bf16.mxu1 %v9600_v29  ;;  %8832 = vmatpush3.bf16.msra.mxu0 %v9609_v11  ;;  %v14822_v11 = vld [vmem:[#allocation62_spill] sm:$0xff] }
 0x4f9   : > { %8833 = vmatprep.subr.bf16.mxu0 %v14641_v13 }
 0x4fa   : > { %7446 = vmatmul.mubr.msk.bf16.gmra.mrb[112].mxu0 %vm14813_vm9, %v14811_v24 }
 0x4fb   : > { %4091 = vmatprep.mubr.bf16.mxu0 %v14814_v4  ;;  %8738 = vmatpush3.bf16.msra.mxu1 %v9600_v29  ;;  %v14819_v29 = vld [vmem:[#allocation75_spill] sm:$0xff] }
 0x4fc   : > { %8771 = vmatprep.subr.bf16.mxu1 %v12180_v63  ;;  %8834 = vmatpush3.bf16.msra.mxu0 %v9612_v51  ;;  %v14827_v51 = vld [vmem:[#allocation82_spill] sm:$0xff] }
 0x4fd   : > { %8839 = vmatprep.subr.bf16.mxu0 %v14641_v13 }
 0x4fe   : > { %7384 = vmatmul.mubr.msk.bf16.gmra.mrb[80].mxu1 %vm11401_vm10, %v11425_v35  ;;  %v14820_v35 = vld [vmem:[#allocation74_spill] sm:$0xff] }
 0x4ff   : > { %3528 = vmatprep.mubr.bf16.mxu1 %v11207_v1  ;;  %vm14821_vm0 = vnez %v14820_v35  ;;  %v627_v1 = vadd.s32 272, %v10871_v5  ;;  %v14841_v35 = vmov 0 }
 0x501   : > { %v871_v40 = vand.u32 15, %v627_v1 }
 0x502   : > { %7447 = vmatmul.mubr.msk.bf16.gmra.mrb[116].mxu0 %vm14817_vm3, %v14815_v9 }
 0x503   : > { %4099 = vmatprep.mubr.bf16.mxu0 %v14818_v55  ;;  %vm1095_vm10 = vcmp.ge.s32.totalorder %v871_v40, 1 }
 0x504   : > { %vm2314_vm5 = vmpackc.low %vm1095_vm10, %vm1095_vm10 }
 0x506   : > { %7385 = vmatmul.mubr.msk.bf16.gmra.mrb[84].mxu1 %vm11481_vm4, %v11502_v56  ;;  %v14823_v56 = vld [vmem:[#allocation78_spill] sm:$0xff] }
 0x507   : > { %3536 = vmatprep.mubr.bf16.mxu1 %v11220_v61  ;;  %v14824_v61 = vld [vmem:[#allocation77_spill] sm:$0xff] }
 0x508   : > { %vm14825_vm4 = vnez %v14824_v61 }
 0x50a   : > { %7448 = vmatmul.mubr.msk.bf16.gmra.mrb[120].mxu0 %vm14821_vm0, %v14819_v29 }
 0x50b   : > { %4107 = vmatprep.mubr.bf16.mxu0 %v14822_v11 }
 0x50e   : > { %7386 = vmatmul.mubr.msk.bf16.gmra.mrb[88].mxu1 %vm11520_vm13, %v11570_v7  ;;  %v14826_v7 = vld [vmem:[#allocation84_spill] sm:$0xff]  ;;  %vm14828_vm13 = vnez %v14827_v51 }
 0x50f   : > { %3544 = vmatprep.mubr.bf16.mxu1 %v11228_v17  ;;  %v2350_v17 = vsel %vm2314_vm5, 65537, %v14591_v22  ;;  %vm14833_vm5 = vsmask.f32 256 }
 0x510   : > { %v7281_v40 = vcombine.low %v2350_v17, %v11079_v46 }
 0x512   : > { %7449 = vmatmul.mubr.msk.bf16.gmra.mrb[124].mxu0 %vm14825_vm4, %v14823_v56  ;;  %vm12229_vm10 = vcmp.ne.s16.totalorder %v7281_v40, 0 }
 0x513   : > { %4115 = vmatprep.mubr.bf16.mxu0 %v11405_v20  ;;  %v14829_v20 = vmov 0 }
 0x514   : > { %v14830_v20 = vsel %vm12229_vm10, 4294967295, %v14829_v20 }
 0x515   : > { %14831 = vst [vmem:[#allocation63_spill] sm:$0xff] %v14830_v20 }
 0x516   : > { %7387 = vmatmul.mubr.msk.bf16.gmra.mrb[92].mxu1 %vm11639_vm12, %v11658_v27  ;;  %vm14880_vm12 = vnez %v14782_v8 }
 0x517   : > { %3552 = vmatprep.mubr.bf16.mxu1 %v11237_v45  ;;  %v14832_v45 = vld [vmem:[#allocation79_spill] sm:$0xff] }
 0x518   : > { %v2186_v27 = vsel %vm14833_vm5, %v14832_v45, %v11105_v25  ;;  %v14860_v25 = vld [vmem:[#allocation94_spill] sm:$0xff] }
 0x51a   : > { %7450 = vmatmul.mubr.msk.bf16.gmra.mrb[128].mxu0 %vm14828_vm13, %v14826_v7  ;;  %vm14834_vm13 = vmmov 0  }
 0x51b   : > { %4123 = vmatprep.mubr.bf16.mxu0 %v14591_v22 }
 0x51e   : > { %7388 = vmatmul.mubr.msk.bf16.gmra.mrb[96].mxu1 %vm11714_vm14, %v11729_v49  ;;  %vm14879_vm14 = vnez %v14777_v58 }
 0x51f   : > { %3560 = vmatprep.mubr.bf16.mxu1 %v11260_v52  ;;  %v4364_v52 = vld [vmem:[%s588_s1] sm:$0x1]  ;;  %s7008_s1 = sshll.u32 %s13978_s13, 4  ;;  %s14101_s1 = int_to_ptr.vmem [resolvable:$true] %s7008_s1 }
 0x520   : > { %s10220_s12 = scalar_lea.vmem %s14101_s1, 4096 }
 0x521   : > { %p10221_p1 = scmp.ne.s32.totalorder %s14101_s1, %s10220_s12 }
 0x522   : > { %7451 = vmatmul.mubr.msk.bf16.gmra.mrb[132].mxu0 %vm12229_vm10, %v2186_v27 }
 0x523   : > { %8835 = vmatprep.mubr.msk.bf16.mxu0 %vm14834_vm13, %v14641_v13  ;;  %p10222_p0 = pnand %p10221_p1, %p15121_p13 }
 0x525   : > { %p10223_p2 = pneg %p10222_p0 }
 0x526   : > { %7389 = vmatmul.mubr.msk.bf16.gmra.mrb[100].mxu1 %vm11794_vm8, %v11808_v62  ;;  %vm14878_vm8 = vnez %v14774_v47 }
 0x527   : > { %3568 = vmatprep.mubr.bf16.mxu1 %v11273_v34  ;;  %v7760_v49 = vpop.f32.mrb[32].mxu0 }
 0x528   : > { %v7761_v1 = vpop.f32.mrb[33].mxu0 }
 0x529   : > { %v12254_v17 = vadd.f32 %v7761_v1, %v7760_v49  ;;  %v7763_v7 = vpop.f32.mrb[34].mxu0 }
 0x52a   : > { %8836 = vmatmul.mubr.bf16.vlgmr.msra.gmra.mrb[136].mxu0 %v4364_v52  ;;  %v7764_v40 = vpop.f32.mrb[35].mxu0 }
 0x52b   : > { %8855 = vmatprep.mubr.msk.bf16.mxu0 %vm14834_vm13, %v14641_v13  ;;  %v12256_v62 = vadd.f32 %v7764_v40, %v7763_v7  ;;  %v594_v7 = vadd.s32 8, %v10871_v5  ;;  %v14861_v13 = vld [vmem:[#allocation92_spill] sm:$0xff] }
 0x52d   : > { %v640_v51 = vand.u32 15, %v594_v7 }
 0x52e   : > { %7390 = vmatmul.mubr.msk.bf16.gmra.mrb[104].mxu1 %vm14806_vm7, %v11872_v59  ;;  %vm14877_vm7 = vnez %v14765_v53 }
 0x52f   : > { %3576 = vmatprep.mubr.bf16.mxu1 %v11309_v15  ;;  %v7766_v34 = vpop.f32.mrb[36].mxu0  ;;  %vm1098_vm5 = vcmp.lt.s32.totalorder %v640_v51, 15 }
 0x530   : > { %v7767_v45 = vpop.f32.mrb[37].mxu0  ;;  %vm2588_vm10 = vmpackc.low %vm1098_vm5, %vm1098_vm5  ;;  %vm14846_vm5 = vsmask.f32 7424 }
 0x531   : > { %v12262_v27 = vadd.f32 %v7767_v45, %v7766_v34  ;;  %v7769_v59 = vpop.f32.mrb[38].mxu0 }
 0x532   : > { %v7770_v52 = vpop.f32.mrb[39].mxu0 }
 0x533   : > { %v12264_v20 = vadd.f32 %v7770_v52, %v7769_v59 }
 0x536   : > { %7391 = vmatmul.mubr.msk.bf16.gmra.mrb[108].mxu1 %vm14809_vm1, %v14807_v60  ;;  %vm14874_vm1 = vnez %v14749_v19 }
 0x537   : > { %3584 = vmatprep.mubr.bf16.mxu1 %v14810_v14 }
 0x538   : > { %v7772_v15 = vpop.f32.mrb[40].mxu0 }
 0x539   : > { %v7773_v49 = vpop.f32.mrb[41].mxu0 }
 0x53a   : > { %v12270_v1 = vadd.f32 %v7773_v49, %v7772_v15  ;;  %v7775_v60 = vpop.f32.mrb[42].mxu0 }
 0x53b   : > { %v7776_v14 = vpop.f32.mrb[43].mxu0 }
 0x53c   : > { %v12273_v34 = vadd.f32 %v7776_v14, %v7775_v60 }
 0x53d   : > { %v7820_v40 = vpop.f32.mrb[8].mxu1 }
 0x53e   : > { %7392 = vmatmul.mubr.msk.bf16.gmra.mrb[112].mxu1 %vm14813_vm9, %v14811_v24  ;;  %v7821_v45 = vpop.f32.mrb[9].mxu1 }
 0x53f   : > { %3592 = vmatprep.mubr.bf16.mxu1 %v14814_v4  ;;  %v12275_v59 = vadd.f32 %v7821_v45, %v7820_v40  ;;  %v7823_v52 = vpop.f32.mrb[10].mxu1 }
 0x540   : > { %v7824_v39 = vpop.f32.mrb[11].mxu1 }
 0x541   : > { %14836 = vst [vmem:[#allocation59_spill] sm:$0xff] %v12275_v59  ;;  %v12277_v12 = vadd.f32 %v7824_v39, %v7823_v52  ;;  %v7778_v24 = vpop.f32.mrb[44].mxu0 }
 0x542   : > { %v7779_v4 = vpop.f32.mrb[45].mxu0 }
 0x543   : > { %14837 = vst [vmem:[#allocation66_spill] sm:$0xff] %v12277_v12  ;;  %v12283_v15 = vadd.f32 %v7779_v4, %v7778_v24  ;;  %v7781_v49 = vpop.f32.mrb[46].mxu0 }
 0x544   : > { %v7782_v60 = vpop.f32.mrb[47].mxu0 }
 0x545   : > { %v7826_v14 = vpop.f32.mrb[12].mxu1  ;;  %v12285_v40 = vadd.f32 %v7782_v60, %v7781_v49 }
 0x546   : > { %7393 = vmatmul.mubr.msk.bf16.gmra.mrb[116].mxu1 %vm14817_vm3, %v14815_v9  ;;  %v7827_v7 = vpop.f32.mrb[13].mxu1  ;;  %v2624_v9 = vsel %vm2588_vm10, 65537, %v14591_v22 }
 0x547   : > { %3600 = vmatprep.mubr.bf16.mxu1 %v14818_v55  ;;  %v12287_v39 = vadd.f32 %v7827_v7, %v7826_v14  ;;  %v7829_v45 = vpop.f32.mrb[14].mxu1  ;;  %v7282_v4 = vcombine.low %v11079_v46, %v2624_v9 }
 0x548   : > { %v7830_v52 = vpop.f32.mrb[15].mxu1 }
 0x549   : > { %14838 = vst [vmem:[#allocation60_spill] sm:$0xff] %v12287_v39  ;;  %v12289_v16 = vadd.f32 %v7830_v52, %v7829_v45  ;;  %v7784_v0 = vpop.f32.mrb[48].mxu0  ;;  %vm12303_vm10 = vcmp.ne.s16.totalorder %v7282_v4, 0  ;;  %v14870_v39 = vld [vmem:[#allocation96_spill] sm:$0xff] }
 0x54a   : > { %v7785_v55 = vpop.f32.mrb[49].mxu0  ;;  %v14842_v35 = vsel %vm12303_vm10, 4294967295, %v14841_v35  ;;  %vm14871_vm9 = vnez %v14870_v39 }
 0x54b   : > { %14839 = vst [vmem:[#allocation73_spill] sm:$0xff] %v12289_v16  ;;  %v12296_v51 = vadd.f32 %v7785_v55, %v7784_v0  ;;  %v7787_v24 = vpop.f32.mrb[50].mxu0  ;;  %14843 = vst [vmem:[#allocation75_spill] sm:$0xff] %v14842_v35  ;;  %v14869_v16 = vld [vmem:[#allocation98_spill] sm:$0xff] }
 0x54c   : > { %v7788_v49 = vpop.f32.mrb[51].mxu0 }
 0x54d   : > { %v7832_v60 = vpop.f32.mrb[16].mxu1  ;;  %v12299_v14 = vadd.f32 %v7788_v49, %v7787_v24 }
 0x54e   : > { %7394 = vmatmul.mubr.msk.bf16.gmra.mrb[120].mxu1 %vm14821_vm0, %v14819_v29  ;;  %v7833_v7 = vpop.f32.mrb[17].mxu1  ;;  %vm14862_vm0 = vnez %v14861_v13 }
 0x54f   : > { %3608 = vmatprep.mubr.bf16.mxu1 %v14822_v11  ;;  %v12301_v45 = vadd.f32 %v7833_v7, %v7832_v60  ;;  %v7835_v52 = vpop.f32.mrb[18].mxu1  ;;  %v14845_v11 = vld [vmem:[#allocation80_spill] sm:$0xff] }
 0x550   : > { %v7836_v44 = vpop.f32.mrb[19].mxu1  ;;  %v2446_v9 = vsel %vm14846_vm5, %v12119_v54, %v14845_v11  ;;  %vm14851_vm5 = vnez %v14850_v57 }
 0x551   : > { %14840 = vst [vmem:[#allocation61_spill] sm:$0xff] %v12301_v45  ;;  %v12307_v29 = vadd.f32 %v7836_v44, %v7835_v52  ;;  %v7790_v0 = vpop.f32.mrb[52].mxu0 }
 0x552   : > { %v7791_v55 = vpop.f32.mrb[53].mxu0 }
 0x553   : > { %14844 = vst [vmem:[#allocation62_spill] sm:$0xff] %v12307_v29  ;;  %v12317_v24 = vadd.f32 %v7791_v55, %v7790_v0  ;;  %v7793_v4 = vpop.f32.mrb[54].mxu0  ;;  %v14853_v55 = vld [vmem:[#allocation87_spill] sm:$0xff] }
 0x554   : > { %v7794_v49 = vpop.f32.mrb[55].mxu0 }
 0x555   : > { %v12319_v44 = vadd.f32 %v7794_v49, %v7793_v4 }
 0x556   : > { %7395 = vmatmul.mubr.msk.bf16.gmra.mrb[124].mxu1 %vm14825_vm4, %v14823_v56  ;;  %v7838_v60 = vpop.f32.mrb[20].mxu1 }
 0x557   : > { %8739 = vmatprep.mubr.msk.bf16.mxu1 %vm12303_vm10, %v2446_v9  ;;  %v7839_v7 = vpop.f32.mrb[21].mxu1  ;;  %v14852_v9 = vld [vmem:[#allocation89_spill] sm:$0xff]  ;;  %vm14854_vm10 = vnez %v14853_v55 }
 0x558   : > { %v12321_v52 = vadd.f32 %v7839_v7, %v7838_v60  ;;  %v7841_v61 = vpop.f32.mrb[22].mxu1  ;;  %v9605_v60 = vld [vmem:[#allocation10 + $0x210] sm:$0xff]  }
 0x559   : > { %v7842_v56 = vpop.f32.mrb[23].mxu1 }
 0x55a   : > { %14847 = vst [vmem:[#allocation78_spill] sm:$0xff] %v12321_v52  ;;  %v12323_v50 = vadd.f32 %v7842_v56, %v7841_v61  ;;  %v9610_v52 = vld [vmem:[#allocation10 + $0x228] sm:$0xff]  }
 0x55b   : > { %v7796_v11 = vpop.f32.mrb[56].mxu0 }
 0x55c   : > { %14848 = vst [vmem:[#allocation84_spill] sm:$0xff] %v12323_v50  ;;  %v7797_v0 = vpop.f32.mrb[57].mxu0 }
 0x55d   : > { %v12332_v4 = vadd.f32 %v7797_v0, %v7796_v11  ;;  %v7799_v49 = vpop.f32.mrb[58].mxu0  ;;  %v14857_v11 = vld [vmem:[#allocation90_spill] sm:$0xff]  ;;  %v14858_v0 = vld [vmem:[#allocation88_spill] sm:$0xff] }
 0x55e   : > { %8740 = vmatmul.mubr.msk.bf16.vlgmr.msra.gmra.mrb[32].mxu1 %vm14851_vm5, %v14849_v43  ;;  %v7800_v7 = vpop.f32.mrb[59].mxu0  ;;  %v7844_v61 = vpop.f32.mrb[24].mxu1  ;;  %vm14859_vm4 = vnez %v14858_v0 }
 0x55f   : > { %8772 = vmatpush3.bf16.msra.mxu1 %v12180_v63  ;;  %8743 = vmatprep.mubr.msk.bf16.mxu1 %vm14854_vm10, %v14852_v9  ;;  %v12334_v56 = vadd.f32 %v7800_v7, %v7799_v49  ;;  %v7845_v35 = vpop.f32.mrb[25].mxu1  ;;  %v9607_v63 = vld [vmem:[#allocation10 + $0x218] sm:$0xff]   ;;  %v9608_v7 = vld [vmem:[#allocation10 + $0x220] sm:$0xff]  }
 0x560   : > { %8773 = vmatprep.subr.bf16.mxu1 %v9604_v21  ;;  %v12336_v31 = vadd.f32 %v7845_v35, %v7844_v61  ;;  %v7847_v43 = vpop.f32.mrb[26].mxu1 }
 0x561   : > { %v7848_v10 = vpop.f32.mrb[27].mxu1 }
 0x562   : > { %14855 = vst [vmem:[#allocation79_spill] sm:$0xff] %v12336_v31  ;;  %v12338_v3 = vadd.f32 %v7848_v10, %v7847_v43 }
 0x563   : > { %8774 = vmatpush3.bf16.msra.mxu1 %v9604_v21  ;;  %v7802_v57 = vpop.f32.mrb[60].mxu0 }
 0x564   : > { %8775 = vmatprep.subr.bf16.mxu1 %v9605_v60  ;;  %14856 = vst [vmem:[#allocation80_spill] sm:$0xff] %v12338_v3  ;;  %v7803_v36 = vpop.f32.mrb[61].mxu0 }
 0x565   : > { %v12346_v35 = vadd.f32 %v7803_v36, %v7802_v57  ;;  %v7805_v49 = vpop.f32.mrb[62].mxu0  ;;  %v14866_v36 = vld [vmem:[#allocation95_spill] sm:$0xff]  ;;  %v14867_v57 = vld [vmem:[#allocation93_spill] sm:$0xff] }
 0x566   : > { %8744 = vmatmul.mubr.msk.bf16.gmra.mrb[36].mxu1 %vm14859_vm4, %v14857_v11  ;;  %v7806_v21 = vpop.f32.mrb[63].mxu0  ;;  %vm14868_vm3 = vnez %v14867_v57 }
 0x567   : > { %8747 = vmatprep.mubr.msk.bf16.mxu1 %vm14862_vm0, %v14860_v25  ;;  %8776 = vmatpush3.bf16.msra.mxu1 %v9605_v60  ;;  %v7850_v61 = vpop.f32.mrb[28].mxu1  ;;  %v12348_v10 = vadd.f32 %v7806_v21, %v7805_v49 }
 0x568   : > { %8777 = vmatprep.subr.bf16.mxu1 %v9607_v63  ;;  %v7851_v43 = vpop.f32.mrb[29].mxu1 }
 0x569   : > { %14863 = vst [vmem:[#allocation85_spill] sm:$0xff] %v12348_v10  ;;  %v12350_v3 = vadd.f32 %v7851_v43, %v7850_v61  ;;  %v7853_v31 = vpop.f32.mrb[30].mxu1  ;;  %v9611_v61 = vld [vmem:[#allocation10 + $0x230] sm:$0xff]  }
 0x56a   : > { %v7854_v50 = vpop.f32.mrb[31].mxu1 }
 0x56b   : > { %14864 = vst [vmem:[#allocation89_spill] sm:$0xff] %v12350_v3  ;;  %8778 = vmatpush3.bf16.msra.mxu1 %v9607_v63  ;;  %v12352_v29 = vadd.f32 %v7854_v50, %v7853_v31  ;;  %v9613_v31 = vld [vmem:[#allocation10 + $0x238] sm:$0xff]  }
 0x56c   : > { %8779 = vmatprep.subr.bf16.mxu1 %v9608_v7 }
 0x56d   : > { %14865 = vst [vmem:[#allocation90_spill] sm:$0xff] %v12352_v29  ;;  %v7808_v60 = vpop.f32.mrb[64].mxu0 }
 0x56e   : > { %8748 = vmatmul.mubr.msk.bf16.gmra.mrb[40].mxu1 %vm14868_vm3, %v14866_v36  ;;  %v7809_v45 = vpop.f32.mrb[65].mxu0 }
 0x56f   : > { %8751 = vmatprep.mubr.msk.bf16.mxu1 %vm14871_vm9, %v14869_v16  ;;  %8780 = vmatpush3.bf16.msra.mxu1 %v9608_v7  ;;  %v12360_v49 = vadd.f32 %v7809_v45, %v7808_v60  ;;  %v7811_v21 = vpop.f32.mrb[66].mxu0 }
 0x570   : > { %v7812_v63 = vpop.f32.mrb[67].mxu0  ;;  %8781 = vmatprep.subr.bf16.mxu1 %v9610_v52 }
 0x571   : > { %14872 = vst [vmem:[#allocation88_spill] sm:$0xff] %v12360_v49  ;;  %v12362_v43 = vadd.f32 %v7812_v63, %v7811_v21 }
 0x573   : > { %14873 = vst [vmem:[#allocation94_spill] sm:$0xff] %v12362_v43  ;;  %8782 = vmatpush3.bf16.msra.mxu1 %v9610_v52 }
 0x574   : > { %8783 = vmatprep.subr.bf16.mxu1 %v9611_v61 }
 0x575   : > { %v7814_v50 = vpop.f32.mrb[68].mxu0 }
 0x576   : > { %8752 = vmatmul.mubr.msk.bf16.gmra.mrb[44].mxu1 %vm14874_vm1, %v11955_v41  ;;  %v7815_v29 = vpop.f32.mrb[69].mxu0 }
 0x577   : > { %8755 = vmatprep.mubr.msk.bf16.mxu1 %vm11988_vm6, %v11999_v26  ;;  %v12370_v45 = vadd.f32 %v7815_v29, %v7814_v50  ;;  %v7817_v7 = vpop.f32.mrb[70].mxu0  ;;  %8784 = vmatpush3.bf16.msra.mxu1 %v9611_v61 }
 0x578   : > { %v7818_v60 = vpop.f32.mrb[71].mxu0  ;;  %8785 = vmatprep.subr.bf16.mxu1 %v9613_v31 }
 0x579   : > { %14875 = vst [vmem:[#allocation95_spill] sm:$0xff] %v12370_v45  ;;  %v12372_v21 = vadd.f32 %v7818_v60, %v7817_v7 }
 0x57b   : > { %14876 = vst [vmem:[#allocation98_spill] sm:$0xff] %v12372_v21  ;;  %8786 = vmatpush3.bf16.msra.mxu1 %v9613_v31 }
 0x57d   : > { %v8032_v52 = vpop.f32.mrb[72].mxu0 }
 0x57e   : > { %8756 = vmatmul.mubr.msk.bf16.gmra.mrb[48].mxu1 %vm14877_vm7, %v12007_v38  ;;  %v8033_v63 = vpop.f32.mrb[73].mxu0 }
 0x57f   : > { %8759 = vmatprep.mubr.msk.bf16.mxu1 %vm14878_vm8, %v11564_v33  ;;  %v12380_v3 = vadd.f32 %v8033_v63, %v8032_v52  ;;  %v8035_v29 = vpop.f32.mrb[74].mxu0 }
 0x580   : > { %v8036_v50 = vpop.f32.mrb[75].mxu0 }
 0x581   : > { %v12382_v61 = vadd.f32 %v8036_v50, %v8035_v29  ;;  %v14882_v50 = vld [vmem:[#allocation105_spill] sm:$0xff] }
 0x582   : > { %vm14883_vm5 = vnez %v14882_v50 }
 0x585   : > { %v8038_v12 = vpop.f32.mrb[76].mxu0 }
 0x586   : > { %8760 = vmatmul.mubr.msk.bf16.gmra.mrb[52].mxu1 %vm14879_vm14, %v11577_v48  ;;  %v8039_v31 = vpop.f32.mrb[77].mxu0 }
 0x587   : > { %8763 = vmatprep.mubr.msk.bf16.mxu1 %vm14880_vm12, %v11585_v37  ;;  %v12390_v7 = vadd.f32 %v8039_v31, %v8038_v12  ;;  %v8041_v60 = vpop.f32.mrb[78].mxu0 }
 0x588   : > { %v8042_v59 = vpop.f32.mrb[79].mxu0 }
 0x589   : > { %v12392_v52 = vadd.f32 %v8042_v59, %v8041_v60 }
 0x58d   : > { %v8044_v63 = vpop.f32.mrb[80].mxu0 }
 0x58e   : > { %8764 = vmatmul.mubr.msk.bf16.gmra.mrb[56].mxu1 %vm14881_vm15, %v11605_v18  ;;  %v8045_v29 = vpop.f32.mrb[81].mxu0 }
 0x58f   : > { %8767 = vmatprep.mubr.msk.bf16.mxu1 %vm14883_vm5, %v11612_v32  ;;  %v12400_v21 = vadd.f32 %v8045_v29, %v8044_v63  ;;  %v8047_v45 = vpop.f32.mrb[82].mxu0 }
 0x590   : > { %v8048_v43 = vpop.f32.mrb[83].mxu0 }
 0x591   : > { %v12402_v12 = vadd.f32 %v8048_v43, %v8047_v45 }
 0x595   : > { %v8050_v31 = vpop.f32.mrb[84].mxu0 }
 0x596   : > { %8768 = vmatmul.mubr.msk.bf16.gmra.mrb[60].mxu1 %vm14884_vm11, %v12107_v30  ;;  %v8051_v59 = vpop.f32.mrb[85].mxu0 }
 0x597   : > { %8787 = vmatprep.mubr.msk.bf16.mxu1 %vm14854_vm10, %v14852_v9  ;;  %v12410_v60 = vadd.f32 %v8051_v59, %v8050_v31  ;;  %v8053_v49 = vpop.f32.mrb[86].mxu0 }
 0x598   : > { %v8054_v10 = vpop.f32.mrb[87].mxu0 }
 0x599   : > { %v12412_v63 = vadd.f32 %v8054_v10, %v8053_v49 }
 0x59d   : > { %v8056_v29 = vpop.f32.mrb[88].mxu0 }
 0x59e   : > { %8788 = vmatmul.mubr.msk.bf16.vlgmr.msra.gmra.mrb[32].mxu1 %vm14859_vm4, %v14857_v11  ;;  %v8057_v43 = vpop.f32.mrb[89].mxu0 }
 0x59f   : > { %8791 = vmatprep.mubr.msk.bf16.mxu1 %vm14862_vm0, %v14860_v25  ;;  %v12420_v45 = vadd.f32 %v8057_v43, %v8056_v29  ;;  %v8059_v55 = vpop.f32.mrb[90].mxu0 }
 0x5a0   : > { %v8060_v9 = vpop.f32.mrb[91].mxu0 }
 0x5a1   : > { %v12422_v31 = vadd.f32 %v8060_v9, %v8059_v55 }
 0x5a5   : > { %v8062_v59 = vpop.f32.mrb[92].mxu0 }
 0x5a6   : > { %8792 = vmatmul.mubr.msk.bf16.gmra.mrb[36].mxu1 %vm14868_vm3, %v14866_v36  ;;  %v8063_v10 = vpop.f32.mrb[93].mxu0 }
 0x5a7   : > { %8795 = vmatprep.mubr.msk.bf16.mxu1 %vm14871_vm9, %v14869_v16  ;;  %v12430_v11 = vadd.f32 %v8063_v10, %v8062_v59  ;;  %v8065_v49 = vpop.f32.mrb[94].mxu0 }
 0x5a8   : > { %v8066_v25 = vpop.f32.mrb[95].mxu0 }
 0x5a9   : > { %v12432_v29 = vadd.f32 %v8066_v25, %v8065_v49 }
 0x5ad   : > { %v8068_v43 = vpop.f32.mrb[96].mxu0 }
 0x5ae   : > { %8796 = vmatmul.mubr.msk.bf16.gmra.mrb[40].mxu1 %vm14874_vm1, %v11955_v41  ;;  %v8069_v55 = vpop.f32.mrb[97].mxu0 }
 0x5af   : > { %8799 = vmatprep.mubr.msk.bf16.mxu1 %vm11988_vm6, %v11999_v26  ;;  %v12440_v36 = vadd.f32 %v8069_v55, %v8068_v43  ;;  %v8071_v9 = vpop.f32.mrb[98].mxu0 }
 0x5b0   : > { %v8072_v16 = vpop.f32.mrb[99].mxu0 }
 0x5b1   : > { %v7896_v59 = vpop.f32.mrb[64].mxu1  ;;  %v12442_v10 = vadd.f32 %v8072_v16, %v8071_v9 }
 0x5b2   : > { %v7897_v39 = vpop.f32.mrb[65].mxu1 }
 0x5b3   : > { %v7898_v49 = vadd.f32 %v7897_v39, %v7896_v59  ;;  %v7899_v25 = vpop.f32.mrb[66].mxu1 }
 0x5b4   : > { %v7900_v57 = vpop.f32.mrb[67].mxu1 }
 0x5b5   : > { %v9042_v13 = vadd.f32 %v7898_v49, %v12254_v17  ;;  %v7901_v19 = vadd.f32 %v7900_v57, %v7899_v25  ;;  %v8074_v41 = vpop.f32.mrb[100].mxu0 }
 0x5b6   : > { %8800 = vmatmul.mubr.msk.bf16.gmra.mrb[44].mxu1 %vm14877_vm7, %v12007_v38  ;;  %v8075_v26 = vpop.f32.mrb[101].mxu0 }
 0x5b7   : > { %v9048_v43 = vadd.f32 %v7901_v19, %v12256_v62  ;;  %8803 = vmatprep.mubr.msk.bf16.mxu1 %vm14878_vm8, %v11564_v33  ;;  %v12452_v55 = vadd.f32 %v8075_v26, %v8074_v41  ;;  %v8077_v39 = vpop.f32.mrb[102].mxu0  ;;  %v12455_v9 = vadd.f32 %v9042_v13, %v12380_v3  ;;  %v628_v13 = vadd.s32 280, %v10871_v5 }
 0x5b8   : > { %v8078_v17 = vpop.f32.mrb[103].mxu0 }
 0x5b9   : > { %v7902_v57 = vpop.f32.mrb[68].mxu1  ;;  %v12457_v16 = vadd.f32 %v8078_v17, %v8077_v39  ;;  %v12460_v59 = vadd.f32 %v9048_v43, %v12382_v61 }
 0x5ba   : > { %v7903_v38 = vpop.f32.mrb[69].mxu1 }
 0x5bb   : > { %v7904_v49 = vadd.f32 %v7903_v38, %v7902_v57  ;;  %v7905_v19 = vpop.f32.mrb[70].mxu1  ;;  %v878_v38 = vand.u32 15, %v628_v13 }
 0x5bc   : > { %v7906_v62 = vpop.f32.mrb[71].mxu1 }
 0x5bd   : > { %v9039_v25 = vadd.f32 %v7904_v49, %v12262_v27  ;;  %v7907_v33 = vadd.f32 %v7906_v62, %v7905_v19  ;;  %v8080_v41 = vpop.f32.mrb[104].mxu0 }
 0x5be   : > { %8804 = vmatmul.mubr.msk.bf16.gmra.mrb[48].mxu1 %vm14879_vm14, %v11577_v48  ;;  %v8081_v3 = vpop.f32.mrb[105].mxu0 }
 0x5bf   : > { %v9045_v26 = vadd.f32 %v7907_v33, %v12264_v20  ;;  %8807 = vmatprep.mubr.msk.bf16.mxu1 %vm14880_vm12, %v11585_v37  ;;  %v12471_v61 = vadd.f32 %v8081_v3, %v8080_v41  ;;  %v8083_v43 = vpop.f32.mrb[106].mxu0  ;;  %v12474_v27 = vadd.f32 %v9039_v25, %v12390_v7  ;;  %vm12485_vm12 = vcmp.lt.s32.totalorder %v878_v38, 15 }
 0x5c0   : > { %v8084_v39 = vpop.f32.mrb[107].mxu0 }
 0x5c1   : > { %v7908_v17 = vpop.f32.mrb[72].mxu1  ;;  %v12476_v57 = vadd.f32 %v8084_v39, %v8083_v43  ;;  %v12479_v48 = vadd.f32 %v9045_v26, %v12392_v52 }
 0x5c2   : > { %v7909_v5 = vpop.f32.mrb[73].mxu1 }
 0x5c3   : > { %v7910_v20 = vadd.f32 %v7909_v5, %v7908_v17  ;;  %v7911_v49 = vpop.f32.mrb[74].mxu1 }
 0x5c4   : > { %v7912_v19 = vpop.f32.mrb[75].mxu1 }
 0x5c5   : > { %v9054_v37 = vadd.f32 %v7910_v20, %v12270_v1  ;;  %v7913_v62 = vadd.f32 %v7912_v19, %v7911_v49  ;;  %v8086_v33 = vpop.f32.mrb[108].mxu0 }
 0x5c6   : > { %8808 = vmatmul.mubr.msk.bf16.gmra.mrb[52].mxu1 %vm14881_vm15, %v11605_v18  ;;  %v8087_v25 = vpop.f32.mrb[109].mxu0  ;;  %vm2622_vm15 = vmpackc.low %vm12485_vm12, %vm12485_vm12  ;;  %vm14887_vm12 = vsmask.f32 7424 }
 0x5c7   : > { %v9060_v52 = vadd.f32 %v7913_v62, %v12273_v34  ;;  %8811 = vmatprep.mubr.msk.bf16.mxu1 %vm14883_vm5, %v11612_v32  ;;  %v12493_v41 = vadd.f32 %v8087_v25, %v8086_v33  ;;  %v8089_v1 = vpop.f32.mrb[110].mxu0  ;;  %v12496_v3 = vadd.f32 %v9054_v37, %v12400_v21  ;;  %v2658_v5 = vsel %vm2622_vm15, 65537, %v14591_v22 }
 0x5c8   : > { %v8090_v13 = vpop.f32.mrb[111].mxu0  ;;  %vm2512_vm5 = vcmask 1047552  }
 0x5c9   : > { %v7914_v26 = vpop.f32.mrb[76].mxu1  ;;  %v12501_v18 = vadd.f32 %v8090_v13, %v8089_v1  ;;  %v12504_v34 = vadd.f32 %v9060_v52, %v12402_v12  ;;  %v7299_v12 = vcombine.low %v11079_v46, %v2658_v5  ;;  %vm2513_vm15 = vmand %vm2512_vm5, %vm14887_vm12  ;;  %v14889_v1 = vmov 0 }
 0x5ca   : > { %v7915_v43 = vpop.f32.mrb[77].mxu1  ;;  %v12528_v46 = vsel %vm2513_vm15, %v12119_v54, 0 }
 0x5cb   : > { %v7916_v39 = vadd.f32 %v7915_v43, %v7914_v26  ;;  %v7917_v32 = vpop.f32.mrb[78].mxu1  ;;  %14888 = vst [vmem:[#allocation111_spill] sm:$0xff] %v12528_v46 }
 0x5cc   : > { %v7918_v17 = vpop.f32.mrb[79].mxu1 }
 0x5cd   : > { %v9051_v21 = vadd.f32 %v7916_v39, %v12283_v15  ;;  %v7919_v38 = vadd.f32 %v7918_v17, %v7917_v32  ;;  %v8092_v20 = vpop.f32.mrb[112].mxu0 }
 0x5ce   : > { %8812 = vmatmul.mubr.msk.bf16.gmra.mrb[56].mxu1 %vm14884_vm11, %v12107_v30  ;;  %v8093_v49 = vpop.f32.mrb[113].mxu0 }
 0x5cf   : > { %v9057_v19 = vadd.f32 %v7919_v38, %v12285_v40  ;;  %8815 = vmatprep.mubr.msk.bf16.mxu1 %vm12121_vm2, %v12130_v23  ;;  %v12516_v37 = vadd.f32 %v8093_v49, %v8092_v20  ;;  %v8095_v62 = vpop.f32.mrb[114].mxu0  ;;  %v12519_v15 = vadd.f32 %v9051_v21, %v12410_v60  ;;  %vm12530_vm2 = vcmp.ne.s16.totalorder %v7299_v12, 0 }
 0x5d0   : > { %v8096_v33 = vpop.f32.mrb[115].mxu0  ;;  %v14890_v1 = vsel %vm12530_vm2, 4294967295, %v14889_v1 }
 0x5d1   : > { %v7920_v7 = vpop.f32.mrb[80].mxu1  ;;  %v12522_v30 = vadd.f32 %v8096_v33, %v8095_v62  ;;  %v12525_v40 = vadd.f32 %v9057_v19, %v12412_v63  ;;  %14891 = vst [vmem:[#allocation112_spill] sm:$0xff] %v14890_v1 }
 0x5d2   : > { %v7921_v25 = vpop.f32.mrb[81].mxu1 }
 0x5d3   : > { %v7922_v52 = vadd.f32 %v7921_v25, %v7920_v7  ;;  %v7923_v23 = vpop.f32.mrb[82].mxu1 }
 0x5d4   : > { %v7924_v60 = vpop.f32.mrb[83].mxu1 }
 0x5d5   : > { %v9066_v13 = vadd.f32 %v7922_v52, %v12296_v51  ;;  %v7925_v26 = vadd.f32 %v7924_v60, %v7923_v23  ;;  %v8098_v43 = vpop.f32.mrb[116].mxu0 }
 0x5d6   : > { %8816 = vmatmul.mubr.msk.bf16.gmra.mrb[60].mxu1 %vm12530_vm2, %v12528_v46  ;;  %v8099_v63 = vpop.f32.mrb[117].mxu0  ;;  %v14900_v46 = vld [vmem:[#allocation73_spill] sm:$0xff] }
 0x5d7   : > { %v9072_v39 = vadd.f32 %v7925_v26, %v12299_v14  ;;  %v12539_v32 = vadd.f32 %v8099_v63, %v8098_v43  ;;  %v8101_v17 = vpop.f32.mrb[118].mxu0  ;;  %v12542_v5 = vadd.f32 %v9066_v13, %v12420_v45 }
 0x5d8   : > { %v8102_v21 = vpop.f32.mrb[119].mxu0 }
 0x5d9   : > { %v7926_v38 = vpop.f32.mrb[84].mxu1  ;;  %v12544_v20 = vadd.f32 %v8102_v21, %v8101_v17  ;;  %v12547_v51 = vadd.f32 %v9072_v39, %v12422_v31 }
 0x5da   : > { %v7927_v49 = vpop.f32.mrb[85].mxu1 }
 0x5db   : > { %v7928_v19 = vadd.f32 %v7927_v49, %v7926_v38  ;;  %v7929_v12 = vpop.f32.mrb[86].mxu1 }
 0x5dc   : > { %v7930_v62 = vpop.f32.mrb[87].mxu1 }
 0x5dd   : > { %v9063_v33 = vadd.f32 %v7928_v19, %v12317_v24  ;;  %v7931_v14 = vadd.f32 %v7930_v62, %v7929_v12  ;;  %v8104_v7 = vpop.f32.mrb[120].mxu0 }
 0x5de   : > { %v8105_v25 = vpop.f32.mrb[121].mxu0 }
 0x5df   : > { %v9069_v52 = vadd.f32 %v7931_v14, %v12319_v44  ;;  %v12551_v45 = vadd.f32 %v8105_v25, %v8104_v7  ;;  %v8107_v23 = vpop.f32.mrb[122].mxu0  ;;  %v12554_v60 = vadd.f32 %v9063_v33, %v12430_v11 }
 0x5e0   : > { %v8108_v13 = vpop.f32.mrb[123].mxu0 }
 0x5e1   : > { %v7932_v31 = vpop.f32.mrb[88].mxu1  ;;  %v12556_v26 = vadd.f32 %v8108_v13, %v8107_v23  ;;  %v12559_v43 = vadd.f32 %v9069_v52, %v12432_v29 }
 0x5e2   : > { %v7933_v63 = vpop.f32.mrb[89].mxu1 }
 0x5e3   : > { %v7934_v24 = vadd.f32 %v7933_v63, %v7932_v31  ;;  %v7935_v39 = vpop.f32.mrb[90].mxu1 }
 0x5e4   : > { %v7936_v17 = vpop.f32.mrb[91].mxu1 }
 0x5e5   : > { %v9078_v21 = vadd.f32 %v7934_v24, %v12332_v4  ;;  %v7937_v44 = vadd.f32 %v7936_v17, %v7935_v39  ;;  %v8110_v38 = vpop.f32.mrb[124].mxu0  ;;  %v14892_v24 = vld [vmem:[#allocation85_spill] sm:$0xff] }
 0x5e6   : > { %v8111_v49 = vpop.f32.mrb[125].mxu0 }
 0x5e7   : > { %v9084_v19 = vadd.f32 %v7937_v44, %v12334_v56  ;;  %v12563_v11 = vadd.f32 %v8111_v49, %v8110_v38  ;;  %v8113_v12 = vpop.f32.mrb[126].mxu0  ;;  %v12566_v62 = vadd.f32 %v9078_v21, %v12440_v36 }
 0x5e8   : > { %v8114_v33 = vpop.f32.mrb[127].mxu0 }
 0x5e9   : > { %v7938_v29 = vpop.f32.mrb[92].mxu1  ;;  %v12568_v14 = vadd.f32 %v8114_v33, %v8113_v12  ;;  %v12571_v7 = vadd.f32 %v9084_v19, %v12442_v10 }
 0x5ea   : > { %v7939_v25 = vpop.f32.mrb[93].mxu1 }
 0x5eb   : > { %v7940_v4 = vadd.f32 %v7939_v25, %v7938_v29  ;;  %v7941_v52 = vpop.f32.mrb[94].mxu1  ;;  %v14893_v29 = vld [vmem:[#allocation88_spill] sm:$0xff] }
 0x5ec   : > { %v7942_v23 = vpop.f32.mrb[95].mxu1 }
 0x5ed   : > { %v9075_v13 = vadd.f32 %v7940_v4, %v12346_v35  ;;  %v7943_v56 = vadd.f32 %v7942_v23, %v7941_v52  ;;  %v8116_v31 = vpop.f32.mrb[128].mxu0 }
 0x5ee   : > { %v8117_v63 = vpop.f32.mrb[129].mxu0 }
 0x5ef   : > { %v9081_v39 = vadd.f32 %v7943_v56, %v14892_v24  ;;  %v12575_v36 = vadd.f32 %v8117_v63, %v8116_v31  ;;  %v8119_v17 = vpop.f32.mrb[130].mxu0  ;;  %v12578_v21 = vadd.f32 %v9075_v13, %v12452_v55  ;;  %v14894_v56 = vld [vmem:[#allocation94_spill] sm:$0xff] }
 0x5f0   : > { %v8120_v44 = vpop.f32.mrb[131].mxu0 }
 0x5f1   : > { %v7944_v10 = vpop.f32.mrb[96].mxu1  ;;  %v12580_v38 = vadd.f32 %v8120_v44, %v8119_v17  ;;  %v12583_v49 = vadd.f32 %v9081_v39, %v12457_v16 }
 0x5f2   : > { %v7945_v19 = vpop.f32.mrb[97].mxu1 }
 0x5f3   : > { %v7946_v35 = vadd.f32 %v7945_v19, %v7944_v10  ;;  %v7947_v12 = vpop.f32.mrb[98].mxu1 }
 0x5f4   : > { %v7948_v33 = vpop.f32.mrb[99].mxu1 }
 0x5f5   : > { %v9090_v25 = vadd.f32 %v7946_v35, %v14893_v29  ;;  %v7949_v4 = vadd.f32 %v7948_v33, %v7947_v12  ;;  %v8122_v52 = vpop.f32.mrb[132].mxu0  ;;  %v14895_v12 = vld [vmem:[#allocation95_spill] sm:$0xff] }
 0x5f6   : > { %v8123_v23 = vpop.f32.mrb[133].mxu0 }
 0x5f7   : > { %v9096_v31 = vadd.f32 %v7949_v4, %v14894_v56  ;;  %v12587_v55 = vadd.f32 %v8123_v23, %v8122_v52  ;;  %v8125_v13 = vpop.f32.mrb[134].mxu0  ;;  %v12590_v63 = vadd.f32 %v9090_v25, %v12471_v61  ;;  %v14896_v23 = vld [vmem:[#allocation98_spill] sm:$0xff] }
 0x5f8   : > { %v8126_v24 = vpop.f32.mrb[135].mxu0 }
 0x5f9   : > { %v7950_v16 = vpop.f32.mrb[100].mxu1  ;;  %v12592_v39 = vadd.f32 %v8126_v24, %v8125_v13  ;;  %v12595_v17 = vadd.f32 %v9096_v31, %v12476_v57 }
 0x5fa   : > { %v7951_v44 = vpop.f32.mrb[101].mxu1 }
 0x5fb   : > { %v7952_v10 = vadd.f32 %v7951_v44, %v7950_v16  ;;  %v7953_v19 = vpop.f32.mrb[102].mxu1 }
 0x5fc   : > { %v7954_v35 = vpop.f32.mrb[103].mxu1 }
 0x5fd   : > { %v9087_v33 = vadd.f32 %v7952_v10, %v14895_v12  ;;  %v7955_v29 = vadd.f32 %v7954_v35, %v7953_v19  ;;  %v12598_v4 = vpop.f32.mrb[136].mxu0  ;;  %v14897_v10 = vld [vmem:[#allocation59_spill] sm:$0xff]  ;;  %v14898_v12 = vld [vmem:[#allocation66_spill] sm:$0xff] }
 0x5fe   : > { %v8837_v52 = vpop.f32.mrb[137].mxu0 }
 0x5ff   : > { %v9093_v61 = vadd.f32 %v7955_v29, %v14896_v23  ;;  %v4467_v25 = vpop.f32.mrb[138].mxu0  ;;  %v12602_v56 = vadd.f32 %v9087_v33, %v12493_v41 }
 0x600   : > { %v8838_v13 = vpop.f32.mrb[139].mxu0 }
 0x601   : > { %v7956_v24 = vpop.f32.mrb[104].mxu1  ;;  %v12605_v57 = vadd.f32 %v9093_v61, %v12501_v18  ;;  %v14899_v13 = vld [vmem:[#allocation60_spill] sm:$0xff] }
 0x602   : > { %v7957_v31 = vpop.f32.mrb[105].mxu1 }
 0x603   : > { %v7958_v16 = vadd.f32 %v7957_v31, %v7956_v24  ;;  %v7959_v44 = vpop.f32.mrb[106].mxu1 }
 0x604   : > { %v7960_v1 = vpop.f32.mrb[107].mxu1 }
 0x605   : > { %v9102_v19 = vadd.f32 %v7958_v16, %v14897_v10  ;;  %v7961_v35 = vadd.f32 %v7960_v1, %v7959_v44 }
 0x607   : > { %v9108_v52 = vadd.f32 %v7961_v35, %v14898_v12  ;;  %v12610_v29 = vadd.f32 %v9102_v19, %v12516_v37  ;;  %v14901_v35 = vld [vmem:[#allocation61_spill] sm:$0xff] }
 0x609   : > { %v7962_v23 = vpop.f32.mrb[108].mxu1  ;;  %v12613_v41 = vadd.f32 %v9108_v52, %v12522_v30 }
 0x60a   : > { %v7963_v33 = vpop.f32.mrb[109].mxu1 }
 0x60b   : > { %v7964_v25 = vadd.f32 %v7963_v33, %v7962_v23  ;;  %v7965_v18 = vpop.f32.mrb[110].mxu1  ;;  %v14902_v23 = vld [vmem:[#allocation62_spill] sm:$0xff] }
 0x60c   : > { %v7966_v61 = vpop.f32.mrb[111].mxu1 }
 0x60d   : > { %v9099_v24 = vadd.f32 %v7964_v25, %v14899_v13  ;;  %v7967_v31 = vadd.f32 %v7966_v61, %v7965_v18  ;;  %v14903_v13 = vld [vmem:[#allocation78_spill] sm:$0xff] }
 0x60f   : > { %v9105_v22 = vadd.f32 %v7967_v31, %v14900_v46  ;;  %v12618_v1 = vadd.f32 %v9099_v24, %v12539_v32 }
 0x611   : > { %v7968_v16 = vpop.f32.mrb[112].mxu1  ;;  %v12621_v37 = vadd.f32 %v9105_v22, %v12544_v20 }
 0x612   : > { %v7969_v44 = vpop.f32.mrb[113].mxu1 }
 0x613   : > { %v7970_v10 = vadd.f32 %v7969_v44, %v7968_v16  ;;  %v7971_v30 = vpop.f32.mrb[114].mxu1  ;;  %v14904_v16 = vld [vmem:[#allocation84_spill] sm:$0xff] }
 0x614   : > { %v7972_v19 = vpop.f32.mrb[115].mxu1 }
 0x615   : > { %v9114_v12 = vadd.f32 %v7970_v10, %v14901_v35  ;;  %v7973_v52 = vadd.f32 %v7972_v19, %v7971_v30 }
 0x617   : > { %v9120_v33 = vadd.f32 %v7973_v52, %v14902_v23  ;;  %v12626_v25 = vadd.f32 %v9114_v12, %v12551_v45  ;;  %v14905_v52 = vld [vmem:[#allocation79_spill] sm:$0xff] }
 0x619   : > { %v7974_v46 = vpop.f32.mrb[116].mxu1  ;;  %v12629_v32 = vadd.f32 %v9120_v33, %v12556_v26 }
 0x61a   : > { %v7975_v18 = vpop.f32.mrb[117].mxu1 }
 0x61b   : > { %v7976_v61 = vadd.f32 %v7975_v18, %v7974_v46  ;;  %v7977_v22 = vpop.f32.mrb[118].mxu1  ;;  %v14906_v46 = vld [vmem:[#allocation80_spill] sm:$0xff] }
 0x61c   : > { %v7978_v20 = vpop.f32.mrb[119].mxu1 }
 0x61d   : > { %v9111_v24 = vadd.f32 %v7976_v61, %v14903_v13  ;;  %v7979_v31 = vadd.f32 %v7978_v20, %v7977_v22 }
 0x61f   : > { %v9117_v44 = vadd.f32 %v7979_v31, %v14904_v16  ;;  %v12634_v10 = vadd.f32 %v9111_v24, %v12563_v11  ;;  %v14907_v31 = vld [vmem:[#allocation89_spill] sm:$0xff] }
 0x621   : > { %v7980_v30 = vpop.f32.mrb[120].mxu1  ;;  %v12637_v45 = vadd.f32 %v9117_v44, %v12568_v14 }
 0x622   : > { %v7981_v19 = vpop.f32.mrb[121].mxu1 }
 0x623   : > { %v7982_v35 = vadd.f32 %v7981_v19, %v7980_v30  ;;  %v7983_v26 = vpop.f32.mrb[122].mxu1  ;;  %v14908_v30 = vld [vmem:[#allocation90_spill] sm:$0xff] }
 0x624   : > { %v7984_v12 = vpop.f32.mrb[123].mxu1 }
 0x625   : > { %v9126_v23 = vadd.f32 %v7982_v35, %v14905_v52  ;;  %v7985_v33 = vadd.f32 %v7984_v12, %v7983_v26  ;;  %v9614_v26 = vld [vmem:[#allocation13] sm:$0xff]   ;;  %v14909_v12 = vmov 0.0   ;;  %v9616_v52 = vld [vmem:[#allocation13 + $0x10] sm:$0xff]  }
 0x626   : > { %8840 = vmatpush3.bf16.msra.mxu0 %v9614_v26 }
 0x627   : > { %v9132_v18 = vadd.f32 %v7985_v33, %v14906_v46  ;;  %v12642_v61 = vadd.f32 %v9126_v23, %v12575_v36  ;;  %8841 = vmatprep.subr.bf16.mxu0 %v14909_v12  ;;  %v9617_v23 = vld [vmem:[#allocation13 + $0x18] sm:$0xff]   ;;  %v9618_v33 = vld [vmem:[#allocation13 + $0x20] sm:$0xff]  }
 0x628   : > { %v9621_v46 = vld [vmem:[#allocation13 + $0x38] sm:$0xff]  }
 0x629   : > { %v7986_v22 = vpop.f32.mrb[124].mxu1  ;;  %v12645_v11 = vadd.f32 %v9132_v18, %v12580_v38  ;;  %v9615_v38 = vld [vmem:[#allocation13 + $0x8] sm:$0xff]   ;;  %v4381_v18 = vld [vmem:[%s14910_s30] sm:$0x1]  ;;  %s15119_s30 = sld [smem:[#allocation118_spill]] }
 0x62a   : > { %v7987_v20 = vpop.f32.mrb[125].mxu1  ;;  %8842 = vmatpush3.bf16.msra.mxu0 %v9615_v38 }
 0x62b   : > { %v7988_v13 = vadd.f32 %v7987_v20, %v7986_v22  ;;  %v7989_v14 = vpop.f32.mrb[126].mxu1  ;;  %8843 = vmatprep.subr.bf16.mxu0 %v14909_v12  ;;  %v4465_v22 = vadd.f32 %v12598_v4, %v4381_v18 }
 0x62c   : > { %v7990_v24 = vpop.f32.mrb[127].mxu1 }
 0x62d   : > { %v9123_v16 = vadd.f32 %v7988_v13, %v14907_v31  ;;  %v7991_v44 = vadd.f32 %v7990_v24, %v7989_v14  ;;  %v12670_v13 = vld [vmem:[%s14911_s18] ss:$0 sm:$0xff]  ;;  %v14912_v24 = vld [vmem:[#allocation57_spill] sm:$0xff]  ;;  %s10319_s18 = smov [#allocation17]  }
 0x62e   : > { %8844 = vmatpush3.bf16.msra.mxu0 %v9616_v52  ;;  %v12674_v31 = vrot.slane %v4465_v22, %v14912_v24  ;;  %s10224_s29 = sshll.u32 %s10319_s18, 4  ;;  %s10225_s29 = int_to_ptr.vmem [resolvable:$false] %s10224_s29 }
 0x62f   : > { %v9129_v19 = vadd.f32 %v7991_v44, %v14908_v30  ;;  %v12650_v35 = vadd.f32 %v9123_v16, %v12587_v55  ;;  %8845 = vmatprep.subr.bf16.mxu0 %v14909_v12  ;;  %v9619_v55 = vld [vmem:[#allocation13 + $0x28] sm:$0xff]   ;;  %s14099_s8 = scalar_lea.hbm %s15119_s30, %s7701_s2  ;;  %s10226_s17 = scalar_lea.vmem %s10225_s29, 8192 }
 0x630   : > { %p10227_p8 = scmp.lt.s32.totalorder %s14101_s1, %s10225_s29  ;;  %p10228_p4 = scmp.lt.s32.totalorder %s10226_s17, %s10220_s12 }
 0x631   : > { %v12653_v36 = vadd.f32 %v9129_v19, %v12592_v39  ;;  %v9620_v39 = vld [vmem:[#allocation13 + $0x30] sm:$0xff]  }
 0x632   : > { %8846 = vmatpush3.bf16.msra.mxu0 %v9617_v23  ;;  %p10229_p10 = por %p10228_p4, %p10227_p8 }
 0x633   : > { %8847 = vmatprep.subr.bf16.mxu0 %v14909_v12 }
 0x634   : > { %p10230_p11 = pnand %p10229_p10, %p10223_p2 }
 0x636   : > { %8848 = vmatpush3.bf16.msra.mxu0 %v9618_v33 }
 0x637   : > { %8849 = vmatprep.subr.bf16.mxu0 %v14909_v12 }
 0x63a   : > { %8850 = vmatpush3.bf16.msra.mxu0 %v9619_v55 }
 0x63b   : > { %8851 = vmatprep.subr.bf16.mxu0 %v14909_v12 }
 0x63e   : > { %8852 = vmatpush3.bf16.msra.mxu0 %v9620_v39 }
 0x63f   : > { %8853 = vmatprep.subr.bf16.mxu0 %v14909_v12 }
 0x642   : > { %8854 = vmatpush3.bf16.msra.mxu0 %v9621_v46 }
 0x643   : > { %8859 = vmatprep.subr.bf16.mxu0 %v14909_v12 }
 0x671   : > { %v8789_v20 = vpop.f32.mrb[32].mxu1 }
 0x672   : > { %v9041_v14 = vadd.f32 %v12474_v27, %v8789_v20  ;;  %v4166_v16 = vpop.f32.mrb[33].mxu1 }
 0x673   : > { %v9044_v44 = vadd.f32 %v12455_v9, %v4166_v16  ;;  %v8790_v30 = vpop.f32.mrb[34].mxu1 }
 0x674   : > { %v4334_v19 = vadd.f32 %v9041_v14, %v12670_v13  ;;  %v9047_v26 = vadd.f32 %v12479_v48, %v8790_v30  ;;  %v4169_v4 = vpop.f32.mrb[35].mxu1 }
 0x675   : > { %v4332_v38 = vadd.f32 %v9044_v44, %v12670_v13  ;;  %v9050_v52 = vadd.f32 %v12460_v59, %v4169_v4 }
 0x676   : > { %v12682_v23 = vadd.f32 %v12674_v31, %v4334_v19  ;;  %v4335_v27 = vadd.f32 %v9047_v26, %v12670_v13 }
 0x677   : > { %v12686_v33 = vadd.f32 %v12674_v31, %v4332_v38  ;;  %v4333_v9 = vadd.f32 %v9050_v52, %v12670_v13 }
 0x678   : > { %v12690_v55 = vadd.f32 %v12674_v31, %v4335_v27 }
 0x679   : > { %v12693_v48 = vadd.f32 %v12674_v31, %v4333_v9  ;;  %v8793_v39 = vpop.f32.mrb[36].mxu1 }
 0x67a   : > { %v9053_v46 = vadd.f32 %v12519_v15, %v8793_v39  ;;  %v4182_v59 = vpop.f32.mrb[37].mxu1 }
 0x67b   : > { %v4506_v18 = vadd.f32 %v12693_v48, %v12686_v33  ;;  %v9056_v22 = vadd.f32 %v12496_v3, %v4182_v59  ;;  %v8794_v20 = vpop.f32.mrb[38].mxu1 }
 0x67c   : > { %v4338_v14 = vadd.f32 %v9053_v46, %v12670_v13  ;;  %v9059_v16 = vadd.f32 %v12525_v40, %v8794_v20  ;;  %v4185_v44 = vpop.f32.mrb[39].mxu1 }
 0x67d   : > { %v4507_v30 = vadd.f32 %v4506_v18, %v12682_v23  ;;  %v4336_v19 = vadd.f32 %v9056_v22, %v12670_v13  ;;  %v9062_v26 = vadd.f32 %v12504_v34, %v4185_v44 }
 0x67e   : > { %v12705_v15 = vadd.f32 %v12674_v31, %v4338_v14  ;;  %v4339_v4 = vadd.f32 %v9059_v16, %v12670_v13 }
 0x67f   : > { %v12709_v38 = vadd.f32 %v12674_v31, %v4336_v19  ;;  %v4508_v3 = vadd.f32 %v4507_v30, %v12690_v55  ;;  %v4337_v52 = vadd.f32 %v9062_v26, %v12670_v13 }
 0x680   : > { %v12714_v40 = vadd.f32 %v12674_v31, %v4339_v4 }
 0x681   : > { %v4509_v27 = vadd.f32 %v4508_v3, %v12709_v38  ;;  %v12718_v9 = vadd.f32 %v12674_v31, %v4337_v52  ;;  %v8797_v34 = vpop.f32.mrb[40].mxu1 }
 0x682   : > { %v9065_v39 = vadd.f32 %v12554_v60, %v8797_v34  ;;  %v4198_v46 = vpop.f32.mrb[41].mxu1 }
 0x683   : > { %v4510_v59 = vadd.f32 %v4509_v27, %v12718_v9  ;;  %v9068_v18 = vadd.f32 %v12542_v5, %v4198_v46  ;;  %v8798_v22 = vpop.f32.mrb[42].mxu1 }
 0x684   : > { %v4342_v20 = vadd.f32 %v9065_v39, %v12670_v13  ;;  %v9071_v14 = vadd.f32 %v12559_v43, %v8798_v22  ;;  %v4201_v16 = vpop.f32.mrb[43].mxu1 }
 0x685   : > { %v4511_v44 = vadd.f32 %v4510_v59, %v12705_v15  ;;  %v4340_v30 = vadd.f32 %v9068_v18, %v12670_v13  ;;  %v9074_v19 = vadd.f32 %v12547_v51, %v4201_v16 }
 0x686   : > { %v12729_v26 = vadd.f32 %v12674_v31, %v4342_v20  ;;  %v4343_v60 = vadd.f32 %v9071_v14, %v12670_v13 }
 0x687   : > { %v12733_v4 = vadd.f32 %v12674_v31, %v4340_v30  ;;  %v4512_v5 = vadd.f32 %v4511_v44, %v12714_v40  ;;  %v4341_v3 = vadd.f32 %v9074_v19, %v12670_v13 }
 0x688   : > { %v12738_v43 = vadd.f32 %v12674_v31, %v4343_v60 }
 0x689   : > { %v4513_v52 = vadd.f32 %v4512_v5, %v12733_v4  ;;  %v12742_v27 = vadd.f32 %v12674_v31, %v4341_v3  ;;  %v8801_v51 = vpop.f32.mrb[44].mxu1 }
 0x68a   : > { %v9077_v34 = vadd.f32 %v12578_v21, %v8801_v51  ;;  %v4214_v39 = vpop.f32.mrb[45].mxu1 }
 0x68b   : > { %v4514_v46 = vadd.f32 %v4513_v52, %v12742_v27  ;;  %v9080_v59 = vadd.f32 %v12566_v62, %v4214_v39  ;;  %v8802_v18 = vpop.f32.mrb[46].mxu1 }
 0x68c   : > { %v4346_v22 = vadd.f32 %v9077_v34, %v12670_v13  ;;  %v9083_v20 = vadd.f32 %v12583_v49, %v8802_v18  ;;  %v4217_v14 = vpop.f32.mrb[47].mxu1 }
 0x68d   : > { %v4515_v16 = vadd.f32 %v4514_v46, %v12729_v26  ;;  %v4344_v44 = vadd.f32 %v9080_v59, %v12670_v13  ;;  %v9086_v30 = vadd.f32 %v12571_v7, %v4217_v14 }
 0x68e   : > { %v12753_v19 = vadd.f32 %v12674_v31, %v4346_v22  ;;  %v4347_v21 = vadd.f32 %v9083_v20, %v12670_v13 }
 0x68f   : > { %v12757_v60 = vadd.f32 %v12674_v31, %v4344_v44  ;;  %v4516_v62 = vadd.f32 %v4515_v16, %v12738_v43  ;;  %v4345_v5 = vadd.f32 %v9086_v30, %v12670_v13 }
 0x690   : > { %v12762_v49 = vadd.f32 %v12674_v31, %v4347_v21 }
 0x691   : > { %v4517_v3 = vadd.f32 %v4516_v62, %v12757_v60  ;;  %v12766_v52 = vadd.f32 %v12674_v31, %v4345_v5  ;;  %v8805_v7 = vpop.f32.mrb[48].mxu1 }
 0x692   : > { %v9089_v51 = vadd.f32 %v12602_v56, %v8805_v7  ;;  %v4230_v34 = vpop.f32.mrb[49].mxu1 }
 0x693   : > { %v4518_v39 = vadd.f32 %v4517_v3, %v12766_v52  ;;  %v9092_v46 = vadd.f32 %v12590_v63, %v4230_v34  ;;  %v8806_v59 = vpop.f32.mrb[50].mxu1 }
 0x694   : > { %v4350_v18 = vadd.f32 %v9089_v51, %v12670_v13  ;;  %v9095_v22 = vadd.f32 %v12605_v57, %v8806_v59  ;;  %v4233_v20 = vpop.f32.mrb[51].mxu1 }
 0x695   : > { %v4519_v14 = vadd.f32 %v4518_v39, %v12753_v19  ;;  %v4348_v16 = vadd.f32 %v9092_v46, %v12670_v13  ;;  %v9098_v44 = vadd.f32 %v12595_v17, %v4233_v20 }
 0x696   : > { %v12777_v30 = vadd.f32 %v12674_v31, %v4350_v18  ;;  %v4351_v56 = vadd.f32 %v9095_v22, %v12670_v13 }
 0x697   : > { %v12781_v21 = vadd.f32 %v12674_v31, %v4348_v16  ;;  %v4520_v63 = vadd.f32 %v4519_v14, %v12762_v49  ;;  %v4349_v62 = vadd.f32 %v9098_v44, %v12670_v13 }
 0x698   : > { %v12786_v57 = vadd.f32 %v12674_v31, %v4351_v56 }
 0x699   : > { %v4521_v5 = vadd.f32 %v4520_v63, %v12781_v21  ;;  %v12790_v3 = vadd.f32 %v12674_v31, %v4349_v62  ;;  %v8809_v17 = vpop.f32.mrb[52].mxu1 }
 0x69a   : > { %v9101_v7 = vadd.f32 %v12618_v1, %v8809_v17  ;;  %v4246_v51 = vpop.f32.mrb[53].mxu1 }
 0x69b   : > { %v4522_v34 = vadd.f32 %v4521_v5, %v12790_v3  ;;  %v9104_v39 = vadd.f32 %v12610_v29, %v4246_v51  ;;  %v8810_v46 = vpop.f32.mrb[54].mxu1 }
 0x69c   : > { %v4354_v59 = vadd.f32 %v9101_v7, %v12670_v13  ;;  %v9107_v18 = vadd.f32 %v12621_v37, %v8810_v46  ;;  %v4249_v22 = vpop.f32.mrb[55].mxu1 }
 0x69d   : > { %v4523_v20 = vadd.f32 %v4522_v34, %v12777_v30  ;;  %v4352_v14 = vadd.f32 %v9104_v39, %v12670_v13  ;;  %v9110_v16 = vadd.f32 %v12613_v41, %v4249_v22 }
 0x69e   : > { %v12801_v44 = vadd.f32 %v12674_v31, %v4354_v59  ;;  %v4355_v1 = vadd.f32 %v9107_v18, %v12670_v13 }
 0x69f   : > { %v12805_v56 = vadd.f32 %v12674_v31, %v4352_v14  ;;  %v4524_v29 = vadd.f32 %v4523_v20, %v12786_v57  ;;  %v4353_v63 = vadd.f32 %v9110_v16, %v12670_v13 }
 0x6a0   : > { %v12810_v37 = vadd.f32 %v12674_v31, %v4355_v1 }
 0x6a1   : > { %v4525_v62 = vadd.f32 %v4524_v29, %v12805_v56  ;;  %v12814_v5 = vadd.f32 %v12674_v31, %v4353_v63  ;;  %v8813_v41 = vpop.f32.mrb[56].mxu1 }
 0x6a2   : > { %v9113_v17 = vadd.f32 %v12634_v10, %v8813_v41  ;;  %v4262_v7 = vpop.f32.mrb[57].mxu1 }
 0x6a3   : > { %v4526_v51 = vadd.f32 %v4525_v62, %v12814_v5  ;;  %v9116_v34 = vadd.f32 %v12626_v25, %v4262_v7  ;;  %v8814_v39 = vpop.f32.mrb[58].mxu1 }
 0x6a4   : > { %v4358_v46 = vadd.f32 %v9113_v17, %v12670_v13  ;;  %v9119_v59 = vadd.f32 %v12637_v45, %v8814_v39  ;;  %v4265_v18 = vpop.f32.mrb[59].mxu1 }
 0x6a5   : > { %v4527_v22 = vadd.f32 %v4526_v51, %v12801_v44  ;;  %v4356_v20 = vadd.f32 %v9116_v34, %v12670_v13  ;;  %v9122_v14 = vadd.f32 %v12629_v32, %v4265_v18 }
 0x6a6   : > { %v12825_v16 = vadd.f32 %v12674_v31, %v4358_v46  ;;  %v4359_v10 = vadd.f32 %v9119_v59, %v12670_v13 }
 0x6a7   : > { %v12829_v1 = vadd.f32 %v12674_v31, %v4356_v20  ;;  %v4528_v25 = vadd.f32 %v4527_v22, %v12810_v37  ;;  %v4357_v29 = vadd.f32 %v9122_v14, %v12670_v13 }
 0x6a8   : > { %v12834_v45 = vadd.f32 %v12674_v31, %v4359_v10 }
 0x6a9   : > { %v4529_v63 = vadd.f32 %v4528_v25, %v12829_v1  ;;  %v12838_v62 = vadd.f32 %v12674_v31, %v4357_v29  ;;  %v8817_v32 = vpop.f32.mrb[60].mxu1 }
 0x6aa   : > { %v9125_v41 = vadd.f32 %v12650_v35, %v8817_v32  ;;  %v4278_v17 = vpop.f32.mrb[61].mxu1 }
 0x6ab   : > { %v4530_v7 = vadd.f32 %v4529_v63, %v12838_v62  ;;  %v9128_v51 = vadd.f32 %v12642_v61, %v4278_v17  ;;  %v8818_v34 = vpop.f32.mrb[62].mxu1 }
 0x6ac   : > { %v4362_v39 = vadd.f32 %v9125_v41, %v12670_v13  ;;  %v9131_v46 = vadd.f32 %v12653_v36, %v8818_v34  ;;  %v4281_v59 = vpop.f32.mrb[63].mxu1 }
 0x6ad   : > { %v4531_v18 = vadd.f32 %v4530_v7, %v12825_v16  ;;  %v4360_v22 = vadd.f32 %v9128_v51, %v12670_v13  ;;  %v9134_v20 = vadd.f32 %v12645_v11, %v4281_v59  ;;  %v9622_v59 = vld [vmem:[#allocation14] sm:$0xff]  }
 0x6ae   : > { %v12849_v14 = vadd.f32 %v12674_v31, %v4362_v39  ;;  %v4363_v35 = vadd.f32 %v9131_v46, %v12670_v13 }
 0x6af   : > { %v12853_v10 = vadd.f32 %v12674_v31, %v4360_v22  ;;  %v4532_v61 = vadd.f32 %v4531_v18, %v12834_v45  ;;  %v4361_v25 = vadd.f32 %v9134_v20, %v12670_v13  ;;  %v9623_v22 = vld [vmem:[#allocation14 + $0x8] sm:$0xff]   ;;  %v9625_v20 = vld [vmem:[#allocation14 + $0x18] sm:$0xff]  }
 0x6b0   : > { %v12858_v36 = vadd.f32 %v12674_v31, %v4363_v35  ;;  %v9626_v35 = vld [vmem:[#allocation14 + $0x20] sm:$0xff]  }
 0x6b1   : > { %v4533_v29 = vadd.f32 %v4532_v61, %v12853_v10  ;;  %v12862_v63 = vadd.f32 %v12674_v31, %v4361_v25  ;;  %v9624_v31 = vld [vmem:[#allocation14 + $0x10] sm:$0xff]   ;;  %v9627_v61 = vld [vmem:[#allocation14 + $0x28] sm:$0xff]  }
 0x6b2   : > { %v9628_v25 = vld [vmem:[#allocation14 + $0x30] sm:$0xff]  }
 0x6b3   : > { %v4534_v11 = vadd.f32 %v4533_v29, %v12862_v63  ;;  %v9629_v29 = vld [vmem:[#allocation14 + $0x38] sm:$0xff]  }
 0x6b5   : > { %v4535_v32 = vadd.f32 %v4534_v11, %v12849_v14 }
 0x6b7   : > { %v4536_v41 = vadd.f32 %v4535_v32, %v12858_v36 }
 0x6b9   : > { %v4537_v17 = vrot.slane %v4536_v41, 4 }
 0x6bb   : > { %v4538_v7 = vadd.f32 %v4537_v17, %v4536_v41 }
 0x6bd   : > { %v4539_v51 = vrot.slane %v4538_v7, 2 }
 0x6bf   : > { %v4540_v34 = vadd.f32 %v4539_v51, %v4538_v7 }
 0x6c1   : > { %v4541_v39 = vrot.slane %v4540_v34, 1 }
 0x6c3   : > { %v4542_v13 = vadd.f32 %v4541_v39, %v4540_v34  ;;  %v9630_v34 = vld [vmem:[#allocation16 + $0x100] sm:$0xff]  }
 0x6c4   : > { %v9631_v39 = vld [vmem:[#allocation16 + $0x140] sm:$0xff]   ;;  %8179 = vmatprep.subr.bf16.mxu1 %v9630_v34  ;;  %v9650_v34 = vld [vmem:[#allocation16 + $0xf0] sm:$0xff]  }
 0x6c5   : > { %v4543_v46 = vmul.f32 0.00390625, %v4542_v13  ;;  %v9632_v13 = vld [vmem:[#allocation16 + $0xc0] sm:$0xff]  }
 0x6c6   : > { %8180 = vmatpush3.bf16.msra.mxu1 %v9632_v13  ;;  %v9652_v13 = vld [vmem:[#allocation16 + $0x178] sm:$0xff]  }
 0x6c7   : > { %v4544_v18 = vpack.c.bf16 %v4543_v46, %v4543_v46  ;;  %v9633_v46 = vld [vmem:[#allocation16 + $0x108] sm:$0xff]  }
 0x6c8   : > { %8181 = vmatprep.subr.bf16.mxu1 %v9633_v46  ;;  %v9653_v46 = vld [vmem:[#allocation16 + $0xf8] sm:$0xff]  }
 0x6c9   : > { %8856 = vmatmul.mubr.bf16.vlgmr.msra.gmra.mrb[140].mxu0 %v4544_v18  ;;  %v9635_v18 = vld [vmem:[#allocation16 + $0xc8] sm:$0xff]  }
 0x6ca   : > { %8860 = vmatpush3.bf16.msra.mxu0 %v9622_v59  ;;  %8875 = vmatprep.mubr.msk.bf16.mxu0 %vm14834_vm13, %v14909_v12  ;;  %v9634_v59 = vld [vmem:[#allocation16 + $0x148] sm:$0xff]   ;;  %vm14922_vm13 = vsmask.f32 256 }
 0x6cb   : > { %8861 = vmatprep.subr.bf16.mxu0 %v14909_v12  ;;  %8182 = vmatpush3.bf16.msra.mxu1 %v9635_v18 }
 0x6ce   : > { %8862 = vmatpush3.bf16.msra.mxu0 %v9623_v22  ;;  %v9637_v22 = vld [vmem:[#allocation16 + $0x150] sm:$0xff]  }
 0x6cf   : > { %8863 = vmatprep.subr.bf16.mxu0 %v14909_v12 }
 0x6d2   : > { %8864 = vmatpush3.bf16.msra.mxu0 %v9624_v31  ;;  %v9638_v31 = vld [vmem:[#allocation16 + $0xd0] sm:$0xff]  }
 0x6d3   : > { %8865 = vmatprep.subr.bf16.mxu0 %v14909_v12 }
 0x6d6   : > { %8866 = vmatpush3.bf16.msra.mxu0 %v9625_v20  ;;  %v9639_v20 = vld [vmem:[#allocation16 + $0x118] sm:$0xff]  }
 0x6d7   : > { %8867 = vmatprep.subr.bf16.mxu0 %v14909_v12 }
 0x6da   : > { %8868 = vmatpush3.bf16.msra.mxu0 %v9626_v35  ;;  %v9640_v35 = vld [vmem:[#allocation16 + $0x158] sm:$0xff]  }
 0x6db   : > { %8869 = vmatprep.subr.bf16.mxu0 %v14909_v12 }
 0x6de   : > { %8870 = vmatpush3.bf16.msra.mxu0 %v9627_v61  ;;  %v9641_v61 = vld [vmem:[#allocation16 + $0xd8] sm:$0xff]  }
 0x6df   : > { %8871 = vmatprep.subr.bf16.mxu0 %v14909_v12 }
 0x6e2   : > { %8872 = vmatpush3.bf16.msra.mxu0 %v9628_v25  ;;  %v9642_v25 = vld [vmem:[#allocation16 + $0x120] sm:$0xff]  }
 0x6e3   : > { %8873 = vmatprep.subr.bf16.mxu0 %v14909_v12  ;;  %v9636_v12 = vld [vmem:[#allocation16 + $0x110] sm:$0xff]  }
 0x6e4   : > { %8183 = vmatprep.subr.bf16.mxu1 %v9636_v12 }
 0x6e5   : > { %8184 = vmatpush3.bf16.msra.mxu1 %v9638_v31 }
 0x6e6   : > { %8874 = vmatpush3.bf16.msra.mxu0 %v9629_v29  ;;  %8185 = vmatprep.subr.bf16.mxu1 %v9639_v20  ;;  %v9643_v29 = vld [vmem:[#allocation16 + $0x160] sm:$0xff]  }
 0x6e7   : > { %8879 = vmatprep.subr.bf16.mxu0 %v9631_v39 }
 0x6e9   : > { %8186 = vmatpush3.bf16.msra.mxu1 %v9641_v61 }
 0x6ea   : > { %8187 = vmatprep.subr.bf16.mxu1 %v9642_v25  ;;  %v4763_v25 = vadd.f32 1.0, %v12682_v23  ;;  %v4772_v23 = vadd.f32 1.0, %v12738_v43  ;;  %v4783_v43 = vadd.f32 1.0, %v12801_v44  ;;  %v4789_v44 = vadd.f32 1.0, %v12853_v10 }
 0x79c   : > { %v4643_v11 = vpop.f32.mrb[140].mxu0 }
 0x79d   : > { %v4649_v32 = vmax.f32 %v4643_v11, 0.0  ;;  %v8857_v41 = vpop.f32.mrb[141].mxu0  ;;  %v9644_v11 = vld [vmem:[#allocation16 + $0xe0] sm:$0xff]  }
 0x79e   : > { %v4646_v17 = vpop.f32.mrb[142].mxu0  ;;  %8188 = vmatpush3.bf16.msra.mxu1 %v9644_v11  ;;  %v9646_v41 = vld [vmem:[#allocation16 + $0x168] sm:$0xff]   ;;  %v4764_v11 = vadd.f32 1.0, %v12690_v55  ;;  %v4775_v55 = vadd.f32 1.0, %v12753_v19  ;;  %v4784_v19 = vadd.f32 1.0, %v12810_v37  ;;  %v4790_v37 = vadd.f32 1.0, %v12862_v63 }
 0x79f   : > { %v4650_v7 = vpack.c.bf16 %v4649_v32, %v4649_v32  ;;  %v8858_v51 = vpop.f32.mrb[143].mxu0  ;;  %v9645_v32 = vld [vmem:[#allocation16 + $0x128] sm:$0xff]  }
 0x7a0   : > { %v9647_v17 = vld [vmem:[#allocation16 + $0xe8] sm:$0xff]   ;;  %8189 = vmatprep.subr.bf16.mxu1 %v9645_v32  ;;  %v9649_v51 = vld [vmem:[#allocation16 + $0x170] sm:$0xff]   ;;  %v4762_v32 = vadd.f32 1.0, %v12693_v48  ;;  %v4773_v48 = vadd.f32 1.0, %v12757_v60  ;;  %v4782_v60 = vadd.f32 1.0, %v12814_v5 }
 0x7a1   : > { %8876 = vmatmul.mubr.bf16.vlgmr.msra.gmra.mrb[144].mxu0 %v4650_v7  ;;  %v9648_v7 = vld [vmem:[#allocation16 + $0x130] sm:$0xff]  }
 0x7a2   : > { %8880 = vmatpush3.bf16.msra.mxu0 %v9631_v39  ;;  %8190 = vmatpush3.bf16.msra.mxu1 %v9647_v17  ;;  %v9651_v39 = vld [vmem:[#allocation16 + $0x138] sm:$0xff]   ;;  %v4765_v17 = vadd.f32 1.0, %v12709_v38  ;;  %v4774_v38 = vadd.f32 1.0, %v12766_v52  ;;  %v4785_v52 = vadd.f32 1.0, %v12829_v1 }
 0x7a3   : > { %8881 = vmatprep.subr.bf16.mxu0 %v9634_v59  ;;  %8191 = vmatprep.subr.bf16.mxu1 %v9648_v7  ;;  %v4768_v7 = vadd.f32 1.0, %v12714_v40  ;;  %v4779_v40 = vadd.f32 1.0, %v12777_v30  ;;  %v4788_v30 = vadd.f32 1.0, %v12834_v45 }
 0x7a6   : > { %8882 = vmatpush3.bf16.msra.mxu0 %v9634_v59  ;;  %8192 = vmatpush3.bf16.msra.mxu1 %v9650_v34  ;;  %v9654_v59 = vld [vmem:[#allocation16 + $0x40] sm:$0xff]   ;;  %v4771_v34 = vadd.f32 1.0, %v12729_v26  ;;  %v4780_v26 = vadd.f32 1.0, %v12786_v57 }
 0x7a7   : > { %8883 = vmatprep.subr.bf16.mxu0 %v9637_v22  ;;  %8193 = vmatprep.subr.bf16.mxu1 %v9651_v39  ;;  %v4769_v39 = vadd.f32 1.0, %v12733_v4  ;;  %v4778_v4 = vadd.f32 1.0, %v12790_v3  ;;  %v4791_v3 = vadd.f32 1.0, %v12849_v14 }
 0x7aa   : > { %8884 = vmatpush3.bf16.msra.mxu0 %v9637_v22  ;;  %8194 = vmatpush3.bf16.msra.mxu1 %v9653_v46  ;;  %v9670_v46 = vld [vmem:[#allocation16 + $0x1c0] sm:$0xff]  }
 0x7ab   : > { %8885 = vmatprep.subr.bf16.mxu0 %v9640_v35  ;;  %8451 = vmatprep.subr.bf16.mxu1 %v9670_v46 }
 0x7ae   : > { %8886 = vmatpush3.bf16.msra.mxu0 %v9640_v35 }
 0x7af   : > { %8887 = vmatprep.subr.bf16.mxu0 %v9643_v29 }
 0x7b2   : > { %8888 = vmatpush3.bf16.msra.mxu0 %v9643_v29  ;;  %v4761_v29 = vadd.f32 1.0, %v12686_v33  ;;  %v4770_v33 = vadd.f32 1.0, %v12742_v27  ;;  %v4781_v27 = vadd.f32 1.0, %v12805_v56  ;;  %v4792_v56 = vadd.f32 1.0, %v12858_v36 }
 0x7b3   : > { %8889 = vmatprep.subr.bf16.mxu0 %v9646_v41 }
 0x7b6   : > { %8890 = vmatpush3.bf16.msra.mxu0 %v9646_v41  ;;  %v4767_v41 = vadd.f32 1.0, %v12705_v15  ;;  %v4776_v15 = vadd.f32 1.0, %v12762_v49  ;;  %v4787_v49 = vadd.f32 1.0, %v12825_v16 }
 0x7b7   : > { %8891 = vmatprep.subr.bf16.mxu0 %v9649_v51 }
 0x7ba   : > { %8892 = vmatpush3.bf16.msra.mxu0 %v9649_v51  ;;  %v4766_v51 = vadd.f32 1.0, %v12718_v9  ;;  %v4777_v9 = vadd.f32 1.0, %v12781_v21  ;;  %v4786_v21 = vadd.f32 1.0, %v12838_v62 }
 0x7bb   : > { %8893 = vmatprep.subr.bf16.mxu0 %v9652_v13 }
 0x7be   : > { %8894 = vmatpush3.bf16.msra.mxu0 %v9652_v13 }
 0x7bf   : > { %8315 = vmatprep.subr.bf16.mxu0 %v9654_v59 }
 0x874   : > { %v4749_v18 = vpop.f32.mrb[144].mxu0 }
 0x875   : > { %v7493_v12 = vmul.f32 -1.442695, %v4749_v18  ;;  %v8877_v22 = vpop.f32.mrb[145].mxu0 }
 0x876   : > { %v4752_v31 = vpop.f32.mrb[146].mxu0 }
 0x877   : > { %9834 = vpow2.f32 %v7493_v12  ;;  %v8878_v20 = vpop.f32.mrb[147].mxu0 }
 0x881   : > { %v9835_v35 = vpop.eup %9834 }
 0x882   : > { %v4758_v61 = vadd.f32 1.0, %v9835_v35 }
 0x884   : > { %9836 = vrcp.f32 %v4758_v61 }
 0x88e   : > { %v9837_v13 = vpop.eup %9836 }
 0x88f   : > { %v4796_v57 = vrot.slane %v9837_v13, %v14912_v24 }
 0x891   : > { %v12909_v5 = vmul.f32 %v4796_v57, %v4761_v29  ;;  %v12911_v16 = vmul.f32 %v4796_v57, %v4762_v32  ;;  %v12913_v1 = vmul.f32 %v4796_v57, %v4763_v25  ;;  %v12915_v45 = vmul.f32 %v4796_v57, %v4764_v11 }
 0x892   : > { %v12917_v62 = vmul.f32 %v4796_v57, %v4765_v17  ;;  %v12919_v24 = vmul.f32 %v4796_v57, %v4766_v51  ;;  %v12921_v14 = vmul.f32 %v4796_v57, %v4767_v41  ;;  %v12923_v10 = vmul.f32 %v4796_v57, %v4768_v7 }
 0x893   : > { %v12925_v36 = vmul.f32 %v4796_v57, %v4769_v39  ;;  %v12927_v63 = vmul.f32 %v4796_v57, %v4770_v33  ;;  %v12929_v59 = vmul.f32 %v4796_v57, %v4771_v34  ;;  %v12931_v18 = vmul.f32 %v4796_v57, %v4772_v23 }
 0x894   : > { %v12933_v12 = vmul.f32 %v4796_v57, %v4773_v48  ;;  %v12935_v22 = vmul.f32 %v4796_v57, %v4774_v38  ;;  %v12937_v31 = vmul.f32 %v4796_v57, %v4775_v55  ;;  %v12939_v20 = vmul.f32 %v4796_v57, %v4776_v15 }
 0x895   : > { %v12941_v35 = vmul.f32 %v4796_v57, %v4777_v9  ;;  %v12943_v61 = vmul.f32 %v4796_v57, %v4778_v4  ;;  %v12945_v25 = vmul.f32 %v4796_v57, %v4779_v40  ;;  %v12947_v29 = vmul.f32 %v4796_v57, %v4780_v26 }
 0x896   : > { %v12949_v11 = vmul.f32 %v4796_v57, %v4781_v27  ;;  %v12951_v32 = vmul.f32 %v4796_v57, %v4782_v60  ;;  %v12953_v41 = vmul.f32 %v4796_v57, %v4783_v43  ;;  %v12955_v17 = vmul.f32 %v4796_v57, %v4784_v19 }
 0x897   : > { %v12957_v7 = vmul.f32 %v4796_v57, %v4785_v52  ;;  %v12959_v51 = vmul.f32 %v4796_v57, %v4786_v21  ;;  %v12961_v34 = vmul.f32 %v4796_v57, %v4787_v49  ;;  %v12963_v39 = vmul.f32 %v4796_v57, %v4788_v30 }
 0x898   : > { %v12965_v23 = vmul.f32 %v4796_v57, %v4789_v44  ;;  %v12967_v33 = vmul.f32 %v4796_v57, %v4790_v37  ;;  %v12969_v55 = vmul.f32 %v4796_v57, %v4791_v3  ;;  %v12971_v48 = vmul.f32 %v4796_v57, %v4792_v56 }
 0x899   : > { %14913 = vst [vmem:[#allocation85_spill] sm:$0xff] %v12957_v7  ;;  %14914 = vst [vmem:[#allocation88_spill] sm:$0xff] %v12959_v51  ;;  %v7494_v15 = vmul.f32 -1.442695, %v12909_v5  ;;  %v7495_v38 = vmul.f32 -1.442695, %v12911_v16 }
 0x89a   : > { %14915 = vst [vmem:[#allocation94_spill] sm:$0xff] %v12961_v34  ;;  %14916 = vst [vmem:[#allocation95_spill] sm:$0xff] %v12963_v39  ;;  %v7496_v40 = vmul.f32 -1.442695, %v12913_v1  ;;  %v7497_v9 = vmul.f32 -1.442695, %v12915_v45 }
 0x89b   : > { %14917 = vst [vmem:[#allocation98_spill] sm:$0xff] %v12965_v23  ;;  %14918 = vst [vmem:[#allocation59_spill] sm:$0xff] %v12967_v33  ;;  %v7498_v26 = vmul.f32 -1.442695, %v12917_v62  ;;  %9838 = vpow2.f32 %v7494_v15  ;;  %v7499_v4 = vmul.f32 -1.442695, %v12919_v24 }
 0x89c   : > { %14919 = vst [vmem:[#allocation66_spill] sm:$0xff] %v12969_v55  ;;  %14920 = vst [vmem:[#allocation60_spill] sm:$0xff] %v12971_v48  ;;  %9840 = vpow2.f32 %v7495_v38  ;;  %v7500_v43 = vmul.f32 -1.442695, %v12921_v14  ;;  %v7501_v13 = vmul.f32 -1.442695, %v12923_v10 }
 0x89d   : > { %9842 = vpow2.f32 %v7496_v40  ;;  %v7502_v27 = vmul.f32 -1.442695, %v12925_v36  ;;  %v7503_v19 = vmul.f32 -1.442695, %v12927_v63  ;;  %v7504_v60 = vmul.f32 -1.442695, %v12929_v59 }
 0x89e   : > { %9844 = vpow2.f32 %v7497_v9  ;;  %v7505_v49 = vmul.f32 -1.442695, %v12931_v18  ;;  %v7506_v52 = vmul.f32 -1.442695, %v12933_v12  ;;  %v7507_v30 = vmul.f32 -1.442695, %v12935_v22 }
 0x89f   : > { %9846 = vpow2.f32 %v7498_v26  ;;  %v7508_v57 = vmul.f32 -1.442695, %v12937_v31  ;;  %v7509_v44 = vmul.f32 -1.442695, %v12939_v20  ;;  %v7510_v37 = vmul.f32 -1.442695, %v12941_v35 }
 0x8a0   : > { %9848 = vpow2.f32 %v7499_v4  ;;  %v7511_v15 = vmul.f32 -1.442695, %v12943_v61  ;;  %v7512_v40 = vmul.f32 -1.442695, %v12945_v25  ;;  %v7513_v26 = vmul.f32 -1.442695, %v12947_v29 }
 0x8a1   : > { %9850 = vpow2.f32 %v7500_v43  ;;  %v7514_v43 = vmul.f32 -1.442695, %v12949_v11  ;;  %v7519_v28 = vmul.f32 -1.442695, %v12959_v51  ;;  %v7520_v54 = vmul.f32 -1.442695, %v12961_v34 }
 0x8a2   : > { %9852 = vpow2.f32 %v7501_v13  ;;  %v7521_v42 = vmul.f32 -1.442695, %v12963_v39  ;;  %v7522_v50 = vmul.f32 -1.442695, %v12965_v23  ;;  %v7523_v6 = vmul.f32 -1.442695, %v12967_v33 }
 0x8a3   : > { %9854 = vpow2.f32 %v7502_v27  ;;  %v7515_v27 = vmul.f32 -1.442695, %v12951_v32  ;;  %v7524_v8 = vmul.f32 -1.442695, %v12969_v55  ;;  %v7525_v58 = vmul.f32 -1.442695, %v12971_v48 }
 0x8a4   : > { %9856 = vpow2.f32 %v7503_v19 }
 0x8a5   : > { %v9839_v21 = vpop.eup %9838  ;;  %9858 = vpow2.f32 %v7504_v60  ;;  %v7516_v60 = vmul.f32 -1.442695, %v12953_v41 }
 0x8a6   : > { %v9841_v3 = vpop.eup %9840  ;;  %9860 = vpow2.f32 %v7505_v49  ;;  %v4925_v47 = vadd.f32 1.0, %v9839_v21 }
 0x8a7   : > { %v9843_v56 = vpop.eup %9842  ;;  %9862 = vpow2.f32 %v7506_v52  ;;  %v7517_v52 = vmul.f32 -1.442695, %v12955_v17  ;;  %v4926_v53 = vadd.f32 1.0, %v9841_v3 }
 0x8a8   : > { %v9845_v46 = vpop.eup %9844  ;;  %9864 = vpow2.f32 %v7507_v30 }
 0x8a9   : > { %v9847_v38 = vpop.eup %9846  ;;  %9866 = vpow2.f32 %v7508_v57  ;;  %v7518_v57 = vmul.f32 -1.442695, %v12957_v7 }
 0x8aa   : > { %v9849_v9 = vpop.eup %9848  ;;  %9868 = vpow2.f32 %v7509_v44  ;;  %v4929_v39 = vadd.f32 1.0, %v9847_v38 }
 0x8ab   : > { %v9851_v4 = vpop.eup %9850  ;;  %9870 = vpow2.f32 %v7510_v37  ;;  %v4930_v55 = vadd.f32 1.0, %v9849_v9 }
 0x8ac   : > { %v9853_v13 = vpop.eup %9852  ;;  %9872 = vpow2.f32 %v7511_v15 }
 0x8ad   : > { %v9855_v19 = vpop.eup %9854  ;;  %9874 = vpow2.f32 %v7512_v40  ;;  %v4932_v21 = vadd.f32 1.0, %v9853_v13 }
 0x8ae   : > { %v9857_v49 = vpop.eup %9856  ;;  %9876 = vpow2.f32 %v7513_v26  ;;  %v4933_v3 = vadd.f32 1.0, %v9855_v19 }
 0x8af   : > { %v9859_v30 = vpop.eup %9858  ;;  %9878 = vpow2.f32 %v7514_v43 }
 0x8b0   : > { %v9861_v44 = vpop.eup %9860  ;;  %9880 = vpow2.f32 %v7515_v27 }
 0x8b1   : > { %v9863_v37 = vpop.eup %9862  ;;  %9882 = vpow2.f32 %v7516_v60 }
 0x8b2   : > { %v9865_v15 = vpop.eup %9864  ;;  %9884 = vpow2.f32 %v7517_v52  ;;  %v4937_v34 = vadd.f32 1.0, %v9863_v37 }
 0x8b3   : > { %v9867_v40 = vpop.eup %9866  ;;  %9886 = vpow2.f32 %v7518_v57  ;;  %v4927_v57 = vadd.f32 1.0, %v9843_v56  ;;  %v4934_v56 = vadd.f32 1.0, %v9857_v49  ;;  %v4938_v9 = vadd.f32 1.0, %v9865_v15 }
 0x8b4   : > { %v9869_v26 = vpop.eup %9868  ;;  %9888 = vpow2.f32 %v7519_v28  ;;  %v4928_v28 = vadd.f32 1.0, %v9845_v46  ;;  %v4935_v46 = vadd.f32 1.0, %v9859_v30 }
 0x8b5   : > { %v9871_v43 = vpop.eup %9870  ;;  %9890 = vpow2.f32 %v7520_v54 }
 0x8b6   : > { %v9873_v27 = vpop.eup %9872  ;;  %9892 = vpow2.f32 %v7521_v42  ;;  %v4931_v42 = vadd.f32 1.0, %v9851_v4  ;;  %v4939_v4 = vadd.f32 1.0, %v9867_v40 }
 0x8b7   : > { %v9875_v60 = vpop.eup %9874  ;;  %9894 = vpow2.f32 %v7522_v50  ;;  %v4942_v51 = vadd.f32 1.0, %v9873_v27 }
 0x8b8   : > { %v9877_v52 = vpop.eup %9876  ;;  %9896 = vpow2.f32 %v7523_v6  ;;  %v4943_v19 = vadd.f32 1.0, %v9875_v60 }
 0x8b9   : > { %v9879_v2 = vpop.eup %9878  ;;  %9898 = vpow2.f32 %v7524_v8  ;;  %v4944_v49 = vadd.f32 1.0, %v9877_v52 }
 0x8ba   : > { %v9881_v23 = vpop.eup %9880  ;;  %9900 = vpow2.f32 %v7525_v58 }
 0x8bb   : > { %v9883_v33 = vpop.eup %9882  ;;  %9902 = vrcp.f32 %v4925_v47  ;;  %v4936_v47 = vadd.f32 1.0, %v9861_v44  ;;  %v4946_v7 = vadd.f32 1.0, %v9881_v23 }
 0x8bc   : > { %v9885_v54 = vpop.eup %9884  ;;  %9904 = vrcp.f32 %v4926_v53 }
 0x8bd   : > { %v9887_v48 = vpop.eup %9886  ;;  %9906 = vrcp.f32 %v4927_v57  ;;  %v4940_v57 = vadd.f32 1.0, %v9869_v26  ;;  %v4948_v44 = vadd.f32 1.0, %v9885_v54 }
 0x8be   : > { %v9889_v50 = vpop.eup %9888  ;;  %9908 = vrcp.f32 %v4928_v28  ;;  %v4941_v28 = vadd.f32 1.0, %v9871_v43  ;;  %v13006_v40 = vadd.f32 1.0, %v9887_v48 }
 0x8bf   : > { %v9891_v6 = vpop.eup %9890  ;;  %9910 = vrcp.f32 %v4929_v39  ;;  %v13008_v26 = vadd.f32 1.0, %v9889_v50 }
 0x8c0   : > { %v9893_v8 = vpop.eup %9892  ;;  %9912 = vrcp.f32 %v4930_v55  ;;  %v4945_v55 = vadd.f32 1.0, %v9879_v2  ;;  %v13011_v60 = vadd.f32 1.0, %v9891_v6 }
 0x8c1   : > { %v9895_v58 = vpop.eup %9894  ;;  %9914 = vrcp.f32 %v4931_v42  ;;  %v4947_v42 = vadd.f32 1.0, %v9883_v33  ;;  %v13013_v2 = vadd.f32 1.0, %v9893_v8 }
 0x8c2   : > { %v9897_v38 = vpop.eup %9896  ;;  %9916 = vrcp.f32 %v4932_v21  ;;  %v13016_v52 = vadd.f32 1.0, %v9895_v58 }
 0x8c3   : > { %v9899_v53 = vpop.eup %9898  ;;  %9918 = vrcp.f32 %v4933_v3 }
 0x8c4   : > { %v9901_v13 = vpop.eup %9900  ;;  %9920 = vrcp.f32 %v4934_v56 }
 0x8c5   : > { %v9903_v39 = vpop.eup %9902  ;;  %9922 = vrcp.f32 %v4935_v46  ;;  %v13031_v8 = vadd.f32 1.0, %v9901_v13  ;;  %v9671_v13 = vld [vmem:[#allocation16 + $0x180] sm:$0xff]  }
 0x8c6   : > { %v9905_v30 = vpop.eup %9904  ;;  %9924 = vrcp.f32 %v4936_v47  ;;  %v5021_v37 = vmul.f32 %v9903_v39, %v12909_v5 }
 0x8c7   : > { %v9907_v15 = vpop.eup %9906  ;;  %9926 = vrcp.f32 %v4937_v34  ;;  %v5022_v43 = vmul.f32 %v9905_v30, %v12911_v16  ;;  %v13021_v34 = vadd.f32 1.0, %v9897_v38  ;;  %v13023_v16 = vadd.f32 1.0, %v9899_v53 }
 0x8c8   : > { %v9909_v27 = vpop.eup %9908  ;;  %9928 = vrcp.f32 %v4938_v9  ;;  %v5023_v23 = vmul.f32 %v9907_v15, %v12913_v1 }
 0x8c9   : > { %v9911_v33 = vpop.eup %9910  ;;  %9930 = vrcp.f32 %v4939_v4  ;;  %v5024_v5 = vmul.f32 %v9909_v27, %v12915_v45  ;;  %v13019_v48 = vpack.c.bf16 %v5022_v43, %v5021_v37  ;;  %v14921_v37 = vld [vmem:[#allocation69_spill] sm:$0xff] }
 0x8ca   : > { %v9913_v54 = vpop.eup %9912  ;;  %9932 = vrcp.f32 %v4940_v57  ;;  %v5025_v50 = vmul.f32 %v9911_v33, %v12917_v62 }
 0x8cb   : > { %v9915_v21 = vpop.eup %9914  ;;  %9934 = vrcp.f32 %v4941_v28  ;;  %v5026_v1 = vmul.f32 %v9913_v54, %v12919_v24  ;;  %v13027_v6 = vpack.c.bf16 %v5024_v5, %v5023_v23  ;;  %v5070_v3 = vshrl.u32 %v13019_v48, 16  ;;  %5588 = vmatprep.mubr.bf16.mxu1 %v13019_v48 }
 0x8cc   : > { %v9917_v45 = vpop.eup %9916  ;;  %9936 = vrcp.f32 %v4942_v51  ;;  %v5027_v56 = vmul.f32 %v9915_v21, %v12921_v14  ;;  %v5073_v58 = vshll.u32 %v13019_v48, 16 }
 0x8cd   : > { %v9919_v46 = vpop.eup %9918  ;;  %9938 = vrcp.f32 %v4943_v19  ;;  %v5028_v62 = vmul.f32 %v9917_v45, %v12923_v10  ;;  %v13036_v38 = vpack.c.bf16 %v5026_v1, %v5025_v50  ;;  %v13038_v24 = vrot.slane %v5070_v3, 7  ;;  %v14925_v45 = vld [vmem:[#allocation83_spill] sm:$0xff] }
 0x8ce   : > { %v9921_v47 = vpop.eup %9920  ;;  %9940 = vrcp.f32 %v4944_v49  ;;  %v5029_v53 = vmul.f32 %v9919_v46, %v12925_v36  ;;  %v5078_v9 = vshrl.u32 %v13027_v6, 16  ;;  %v5081_v51 = vshll.u32 %v13027_v6, 16  ;;  %v9673_v49 = vld [vmem:[#allocation16 + $0x1c8] sm:$0xff]  }
 0x8cf   : > { %v9923_v4 = vpop.eup %9922  ;;  %9942 = vrcp.f32 %v4945_v55  ;;  %v5030_v14 = vmul.f32 %v9921_v47, %v12927_v63  ;;  %v13044_v57 = vpack.c.bf16 %v5028_v62, %v5027_v56  ;;  %v5075_v10 = vor.u32 %v5073_v58, %v13038_v24 }
 0x8d0   : > { %v9925_v28 = vpop.eup %9924  ;;  %9944 = vrcp.f32 %v4946_v7  ;;  %v5031_v19 = vmul.f32 %v9923_v4, %v12929_v59  ;;  %v13048_v39 = vrot.slane %v5073_v58, 1  ;;  %v5235_v36 = vrot.slane %v5081_v51, 1  ;;  %v14923_v7 = vld [vmem:[#allocation70_spill] sm:$0xff] }
 0x8d1   : > { %v9927_v30 = vpop.eup %9926  ;;  %9946 = vrcp.f32 %v4947_v42  ;;  %v5032_v55 = vmul.f32 %v9925_v28, %v12931_v18  ;;  %v13053_v63 = vpack.c.bf16 %v5030_v14, %v5029_v53  ;;  %v13057_v15 = vsel %vm14922_vm13, %v14921_v37, %v5075_v10  ;;  %vm14927_vm13 = vmmov %vm14887_vm12  ;;  %v9677_v14 = vld [vmem:[#allocation16 + $0x190] sm:$0xff]   ;;  %v9679_v10 = vld [vmem:[#allocation16 + $0x1d8] sm:$0xff]  }
 0x8d2   : > { %v9929_v43 = vpop.eup %9928  ;;  %9948 = vrcp.f32 %v4948_v44  ;;  %v5033_v59 = vmul.f32 %v9927_v30, %v12933_v12  ;;  %vm14924_vm5 = vnez %v14923_v7  ;;  %v5234_v27 = vor.u32 %v13048_v39, %v5070_v3  ;;  %v9674_v12 = vld [vmem:[#allocation16 + $0x188] sm:$0xff]  }
 0x8d3   : > { %7550 = vmatmul.mubr.msk.bf16.vlgmr.msra.gmra.mrb[128].mxu1 %vm14924_vm5, %v13057_v15  ;;  %v5237_v23 = vor.u32 %v5235_v36, %v5078_v9  ;;  %v9931_v42 = vpop.eup %9930  ;;  %9950 = vrcp.f32 %v13006_v40  ;;  %v5034_v18 = vmul.f32 %v9929_v43, %v12935_v22  ;;  %v13066_v33 = vpack.c.bf16 %v5032_v55, %v5031_v19  ;;  %v9676_v22 = vld [vmem:[#allocation16 + $0x1d0] sm:$0xff]   ;;  %v9657_v19 = vld [vmem:[#allocation16 + $0x8] sm:$0xff]  }
 0x8d4   : > { %5596 = vmatprep.mubr.bf16.mxu1 %v13027_v6  ;;  %v5089_v44 = vshll.u32 %v13036_v38, 16  ;;  %8452 = vmatpush3.bf16.msra.mxu1 %v9671_v13  ;;  %v9933_v5 = vpop.eup %9932  ;;  %9952 = vrcp.f32 %v13008_v26  ;;  %v5035_v54 = vmul.f32 %v9931_v42, %v12937_v31  ;;  %v13073_v50 = vsel %vm14887_vm12, %v5234_v27, %v5235_v36  ;;  %v9655_v26 = vld [vmem:[#allocation16] sm:$0xff]   ;;  %v14930_v42 = vld [vmem:[#allocation71_spill] sm:$0xff] }
 0x8d5   : > { %v5086_v40 = vshrl.u32 %v13036_v38, 16  ;;  %8453 = vmatprep.subr.bf16.mxu1 %v9673_v49  ;;  %v9935_v21 = vpop.eup %9934  ;;  %9954 = vrcp.f32 %v13011_v60  ;;  %v5036_v1 = vmul.f32 %v9933_v5, %v12939_v20  ;;  %v13078_v3 = vpack.c.bf16 %v5034_v18, %v5033_v59  ;;  %v9656_v20 = vld [vmem:[#allocation16 + $0x48] sm:$0xff]  }
 0x8d6   : > { %vm14926_vm15 = vnez %v14925_v45  ;;  %v5238_v31 = vrot.slane %v5089_v44, 1  ;;  %v9937_v56 = vpop.eup %9936  ;;  %9956 = vrcp.f32 %v13013_v2  ;;  %v5037_v58 = vmul.f32 %v9935_v21, %v12941_v35 }
 0x8d7   : > { %8895 = vmatprep.mubr.msk.bf16.mxu0 %vm14926_vm15, %v13073_v50  ;;  %v5097_v46 = vshll.u32 %v13044_v57, 16  ;;  %v13088_v60 = vrot.slane %v5078_v9, 7  ;;  %v9939_v62 = vpop.eup %9938  ;;  %9958 = vrcp.f32 %v13016_v52  ;;  %v5038_v47 = vmul.f32 %v9937_v56, %v12943_v61  ;;  %v14928_v9 = vld [vmem:[#allocation87_spill] sm:$0xff] }
 0x8d8   : > { %v13092_v53 = vpack.c.bf16 %v5036_v1, %v5035_v54  ;;  %v13095_v4 = vsel %vm14927_vm13, %v5237_v23, %v5238_v31  ;;  %8454 = vmatpush3.bf16.msra.mxu1 %v9674_v12  ;;  %v9941_v2 = vpop.eup %9940  ;;  %9960 = vrcp.f32 %v13021_v34  ;;  %v5039_v35 = vmul.f32 %v9939_v62, %v12945_v25  ;;  %v9659_v1 = vld [vmem:[#allocation16 + $0x10] sm:$0xff]  }
 0x8d9   : > { %8896 = vmatmul.mubr.msk.bf16.vlgmr.msra.gmra.mrb[148].mxu0 %vm14854_vm10, %v13095_v4  ;;  %v5240_v52 = vor.u32 %v5238_v31, %v5086_v40  ;;  %v5241_v61 = vrot.slane %v5097_v46, 1  ;;  %8455 = vmatprep.subr.bf16.mxu1 %v9676_v22  ;;  %v9943_v13 = vpop.eup %9942  ;;  %9962 = vrcp.f32 %v13023_v16  ;;  %v5040_v28 = vmul.f32 %v9941_v2, %v12947_v29  ;;  %v9658_v29 = vld [vmem:[#allocation16 + $0x50] sm:$0xff]  }
 0x8da   : > { %v13108_v34 = vpack.c.bf16 %v5038_v47, %v5037_v58  ;;  %8316 = vmatpush3.bf16.msra.mxu0 %v9655_v26  ;;  %v5083_v25 = vor.u32 %v5081_v51, %v13088_v60  ;;  %v9945_v36 = vpop.eup %9944  ;;  %9964 = vrcp.f32 %v13031_v8  ;;  %v5041_v49 = vmul.f32 %v9943_v13, %v12949_v11  ;;  %v9680_v51 = vld [vmem:[#allocation16 + $0x198] sm:$0xff]   ;;  %v14932_v26 = vld [vmem:[#allocation85_spill] sm:$0xff]  ;;  %v14933_v47 = vld [vmem:[#allocation88_spill] sm:$0xff] }
 0x8db   : > { %v13116_v30 = vsel %vm14887_vm12, %v5240_v52, %v5241_v61  ;;  %8317 = vmatprep.subr.bf16.mxu0 %v9656_v20  ;;  %v5094_v16 = vshrl.u32 %v13044_v57, 16  ;;  %v9947_v55 = vpop.eup %9946  ;;  %v5042_v43 = vmul.f32 %v9945_v36, %v12951_v32  ;;  %v13120_v59 = vpack.c.bf16 %v5040_v28, %v5039_v35  ;;  %v9660_v20 = vld [vmem:[#allocation16 + $0x58] sm:$0xff]   ;;  %v9683_v52 = vld [vmem:[#allocation16 + $0x1a0] sm:$0xff]  }
 0x8dc   : > { %8899 = vmatprep.mubr.msk.bf16.mxu0 %vm14859_vm4, %v13116_v30  ;;  %vm14929_vm13 = vsmask.f32 256  ;;  %v5105_v11 = vshll.u32 %v13053_v63, 16  ;;  %8456 = vmatpush3.bf16.msra.mxu1 %v9677_v14  ;;  %v9949_v27 = vpop.eup %9948  ;;  %v5043_v23 = vmul.f32 %v9947_v55, %v12953_v41  ;;  %vm14931_vm12 = vnez %v14930_v42  ;;  %v14936_v28 = vld [vmem:[#allocation92_spill] sm:$0xff]  ;;  %v14937_v55 = vld [vmem:[#allocation95_spill] sm:$0xff] }
 0x8dd   : > { %v13127_v8 = vsel %vm14929_vm13, %v13038_v24, %v5083_v25  ;;  %v5243_v32 = vor.u32 %v5241_v61, %v5094_v16  ;;  %v5102_v18 = vshrl.u32 %v13053_v63, 16  ;;  %v5113_v12 = vshll.u32 %v13066_v33, 16  ;;  %8457 = vmatprep.subr.bf16.mxu1 %v9679_v10  ;;  %v9682_v24 = vld [vmem:[#allocation16 + $0x1e0] sm:$0xff]   ;;  %v9951_v5 = vpop.eup %9950  ;;  %v14935_v10 = vld [vmem:[#allocation94_spill] sm:$0xff] }
 0x8de   : > { %7551 = vmatmul.mubr.msk.bf16.gmra.mrb[132].mxu1 %vm14931_vm12, %v13127_v8  ;;  %v5044_v54 = vmul.f32 %v9949_v27, %v12955_v17  ;;  %v13139_v22 = vpack.c.bf16 %v5042_v43, %v5041_v49  ;;  %v5244_v41 = vrot.slane %v5105_v11, 1  ;;  %8318 = vmatpush3.bf16.msra.mxu0 %v9657_v19  ;;  %v13146_v21 = vrot.slane %v5086_v40, 7  ;;  %v9953_v31 = vpop.eup %9952  ;;  %v9684_v49 = vld [vmem:[#allocation16 + $0x1e8] sm:$0xff]  }
 0x8df   : > { %5604 = vmatprep.mubr.bf16.mxu1 %v13036_v38  ;;  %v5045_v56 = vmul.f32 %v9951_v5, %v14932_v26  ;;  %v5247_v58 = vrot.slane %v5113_v12, 1  ;;  %8319 = vmatprep.subr.bf16.mxu0 %v9658_v29  ;;  %v14456_v17 = vshll.u32 %v13078_v3, 16  ;;  %v9955_v62 = vpop.eup %9954  ;;  %v5046_v14 = vmul.f32 %v9953_v31, %v14933_v47  ;;  %v14938_v5 = vld [vmem:[#allocation98_spill] sm:$0xff]  ;;  %v9662_v26 = vld [vmem:[#allocation16 + $0x60] sm:$0xff]  }
 0x8e0   : > { %v13153_v2 = vpack.c.bf16 %v5044_v54, %v5043_v23  ;;  %vm14934_vm13 = vsmask.f32 7424  ;;  %v5246_v40 = vor.u32 %v5244_v41, %v5102_v18  ;;  %8458 = vmatpush3.bf16.msra.mxu1 %v9680_v51  ;;  %v9957_v61 = vpop.eup %9956  ;;  %v5047_v13 = vmul.f32 %v9955_v62, %v14935_v10  ;;  %v9661_v23 = vld [vmem:[#allocation16 + $0x18] sm:$0xff]   ;;  %v14939_v54 = vld [vmem:[#allocation93_spill] sm:$0xff]  ;;  %v14942_v10 = vld [vmem:[#allocation66_spill] sm:$0xff] }
 0x8e1   : > { %v13156_v35 = vsel %vm14934_vm13, %v5243_v32, %v5244_v41  ;;  %v5091_v25 = vor.u32 %v5089_v44, %v13146_v21  ;;  %v5110_v19 = vshrl.u32 %v13066_v33, 16  ;;  %v5250_v36 = vrot.slane %v14456_v17, 1  ;;  %8459 = vmatprep.subr.bf16.mxu1 %v9682_v24  ;;  %v9959_v29 = vpop.eup %9958  ;;  %v14940_v62 = vld [vmem:[#allocation59_spill] sm:$0xff] }
 0x8e2   : > { %8900 = vmatmul.mubr.msk.bf16.gmra.mrb[152].mxu0 %vm14862_vm0, %v13156_v35  ;;  %v5048_v43 = vmul.f32 %v9957_v61, %v14937_v55  ;;  %v13171_v51 = vpack.c.bf16 %v5046_v14, %v5045_v56  ;;  %v13174_v27 = vsel %vm14934_vm13, %v5246_v40, %v5247_v58  ;;  %v9961_v32 = vpop.eup %9960  ;;  %v5049_v44 = vmul.f32 %v9959_v29, %v14938_v5  ;;  %v9664_v5 = vld [vmem:[#allocation16 + $0x68] sm:$0xff]  }
 0x8e3   : > { %8320 = vmatpush3.bf16.msra.mxu0 %v9659_v1  ;;  %8903 = vmatprep.mubr.msk.bf16.mxu0 %vm14868_vm3, %v13174_v27  ;;  %v5249_v24 = vor.u32 %v5247_v58, %v5110_v19  ;;  %v5118_v41 = vshrl.u32 %v13078_v3, 16  ;;  %v14450_v31 = vshll.u32 %v13092_v53, 16  ;;  %v9963_v56 = vpop.eup %9962  ;;  %v5050_v1 = vmul.f32 %v9961_v32, %v14940_v62  ;;  %v9685_v58 = vld [vmem:[#allocation16 + $0x1a8] sm:$0xff]  }
 0x8e4   : > { %8321 = vmatprep.subr.bf16.mxu0 %v9660_v20  ;;  %v13185_v47 = vpack.c.bf16 %v5048_v43, %v5047_v13  ;;  %vm14941_vm13 = vsmask.f32 256  ;;  %v13193_v40 = vrot.slane %v5094_v16, 7  ;;  %8460 = vmatpush3.bf16.msra.mxu1 %v9683_v52  ;;  %v9965_v61 = vpop.eup %9964  ;;  %v5051_v29 = vmul.f32 %v9963_v56, %v14942_v10  ;;  %v14943_v20 = vld [vmem:[#allocation58_spill] sm:$0xff]  ;;  %v9663_v52 = vld [vmem:[#allocation16 + $0x20] sm:$0xff]  }
 0x8e5   : > { %v13189_v14 = vsel %vm14941_vm13, %v13088_v60, %v5091_v25  ;;  %vm14944_vm2 = vnez %v14943_v20  ;;  %v5252_v13 = vor.u32 %v5250_v36, %v5118_v41  ;;  %v14445_v55 = vshll.u32 %v13108_v34, 16  ;;  %8461 = vmatprep.subr.bf16.mxu1 %v9684_v49  ;;  %v9686_v60 = vld [vmem:[#allocation16 + $0x1f0] sm:$0xff]   ;;  %v14945_v25 = vld [vmem:[#allocation60_spill] sm:$0xff]  ;;  %v15050_v20 = vld [vmem:[#allocation97_spill] sm:$0xff] }
 0x8e6   : > { %7552 = vmatmul.mubr.msk.bf16.gmra.mrb[136].mxu1 %vm14944_vm2, %v13189_v14  ;;  %v5052_v43 = vmul.f32 %v9965_v61, %v14945_v25  ;;  %v13203_v16 = vpack.c.bf16 %v5050_v1, %v5049_v44  ;;  %v5253_v32 = vrot.slane %v14450_v31, 1  ;;  %vm14946_vm13 = vsmask.f32 7424  ;;  %v9687_v44 = vld [vmem:[#allocation16 + $0x1b0] sm:$0xff]   ;;  %v9688_v61 = vld [vmem:[#allocation16 + $0x1f8] sm:$0xff]  }
 0x8e7   : > { %5612 = vmatprep.mubr.bf16.mxu1 %v13044_v57  ;;  %8322 = vmatpush3.bf16.msra.mxu0 %v9661_v23  ;;  %v13211_v62 = vsel %vm14946_vm13, %v5249_v24, %v5250_v36  ;;  %v5099_v49 = vor.u32 %v5097_v46, %v13193_v40  ;;  %vm14948_vm3 = vmmov %vm14946_vm13  ;;  %v14451_v46 = vshrl.u32 %v13092_v53, 16  ;;  %v9665_v24 = vld [vmem:[#allocation16 + $0x28] sm:$0xff]   ;;  %v14448_v10 = vshll.u32 %v13120_v59, 16  ;;  %v15030_v36 = vld [vmem:[#allocation74_spill] sm:$0xff] }
 0x8e8   : > { %8323 = vmatprep.subr.bf16.mxu0 %v9662_v26  ;;  %v13208_v56 = vpack.c.bf16 %v5052_v43, %v5051_v29  ;;  %8462 = vmatpush3.bf16.msra.mxu1 %v9685_v58  ;;  %v13220_v23 = vsel %vm14948_vm3, %v5252_v13, %v5253_v32  ;;  %v5256_v26 = vrot.slane %v14445_v55, 1  ;;  %v14446_v58 = vshrl.u32 %v13108_v34, 16  ;;  %v9666_v29 = vld [vmem:[#allocation16 + $0x70] sm:$0xff]   ;;  %v9689_v43 = vld [vmem:[#allocation16 + $0x1b8] sm:$0xff]  }
 0x8e9   : > { %14949 = vst [vmem:[#allocation73_spill] sm:$0xff] %v13220_v23  ;;  %8463 = vmatprep.subr.bf16.mxu1 %v9686_v60  ;;  %vm14951_vm3 = vsmask.f32 256  ;;  %v5255_v60 = vor.u32 %v5253_v32, %v14451_v46  ;;  %v5104_v25 = vrot.slane %v5102_v18, 7  ;;  %v14449_v55 = vshll.u32 %v13139_v22, 16  ;;  %v9668_v18 = vld [vmem:[#allocation16 + $0x78] sm:$0xff]  }
 0x8ea   : > { %8904 = vmatmul.mubr.msk.bf16.gmra.mrb[156].mxu0 %vm14871_vm9, %v13211_v62  ;;  %v13232_v13 = vsel %vm14951_vm3, %v13146_v21, %v5099_v49  ;;  %v9667_v21 = vld [vmem:[#allocation16 + $0x30] sm:$0xff]   ;;  %v5259_v32 = vrot.slane %v14448_v10, 1  ;;  %vm14954_vm3 = vsmask.f32 7424  ;;  %v13266_v10 = vld [vmem:[#allocation16 + $0x80] sm:$0xff]   ;;  %v5112_v31 = vrot.slane %v5110_v19, 7 }
 0x8eb   : > { %8907 = vmatprep.mubr.msk.bf16.mxu0 %vm14874_vm1, %v13220_v23  ;;  %8324 = vmatpush3.bf16.msra.mxu0 %v9663_v52  ;;  %v14952_v52 = vld [vmem:[#allocation64_spill] sm:$0xff]  ;;  %v13248_v49 = vsel %vm14954_vm3, %v5255_v60, %v5256_v26  ;;  %vm14957_vm1 = vmmov %vm14954_vm3  ;;  %v9669_v60 = vld [vmem:[#allocation16 + $0x38] sm:$0xff]   ;;  %v5120_v17 = vrot.slane %v5118_v41, 7  ;;  %vm14993_vm9 = vsmask.f32 256  ;;  %v15019_v7 = vshll.u32 %v13153_v2, 16 }
 0x8ec   : > { %8325 = vmatprep.subr.bf16.mxu0 %v9664_v5  ;;  %8464 = vmatpush3.bf16.msra.mxu1 %v9687_v44  ;;  %vm14953_vm13 = vnez %v14952_v52  ;;  %v5258_v5 = vor.u32 %v5256_v26, %v14446_v58  ;;  %14955 = vst [vmem:[#allocation61_spill] sm:$0xff] %v13248_v49  ;;  %v5107_v44 = vor.u32 %v5105_v11, %v5104_v25  ;;  %v14455_v26 = vshrl.u32 %v13120_v59, 16  ;;  %v15012_v58 = vld [vmem:[#allocation91_spill] sm:$0xff]  ;;  %v15034_v23 = vld [vmem:[#allocation77_spill] sm:$0xff] }
 0x8ed   : > { %8465 = vmatprep.subr.bf16.mxu1 %v9688_v61  ;;  %v14453_v11 = vshrl.u32 %v13139_v22, 16  ;;  %v5115_v19 = vor.u32 %v5113_v12, %v5112_v31  ;;  %v14466_v12 = vshll.u32 %v13185_v47, 16  ;;  %vm15031_vm4 = vnez %v15030_v36 }
 0x8ee   : > { %7553 = vmatmul.mubr.msk.bf16.gmra.mrb[140].mxu1 %vm14953_vm13, %v13232_v13  ;;  %v13256_v61 = vsel %vm14957_vm1, %v5258_v5, %v5259_v32  ;;  %vm14960_vm1 = vsmask.f32 256  ;;  %vm15035_vm10 = vnez %v15034_v23 }
 0x8ef   : > { %5620 = vmatprep.mubr.bf16.mxu1 %v13053_v63  ;;  %8326 = vmatpush3.bf16.msra.mxu0 %v9665_v24  ;;  %14958 = vst [vmem:[#allocation62_spill] sm:$0xff] %v13256_v61  ;;  %v5262_v24 = vrot.slane %v14449_v55, 1  ;;  %v13270_v5 = vsel %vm14960_vm1, %v13193_v40, %v5107_v44  ;;  %v5261_v55 = vor.u32 %v5259_v32, %v14455_v26  ;;  %vm14963_vm1 = vsmask.f32 7424  ;;  %v14979_v44 = vld [vmem:[#allocation104_spill] sm:$0xff] }
 0x8f0   : > { %8327 = vmatprep.subr.bf16.mxu0 %v9666_v29  ;;  %8466 = vmatpush3.bf16.msra.mxu1 %v9689_v43  ;;  %v14454_v43 = vshll.u32 %v13153_v2, 16  ;;  %v15005_v29 = vld [vmem:[#allocation86_spill] sm:$0xff] }
 0x8f1   : > { %v5264_v46 = vor.u32 %v5262_v24, %v14453_v11  ;;  %v13287_v32 = vsel %vm14963_vm1, %v5261_v55, %v5262_v24  ;;  %v14458_v55 = vshrl.u32 %v13153_v2, 16  ;;  %v14463_v24 = vshrl.u32 %v13171_v51, 16 }
 0x8f2   : > { %8908 = vmatmul.mubr.msk.bf16.gmra.mrb[160].mxu0 %vm11988_vm6, %v13248_v49  ;;  %v5265_v40 = vrot.slane %v14454_v43, 1  ;;  %14964 = vst [vmem:[#allocation78_spill] sm:$0xff] %v13287_v32  ;;  %v14469_v43 = vshll.u32 %v13203_v16, 16  ;;  %vm14980_vm6 = vnez %v14979_v44  ;;  %v15026_v49 = vld [vmem:[#allocation56_spill] sm:$0xff] }
 0x8f3   : > { %8911 = vmatprep.mubr.msk.bf16.mxu0 %vm14877_vm7, %v13256_v61  ;;  %8328 = vmatpush3.bf16.msra.mxu0 %v9667_v21  ;;  %v14961_v21 = vld [vmem:[#allocation67_spill] sm:$0xff]  ;;  %vm14966_vm7 = vmmov %vm14963_vm1  ;;  %vm14969_vm1 = vsmask.f32 256  ;;  %vm15027_vm0 = vnez %v15026_v49 }
 0x8f4   : > { %8329 = vmatprep.subr.bf16.mxu0 %v9668_v18  ;;  %vm14962_vm3 = vnez %v14961_v21  ;;  %v14457_v18 = vshll.u32 %v13171_v51, 16  ;;  %v13295_v11 = vsel %vm14966_vm7, %v5264_v46, %v5265_v40  ;;  %v13306_v26 = vsel %vm14969_vm1, %v5104_v25, %v5115_v19 }
 0x8f5   : > { %14967 = vst [vmem:[#allocation84_spill] sm:$0xff] %v13295_v11  ;;  %v5267_v46 = vor.u32 %v5265_v40, %v14458_v55  ;;  %v5271_v25 = vrot.slane %v14466_v12, 1  ;;  %vm14972_vm1 = vsmask.f32 7424  ;;  %v14974_v40 = vshll.u32 %v13078_v3, 16  ;;  %v14975_v55 = vld [vmem:[#allocation103_spill] sm:$0xff] }
 0x8f6   : > { %7554 = vmatmul.mubr.msk.bf16.gmra.mrb[144].mxu1 %vm14962_vm3, %v13270_v5 }
 0x8f7   : > { %5628 = vmatprep.mubr.bf16.mxu1 %v13066_v33  ;;  %8330 = vmatpush3.bf16.msra.mxu0 %v9669_v60  ;;  %v5268_v60 = vrot.slane %v14457_v18, 1  ;;  %v14970_v18 = vld [vmem:[#allocation72_spill] sm:$0xff]  ;;  %v5123_v41 = vor.u32 %v14974_v40, %v5120_v17  ;;  %v14477_v40 = vshll.u32 %v13208_v56, 16 }
 0x8f8   : > { %8927 = vmatprep.subr.bf16.mxu0 %v13266_v10  ;;  %vm14971_vm7 = vnez %v14970_v18 }
 0x8f9   : > { %v5270_v37 = vor.u32 %v5268_v60, %v14463_v24  ;;  %v13322_v19 = vsel %vm14972_vm1, %v5267_v46, %v5268_v60  ;;  %v5274_v24 = vrot.slane %v14469_v43, 1  ;;  %v14472_v60 = vshrl.u32 %v13185_v47, 16  ;;  %v14983_v43 = vld [vmem:[#allocation76_spill] sm:$0xff]  ;;  %v15058_v18 = vld [vmem:[#allocation78_spill] sm:$0xff] }
 0x8fa   : > { %8912 = vmatmul.mubr.msk.bf16.gmra.mrb[164].mxu0 %vm14878_vm8, %v13287_v32  ;;  %14973 = vst [vmem:[#allocation79_spill] sm:$0xff] %v13322_v19  ;;  %vm14977_vm8 = vmmov %vm14972_vm1  ;;  %v14473_v46 = vshrl.u32 %v13203_v16, 16  ;;  %vm14981_vm1 = vsmask.f32 256  ;;  %v14481_v32 = vshrl.u32 %v13208_v56, 16 }
 0x8fb   : > { %8915 = vmatprep.mubr.msk.bf16.mxu0 %vm14879_vm14, %v13295_v11  ;;  %vm14976_vm14 = vnez %v14975_v55  ;;  %v13330_v11 = vsel %vm14977_vm8, %v5270_v37, %v5271_v25  ;;  %v13341_v12 = vsel %vm14981_vm1, %v5112_v31, %v5123_v41  ;;  %v5273_v37 = vor.u32 %v5271_v25, %v14472_v60 }
 0x8fc   : > { %14978 = vst [vmem:[#allocation80_spill] sm:$0xff] %v13330_v11  ;;  %v14982_v55 = vshrl.u32 %v13092_v53, 16  ;;  %vm14984_vm8 = vnez %v14983_v43  ;;  %v5276_v44 = vor.u32 %v5274_v24, %v14473_v46  ;;  %vm14985_vm1 = vsmask.f32 7424  ;;  %v15055_v43 = vld [vmem:[#allocation62_spill] sm:$0xff]  ;;  %v15061_v36 = vld [vmem:[#allocation84_spill] sm:$0xff] }
 0x8fd   : > { %v13356_v31 = vsel %vm14985_vm1, %v5273_v37, %v5274_v24  ;;  %v14987_v25 = vshll.u32 %v13092_v53, 16  ;;  %v14994_v37 = vshrl.u32 %v13108_v34, 16 }
 0x8fe   : > { %7555 = vmatmul.mubr.msk.bf16.gmra.mrb[148].mxu1 %vm14971_vm7, %v13306_v26  ;;  %14986 = vst [vmem:[#allocation89_spill] sm:$0xff] %v13356_v31 }
 0x8ff   : > { %5636 = vmatprep.mubr.bf16.mxu1 %v13078_v3 }
 0x902   : > { %8916 = vmatmul.mubr.msk.bf16.gmra.mrb[168].mxu0 %vm14976_vm14, %v13322_v19  ;;  %v5128_v19 = vrot.slane %v14982_v55, 7  ;;  %v14988_v55 = vld [vmem:[#allocation105_spill] sm:$0xff]  ;;  %vm14990_vm14 = vmmov %vm14985_vm1 }
 0x903   : > { %8919 = vmatprep.mubr.msk.bf16.mxu0 %vm14980_vm6, %v13330_v11  ;;  %v5277_v11 = vrot.slane %v14477_v40, 1  ;;  %vm14989_vm6 = vnez %v14988_v55  ;;  %v14995_v55 = vld [vmem:[#allocation81_spill] sm:$0xff] }
 0x904   : > { %v5131_v41 = vor.u32 %v14987_v25, %v5128_v19  ;;  %v5136_v25 = vrot.slane %v14994_v37, 7  ;;  %vm14996_vm1 = vnez %v14995_v55 }
 0x905   : > { %v13364_v60 = vsel %vm14990_vm14, %v5276_v44, %v5277_v11  ;;  %v5279_v24 = vor.u32 %v5277_v11, %v14481_v32  ;;  %v14997_v44 = vld [vmem:[#allocation107_spill] sm:$0xff]  ;;  %v15002_v11 = vmov 0   ;;  %v15004_v32 = vshrl.u32 %v13120_v59, 16 }
 0x906   : > { %7556 = vmatmul.mubr.msk.bf16.gmra.mrb[152].mxu1 %vm14984_vm8, %v13341_v12  ;;  %14991 = vst [vmem:[#allocation90_spill] sm:$0xff] %v13364_v60  ;;  %v13371_v40 = vsel %vm14993_vm9, %v5120_v17, %v5131_v41  ;;  %v15000_v41 = vld [vmem:[#allocation108_spill] sm:$0xff] }
 0x907   : > { %5644 = vmatprep.mubr.bf16.mxu1 %v13092_v53  ;;  %v13383_v46 = vsel %vm14990_vm14, %v5279_v24, %v14997_v44  ;;  %vm15001_vm9 = vnez %v15000_v41  ;;  %v9675_v24 = vld [vmem:[#allocation16 + $0x88] sm:$0xff]  }
 0x908   : > { %14998 = vst [vmem:[#allocation57_spill] sm:$0xff] %v13383_v46  ;;  %v15008_v41 = vld [vmem:[#allocation109_spill] sm:$0xff] }
 0x90a   : > { %8920 = vmatmul.mubr.msk.bf16.gmra.mrb[172].mxu0 %vm14989_vm6, %v13356_v31  ;;  %v5144_v31 = vrot.slane %v15004_v32, 7  ;;  %vm15006_vm6 = vnez %v15005_v29  ;;  %v9678_v32 = vld [vmem:[#allocation16 + $0x90] sm:$0xff]  }
 0x90b   : > { %8923 = vmatprep.mubr.msk.bf16.mxu0 %vm14884_vm11, %v13364_v60  ;;  %v14999_v60 = vshll.u32 %v13108_v34, 16  ;;  %vm15003_vm11 = vsmask.f32 256 }
 0x90d   : > { %v5139_v17 = vor.u32 %v14999_v60, %v5136_v25  ;;  %v15007_v60 = vshll.u32 %v13120_v59, 16 }
 0x90e   : > { %7557 = vmatmul.mubr.msk.bf16.gmra.mrb[156].mxu1 %vm14996_vm1, %v13371_v40 }
 0x90f   : > { %5652 = vmatprep.mubr.bf16.mxu1 %v13108_v34  ;;  %v13392_v37 = vsel %vm15003_vm11, %v5128_v19, %v5139_v17  ;;  %v5147_v61 = vor.u32 %v15007_v60, %v5144_v31  ;;  %v15011_v17 = vshrl.u32 %v13139_v22, 16  ;;  %v15017_v60 = vld [vmem:[#allocation68_spill] sm:$0xff] }
 0x911   : > { %v13408_v19 = vsel %vm15003_vm11, %v5136_v25, %v5147_v61  ;;  %v9690_v61 = vld [vmem:[#allocation16 + $0xa0] sm:$0xff]  }
 0x912   : > { %8924 = vmatmul.mubr.msk.bf16.gmra.mrb[176].mxu0 %vm15001_vm9, %v13383_v46  ;;  %v15009_v46 = vld [vmem:[#allocation110_spill] sm:$0xff]  ;;  %vm15013_vm9 = vnez %v15012_v58  ;;  %v15052_v58 = vld [vmem:[#allocation61_spill] sm:$0xff] }
 0x913   : > { %6054 = vmatprep.mubr.bf16.mxu0 %v15002_v11  ;;  %vm15010_vm14 = vnez %v15009_v46  ;;  %v5152_v11 = vrot.slane %v15011_v17, 7  ;;  %v9681_v46 = vld [vmem:[#allocation16 + $0x98] sm:$0xff]  }
 0x916   : > { %7558 = vmatmul.mubr.msk.bf16.gmra.mrb[160].mxu1 %vm15006_vm6, %v13392_v37 }
 0x917   : > { %5660 = vmatprep.mubr.bf16.mxu1 %v13120_v59 }
 0x91a   : > { %7606 = vmatmul.mubr.msk.bf16.vlgmr.msra.gmra.mrb[180].mxu0 %vm15010_vm14, %v15008_v41  ;;  %vm15015_vm14 = vmmov %vm15003_vm11  ;;  %v15016_v41 = vshrl.u32 %v13153_v2, 16  ;;  %vm15018_vm11 = vnez %v15017_v60  ;;  %v15064_v60 = vld [vmem:[#allocation79_spill] sm:$0xff] }
 0x91b   : > { %8928 = vmatpush3.bf16.msra.mxu0 %v13266_v10  ;;  %6062 = vmatprep.mubr.bf16.mxu0 %v13019_v48  ;;  %v15014_v10 = vshll.u32 %v13139_v22, 16 }
 0x91c   : > { %8929 = vmatprep.subr.bf16.mxu0 %v9675_v24 }
 0x91d   : > { %v5155_v48 = vor.u32 %v15014_v10, %v5152_v11  ;;  %v15021_v10 = vshrl.u32 %v13171_v51, 16 }
 0x91e   : > { %7559 = vmatmul.mubr.msk.bf16.gmra.mrb[164].mxu1 %vm15013_vm9, %v13408_v19 }
 0x91f   : > { %5668 = vmatprep.mubr.bf16.mxu1 %v13139_v22  ;;  %8930 = vmatpush3.bf16.msra.mxu0 %v9675_v24  ;;  %v13423_v25 = vsel %vm15015_vm14, %v5144_v31, %v5155_v48  ;;  %v5160_v24 = vrot.slane %v15016_v41, 7  ;;  %v9692_v31 = vld [vmem:[#allocation16 + $0xb0] sm:$0xff]   ;;  %v15022_v48 = vld [vmem:[#allocation65_spill] sm:$0xff]  ;;  %v9693_v41 = vld [vmem:[#allocation16 + $0xb8] sm:$0xff]  }
 0x920   : > { %8931 = vmatprep.subr.bf16.mxu0 %v9678_v32 }
 0x922   : > { %7607 = vmatmul.mubr.msk.bf16.gmra.mrb[184].mxu0 %vm14924_vm5, %v13057_v15  ;;  %v9691_v15 = vld [vmem:[#allocation16 + $0xa8] sm:$0xff]   ;;  %vm15020_vm5 = vmmov %vm15015_vm14  ;;  %vm15023_vm14 = vnez %v15022_v48 }
 0x923   : > { %6070 = vmatprep.mubr.bf16.mxu0 %v13027_v6  ;;  %8932 = vmatpush3.bf16.msra.mxu0 %v9678_v32  ;;  %v5163_v32 = vor.u32 %v15019_v7, %v5160_v24  ;;  %v15024_v7 = vshll.u32 %v13171_v51, 16 }
 0x924   : > { %8933 = vmatprep.subr.bf16.mxu0 %v9681_v46 }
 0x925   : > { %v13438_v17 = vsel %vm15020_vm5, %v5152_v11, %v5163_v32  ;;  %v13452_v11 = vld [vmem:[#allocation16 + $0x200] sm:$0xff]  }
 0x926   : > { %7560 = vmatmul.mubr.msk.bf16.gmra.mrb[168].mxu1 %vm15018_vm11, %v13423_v25 }
 0x927   : > { %5676 = vmatprep.mubr.bf16.mxu1 %v13153_v2  ;;  %8934 = vmatpush3.bf16.msra.mxu0 %v9681_v46  ;;  %v5168_v46 = vrot.slane %v15021_v10, 7 }
 0x928   : > { %8935 = vmatprep.subr.bf16.mxu0 %v9690_v61 }
 0x92a   : > { %7608 = vmatmul.mubr.msk.bf16.gmra.mrb[188].mxu0 %vm14931_vm12, %v13127_v8 }
 0x92b   : > { %6078 = vmatprep.mubr.bf16.mxu0 %v13036_v38  ;;  %8936 = vmatpush3.bf16.msra.mxu0 %v9690_v61  ;;  %v5171_v61 = vor.u32 %v15024_v7, %v5168_v46 }
 0x92c   : > { %8937 = vmatprep.subr.bf16.mxu0 %v9691_v15 }
 0x92d   : > { %v13455_v32 = vsel %vm15020_vm5, %v5160_v24, %v5171_v61  ;;  %v15029_v61 = vshrl.u32 %v13203_v16, 16 }
 0x92e   : > { %7561 = vmatmul.mubr.msk.bf16.gmra.mrb[172].mxu1 %vm15023_vm14, %v13438_v17 }
 0x92f   : > { %5684 = vmatprep.mubr.bf16.mxu1 %v13171_v51  ;;  %8938 = vmatpush3.bf16.msra.mxu0 %v9691_v15  ;;  %v15025_v15 = vshrl.u32 %v13185_v47, 16 }
 0x930   : > { %8939 = vmatprep.subr.bf16.mxu0 %v9692_v31 }
 0x931   : > { %v5176_v10 = vrot.slane %v15025_v15, 7  ;;  %v5184_v15 = vrot.slane %v15029_v61, 7 }
 0x932   : > { %7609 = vmatmul.mubr.msk.bf16.gmra.mrb[192].mxu0 %vm14944_vm2, %v13189_v14 }
 0x933   : > { %6086 = vmatprep.mubr.bf16.mxu0 %v13044_v57  ;;  %8940 = vmatpush3.bf16.msra.mxu0 %v9692_v31  ;;  %v15028_v31 = vshll.u32 %v13185_v47, 16 }
 0x934   : > { %8941 = vmatprep.subr.bf16.mxu0 %v9693_v41 }
 0x935   : > { %v5179_v7 = vor.u32 %v15028_v31, %v5176_v10 }
 0x936   : > { %7562 = vmatmul.mubr.msk.bf16.gmra.mrb[176].mxu1 %vm15027_vm0, %v13455_v32 }
 0x937   : > { %5692 = vmatprep.mubr.bf16.mxu1 %v13185_v47  ;;  %8942 = vmatpush3.bf16.msra.mxu0 %v9693_v41  ;;  %v13471_v24 = vsel %vm15020_vm5, %v5168_v46, %v5179_v7  ;;  %v15032_v41 = vshll.u32 %v13203_v16, 16  ;;  %v15033_v7 = vshrl.u32 %v13208_v56, 16 }
 0x938   : > { %8975 = vmatprep.subr.bf16.mxu0 %v13452_v11 }
 0x939   : > { %v5187_v31 = vor.u32 %v15032_v41, %v5184_v15  ;;  %v13490_v61 = vrot.slane %v15033_v7, 7  ;;  %v15036_v41 = vshll.u32 %v13208_v56, 16 }
 0x93a   : > { %7610 = vmatmul.mubr.msk.bf16.gmra.mrb[196].mxu0 %vm14953_vm13, %v13232_v13 }
 0x93b   : > { %6094 = vmatprep.mubr.bf16.mxu0 %v13053_v63  ;;  %v13486_v46 = vsel %vm15020_vm5, %v5176_v10, %v5187_v31  ;;  %v5195_v1 = vor.u32 %v15036_v41, %v13490_v61  ;;  %v15037_v31 = vld [vmem:[#allocation82_spill] sm:$0xff]  ;;  %v15071_v41 = vld [vmem:[#allocation89_spill] sm:$0xff] }
 0x93c   : > { %vm15038_vm15 = vnez %v15037_v31  ;;  %v15074_v31 = vld [vmem:[#allocation69_spill] sm:$0xff] }
 0x93d   : > { %v13504_v10 = vsel %vm15020_vm5, %v5184_v15, %v5195_v1  ;;  %v15068_v15 = vld [vmem:[#allocation80_spill] sm:$0xff] }
 0x93e   : > { %7563 = vmatmul.mubr.msk.bf16.gmra.mrb[180].mxu1 %vm15031_vm4, %v13471_v24 }
 0x93f   : > { %5700 = vmatprep.mubr.bf16.mxu1 %v13203_v16 }
 0x942   : > { %7611 = vmatmul.mubr.msk.bf16.gmra.mrb[200].mxu0 %vm14962_vm3, %v13270_v5 }
 0x943   : > { %6102 = vmatprep.mubr.bf16.mxu0 %v13066_v33 }
 0x946   : > { %7564 = vmatmul.mubr.msk.bf16.gmra.mrb[184].mxu1 %vm15035_vm10, %v13486_v46 }
 0x947   : > { %5708 = vmatprep.mubr.bf16.mxu1 %v13208_v56 }
 0x94a   : > { %7612 = vmatmul.mubr.msk.bf16.gmra.mrb[204].mxu0 %vm14971_vm7, %v13306_v26 }
 0x94b   : > { %6110 = vmatprep.mubr.bf16.mxu0 %v13078_v3 }
 0x94e   : > { %7565 = vmatmul.mubr.msk.bf16.gmra.mrb[188].mxu1 %vm15038_vm15, %v13504_v10 }
 0x94f   : > { %6569 = vmatprep.mubr.bf16.mxu1 %v13027_v6 }
 0x952   : > { %7613 = vmatmul.mubr.msk.bf16.gmra.mrb[208].mxu0 %vm14984_vm8, %v13341_v12 }
 0x953   : > { %6118 = vmatprep.mubr.bf16.mxu0 %v13092_v53 }
 0x956   : > { %7662 = vmatmul.mubr.msk.bf16.vlgmr.msra.gmra.mrb[192].mxu1 %vm14931_vm12, %v13127_v8  ;;  %v15047_v8 = vld [vmem:[#allocation96_spill] sm:$0xff] }
 0x957   : > { %6577 = vmatprep.mubr.bf16.mxu1 %v13036_v38  ;;  %v15040_v38 = vld [vmem:[#allocation75_spill] sm:$0xff] }
 0x958   : > { %vm15041_vm12 = vnez %v15040_v38 }
 0x95a   : > { %7614 = vmatmul.mubr.msk.bf16.gmra.mrb[212].mxu0 %vm14996_vm1, %v13371_v40 }
 0x95b   : > { %6126 = vmatprep.mubr.bf16.mxu0 %v13108_v34 }
 0x95e   : > { %7663 = vmatmul.mubr.msk.bf16.gmra.mrb[196].mxu1 %vm14944_vm2, %v13189_v14  ;;  %vm15039_vm2 = vsmask.f32 7424  ;;  %v15049_v14 = vld [vmem:[#allocation73_spill] sm:$0xff] }
 0x95f   : > { %6585 = vmatprep.mubr.bf16.mxu1 %v13044_v57  ;;  %v5233_v6 = vsel %vm15039_vm2, %v14997_v44, %v13048_v39  ;;  %v9695_v57 = vld [vmem:[#allocation16 + $0x208] sm:$0xff]   ;;  %v9696_v39 = vld [vmem:[#allocation16 + $0x210] sm:$0xff]  }
 0x962   : > { %7615 = vmatmul.mubr.msk.bf16.gmra.mrb[216].mxu0 %vm15006_vm6, %v13392_v37 }
 0x963   : > { %6134 = vmatprep.mubr.bf16.mxu0 %v13120_v59 }
 0x966   : > { %7664 = vmatmul.mubr.msk.bf16.gmra.mrb[200].mxu1 %vm14953_vm13, %v13232_v13  ;;  %vm15043_vm13 = vnez %v14928_v9  ;;  %v15053_v13 = vld [vmem:[#allocation99_spill] sm:$0xff] }
 0x967   : > { %6593 = vmatprep.mubr.bf16.mxu1 %v13053_v63  ;;  %v9697_v63 = vld [vmem:[#allocation16 + $0x218] sm:$0xff]  }
 0x96a   : > { %7616 = vmatmul.mubr.msk.bf16.gmra.mrb[220].mxu0 %vm15013_vm9, %v13408_v19 }
 0x96b   : > { %6142 = vmatprep.mubr.bf16.mxu0 %v13139_v22 }
 0x96e   : > { %7665 = vmatmul.mubr.msk.bf16.gmra.mrb[204].mxu1 %vm14962_vm3, %v13270_v5  ;;  %vm15044_vm3 = vnez %v14858_v0  ;;  %v15056_v5 = vld [vmem:[#allocation100_spill] sm:$0xff] }
 0x96f   : > { %6601 = vmatprep.mubr.bf16.mxu1 %v13066_v33  ;;  %v9698_v33 = vld [vmem:[#allocation16 + $0x220] sm:$0xff]  }
 0x972   : > { %7617 = vmatmul.mubr.msk.bf16.gmra.mrb[224].mxu0 %vm15018_vm11, %v13423_v25 }
 0x973   : > { %6150 = vmatprep.mubr.bf16.mxu0 %v13153_v2 }
 0x976   : > { %7666 = vmatmul.mubr.msk.bf16.gmra.mrb[208].mxu1 %vm14971_vm7, %v13306_v26  ;;  %vm15045_vm7 = vnez %v14936_v28 }
 0x977   : > { %6609 = vmatprep.mubr.bf16.mxu1 %v13078_v3 }
 0x97a   : > { %7618 = vmatmul.mubr.msk.bf16.gmra.mrb[228].mxu0 %vm15023_vm14, %v13438_v17 }
 0x97b   : > { %6158 = vmatprep.mubr.bf16.mxu0 %v13171_v51 }
 0x97e   : > { %7667 = vmatmul.mubr.msk.bf16.gmra.mrb[212].mxu1 %vm14984_vm8, %v13341_v12  ;;  %vm15046_vm8 = vnez %v14939_v54  ;;  %v15059_v12 = vld [vmem:[#allocation101_spill] sm:$0xff] }
 0x97f   : > { %6617 = vmatprep.mubr.bf16.mxu1 %v13092_v53 }
 0x982   : > { %7619 = vmatmul.mubr.msk.bf16.gmra.mrb[232].mxu0 %vm15027_vm0, %v13455_v32 }
 0x983   : > { %6166 = vmatprep.mubr.bf16.mxu0 %v13185_v47 }
 0x986   : > { %7668 = vmatmul.mubr.msk.bf16.gmra.mrb[216].mxu1 %vm14996_vm1, %v13371_v40  ;;  %vm15048_vm1 = vnez %v15047_v8 }
 0x987   : > { %6625 = vmatprep.mubr.bf16.mxu1 %v13108_v34 }
 0x98a   : > { %7620 = vmatmul.mubr.msk.bf16.gmra.mrb[236].mxu0 %vm15031_vm4, %v13471_v24 }
 0x98b   : > { %6174 = vmatprep.mubr.bf16.mxu0 %v13203_v16 }
 0x98e   : > { %7669 = vmatmul.mubr.msk.bf16.gmra.mrb[220].mxu1 %vm15006_vm6, %v13392_v37  ;;  %vm15042_vm6 = vnez %v14925_v45  ;;  %v9699_v45 = vld [vmem:[#allocation16 + $0x228] sm:$0xff]  }
 0x98f   : > { %6633 = vmatprep.mubr.bf16.mxu1 %v13120_v59 }
 0x992   : > { %7621 = vmatmul.mubr.msk.bf16.gmra.mrb[240].mxu0 %vm15035_vm10, %v13486_v46 }
 0x993   : > { %8943 = vmatprep.mubr.msk.bf16.mxu0 %vm15041_vm12, %v5233_v6  ;;  %v15072_v6 = vld [vmem:[#allocation105_spill] sm:$0xff] }
 0x994   : > { %vm15073_vm2 = vnez %v15072_v6 }
 0x996   : > { %7670 = vmatmul.mubr.msk.bf16.gmra.mrb[224].mxu1 %vm15013_vm9, %v13408_v19  ;;  %vm15051_vm9 = vnez %v15050_v20  ;;  %v15062_v19 = vld [vmem:[#allocation102_spill] sm:$0xff] }
 0x997   : > { %6641 = vmatprep.mubr.bf16.mxu1 %v13139_v22  ;;  %v9700_v22 = vld [vmem:[#allocation16 + $0x230] sm:$0xff]  }
 0x99a   : > { %8944 = vmatmul.mubr.msk.bf16.vlgmr.msra.gmra.mrb[148].mxu0 %vm15042_vm6, %v13073_v50 }
 0x99b   : > { %8976 = vmatpush3.bf16.msra.mxu0 %v13452_v11  ;;  %8947 = vmatprep.mubr.msk.bf16.mxu0 %vm15043_vm13, %v13095_v4 }
 0x99c   : > { %8977 = vmatprep.subr.bf16.mxu0 %v9695_v57 }
 0x99e   : > { %7671 = vmatmul.mubr.msk.bf16.gmra.mrb[228].mxu1 %vm15018_vm11, %v13423_v25  ;;  %vm15054_vm11 = vnez %v15053_v13 }
 0x99f   : > { %6649 = vmatprep.mubr.bf16.mxu1 %v13153_v2  ;;  %8978 = vmatpush3.bf16.msra.mxu0 %v9695_v57  ;;  %v9701_v2 = vld [vmem:[#allocation16 + $0x238] sm:$0xff]  }
 0x9a0   : > { %8979 = vmatprep.subr.bf16.mxu0 %v9696_v39 }
 0x9a2   : > { %8948 = vmatmul.mubr.msk.bf16.gmra.mrb[152].mxu0 %vm15044_vm3, %v13116_v30 }
 0x9a3   : > { %8951 = vmatprep.mubr.msk.bf16.mxu0 %vm15045_vm7, %v13156_v35  ;;  %8980 = vmatpush3.bf16.msra.mxu0 %v9696_v39 }
 0x9a4   : > { %8981 = vmatprep.subr.bf16.mxu0 %v9697_v63 }
 0x9a6   : > { %7672 = vmatmul.mubr.msk.bf16.gmra.mrb[232].mxu1 %vm15023_vm14, %v13438_v17  ;;  %v8195_v50 = vpop.f32.mrb[128].mxu1  ;;  %vm15060_vm14 = vnez %v15059_v12  ;;  %v15065_v17 = vld [vmem:[#allocation103_spill] sm:$0xff] }
 0x9a7   : > { %6657 = vmatprep.mubr.bf16.mxu1 %v13171_v51  ;;  %8982 = vmatpush3.bf16.msra.mxu0 %v9697_v63  ;;  %v8196_v3 = vpop.f32.mrb[129].mxu1  ;;  %vm15066_vm5 = vnez %v15065_v17 }
 0x9a8   : > { %8983 = vmatprep.subr.bf16.mxu0 %v9698_v33  ;;  %v13607_v53 = vadd.f32 %v8196_v3, %v8195_v50  ;;  %v8198_v34 = vpop.f32.mrb[130].mxu1  ;;  %v15078_v3 = vld [vmem:[#allocation90_spill] sm:$0xff] }
 0x9a9   : > { %v8199_v59 = vpop.f32.mrb[131].mxu1 }
 0x9aa   : > { %8952 = vmatmul.mubr.msk.bf16.gmra.mrb[156].mxu0 %vm15046_vm8, %v13174_v27  ;;  %v13615_v42 = vadd.f32 %v8199_v59, %v8198_v34 }
 0x9ab   : > { %8955 = vmatprep.mubr.msk.bf16.mxu0 %vm15048_vm1, %v13211_v62  ;;  %8984 = vmatpush3.bf16.msra.mxu0 %v9698_v33  ;;  %v15076_v33 = vld [vmem:[#allocation63_spill] sm:$0xff] }
 0x9ac   : > { %8985 = vmatprep.subr.bf16.mxu0 %v9699_v45  ;;  %vm15077_vm12 = vnez %v15076_v33 }
 0x9ae   : > { %7673 = vmatmul.mubr.msk.bf16.gmra.mrb[236].mxu1 %vm15027_vm0, %v13455_v32  ;;  %vm15057_vm0 = vnez %v15056_v5 }
 0x9af   : > { %6665 = vmatprep.mubr.bf16.mxu1 %v13185_v47  ;;  %8986 = vmatpush3.bf16.msra.mxu0 %v9699_v45  ;;  %v15079_v45 = vld [vmem:[#allocation106_spill] sm:$0xff] }
 0x9b0   : > { %8987 = vmatprep.subr.bf16.mxu0 %v9700_v22  ;;  %vm15080_vm6 = vnez %v15079_v45 }
 0x9b1   : > { %v8201_v51 = vpop.f32.mrb[132].mxu1 }
 0x9b2   : > { %8956 = vmatmul.mubr.msk.bf16.gmra.mrb[160].mxu0 %vm15051_vm9, %v15049_v14  ;;  %v8202_v1 = vpop.f32.mrb[133].mxu1 }
 0x9b3   : > { %8959 = vmatprep.mubr.msk.bf16.mxu0 %vm15054_vm11, %v15052_v58  ;;  %v13627_v52 = vadd.f32 %v8202_v1, %v8201_v51  ;;  %v8204_v29 = vpop.f32.mrb[134].mxu1  ;;  %8988 = vmatpush3.bf16.msra.mxu0 %v9700_v22 }
 0x9b4   : > { %v8205_v49 = vpop.f32.mrb[135].mxu1  ;;  %8989 = vmatprep.subr.bf16.mxu0 %v9701_v2 }
 0x9b5   : > { %v13629_v47 = vadd.f32 %v8205_v49, %v8204_v29 }
 0x9b6   : > { %7674 = vmatmul.mubr.msk.bf16.gmra.mrb[240].mxu1 %vm15031_vm4, %v13471_v24  ;;  %vm15063_vm4 = vnez %v15062_v19 }
 0x9b7   : > { %6673 = vmatprep.mubr.bf16.mxu1 %v13203_v16  ;;  %8990 = vmatpush3.bf16.msra.mxu0 %v9701_v2 }
 0x9b9   : > { %v8207_v26 = vpop.f32.mrb[136].mxu1 }
 0x9ba   : > { %8960 = vmatmul.mubr.msk.bf16.gmra.mrb[164].mxu0 %vm15057_vm0, %v15055_v43  ;;  %v8208_v21 = vpop.f32.mrb[137].mxu1 }
 0x9bb   : > { %8963 = vmatprep.mubr.msk.bf16.mxu0 %vm15060_vm14, %v15058_v18  ;;  %v13641_v40 = vadd.f32 %v8208_v21, %v8207_v26  ;;  %v8210_v55 = vpop.f32.mrb[138].mxu1 }
 0x9bc   : > { %v8211_v44 = vpop.f32.mrb[139].mxu1 }
 0x9bd   : > { %v13643_v37 = vadd.f32 %v8211_v44, %v8210_v55 }
 0x9be   : > { %7675 = vmatmul.mubr.msk.bf16.gmra.mrb[244].mxu1 %vm15035_vm10, %v13486_v46  ;;  %v15069_v46 = vld [vmem:[#allocation104_spill] sm:$0xff] }
 0x9bf   : > { %6681 = vmatprep.mubr.bf16.mxu1 %v13208_v56  ;;  %v15067_v56 = vmov 0   ;;  %vm15070_vm10 = vnez %v15069_v46 }
 0x9c1   : > { %v8213_v16 = vpop.f32.mrb[140].mxu1 }
 0x9c2   : > { %8964 = vmatmul.mubr.msk.bf16.gmra.mrb[168].mxu0 %vm15063_vm4, %v15061_v36  ;;  %v8214_v25 = vpop.f32.mrb[141].mxu1 }
 0x9c3   : > { %8967 = vmatprep.mubr.msk.bf16.mxu0 %vm15066_vm5, %v15064_v60  ;;  %v13655_v48 = vadd.f32 %v8214_v25, %v8213_v16  ;;  %v8216_v11 = vpop.f32.mrb[142].mxu1 }
 0x9c4   : > { %v8217_v32 = vpop.f32.mrb[143].mxu1 }
 0x9c5   : > { %v13657_v24 = vadd.f32 %v8217_v32, %v8216_v11 }
 0x9c6   : > { %7676 = vmatmul.mubr.msk.bf16.gmra.mrb[248].mxu1 %vm15038_vm15, %v13504_v10  ;;  %vm15075_vm15 = vsmask.f32 256 }
 0x9c7   : > { %6689 = vmatprep.mubr.bf16.mxu1 %v15067_v56  ;;  %v5197_v10 = vsel %vm15075_vm15, %v13490_v61, %v15074_v31 }
 0x9c9   : > { %v8219_v23 = vpop.f32.mrb[144].mxu1 }
 0x9ca   : > { %8968 = vmatmul.mubr.msk.bf16.gmra.mrb[172].mxu0 %vm15070_vm10, %v15068_v15  ;;  %v8220_v7 = vpop.f32.mrb[145].mxu1 }
 0x9cb   : > { %8971 = vmatprep.mubr.msk.bf16.mxu0 %vm15073_vm2, %v15071_v41  ;;  %v13669_v38 = vadd.f32 %v8220_v7, %v8219_v23  ;;  %v8222_v57 = vpop.f32.mrb[146].mxu1 }
 0x9cc   : > { %v8223_v39 = vpop.f32.mrb[147].mxu1 }
 0x9cd   : > { %v13671_v63 = vadd.f32 %v8223_v39, %v8222_v57 }
 0x9ce   : > { %7677 = vmatmul.mubr.msk.bf16.gmra.mrb[252].mxu1 %vm15077_vm12, %v5197_v10 }
 0x9d1   : > { %v8225_v50 = vpop.f32.mrb[148].mxu1 }
 0x9d2   : > { %8972 = vmatmul.mubr.msk.bf16.gmra.mrb[176].mxu0 %vm15080_vm6, %v15078_v3  ;;  %v8226_v34 = vpop.f32.mrb[149].mxu1 }
 0x9d3   : > { %8991 = vmatprep.mubr.msk.bf16.mxu0 %vm15043_vm13, %v13095_v4  ;;  %v13684_v59 = vadd.f32 %v8226_v34, %v8225_v50  ;;  %v8228_v22 = vpop.f32.mrb[150].mxu1 }
 0x9d4   : > { %v8229_v2 = vpop.f32.mrb[151].mxu1 }
 0x9d5   : > { %v13686_v51 = vadd.f32 %v8229_v2, %v8228_v22 }
 0x9d9   : > { %v8231_v61 = vpop.f32.mrb[152].mxu1 }
 0x9da   : > { %8992 = vmatmul.mubr.msk.bf16.vlgmr.msra.gmra.mrb[148].mxu0 %vm15044_vm3, %v13116_v30  ;;  %v8232_v1 = vpop.f32.mrb[153].mxu1 }
 0x9db   : > { %8995 = vmatprep.mubr.msk.bf16.mxu0 %vm15045_vm7, %v13156_v35  ;;  %v13694_v29 = vadd.f32 %v8232_v1, %v8231_v61  ;;  %v8234_v9 = vpop.f32.mrb[154].mxu1 }
 0x9dc   : > { %v8235_v4 = vpop.f32.mrb[155].mxu1 }
 0x9dd   : > { %v13696_v49 = vadd.f32 %v8235_v4, %v8234_v9 }
 0x9e1   : > { %v8237_v26 = vpop.f32.mrb[156].mxu1 }
 0x9e2   : > { %8996 = vmatmul.mubr.msk.bf16.gmra.mrb[152].mxu0 %vm15046_vm8, %v13174_v27  ;;  %v8238_v21 = vpop.f32.mrb[157].mxu1 }
 0x9e3   : > { %8999 = vmatprep.mubr.msk.bf16.mxu0 %vm15048_vm1, %v13211_v62  ;;  %v13704_v0 = vadd.f32 %v8238_v21, %v8237_v26  ;;  %v8240_v30 = vpop.f32.mrb[158].mxu1 }
 0x9e4   : > { %v8241_v35 = vpop.f32.mrb[159].mxu1 }
 0x9e5   : > { %v13706_v28 = vadd.f32 %v8241_v35, %v8240_v30 }
 0x9e9   : > { %v8243_v55 = vpop.f32.mrb[160].mxu1 }
 0x9ea   : > { %9000 = vmatmul.mubr.msk.bf16.gmra.mrb[156].mxu0 %vm15051_vm9, %v15049_v14  ;;  %v8244_v44 = vpop.f32.mrb[161].mxu1 }
 0x9eb   : > { %9003 = vmatprep.mubr.msk.bf16.mxu0 %vm15054_vm11, %v15052_v58  ;;  %v13714_v27 = vadd.f32 %v8244_v44, %v8243_v55  ;;  %v8246_v54 = vpop.f32.mrb[162].mxu1 }
 0x9ec   : > { %v8247_v62 = vpop.f32.mrb[163].mxu1 }
 0x9ed   : > { %v8331_v8 = vpop.f32.mrb[180].mxu0  ;;  %v13716_v16 = vadd.f32 %v8247_v62, %v8246_v54 }
 0x9ee   : > { %v8332_v25 = vpop.f32.mrb[181].mxu0 }
 0x9ef   : > { %v8333_v11 = vadd.f32 %v8332_v25, %v8331_v8  ;;  %v8334_v32 = vpop.f32.mrb[182].mxu0 }
 0x9f0   : > { %v8335_v56 = vpop.f32.mrb[183].mxu0 }
 0x9f1   : > { %v13719_v23 = vadd.f32 %v8333_v11, %v13607_v53  ;;  %v8336_v14 = vadd.f32 %v8335_v56, %v8334_v32  ;;  %v8249_v20 = vpop.f32.mrb[164].mxu1  ;;  %v15081_v11 = vld [vmem:[#allocation57_spill] sm:$0xff]  ;;  %v15082_v32 = vld [vmem:[#allocation108_spill] sm:$0xff] }
 0x9f2   : > { %9004 = vmatmul.mubr.msk.bf16.gmra.mrb[160].mxu0 %vm15057_vm0, %v15055_v43  ;;  %v8250_v58 = vpop.f32.mrb[165].mxu1  ;;  %vm15083_vm13 = vnez %v15082_v32 }
 0x9f3   : > { %v13725_v13 = vadd.f32 %v8336_v14, %v13615_v42  ;;  %9007 = vmatprep.mubr.msk.bf16.mxu0 %vm15060_vm14, %v15058_v18  ;;  %v13730_v7 = vadd.f32 %v8250_v58, %v8249_v20  ;;  %v8252_v57 = vpop.f32.mrb[166].mxu1 }
 0x9f4   : > { %v8253_v39 = vpop.f32.mrb[167].mxu1 }
 0x9f5   : > { %v8337_v53 = vpop.f32.mrb[184].mxu0  ;;  %v13732_v31 = vadd.f32 %v8253_v39, %v8252_v57 }
 0x9f6   : > { %v8338_v10 = vpop.f32.mrb[185].mxu0 }
 0x9f7   : > { %v8339_v33 = vadd.f32 %v8338_v10, %v8337_v53  ;;  %v8340_v50 = vpop.f32.mrb[186].mxu0 }
 0x9f8   : > { %v8341_v5 = vpop.f32.mrb[187].mxu0 }
 0x9f9   : > { %v13735_v43 = vadd.f32 %v8339_v33, %v13627_v52  ;;  %v8342_v42 = vadd.f32 %v8341_v5, %v8340_v50  ;;  %v8255_v34 = vpop.f32.mrb[168].mxu1  ;;  %v15084_v33 = vld [vmem:[#allocation111_spill] sm:$0xff]  ;;  %v15085_v50 = vld [vmem:[#allocation112_spill] sm:$0xff] }
 0x9fa   : > { %9008 = vmatmul.mubr.msk.bf16.gmra.mrb[164].mxu0 %vm15063_vm4, %v15061_v36  ;;  %v8256_v18 = vpop.f32.mrb[169].mxu1  ;;  %vm15086_vm3 = vnez %v15085_v50 }
 0x9fb   : > { %v13741_v12 = vadd.f32 %v8342_v42, %v13629_v47  ;;  %9011 = vmatprep.mubr.msk.bf16.mxu0 %vm15066_vm5, %v15064_v60  ;;  %v13746_v22 = vadd.f32 %v8256_v18, %v8255_v34  ;;  %v8258_v2 = vpop.f32.mrb[170].mxu1 }
 0x9fc   : > { %v8259_v61 = vpop.f32.mrb[171].mxu1 }
 0x9fd   : > { %v8343_v52 = vpop.f32.mrb[188].mxu0  ;;  %v13748_v1 = vadd.f32 %v8259_v61, %v8258_v2 }
 0x9fe   : > { %v8344_v9 = vpop.f32.mrb[189].mxu0 }
 0x9ff   : > { %v8345_v4 = vadd.f32 %v8344_v9, %v8343_v52  ;;  %v8346_v26 = vpop.f32.mrb[190].mxu0 }
 0xa00   : > { %v8347_v19 = vpop.f32.mrb[191].mxu0 }
 0xa01   : > { %v13751_v36 = vadd.f32 %v8345_v4, %v13641_v40  ;;  %v8348_v47 = vadd.f32 %v8347_v19, %v8346_v26  ;;  %v8261_v21 = vpop.f32.mrb[172].mxu1 }
 0xa02   : > { %9012 = vmatmul.mubr.msk.bf16.gmra.mrb[168].mxu0 %vm15070_vm10, %v15068_v15  ;;  %v8262_v60 = vpop.f32.mrb[173].mxu1 }
 0xa03   : > { %v13757_v17 = vadd.f32 %v8348_v47, %v13643_v37  ;;  %9015 = vmatprep.mubr.msk.bf16.mxu0 %vm15073_vm2, %v15071_v41  ;;  %v13762_v30 = vadd.f32 %v8262_v60, %v8261_v21  ;;  %v8264_v35 = vpop.f32.mrb[174].mxu1 }
 0xa04   : > { %v8265_v55 = vpop.f32.mrb[175].mxu1 }
 0xa05   : > { %v8349_v40 = vpop.f32.mrb[192].mxu0  ;;  %v13764_v44 = vadd.f32 %v8265_v55, %v8264_v35 }
 0xa06   : > { %v8350_v54 = vpop.f32.mrb[193].mxu0 }
 0xa07   : > { %v8351_v62 = vadd.f32 %v8350_v54, %v8349_v40  ;;  %v8352_v8 = vpop.f32.mrb[194].mxu0 }
 0xa08   : > { %v8353_v46 = vpop.f32.mrb[195].mxu0 }
 0xa09   : > { %v13767_v15 = vadd.f32 %v8351_v62, %v13655_v48  ;;  %v8354_v37 = vadd.f32 %v8353_v46, %v8352_v8  ;;  %v8267_v25 = vpop.f32.mrb[176].mxu1 }
 0xa0a   : > { %9016 = vmatmul.mubr.msk.bf16.gmra.mrb[172].mxu0 %vm15080_vm6, %v15078_v3  ;;  %v8268_v41 = vpop.f32.mrb[177].mxu1 }
 0xa0b   : > { %v13773_v6 = vadd.f32 %v8354_v37, %v13657_v24  ;;  %9019 = vmatprep.mubr.msk.bf16.mxu0 %vm15083_vm13, %v15081_v11  ;;  %v13778_v56 = vadd.f32 %v8268_v41, %v8267_v25  ;;  %v8270_v14 = vpop.f32.mrb[178].mxu1 }
 0xa0c   : > { %v8271_v20 = vpop.f32.mrb[179].mxu1 }
 0xa0d   : > { %v8355_v48 = vpop.f32.mrb[196].mxu0  ;;  %v13780_v58 = vadd.f32 %v8271_v20, %v8270_v14 }
 0xa0e   : > { %v8356_v57 = vpop.f32.mrb[197].mxu0 }
 0xa0f   : > { %v8357_v39 = vadd.f32 %v8356_v57, %v8355_v48  ;;  %v8358_v53 = vpop.f32.mrb[198].mxu0 }
 0xa10   : > { %v8359_v45 = vpop.f32.mrb[199].mxu0 }
 0xa11   : > { %v13783_v3 = vadd.f32 %v8357_v39, %v13669_v38  ;;  %v8360_v24 = vadd.f32 %v8359_v45, %v8358_v53  ;;  %v8273_v10 = vpop.f32.mrb[180].mxu1 }
 0xa12   : > { %9020 = vmatmul.mubr.msk.bf16.gmra.mrb[176].mxu0 %vm15086_vm3, %v15084_v33  ;;  %v8274_v5 = vpop.f32.mrb[181].mxu1 }
 0xa13   : > { %v13789_v42 = vadd.f32 %v8360_v24, %v13671_v63  ;;  %v13791_v34 = vadd.f32 %v8274_v5, %v8273_v10  ;;  %v8276_v18 = vpop.f32.mrb[182].mxu1 }
 0xa14   : > { %v8277_v2 = vpop.f32.mrb[183].mxu1 }
 0xa15   : > { %v8361_v61 = vpop.f32.mrb[200].mxu0  ;;  %v13793_v52 = vadd.f32 %v8277_v2, %v8276_v18 }
 0xa16   : > { %v8362_v9 = vpop.f32.mrb[201].mxu0 }
 0xa17   : > { %v8363_v38 = vadd.f32 %v8362_v9, %v8361_v61  ;;  %v8364_v4 = vpop.f32.mrb[202].mxu0 }
 0xa18   : > { %v8365_v26 = vpop.f32.mrb[203].mxu0 }
 0xa19   : > { %v13796_v19 = vadd.f32 %v8363_v38, %v13684_v59  ;;  %v8366_v47 = vadd.f32 %v8365_v26, %v8364_v4  ;;  %v8279_v21 = vpop.f32.mrb[184].mxu1 }
 0xa1a   : > { %v8280_v60 = vpop.f32.mrb[185].mxu1 }
 0xa1b   : > { %v13799_v63 = vadd.f32 %v8366_v47, %v13686_v51  ;;  %v13801_v35 = vadd.f32 %v8280_v60, %v8279_v21  ;;  %v8282_v55 = vpop.f32.mrb[186].mxu1 }
 0xa1c   : > { %v8283_v40 = vpop.f32.mrb[187].mxu1 }
 0xa1d   : > { %v8367_v54 = vpop.f32.mrb[204].mxu0  ;;  %v13803_v62 = vadd.f32 %v8283_v40, %v8282_v55 }
 0xa1e   : > { %v8368_v8 = vpop.f32.mrb[205].mxu0 }
 0xa1f   : > { %v8369_v46 = vadd.f32 %v8368_v8, %v8367_v54  ;;  %v8370_v37 = vpop.f32.mrb[206].mxu0 }
 0xa20   : > { %v8371_v25 = vpop.f32.mrb[207].mxu0 }
 0xa21   : > { %v13806_v59 = vadd.f32 %v8369_v46, %v13694_v29  ;;  %v8372_v41 = vadd.f32 %v8371_v25, %v8370_v37  ;;  %v8285_v11 = vpop.f32.mrb[188].mxu1 }
 0xa22   : > { %v8286_v32 = vpop.f32.mrb[189].mxu1 }
 0xa23   : > { %v13809_v51 = vadd.f32 %v8372_v41, %v13696_v49  ;;  %v13811_v14 = vadd.f32 %v8286_v32, %v8285_v11  ;;  %v8288_v20 = vpop.f32.mrb[190].mxu1 }
 0xa24   : > { %v8289_v48 = vpop.f32.mrb[191].mxu1 }
 0xa25   : > { %v8373_v57 = vpop.f32.mrb[208].mxu0  ;;  %v13813_v39 = vadd.f32 %v8289_v48, %v8288_v20 }
 0xa26   : > { %v8374_v53 = vpop.f32.mrb[209].mxu0 }
 0xa27   : > { %v8375_v45 = vadd.f32 %v8374_v53, %v8373_v57  ;;  %v8376_v24 = vpop.f32.mrb[210].mxu0 }
 0xa28   : > { %v8377_v10 = vpop.f32.mrb[211].mxu0 }
 0xa29   : > { %v13816_v29 = vadd.f32 %v8375_v45, %v13704_v0  ;;  %v8378_v33 = vadd.f32 %v8377_v10, %v8376_v24  ;;  %v8467_v50 = vpop.f32.mrb[192].mxu1 }
 0xa2a   : > { %v8468_v5 = vpop.f32.mrb[193].mxu1 }
 0xa2b   : > { %v13819_v49 = vadd.f32 %v8378_v33, %v13706_v28  ;;  %v8469_v18 = vadd.f32 %v8468_v5, %v8467_v50  ;;  %v8470_v2 = vpop.f32.mrb[194].mxu1 }
 0xa2c   : > { %v8471_v61 = vpop.f32.mrb[195].mxu1 }
 0xa2d   : > { %v8379_v9 = vpop.f32.mrb[212].mxu0  ;;  %v8472_v38 = vadd.f32 %v8471_v61, %v8470_v2  ;;  %v13822_v4 = vadd.f32 %v13719_v23, %v8469_v18 }
 0xa2e   : > { %v8380_v26 = vpop.f32.mrb[213].mxu0 }
 0xa2f   : > { %v8381_v47 = vadd.f32 %v8380_v26, %v8379_v9  ;;  %v8382_v21 = vpop.f32.mrb[214].mxu0  ;;  %v13825_v0 = vadd.f32 %v13725_v13, %v8472_v38 }
 0xa30   : > { %v8383_v60 = vpop.f32.mrb[215].mxu0 }
 0xa31   : > { %v13828_v55 = vadd.f32 %v8381_v47, %v13714_v27  ;;  %v8384_v28 = vadd.f32 %v8383_v60, %v8382_v21  ;;  %v8473_v40 = vpop.f32.mrb[196].mxu1 }
 0xa32   : > { %v8474_v54 = vpop.f32.mrb[197].mxu1 }
 0xa33   : > { %v13831_v8 = vadd.f32 %v8384_v28, %v13716_v16  ;;  %v8475_v46 = vadd.f32 %v8474_v54, %v8473_v40  ;;  %v8476_v37 = vpop.f32.mrb[198].mxu1 }
 0xa34   : > { %v8477_v23 = vpop.f32.mrb[199].mxu1 }
 0xa35   : > { %v8385_v25 = vpop.f32.mrb[216].mxu0  ;;  %v8478_v41 = vadd.f32 %v8477_v23, %v8476_v37  ;;  %v13834_v11 = vadd.f32 %v13735_v43, %v8475_v46 }
 0xa36   : > { %v8386_v13 = vpop.f32.mrb[217].mxu0 }
 0xa37   : > { %v8387_v32 = vadd.f32 %v8386_v13, %v8385_v25  ;;  %v8388_v20 = vpop.f32.mrb[218].mxu0  ;;  %v13837_v27 = vadd.f32 %v13741_v12, %v8478_v41 }
 0xa38   : > { %v8389_v48 = vpop.f32.mrb[219].mxu0 }
 0xa39   : > { %v13840_v57 = vadd.f32 %v8387_v32, %v13730_v7  ;;  %v8390_v16 = vadd.f32 %v8389_v48, %v8388_v20  ;;  %v8479_v53 = vpop.f32.mrb[200].mxu1 }
 0xa3a   : > { %v8480_v45 = vpop.f32.mrb[201].mxu1 }
 0xa3b   : > { %v13843_v24 = vadd.f32 %v8390_v16, %v13732_v31  ;;  %v8481_v10 = vadd.f32 %v8480_v45, %v8479_v53  ;;  %v8482_v33 = vpop.f32.mrb[202].mxu1 }
 0xa3c   : > { %v8483_v43 = vpop.f32.mrb[203].mxu1 }
 0xa3d   : > { %v8391_v50 = vpop.f32.mrb[220].mxu0  ;;  %v8484_v5 = vadd.f32 %v8483_v43, %v8482_v33  ;;  %v13846_v18 = vadd.f32 %v13751_v36, %v8481_v10 }
 0xa3e   : > { %v8392_v12 = vpop.f32.mrb[221].mxu0 }
 0xa3f   : > { %v8393_v2 = vadd.f32 %v8392_v12, %v8391_v50  ;;  %v8394_v61 = vpop.f32.mrb[222].mxu0  ;;  %v13849_v7 = vadd.f32 %v13757_v17, %v8484_v5 }
 0xa40   : > { %v8395_v9 = vpop.f32.mrb[223].mxu0 }
 0xa41   : > { %v13852_v38 = vadd.f32 %v8393_v2, %v13746_v22  ;;  %v8396_v31 = vadd.f32 %v8395_v9, %v8394_v61  ;;  %v8485_v26 = vpop.f32.mrb[204].mxu1 }
 0xa42   : > { %v8486_v47 = vpop.f32.mrb[205].mxu1 }
 0xa43   : > { %v13855_v21 = vadd.f32 %v8396_v31, %v13748_v1  ;;  %v8487_v60 = vadd.f32 %v8486_v47, %v8485_v26  ;;  %v8488_v28 = vpop.f32.mrb[206].mxu1 }
 0xa44   : > { %v8489_v36 = vpop.f32.mrb[207].mxu1 }
 0xa45   : > { %v8397_v40 = vpop.f32.mrb[224].mxu0  ;;  %v8490_v54 = vadd.f32 %v8489_v36, %v8488_v28  ;;  %v13858_v46 = vadd.f32 %v13767_v15, %v8487_v60 }
 0xa46   : > { %v8398_v17 = vpop.f32.mrb[225].mxu0 }
 0xa47   : > { %v8399_v37 = vadd.f32 %v8398_v17, %v8397_v40  ;;  %v8400_v23 = vpop.f32.mrb[226].mxu0  ;;  %v13861_v22 = vadd.f32 %v13773_v6, %v8490_v54 }
 0xa48   : > { %v8401_v25 = vpop.f32.mrb[227].mxu0 }
 0xa49   : > { %v13864_v41 = vadd.f32 %v8399_v37, %v13762_v30  ;;  %v8402_v1 = vadd.f32 %v8401_v25, %v8400_v23  ;;  %v8491_v13 = vpop.f32.mrb[208].mxu1 }
 0xa4a   : > { %v8492_v32 = vpop.f32.mrb[209].mxu1 }
 0xa4b   : > { %v13867_v20 = vadd.f32 %v8402_v1, %v13764_v44  ;;  %v8493_v48 = vadd.f32 %v8492_v32, %v8491_v13  ;;  %v8494_v16 = vpop.f32.mrb[210].mxu1 }
 0xa4c   : > { %v8495_v15 = vpop.f32.mrb[211].mxu1 }
 0xa4d   : > { %v8403_v53 = vpop.f32.mrb[228].mxu0  ;;  %v8496_v45 = vadd.f32 %v8495_v15, %v8494_v16  ;;  %v13870_v10 = vadd.f32 %v13783_v3, %v8493_v48 }
 0xa4e   : > { %v8404_v6 = vpop.f32.mrb[229].mxu0 }
 0xa4f   : > { %v8405_v33 = vadd.f32 %v8404_v6, %v8403_v53  ;;  %v8406_v43 = vpop.f32.mrb[230].mxu0  ;;  %v13873_v30 = vadd.f32 %v13789_v42, %v8496_v45 }
 0xa50   : > { %v8407_v50 = vpop.f32.mrb[231].mxu0 }
 0xa51   : > { %v13876_v5 = vadd.f32 %v8405_v33, %v13778_v56  ;;  %v8408_v44 = vadd.f32 %v8407_v50, %v8406_v43  ;;  %v8497_v12 = vpop.f32.mrb[212].mxu1 }
 0xa52   : > { %v8498_v2 = vpop.f32.mrb[213].mxu1 }
 0xa53   : > { %v13879_v61 = vadd.f32 %v8408_v44, %v13780_v58  ;;  %v8499_v9 = vadd.f32 %v8498_v2, %v8497_v12  ;;  %v8500_v31 = vpop.f32.mrb[214].mxu1 }
 0xa54   : > { %v8501_v3 = vpop.f32.mrb[215].mxu1 }
 0xa55   : > { %v8409_v26 = vpop.f32.mrb[232].mxu0  ;;  %v8502_v47 = vadd.f32 %v8501_v3, %v8500_v31  ;;  %v13882_v60 = vadd.f32 %v13796_v19, %v8499_v9 }
 0xa56   : > { %v8410_v42 = vpop.f32.mrb[233].mxu0 }
 0xa57   : > { %v8411_v28 = vadd.f32 %v8410_v42, %v8409_v26  ;;  %v8412_v36 = vpop.f32.mrb[234].mxu0  ;;  %v13885_v56 = vadd.f32 %v13799_v63, %v8502_v47 }
 0xa58   : > { %v8413_v40 = vpop.f32.mrb[235].mxu0 }
 0xa59   : > { %v13888_v54 = vadd.f32 %v8411_v28, %v13791_v34  ;;  %v8414_v58 = vadd.f32 %v8413_v40, %v8412_v36  ;;  %v8503_v17 = vpop.f32.mrb[216].mxu1 }
 0xa5a   : > { %v8504_v37 = vpop.f32.mrb[217].mxu1 }
 0xa5b   : > { %v13891_v23 = vadd.f32 %v8414_v58, %v13793_v52  ;;  %v8505_v25 = vadd.f32 %v8504_v37, %v8503_v17  ;;  %v8506_v1 = vpop.f32.mrb[218].mxu1 }
 0xa5c   : > { %v8507_v19 = vpop.f32.mrb[219].mxu1 }
 0xa5d   : > { %v8415_v13 = vpop.f32.mrb[236].mxu0  ;;  %v8508_v32 = vadd.f32 %v8507_v19, %v8506_v1  ;;  %v13894_v48 = vadd.f32 %v13806_v59, %v8505_v25 }
 0xa5e   : > { %v8416_v63 = vpop.f32.mrb[237].mxu0 }
 0xa5f   : > { %v8417_v16 = vadd.f32 %v8416_v63, %v8415_v13  ;;  %v8418_v15 = vpop.f32.mrb[238].mxu0  ;;  %v13897_v34 = vadd.f32 %v13809_v51, %v8508_v32 }
 0xa60   : > { %v8419_v53 = vpop.f32.mrb[239].mxu0 }
 0xa61   : > { %v13900_v45 = vadd.f32 %v8417_v16, %v13801_v35  ;;  %v8420_v52 = vadd.f32 %v8419_v53, %v8418_v15  ;;  %v8509_v6 = vpop.f32.mrb[220].mxu1 }
 0xa62   : > { %v8510_v33 = vpop.f32.mrb[221].mxu1 }
 0xa63   : > { %v13903_v43 = vadd.f32 %v8420_v52, %v13803_v62  ;;  %v8511_v50 = vadd.f32 %v8510_v33, %v8509_v6  ;;  %v8512_v44 = vpop.f32.mrb[222].mxu1 }
 0xa64   : > { %v8513_v59 = vpop.f32.mrb[223].mxu1 }
 0xa65   : > { %v8421_v12 = vpop.f32.mrb[240].mxu0  ;;  %v8514_v2 = vadd.f32 %v8513_v59, %v8512_v44  ;;  %v13906_v9 = vadd.f32 %v13816_v29, %v8511_v50 }
 0xa66   : > { %v8422_v51 = vpop.f32.mrb[241].mxu0 }
 0xa67   : > { %v8423_v31 = vadd.f32 %v8422_v51, %v8421_v12  ;;  %v8424_v3 = vpop.f32.mrb[242].mxu0  ;;  %v13909_v35 = vadd.f32 %v13819_v49, %v8514_v2 }
 0xa68   : > { %v8425_v26 = vpop.f32.mrb[243].mxu0 }
 0xa69   : > { %v13912_v47 = vadd.f32 %v8423_v31, %v13811_v14  ;;  %v8426_v62 = vadd.f32 %v8425_v26, %v8424_v3  ;;  %v8515_v42 = vpop.f32.mrb[224].mxu1 }
 0xa6a   : > { %v8516_v28 = vpop.f32.mrb[225].mxu1 }
 0xa6b   : > { %v9225_v36 = vadd.f32 %v8426_v62, %v13813_v39  ;;  %v8517_v40 = vadd.f32 %v8516_v28, %v8515_v42  ;;  %v8518_v58 = vpop.f32.mrb[226].mxu1 }
 0xa6c   : > { %v8519_v17 = vpop.f32.mrb[227].mxu1 }
 0xa6d   : > { %v8520_v29 = vadd.f32 %v8519_v17, %v8518_v58  ;;  %v13916_v37 = vadd.f32 %v13828_v55, %v8517_v40 }
 0xa6f   : > { %v13919_v25 = vadd.f32 %v13831_v8, %v8520_v29 }
 0xa71   : > { %v8521_v49 = vpop.f32.mrb[228].mxu1 }
 0xa72   : > { %v8522_v1 = vpop.f32.mrb[229].mxu1 }
 0xa73   : > { %v8523_v19 = vadd.f32 %v8522_v1, %v8521_v49  ;;  %v8524_v14 = vpop.f32.mrb[230].mxu1 }
 0xa74   : > { %v8525_v13 = vpop.f32.mrb[231].mxu1 }
 0xa75   : > { %v8526_v32 = vadd.f32 %v8525_v13, %v8524_v14  ;;  %v13922_v63 = vadd.f32 %v13840_v57, %v8523_v19 }
 0xa77   : > { %v13925_v39 = vadd.f32 %v13843_v24, %v8526_v32 }
 0xa79   : > { %v8527_v16 = vpop.f32.mrb[232].mxu1 }
 0xa7a   : > { %v8528_v15 = vpop.f32.mrb[233].mxu1 }
 0xa7b   : > { %v8529_v53 = vadd.f32 %v8528_v15, %v8527_v16  ;;  %v8530_v55 = vpop.f32.mrb[234].mxu1 }
 0xa7c   : > { %v8531_v52 = vpop.f32.mrb[235].mxu1 }
 0xa7d   : > { %v8532_v6 = vadd.f32 %v8531_v52, %v8530_v55  ;;  %v13928_v8 = vadd.f32 %v13852_v38, %v8529_v53 }
 0xa7f   : > { %v13931_v33 = vadd.f32 %v13855_v21, %v8532_v6 }
 0xa81   : > { %v8533_v50 = vpop.f32.mrb[236].mxu1 }
 0xa82   : > { %v8534_v44 = vpop.f32.mrb[237].mxu1 }
 0xa83   : > { %v8535_v59 = vadd.f32 %v8534_v44, %v8533_v50  ;;  %v8536_v57 = vpop.f32.mrb[238].mxu1 }
 0xa84   : > { %v8537_v12 = vpop.f32.mrb[239].mxu1 }
 0xa85   : > { %v8538_v2 = vadd.f32 %v8537_v12, %v8536_v57  ;;  %v13934_v24 = vadd.f32 %v13864_v41, %v8535_v59 }
 0xa87   : > { %v13937_v51 = vadd.f32 %v13867_v20, %v8538_v2 }
 0xa89   : > { %v8539_v31 = vpop.f32.mrb[240].mxu1 }
 0xa8a   : > { %v8540_v3 = vpop.f32.mrb[241].mxu1 }
 0xa8b   : > { %v8541_v26 = vadd.f32 %v8540_v3, %v8539_v31  ;;  %v8542_v38 = vpop.f32.mrb[242].mxu1 }
 0xa8c   : > { %v8543_v62 = vpop.f32.mrb[243].mxu1 }
 0xa8d   : > { %v8544_v42 = vadd.f32 %v8543_v62, %v8542_v38  ;;  %v13940_v21 = vadd.f32 %v13876_v5, %v8541_v26  ;;  %v15088_v38 = vld [vmem:[#allocation24_spill] sm:$0xff] }
 0xa8f   : > { %v13943_v28 = vadd.f32 %v13879_v61, %v8544_v42 }
 0xa91   : > { %v8545_v40 = vpop.f32.mrb[244].mxu1 }
 0xa92   : > { %v8546_v58 = vpop.f32.mrb[245].mxu1 }
 0xa93   : > { %v8547_v17 = vadd.f32 %v8546_v58, %v8545_v40  ;;  %v8548_v41 = vpop.f32.mrb[246].mxu1  ;;  %v15089_v40 = vld [vmem:[#allocation25_spill] sm:$0xff] }
 0xa94   : > { %v8549_v29 = vpop.f32.mrb[247].mxu1 }
 0xa95   : > { %v8550_v49 = vadd.f32 %v8549_v29, %v8548_v41  ;;  %v13946_v20 = vadd.f32 %v13888_v54, %v8547_v17  ;;  %v15091_v17 = vld [vmem:[#allocation27_spill] sm:$0xff] }
 0xa97   : > { %v13949_v1 = vadd.f32 %v13891_v23, %v8550_v49 }
 0xa99   : > { %v8551_v19 = vpop.f32.mrb[248].mxu1 }
 0xa9a   : > { %v8552_v14 = vpop.f32.mrb[249].mxu1 }
 0xa9b   : > { %v8553_v13 = vadd.f32 %v8552_v14, %v8551_v19  ;;  %v8554_v5 = vpop.f32.mrb[250].mxu1 }
 0xa9c   : > { %v8555_v32 = vpop.f32.mrb[251].mxu1 }
 0xa9d   : > { %v8556_v61 = vadd.f32 %v8555_v32, %v8554_v5  ;;  %v13952_v16 = vadd.f32 %v13900_v45, %v8553_v13  ;;  %v13965_v45 = vld [vmem:[%s15087_s15] ss:$0 sm:$0xff] }
 0xa9f   : > { %v13955_v15 = vadd.f32 %v13903_v43, %v8556_v61 }
 0xaa1   : > { %v8557_v53 = vpop.f32.mrb[252].mxu1 }
 0xaa2   : > { %v8558_v55 = vpop.f32.mrb[253].mxu1 }
 0xaa3   : > { %v8559_v54 = vadd.f32 %v8558_v55, %v8557_v53  ;;  %v8560_v52 = vpop.f32.mrb[254].mxu1  ;;  %v15092_v55 = vld [vmem:[#allocation28_spill] sm:$0xff] }
 0xaa4   : > { %v8561_v6 = vpop.f32.mrb[255].mxu1 }
 0xaa5   : > { %v8562_v23 = vadd.f32 %v8561_v6, %v8560_v52  ;;  %v13958_v50 = vadd.f32 %v13912_v47, %v8559_v54  ;;  %v15093_v52 = vld [vmem:[#allocation29_spill] sm:$0xff] }
 0xaa7   : > { %v13960_v44 = vadd.f32 %v9225_v36, %v8562_v23  ;;  %v15094_v23 = vld [vmem:[#allocation30_spill] sm:$0xff] }
 0xaad   : > { %v8993_v59 = vpop.f32.mrb[148].mxu0 }
 0xaae   : > { %v9137_v43 = vadd.f32 %v13834_v11, %v8993_v59  ;;  %v6732_v57 = vpop.f32.mrb[149].mxu0 }
 0xaaf   : > { %v9140_v12 = vadd.f32 %v13822_v4, %v6732_v57  ;;  %v8994_v2 = vpop.f32.mrb[150].mxu0  ;;  %v15090_v4 = vld [vmem:[#allocation26_spill] sm:$0xff] }
 0xab0   : > { %v6900_v31 = vadd.f32 %v9137_v43, %v13965_v45  ;;  %v9143_v47 = vadd.f32 %v13837_v27, %v8994_v2  ;;  %v6735_v3 = vpop.f32.mrb[151].mxu0  ;;  %v15095_v43 = vld [vmem:[#allocation31_spill] sm:$0xff] }
 0xab1   : > { %v6898_v36 = vadd.f32 %v9140_v12, %v13965_v45  ;;  %v9146_v26 = vadd.f32 %v13825_v0, %v6735_v3 }
 0xab2   : > { %v6932_v62 = vadd.f32 %v15088_v38, %v6900_v31  ;;  %v6901_v42 = vadd.f32 %v9143_v47, %v13965_v45 }
 0xab3   : > { %v6930_v58 = vadd.f32 %v6898_v36, %v15089_v40  ;;  %v6899_v11 = vadd.f32 %v9146_v26, %v13965_v45  ;;  %v15097_v40 = vld [vmem:[#allocation33_spill] sm:$0xff] }
 0xab4   : > { %6964 = vst [vmem:[%s13978_s13 + $0x10] sm:$0xff] %v6932_v62  ;;  %v6933_v27 = vadd.f32 %v15090_v4, %v6901_v42  ;;  %v15096_v62 = vld [vmem:[#allocation32_spill] sm:$0xff] }
 0xab5   : > { %6962 = vst [vmem:[%s13978_s13] sm:$0xff] %v6930_v58  ;;  %v6931_v0 = vadd.f32 %v6899_v11, %v15091_v17  ;;  %v8997_v41 = vpop.f32.mrb[152].mxu0  ;;  %v15098_v11 = vld [vmem:[#allocation34_spill] sm:$0xff] }
 0xab6   : > { %6965 = vst [vmem:[%s13978_s13 + $0x18] sm:$0xff] %v6933_v27  ;;  %v9149_v29 = vadd.f32 %v13858_v46, %v8997_v41  ;;  %v6748_v49 = vpop.f32.mrb[153].mxu0  ;;  %v15099_v27 = vld [vmem:[#allocation35_spill] sm:$0xff] }
 0xab7   : > { %6963 = vst [vmem:[%s13978_s13 + $0x8] sm:$0xff] %v6931_v0  ;;  %v9152_v19 = vadd.f32 %v13846_v18, %v6748_v49  ;;  %v8998_v14 = vpop.f32.mrb[154].mxu0 }
 0xab8   : > { %v6904_v13 = vadd.f32 %v9149_v29, %v13965_v45  ;;  %v9155_v5 = vadd.f32 %v13861_v22, %v8998_v14  ;;  %v6751_v32 = vpop.f32.mrb[155].mxu0 }
 0xab9   : > { %v6902_v61 = vadd.f32 %v9152_v19, %v13965_v45  ;;  %v9158_v53 = vadd.f32 %v13849_v7, %v6751_v32  ;;  %v15100_v32 = vld [vmem:[#allocation36_spill] sm:$0xff] }
 0xaba   : > { %v6936_v54 = vadd.f32 %v15092_v55, %v6904_v13  ;;  %v6905_v46 = vadd.f32 %v9155_v5, %v13965_v45 }
 0xabb   : > { %v6934_v6 = vadd.f32 %v6902_v61, %v15093_v52  ;;  %v6903_v18 = vadd.f32 %v9158_v53, %v13965_v45  ;;  %v15101_v53 = vld [vmem:[#allocation37_spill] sm:$0xff]  ;;  %v15103_v52 = vld [vmem:[#allocation39_spill] sm:$0xff] }
 0xabc   : > { %6968 = vst [vmem:[%s13978_s13 + $0x30] sm:$0xff] %v6936_v54  ;;  %v6937_v59 = vadd.f32 %v15094_v23, %v6905_v46  ;;  %v15102_v54 = vld [vmem:[#allocation38_spill] sm:$0xff] }
 0xabd   : > { %6966 = vst [vmem:[%s13978_s13 + $0x20] sm:$0xff] %v6934_v6  ;;  %v6935_v22 = vadd.f32 %v6903_v18, %v15095_v43  ;;  %v9001_v57 = vpop.f32.mrb[156].mxu0 }
 0xabe   : > { %6969 = vst [vmem:[%s13978_s13 + $0x38] sm:$0xff] %v6937_v59  ;;  %v9161_v12 = vadd.f32 %v13882_v60, %v9001_v57  ;;  %v6764_v7 = vpop.f32.mrb[157].mxu0 }
 0xabf   : > { %6967 = vst [vmem:[%s13978_s13 + $0x28] sm:$0xff] %v6935_v22  ;;  %v9164_v2 = vadd.f32 %v13870_v10, %v6764_v7  ;;  %v9002_v31 = vpop.f32.mrb[158].mxu0 }
 0xac0   : > { %v6908_v47 = vadd.f32 %v9161_v12, %v13965_v45  ;;  %v9167_v3 = vadd.f32 %v13885_v56, %v9002_v31  ;;  %v6767_v36 = vpop.f32.mrb[159].mxu0 }
 0xac1   : > { %v6906_v26 = vadd.f32 %v9164_v2, %v13965_v45  ;;  %v9170_v38 = vadd.f32 %v13873_v30, %v6767_v36  ;;  %v15104_v2 = vld [vmem:[#allocation40_spill] sm:$0xff]  ;;  %v15106_v36 = vld [vmem:[#allocation42_spill] sm:$0xff] }
 0xac2   : > { %v6940_v42 = vadd.f32 %v15096_v62, %v6908_v47  ;;  %v6909_v60 = vadd.f32 %v9167_v3, %v13965_v45  ;;  %v15105_v47 = vld [vmem:[#allocation41_spill] sm:$0xff] }
 0xac3   : > { %v6938_v58 = vadd.f32 %v6906_v26, %v15097_v40  ;;  %v6907_v10 = vadd.f32 %v9170_v38, %v13965_v45  ;;  %v15107_v38 = vld [vmem:[#allocation43_spill] sm:$0xff] }
 0xac4   : > { %6972 = vst [vmem:[%s13978_s13 + $0x50] sm:$0xff] %v6940_v42  ;;  %v6941_v4 = vadd.f32 %v15098_v11, %v6909_v60 }
 0xac5   : > { %6970 = vst [vmem:[%s13978_s13 + $0x40] sm:$0xff] %v6938_v58  ;;  %v6939_v56 = vadd.f32 %v6907_v10, %v15099_v27  ;;  %v9005_v17 = vpop.f32.mrb[160].mxu0 }
 0xac6   : > { %6973 = vst [vmem:[%s13978_s13 + $0x58] sm:$0xff] %v6941_v4  ;;  %v9173_v0 = vadd.f32 %v13906_v9, %v9005_v17  ;;  %v6780_v30 = vpop.f32.mrb[161].mxu0 }
 0xac7   : > { %6971 = vst [vmem:[%s13978_s13 + $0x48] sm:$0xff] %v6939_v56  ;;  %v9176_v41 = vadd.f32 %v13894_v48, %v6780_v30  ;;  %v9006_v29 = vpop.f32.mrb[162].mxu0  ;;  %v15108_v56 = vld [vmem:[#allocation44_spill] sm:$0xff] }
 0xac8   : > { %v6912_v49 = vadd.f32 %v9173_v0, %v13965_v45  ;;  %v9179_v19 = vadd.f32 %v13909_v35, %v9006_v29  ;;  %v6783_v14 = vpop.f32.mrb[163].mxu0  ;;  %v15109_v0 = vld [vmem:[#allocation45_spill] sm:$0xff] }
 0xac9   : > { %v6910_v13 = vadd.f32 %v9176_v41, %v13965_v45  ;;  %v9182_v5 = vadd.f32 %v13897_v34, %v6783_v14  ;;  %v15110_v41 = vld [vmem:[#allocation46_spill] sm:$0xff] }
 0xaca   : > { %v6944_v61 = vadd.f32 %v15100_v32, %v6912_v49  ;;  %v6913_v9 = vadd.f32 %v9179_v19, %v13965_v45  ;;  %v15111_v49 = vld [vmem:[#allocation47_spill] sm:$0xff] }
 0xacb   : > { %v6942_v55 = vadd.f32 %v6910_v13, %v15101_v53  ;;  %v6911_v48 = vadd.f32 %v9182_v5, %v13965_v45 }
 0xacc   : > { %6976 = vst [vmem:[%s13978_s13 + $0x70] sm:$0xff] %v6944_v61  ;;  %v6945_v46 = vadd.f32 %v15102_v54, %v6913_v9 }
 0xacd   : > { %6974 = vst [vmem:[%s13978_s13 + $0x60] sm:$0xff] %v6942_v55  ;;  %v6943_v35 = vadd.f32 %v6911_v48, %v15103_v52  ;;  %v9009_v6 = vpop.f32.mrb[164].mxu0  ;;  %v15112_v48 = vld [vmem:[#allocation48_spill] sm:$0xff] }
 0xace   : > { %6977 = vst [vmem:[%s13978_s13 + $0x78] sm:$0xff] %v6945_v46  ;;  %v9185_v18 = vadd.f32 %v13922_v63, %v9009_v6  ;;  %v6796_v34 = vpop.f32.mrb[165].mxu0  ;;  %v15113_v46 = vld [vmem:[#allocation49_spill] sm:$0xff] }
 0xacf   : > { %6975 = vst [vmem:[%s13978_s13 + $0x68] sm:$0xff] %v6943_v35  ;;  %v9188_v23 = vadd.f32 %v13916_v37, %v6796_v34  ;;  %v9010_v59 = vpop.f32.mrb[166].mxu0  ;;  %v15114_v35 = vld [vmem:[#allocation50_spill] sm:$0xff] }
 0xad0   : > { %v6916_v43 = vadd.f32 %v9185_v18, %v13965_v45  ;;  %v9191_v22 = vadd.f32 %v13925_v39, %v9010_v59  ;;  %v6799_v57 = vpop.f32.mrb[167].mxu0 }
 0xad1   : > { %v6914_v12 = vadd.f32 %v9188_v23, %v13965_v45  ;;  %v9194_v7 = vadd.f32 %v13919_v25, %v6799_v57 }
 0xad2   : > { %v6948_v31 = vadd.f32 %v15104_v2, %v6916_v43  ;;  %v6917_v63 = vadd.f32 %v9191_v22, %v13965_v45 }
 0xad3   : > { %v6946_v3 = vadd.f32 %v6914_v12, %v15105_v47  ;;  %v6915_v37 = vadd.f32 %v9194_v7, %v13965_v45 }
 0xad4   : > { %6980 = vst [vmem:[%s13978_s13 + $0x90] sm:$0xff] %v6948_v31  ;;  %v6949_v26 = vadd.f32 %v15106_v36, %v6917_v63  ;;  %v15117_v63 = vld [vmem:[#allocation53_spill] sm:$0xff] }
 0xad5   : > { %6978 = vst [vmem:[%s13978_s13 + $0x80] sm:$0xff] %v6946_v3  ;;  %v6947_v39 = vadd.f32 %v6915_v37, %v15107_v38  ;;  %v9013_v62 = vpop.f32.mrb[168].mxu0 }
 0xad6   : > { %6981 = vst [vmem:[%s13978_s13 + $0x98] sm:$0xff] %v6949_v26  ;;  %v9197_v42 = vadd.f32 %v13934_v24, %v9013_v62  ;;  %v6812_v25 = vpop.f32.mrb[169].mxu0 }
 0xad7   : > { %6979 = vst [vmem:[%s13978_s13 + $0x88] sm:$0xff] %v6947_v39  ;;  %v9200_v60 = vadd.f32 %v13928_v8, %v6812_v25  ;;  %v9014_v40 = vpop.f32.mrb[170].mxu0 }
 0xad8   : > { %v6920_v58 = vadd.f32 %v9197_v42, %v13965_v45  ;;  %v9203_v10 = vadd.f32 %v13937_v51, %v9014_v40  ;;  %v6815_v11 = vpop.f32.mrb[171].mxu0 }
 0xad9   : > { %v6918_v4 = vadd.f32 %v9200_v60, %v13965_v45  ;;  %v9206_v27 = vadd.f32 %v13931_v33, %v6815_v11 }
 0xada   : > { %v6952_v17 = vadd.f32 %v15108_v56, %v6920_v58  ;;  %v6921_v24 = vadd.f32 %v9203_v10, %v13965_v45 }
 0xadb   : > { %v6950_v30 = vadd.f32 %v6918_v4, %v15109_v0  ;;  %v6919_v8 = vadd.f32 %v9206_v27, %v13965_v45 }
 0xadc   : > { %6984 = vst [vmem:[%s13978_s13 + $0xb0] sm:$0xff] %v6952_v17  ;;  %v6953_v29 = vadd.f32 %v15110_v41, %v6921_v24 }
 0xadd   : > { %6982 = vst [vmem:[%s13978_s13 + $0xa0] sm:$0xff] %v6950_v30  ;;  %v6951_v51 = vadd.f32 %v6919_v8, %v15111_v49  ;;  %v9017_v19 = vpop.f32.mrb[172].mxu0 }
 0xade   : > { %6985 = vst [vmem:[%s13978_s13 + $0xb8] sm:$0xff] %v6953_v29  ;;  %v9209_v14 = vadd.f32 %v13946_v20, %v9017_v19  ;;  %v6828_v33 = vpop.f32.mrb[173].mxu0 }
 0xadf   : > { %6983 = vst [vmem:[%s13978_s13 + $0xa8] sm:$0xff] %v6951_v51  ;;  %v9212_v13 = vadd.f32 %v13940_v21, %v6828_v33  ;;  %v9018_v5 = vpop.f32.mrb[174].mxu0 }
 0xae0   : > { %v6924_v32 = vadd.f32 %v9209_v14, %v13965_v45  ;;  %v9215_v61 = vadd.f32 %v13949_v1, %v9018_v5  ;;  %v6831_v9 = vpop.f32.mrb[175].mxu0  ;;  %v15115_v1 = vld [vmem:[#allocation51_spill] sm:$0xff] }
 0xae1   : > { %v6922_v53 = vadd.f32 %v9212_v13, %v13965_v45  ;;  %v9218_v55 = vadd.f32 %v13943_v28, %v6831_v9 }
 0xae2   : > { %v6956_v54 = vadd.f32 %v15112_v48, %v6924_v32  ;;  %v6925_v20 = vadd.f32 %v9215_v61, %v13965_v45 }
 0xae3   : > { %v6954_v52 = vadd.f32 %v6922_v53, %v15113_v46  ;;  %v6923_v21 = vadd.f32 %v9218_v55, %v13965_v45 }
 0xae4   : > { %6988 = vst [vmem:[%s13978_s13 + $0xd0] sm:$0xff] %v6956_v54  ;;  %v6957_v6 = vadd.f32 %v15114_v35, %v6925_v20 }
 0xae5   : > { %6986 = vst [vmem:[%s13978_s13 + $0xc0] sm:$0xff] %v6954_v52  ;;  %v6955_v18 = vadd.f32 %v6923_v21, %v15115_v1  ;;  %v9021_v34 = vpop.f32.mrb[176].mxu0 }
 0xae6   : > { %6989 = vst [vmem:[%s13978_s13 + $0xd8] sm:$0xff] %v6957_v6  ;;  %v9221_v28 = vadd.f32 %v13958_v50, %v9021_v34  ;;  %v6844_v23 = vpop.f32.mrb[177].mxu0  ;;  %v15116_v50 = vld [vmem:[#allocation52_spill] sm:$0xff] }
 0xae7   : > { %6987 = vst [vmem:[%s13978_s13 + $0xc8] sm:$0xff] %v6955_v18  ;;  %v9224_v59 = vadd.f32 %v13952_v16, %v6844_v23  ;;  %v9022_v43 = vpop.f32.mrb[178].mxu0 }
 0xae8   : > { %v6928_v22 = vadd.f32 %v9221_v28, %v13965_v45  ;;  %v9227_v57 = vadd.f32 %v13960_v44, %v9022_v43  ;;  %v6847_v12 = vpop.f32.mrb[179].mxu0  ;;  %v15118_v44 = vld [vmem:[#allocation54_spill] sm:$0xff] }
 0xae9   : > { %v6926_v7 = vadd.f32 %v9224_v59, %v13965_v45  ;;  %v9230_v2 = vadd.f32 %v13955_v15, %v6847_v12  ;;  %v15120_v15 = vld [vmem:[#allocation55_spill] sm:$0xff] }
 0xaea   : > { %v6960_v31 = vadd.f32 %v15116_v50, %v6928_v22  ;;  %v6929_v16 = vadd.f32 %v9227_v57, %v13965_v45 }
 0xaeb   : > { %v6958_v47 = vadd.f32 %v6926_v7, %v15117_v63  ;;  %v6927_v3 = vadd.f32 %v9230_v2, %v13965_v45 }
 0xaec   : > { %6992 = vst [vmem:[%s13978_s13 + $0xf0] sm:$0xff] %v6960_v31  ;;  %v6961_v37 = vadd.f32 %v15118_v44, %v6929_v16 }
 0xaed   : > { %6990 = vst [vmem:[%s13978_s13 + $0xe0] sm:$0xff] %v6958_v47  ;;  %v6959_v36 = vadd.f32 %v6927_v3, %v15120_v15 }
 0xaee   : > { %6993 = vst [vmem:[%s13978_s13 + $0xf8] sm:$0xff] %v6961_v37 }
 0xaef   : > { %6991 = vst [vmem:[%s13978_s13 + $0xe8] sm:$0xff] %v6959_v36 }
 0xaf0   : > { %10233 = shalt.err (!%p10230_p11)
}
 0xaf1   : > { %s10234_s15 = scalar_lea.hbm %s14099_s8, 4096  ;;  %s10238_s2 = scalar_lea.hbm %s15119_s30, 8192 }
 0xaf2   : > { %p10235_p3 = scmp.ne.s32.totalorder %s14099_s8, %s10234_s15  ;;  %p10239_p6 = scmp.lt.u32.totalorder %s14099_s8, %s15119_s30 }
 0xaf3   : > { %p10240_p9 = scmp.lt.u32.totalorder %s10238_s2, %s10234_s15  ;;  %p10242_p1 = scmp.lt.u32.totalorder %s10234_s15, %s14099_s8 }
 0xaf4   : > { %p10236_p5 = pnand %p10235_p3, %p15121_p13 }
 0xaf5   : > { %p10241_p12 = por %p10240_p9, %p10239_p6 }
 0xaf6   : > { %p10237_p7 = pneg %p10236_p5 }
 0xaf7   : > { %p10243_p0 = por %p10242_p1, %p10241_p12 }
 0xaf9   : > { %p10244_p2 = pnand %p10243_p0, %p10237_p7 }
 0xafb   : > { %10247 = shalt.err (!%p10244_p2)
}
 0xafc   : > { %s10320_s12 = smov 128   ;;  %s10321_s18 = smov 8  }
 0xafd   : > { %9393 = dma.vmem_to_hbm [thread:$0]  (%p15121_p13), %s14101_s1, 4096, %s14099_s8, %s6995_s14, %s10320_s12, %s10320_s12, %s10321_s18  }
 0xafe PF: > { %s7023_s29 = sand.u32 1, %s10290_s25   ;;  %p15122_p8 = scmp.ne.s32.totalorder %s14508_s21, 0 }
 0xaff   : > { %p15123_p4 = scmp.ge.s32.totalorder %s10302_s28, 2  ;;  %s7024_s17 = scalar_lea.sflag [#allocation4], %s7023_s29 }
 0xb01   : > { %p9425_p10 = pnand %p15123_p4, %p15122_p8 }
 0xb03   : > { %10285 = dma.done.wait (!%p9425_p10), %s7024_s17, 4096  }
 0xb04   : > { %10287 = vsyncadd (!%p9425_p10), %s7024_s17, 4294963200  ;;  %p30_p11 = scmp.ge.s32.totalorder %s10628_s16, 4   ;;  %s15124_s25 = smov %s10294_s26 }
 0xb05   : > { %s15125_s26 = smov %s10298_s27  ;;  %s15126_s27 = smov %s10639_s6 }
 0xb06   : > { %s15127_s28 = smov %s10628_s16  ;;  %32 = sbr.rel (!%p30_p11) target bundleno = 16 (0x10), region = 156 }
 0xb0d   :  { %7029 = vsyncpa [#allocation3], 1 }
 0xb0e   :  { %7031 = vsyncpa [#allocation3 + $0x1], 1 }
 0xb0f   :  { %7032 = vsyncpa [#allocation6], 1 }
 0xb10   :  { %7033 = vsyncpa [#allocation9], 1 }
 0xb11   :  { %7034 = vsyncpa [#allocation12], 1 }
 0xb12   :  { %7035 = vsyncpa [#allocation15], 1 }
 0xb13   :  { %7036 = vsyncpa [#allocation4], 1 }
 0xb14   :  { %7038 = vsyncpa [#allocation4 + $0x1], 1 }

</bundles_post_ra>
